<compile_context>
chip_gen: v7x
topology: tpu7x:2x2x1
jax: 0.10.0
libtpu: 0.0.40
codegen_flags: <defaults>
</compile_context>

<pallas_src>
import functools

import jax
import jax.numpy as jnp
from jax.experimental import pallas as pl
from jax.experimental.pallas import tpu as pltpu


# ----------------------------------------------------------------------------
# Fused kernel: fixed time encoding + TransformerAggregator (attention +
# out proj + relu + layernorm) tiled over root-node row blocks, with the
# EdgePredictor run on the final grid step over the accumulated hidden state.
# ----------------------------------------------------------------------------
def _tgnn_fused_kernel(root_feat_ref, ts_ref, nbr_ref, w_ref, b_ref,
                       out_ref, h_scratch,
                       *, dt, num_edge, neg_samples):
    f32 = jnp.float32
    dot = lambda a, b: jnp.dot(a, b, preferred_element_type=f32)

    i = pl.program_id(0)

    root_feat = root_feat_ref[...]                  # (tr, Dn)
    ts = ts_ref[...]                                # (tr, Nbr+1): [nbr ts..., root ts]
    nbr_packed = nbr_ref[...]                       # (tr*Nbr, Dn+De)
    w = w_ref[...]                                  # (120, 2*Dout) weight slab
    b = b_ref[...]                                  # (6,   2*Dout) bias slab

    tr, dn = root_feat.shape
    nbr = ts.shape[1] - 1
    de = nbr_packed.shape[1] - dn
    dout = w.shape[1] // 2

    # static row offsets into the weight slab (all multiples of 8 here)
    o_root = 0                       # [wq_n | wo_r]              (dn,   2*dout)
    o_kv_ne = o_root + dn            # [[wk_n|wv_n];[wk_e|wv_e]]  (dn+de,2*dout)
    o_kv_t = o_kv_ne + dn + de       # [wk_t | wv_t]              (dt,   2*dout)
    o_att = o_kv_t + dt              # [headmask | wo_h]          (dout, 2*dout)
    o_pred = o_att + dout            # [w_src | w_dst]            (dout, 2*dout)

    # --- fixed time encoding for neighbor deltas: phi(t) = cos(t*w + b) ---
    tw = b[5:6, 0:dt].reshape(1, 1, dt)
    tb = b[5:6, dout:dout + dt].reshape(1, 1, dt)
    delta_t = ts[:, nbr:nbr + 1] - ts[:, 0:nbr]                         # (tr, Nbr)
    edge_tf = jnp.cos(delta_t[:, :, None] * tw + tb).reshape(tr * nbr, dt)

    # --- Q projection + root part of the output projection (one matmul) ---
    root_proj = dot(root_feat, w[o_root:o_root + dn, :])                # (tr, 2*Dout)
    q = root_proj[:, :dout] + b[0:1, 0:dout]          # zero-time term folded into bias

    # --- packed K/V projection (one wide matmul chain), then split ---
    kv = (dot(nbr_packed, w[o_kv_ne:o_kv_ne + dn + de, :])
          + dot(edge_tf, w[o_kv_t:o_kv_t + dt, :])
          + b[1:2, :])                                                  # (tr*Nbr, 2*Dout)
    k3 = kv[:, :dout].reshape(tr, nbr, dout)
    v3 = kv[:, dout:].reshape(tr, nbr, dout)

    # --- all-heads attention via a block-diagonal head-mask matmul ---
    # lane j of `s` holds the score of head(j), replicated across that head's
    # dh lanes, so the softmax result multiplies V directly.
    qk = (q[:, None, :] * k3).reshape(tr * nbr, dout)
    s = dot(qk, w[o_att:o_att + dout, 0:dout]).reshape(tr, nbr, dout)
    s = jnp.where(s > 0, s, 0.2 * s)                                    # LeakyReLU(0.2)
    s = s - jnp.max(s, axis=1, keepdims=True)                           # softmax over Nbr
    p_att = jnp.exp(s)
    p_att = p_att * pl.reciprocal(jnp.sum(p_att, axis=1, keepdims=True),
                                  approx=True)
    agg = jnp.sum(p_att * v3, axis=1)                                   # (tr, Dout)

    # --- output projection + relu + layernorm ---
    rst = (root_proj[:, dout:] + dot(agg, w[o_att:o_att + dout, dout:])
           + b[0:1, dout:])                                             # + bo
    rst = jnp.maximum(rst, 0.0)
    mean = jnp.mean(rst, axis=-1, keepdims=True)
    var = jnp.mean((rst - mean) ** 2, axis=-1, keepdims=True)
    h_blk = ((rst - mean) * jax.lax.rsqrt(var + 1e-5)
             * b[2:3, 0:dout] + b[2:3, dout:])                          # ln_g, ln_b

    row0 = i * tr
    if tr % 8 == 0:
        row0 = pl.multiple_of(row0, 8)
    h_scratch[pl.ds(row0, tr), :] = h_blk.astype(f32)

    # --- EdgePredictor on the final grid step (fused; no HBM round trip) ---
    @pl.when(i == pl.num_programs(0) - 1)
    def _():
        h = h_scratch[...]                                              # (R, Dout)
        hw = dot(h, w[o_pred:o_pred + dout, :])                         # (R, 2*Dout)
        e = num_edge
        h_src = hw[:e, :dout] + b[3:4, 0:dout]                          # + b_src
        h_pos = hw[e:2 * e, dout:] + b[3:4, dout:]                      # + b_dst
        h_neg = hw[2 * e:, dout:] + b[3:4, dout:]                       # + b_dst

        pos_e = jnp.maximum(h_src + h_pos, 0.0)                         # (E, Dout)
        neg_e = jnp.maximum(h_neg.reshape(neg_samples, e, dout)
                            + h_src[None, :, :], 0.0)                   # (neg, E, Dout)
        all_e = jnp.concatenate([pos_e[None, :, :], neg_e], axis=0)     # (1+neg, E, Dout)
        # matvec against w_out as VPU multiply + lane reduce (no N=1 matmul)
        scores = (jnp.sum(all_e * b[4:5, 0:dout], axis=-1)
                  + b[4:5, dout:dout + 1])                              # (1+neg, E)
        out_ref[...] = scores.astype(out_ref.dtype)


# ----------------------------------------------------------------------------
# One-time parameter prep (batch independent).  Call once, reuse every call.
# ----------------------------------------------------------------------------
def pack_tgnn_params(params, *, num_head):
    p, pp = params['layer0'], params['pred']
    dn = p['wq_n'].shape[0]
    de = p['wk_e'].shape[0]
    dt = p['tw'].shape[1]
    dout = p['bq'].shape[1]
    assert dout % num_head == 0 and dt <= dout

    # zero-time query term: phi(0) @ wq_t = cos(tb) @ wq_t is a constant row.
    bq_eff = jnp.cos(p['tb']) @ p['wq_t'] + p['bq']                     # (1, Dout)

    # block-diagonal head mask: per-head dot products as a single matmul.
    head_id = jnp.arange(dout, dtype=jnp.int32) // (dout // num_head)
    headmask = (head_id[:, None] == head_id[None, :]).astype(jnp.float32)

    cat = lambda a, c: jnp.concatenate([a, c], axis=1)

    # lane-dense weight slab, rows: root | kv-node | kv-edge | kv-time | att | pred
    w_slab = jnp.concatenate([
        cat(p['wq_n'], p['wo_r']),          # (Dn,   2*Dout)
        cat(p['wk_n'], p['wv_n']),          # (Dn,   2*Dout)
        cat(p['wk_e'], p['wv_e']),          # (De,   2*Dout)
        cat(p['wk_t'], p['wv_t']),          # (Dt,   2*Dout)
        cat(headmask, p['wo_h']),           # (Dout, 2*Dout)
        cat(pp['w_src'], pp['w_dst']),      # (Dout, 2*Dout)
    ], axis=0).astype(jnp.float32)

    pad_t = jnp.zeros((1, dout - dt), jnp.float32)
    b_slab = jnp.concatenate([
        cat(bq_eff, p['bo']),                                           # row 0
        cat(p['bk'], p['bv']),                                          # row 1
        cat(p['ln_g'], p['ln_b']),                                      # row 2
        cat(pp['b_src'], pp['b_dst']),                                  # row 3
        cat(pp['w_out'].reshape(1, dout),
            jnp.broadcast_to(pp['b_out'].reshape(1, 1), (1, dout))),    # row 4
        cat(jnp.concatenate([p['tw'], pad_t], axis=1),
            jnp.concatenate([p['tb'], pad_t], axis=1)),                 # row 5
    ], axis=0).astype(jnp.float32)

    dims = dict(dn=dn, de=de, dt=dt, dout=dout)
    return w_slab, b_slab, dims


# ----------------------------------------------------------------------------
# TGNN.forward  (aggregate_messages_and_update_memory -> edge_predictor)
# ----------------------------------------------------------------------------
def tgnn_forward(block, packed, *, neg_samples, block_rows=None):
    w_slab, b_slab, dims = packed
    dn, de, dt, dout = dims['dn'], dims['de'], dims['dt'], dims['dout']

    root_feat = block['root_node_feature']
    R = root_feat.shape[0]
    nbr = block['neighbor_ts'].shape[1]
    num_edge = R // (neg_samples + 2)

    # glue: same .view(...) flattening PyTorch does, plus lane-dense packing of
    # the neighbor features and folding root_ts into the neighbor ts block.
    nbr_packed = jnp.concatenate(
        [block['neighbor_node_feature'].reshape(R * nbr, dn),
         block['neighbor_edge_feature'].reshape(R * nbr, de)], axis=1)
    ts_all = jnp.concatenate(
        [block['neighbor_ts'], block['root_ts'].reshape(R, 1)], axis=1)

    if block_rows is None:
        block_rows = R                  # toy sizes: grid=(1,) -> min launch overhead
    assert R % block_rows == 0
    tr = block_rows
    grid = (R // tr,)

    out = pl.pallas_call(
        functools.partial(_tgnn_fused_kernel, dt=dt, num_edge=num_edge,
                          neg_samples=neg_samples),
        out_shape=jax.ShapeDtypeStruct((1 + neg_samples, num_edge), jnp.float32),
        grid_spec=pltpu.PrefetchScalarGridSpec(
            num_scalar_prefetch=0,
            grid=grid,
            in_specs=[
                pl.BlockSpec((tr, dn), lambda i: (i, 0)),
                pl.BlockSpec((tr, nbr + 1), lambda i: (i, 0)),
                pl.BlockSpec((tr * nbr, dn + de), lambda i: (i, 0)),
                pl.BlockSpec(w_slab.shape, lambda i: (0, 0)),
                pl.BlockSpec(b_slab.shape, lambda i: (0, 0)),
            ],
            out_specs=pl.BlockSpec((1 + neg_samples, num_edge),
                                   lambda i: (0, 0)),
            scratch_shapes=[pltpu.VMEM((R, dout), jnp.float32)]),
        compiler_params=pltpu.CompilerParams(
            dimension_semantics=("arbitrary",)),   # predictor reads full h_scratch
    )(root_feat, ts_all, nbr_packed, w_slab, b_slab)

    # restore the original (E, 1) / (E*neg, 1) column layout
    pos = out[0:1, :].reshape(num_edge, 1)
    neg = out[1:, :].reshape(num_edge * neg_samples, 1)
    return pos, neg


# ----------------------------------------------------------------------------
# Pure-JAX reference (for correctness check)
# ----------------------------------------------------------------------------
def tgnn_forward_ref(block, params, *, num_head, neg_samples):
    p = params['layer0']
    root_feat = block['root_node_feature']
    R, Dn = root_feat.shape
    Nbr = block['neighbor_ts'].shape[1]
    nbr_feat = block['neighbor_node_feature'].reshape(R * Nbr, Dn)
    nbr_edge = block['neighbor_edge_feature'].reshape(R * Nbr, -1)
    root_ts = block['root_ts']
    nbr_ts = block['neighbor_ts']
    Dout = p['bq'].shape[1]

    zero_tf = jnp.cos(jnp.zeros((R, 1)) * p['tw'] + p['tb'])
    delta = (root_ts[:, None] - nbr_ts).reshape(R * Nbr, 1)
    edge_tf = jnp.cos(delta * p['tw'] + p['tb'])

    q = root_feat @ p['wq_n'] + zero_tf @ p['wq_t'] + p['bq']
    k = nbr_feat @ p['wk_n'] + nbr_edge @ p['wk_e'] + edge_tf @ p['wk_t'] + p['bk']
    v = nbr_feat @ p['wv_n'] + nbr_edge @ p['wv_e'] + edge_tf @ p['wv_t'] + p['bv']

    dh = Dout // num_head
    q4 = q.reshape(R, 1, num_head, dh)
    k4 = k.reshape(R, Nbr, num_head, dh)
    v4 = v.reshape(R, Nbr, num_head, dh)
    s = jnp.sum(q4 * k4, axis=-1)                     # (R, Nbr, H)
    s = jnp.where(s > 0, s, 0.2 * s)
    att = jax.nn.softmax(s, axis=1)
    agg = jnp.sum(att[..., None] * v4, axis=1).reshape(R, Dout)

    rst = root_feat @ p['wo_r'] + agg @ p['wo_h'] + p['bo']
    rst = jnp.maximum(rst, 0.0)
    mean = rst.mean(-1, keepdims=True)
    var = ((rst - mean) ** 2).mean(-1, keepdims=True)
    h = (rst - mean) / jnp.sqrt(var + 1e-5) * p['ln_g'] + p['ln_b']

    pp = params['pred']
    E = R // (neg_samples + 2)
    h_src = h[:E] @ pp['w_src'] + pp['b_src']
    h_pos = h[E:2 * E] @ pp['w_dst'] + pp['b_dst']
    h_neg = h[2 * E:] @ pp['w_dst'] + pp['b_dst']
    pos = jnp.maximum(h_src + h_pos, 0.0) @ pp['w_out'] + pp['b_out']
    neg = (jnp.maximum(jnp.tile(h_src, (neg_samples, 1)) + h_neg, 0.0)
           @ pp['w_out'] + pp['b_out'])
    return pos, neg


if __name__ == "__main__":
    # small shapes: dim_node_feat=16, dim_edge_feat=8, dim_time=16, dim_out=32,
    # att_head=2, neighbors=8, num_edge=8, neg_samples=1  -> R = 24 roots
    Dn, De, Dt, Dout, H, Nbr = 16, 8, 16, 32, 2, 8
    E, NEG = 8, 1
    R = E * (NEG + 2)

    key = jax.random.PRNGKey(0)
    keys = iter(jax.random.split(key, 32))
    nrm = lambda shape, scale=0.1: scale * jax.random.normal(next(keys), shape,
                                                             jnp.float32)
    block = dict(
        root_node_feature=nrm((R, Dn), 1.0),
        root_ts=jax.random.uniform(next(keys), (R,), jnp.float32, 0.0, 100.0),
        neighbor_node_feature=nrm((R, Nbr, Dn), 1.0),
        neighbor_edge_feature=nrm((R, Nbr, De), 1.0),
        neighbor_ts=jax.random.uniform(next(keys), (R, Nbr), jnp.float32, 0.0, 100.0),
    )

    # fixed time encoder weights (TGL-style): w = 1/10^linspace(0,9,Dt), b = 0
    tw = (1.0 / (10.0 ** jnp.linspace(0.0, 9.0, Dt))).reshape(1, Dt).astype(jnp.float32)
    tb = jnp.zeros((1, Dt), jnp.float32)

    layer0 = dict(
        tw=tw, tb=tb,
        wq_n=nrm((Dn, Dout)), wq_t=nrm((Dt, Dout)), bq=nrm((1, Dout)),
        wk_n=nrm((Dn, Dout)), wk_e=nrm((De, Dout)), wk_t=nrm((Dt, Dout)), bk=nrm((1, Dout)),
        wv_n=nrm((Dn, Dout)), wv_e=nrm((De, Dout)), wv_t=nrm((Dt, Dout)), bv=nrm((1, Dout)),
        wo_r=nrm((Dn, Dout)), wo_h=nrm((Dout, Dout)), bo=nrm((1, Dout)),
        ln_g=jnp.ones((1, Dout), jnp.float32), ln_b=jnp.zeros((1, Dout), jnp.float32),
    )
    pred = dict(
        w_src=nrm((Dout, Dout)), b_src=nrm((1, Dout)),
        w_dst=nrm((Dout, Dout)), b_dst=nrm((1, Dout)),
        w_out=nrm((Dout, 1)), b_out=nrm((1, 1)),
    )
    params = dict(layer0=layer0, pred=pred)

    # one-time parameter prep (cached / reused across calls)
    packed = pack_tgnn_params(params, num_head=H)
    jax.block_until_ready(packed[:2])

    pos, neg = tgnn_forward(block, packed, neg_samples=NEG)
    jax.block_until_ready((pos, neg))

    pos_ref, neg_ref = tgnn_forward_ref(block, params, num_head=H, neg_samples=NEG)
    assert pos.shape == (E, 1) and neg.shape == (E * NEG, 1)
    # tolerance relaxed slightly for the approx-reciprocal softmax normalization
    assert jnp.allclose(pos, pos_ref, atol=2e-3, rtol=2e-3)
    assert jnp.allclose(neg, neg_ref, atol=2e-3, rtol=2e-3)
    print("KERNEL_OK")
</pallas_src>

<mosaic_0001>
module attributes {stable_mosaic.version = 11 : i64} {
  func.func @_tgnn_fused_kernel(%arg0: i32, %arg1: memref<24x16xf32, #tpu.memory_space<vmem>>, %arg2: memref<24x9xf32, #tpu.memory_space<vmem>>, %arg3: memref<192x24xf32, #tpu.memory_space<vmem>>, %arg4: memref<120x64xf32, #tpu.memory_space<vmem>>, %arg5: memref<6x64xf32, #tpu.memory_space<vmem>>, %arg6: memref<2x8xf32, #tpu.memory_space<vmem>>, %arg7: memref<24x32xf32, #tpu.memory_space<vmem>>) attributes {dimension_semantics = [#tpu.dimension_semantics<arbitrary>], iteration_bounds = array<i64: 1>, scalar_prefetch = 0 : i64, scratch_operands = 1 : i64, tpu.core_type = #tpu.core_type<tc>, window_params = [{transform_indices = @transform_0, window_bounds = array<i64: 24, 16>}, {transform_indices = @transform_1, window_bounds = array<i64: 24, 9>}, {transform_indices = @transform_2, window_bounds = array<i64: 192, 24>}, {pipeline_mode = #tpu.pipeline_mode<synchronous>, transform_indices = @transform_3, window_bounds = array<i64: 120, 64>}, {pipeline_mode = #tpu.pipeline_mode<synchronous>, transform_indices = @transform_4, window_bounds = array<i64: 6, 64>}, {pipeline_mode = #tpu.pipeline_mode<synchronous>, transform_indices = @transform_5, window_bounds = array<i64: 2, 8>}]} {
    %c0 = arith.constant 0 : index
    %c0_0 = arith.constant 0 : index
    %0 = vector.load %arg1[%c0, %c0_0] : memref<24x16xf32, #tpu.memory_space<vmem>>, vector<24x16xf32>
    %c0_1 = arith.constant 0 : index
    %c0_2 = arith.constant 0 : index
    %1 = vector.load %arg2[%c0_1, %c0_2] : memref<24x9xf32, #tpu.memory_space<vmem>>, vector<24x9xf32>
    %c0_3 = arith.constant 0 : index
    %c0_4 = arith.constant 0 : index
    %2 = vector.load %arg3[%c0_3, %c0_4] : memref<192x24xf32, #tpu.memory_space<vmem>>, vector<192x24xf32>
    %c0_5 = arith.constant 0 : index
    %c0_6 = arith.constant 0 : index
    %3 = vector.load %arg4[%c0_5, %c0_6] : memref<120x64xf32, #tpu.memory_space<vmem>>, vector<120x64xf32>
    %c0_7 = arith.constant 0 : index
    %c0_8 = arith.constant 0 : index
    %4 = vector.load %arg5[%c0_7, %c0_8] : memref<6x64xf32, #tpu.memory_space<vmem>>, vector<6x64xf32>
    %5 = vector.extract_strided_slice %4 {offsets = [5, 0], sizes = [1, 16], strides = [1, 1]} : vector<6x64xf32> to vector<1x16xf32>
    %6 = vector.shape_cast %5 : vector<1x16xf32> to vector<1x1x16xf32>
    %7 = vector.extract_strided_slice %4 {offsets = [5, 32], sizes = [1, 16], strides = [1, 1]} : vector<6x64xf32> to vector<1x16xf32>
    %8 = vector.shape_cast %7 : vector<1x16xf32> to vector<1x1x16xf32>
    %9 = vector.extract_strided_slice %1 {offsets = [0, 8], sizes = [24, 1], strides = [1, 1]} : vector<24x9xf32> to vector<24x1xf32>
    %10 = vector.extract_strided_slice %1 {offsets = [0, 0], sizes = [24, 8], strides = [1, 1]} : vector<24x9xf32> to vector<24x8xf32>
    %11 = vector.broadcast %9 : vector<24x1xf32> to vector<24x8xf32>
    %12 = arith.subf %11, %10 : vector<24x8xf32>
    %13 = vector.shape_cast %12 : vector<24x8xf32> to vector<24x8x1xf32>
    %14 = vector.broadcast %13 : vector<24x8x1xf32> to vector<24x8x16xf32>
    %15 = vector.broadcast %6 : vector<1x1x16xf32> to vector<24x8x16xf32>
    %16 = arith.mulf %14, %15 : vector<24x8x16xf32>
    %17 = vector.broadcast %8 : vector<1x1x16xf32> to vector<24x8x16xf32>
    %18 = arith.addf %16, %17 : vector<24x8x16xf32>
    %19 = math.cos %18 : vector<24x8x16xf32>
    %20 = vector.shape_cast %19 : vector<24x8x16xf32> to vector<192x16xf32>
    %21 = vector.extract_strided_slice %3 {offsets = [0, 0], sizes = [16, 64], strides = [1, 1]} : vector<120x64xf32> to vector<16x64xf32>
    %cst = arith.constant dense<0.000000e+00> : vector<24x64xf32>
    %22 = tpu.matmul %0, %21, %cst {dimension_numbers = #tpu.dot_dimension_numbers<[1], [0], [0], [1], [0, 0, 1, 1], [], []>} : vector<24x16xf32>, vector<16x64xf32>, vector<24x64xf32> -> vector<24x64xf32>
    %23 = vector.extract_strided_slice %22 {offsets = [0, 0], sizes = [24, 32], strides = [1, 1]} : vector<24x64xf32> to vector<24x32xf32>
    %24 = vector.extract_strided_slice %4 {offsets = [0, 0], sizes = [1, 32], strides = [1, 1]} : vector<6x64xf32> to vector<1x32xf32>
    %25 = vector.broadcast %24 : vector<1x32xf32> to vector<24x32xf32>
    %26 = arith.addf %23, %25 : vector<24x32xf32>
    %27 = vector.extract_strided_slice %3 {offsets = [16, 0], sizes = [24, 64], strides = [1, 1]} : vector<120x64xf32> to vector<24x64xf32>
    %cst_9 = arith.constant dense<0.000000e+00> : vector<192x64xf32>
    %28 = tpu.matmul %2, %27, %cst_9 {dimension_numbers = #tpu.dot_dimension_numbers<[1], [0], [0], [1], [0, 0, 1, 1], [], []>} : vector<192x24xf32>, vector<24x64xf32>, vector<192x64xf32> -> vector<192x64xf32>
    %29 = vector.extract_strided_slice %3 {offsets = [40, 0], sizes = [16, 64], strides = [1, 1]} : vector<120x64xf32> to vector<16x64xf32>
    %cst_10 = arith.constant dense<0.000000e+00> : vector<192x64xf32>
    %30 = tpu.matmul %20, %29, %cst_10 {dimension_numbers = #tpu.dot_dimension_numbers<[1], [0], [0], [1], [0, 0, 1, 1], [], []>} : vector<192x16xf32>, vector<16x64xf32>, vector<192x64xf32> -> vector<192x64xf32>
    %31 = arith.addf %28, %30 : vector<192x64xf32>
    %32 = vector.extract_strided_slice %4 {offsets = [1, 0], sizes = [1, 64], strides = [1, 1]} : vector<6x64xf32> to vector<1x64xf32>
    %33 = vector.broadcast %32 : vector<1x64xf32> to vector<192x64xf32>
    %34 = arith.addf %31, %33 : vector<192x64xf32>
    %35 = vector.extract_strided_slice %34 {offsets = [0, 0], sizes = [192, 32], strides = [1, 1]} : vector<192x64xf32> to vector<192x32xf32>
    %36 = vector.shape_cast %35 : vector<192x32xf32> to vector<24x8x32xf32>
    %37 = vector.extract_strided_slice %34 {offsets = [0, 32], sizes = [192, 32], strides = [1, 1]} : vector<192x64xf32> to vector<192x32xf32>
    %38 = vector.shape_cast %37 : vector<192x32xf32> to vector<24x8x32xf32>
    %39 = vector.shape_cast %26 : vector<24x32xf32> to vector<24x1x32xf32>
    %40 = vector.broadcast %39 : vector<24x1x32xf32> to vector<24x8x32xf32>
    %41 = arith.mulf %40, %36 : vector<24x8x32xf32>
    %42 = vector.shape_cast %41 : vector<24x8x32xf32> to vector<192x32xf32>
    %43 = vector.extract_strided_slice %3 {offsets = [56, 0], sizes = [32, 32], strides = [1, 1]} : vector<120x64xf32> to vector<32x32xf32>
    %cst_11 = arith.constant dense<0.000000e+00> : vector<192x32xf32>
    %44 = tpu.matmul %42, %43, %cst_11 {dimension_numbers = #tpu.dot_dimension_numbers<[1], [0], [0], [1], [0, 0, 1, 1], [], []>} : vector<192x32xf32>, vector<32x32xf32>, vector<192x32xf32> -> vector<192x32xf32>
    %45 = vector.shape_cast %44 : vector<192x32xf32> to vector<24x8x32xf32>
    %cst_12 = arith.constant 0.000000e+00 : f32
    %46 = vector.broadcast %cst_12 : f32 to vector<24x8x32xf32>
    %47 = arith.cmpf ogt, %45, %46 : vector<24x8x32xf32>
    %cst_13 = arith.constant 2.000000e-01 : f32
    %48 = vector.broadcast %cst_13 : f32 to vector<24x8x32xf32>
    %49 = arith.mulf %48, %45 : vector<24x8x32xf32>
    %50 = arith.select %47, %45, %49 : vector<24x8x32xi1>, vector<24x8x32xf32>
    %cst_14 = arith.constant dense<0xFF800000> : vector<24x32xf32>
    %51 = vector.multi_reduction <maximumf>, %50, %cst_14 [1] : vector<24x8x32xf32> to vector<24x32xf32>
    %52 = vector.shape_cast %51 : vector<24x32xf32> to vector<24x1x32xf32>
    %53 = vector.broadcast %52 : vector<24x1x32xf32> to vector<24x8x32xf32>
    %54 = arith.subf %50, %53 : vector<24x8x32xf32>
    %55 = math.exp %54 : vector<24x8x32xf32>
    %cst_15 = arith.constant dense<0.000000e+00> : vector<24x32xf32>
    %56 = vector.multi_reduction <add>, %55, %cst_15 [1] : vector<24x8x32xf32> to vector<24x32xf32>
    %57 = vector.shape_cast %56 : vector<24x32xf32> to vector<24x1x32xf32>
    %58 = tpu.reciprocal %57 {approx = true} : vector<24x1x32xf32> -> vector<24x1x32xf32>
    %59 = vector.broadcast %58 : vector<24x1x32xf32> to vector<24x8x32xf32>
    %60 = arith.mulf %55, %59 : vector<24x8x32xf32>
    %61 = arith.mulf %60, %38 : vector<24x8x32xf32>
    %cst_16 = arith.constant dense<0.000000e+00> : vector<24x32xf32>
    %62 = vector.multi_reduction <add>, %61, %cst_16 [1] : vector<24x8x32xf32> to vector<24x32xf32>
    %63 = vector.extract_strided_slice %22 {offsets = [0, 32], sizes = [24, 32], strides = [1, 1]} : vector<24x64xf32> to vector<24x32xf32>
    %64 = vector.extract_strided_slice %3 {offsets = [56, 32], sizes = [32, 32], strides = [1, 1]} : vector<120x64xf32> to vector<32x32xf32>
    %cst_17 = arith.constant dense<0.000000e+00> : vector<24x32xf32>
    %65 = tpu.matmul %62, %64, %cst_17 {dimension_numbers = #tpu.dot_dimension_numbers<[1], [0], [0], [1], [0, 0, 1, 1], [], []>} : vector<24x32xf32>, vector<32x32xf32>, vector<24x32xf32> -> vector<24x32xf32>
    %66 = arith.addf %63, %65 : vector<24x32xf32>
    %67 = vector.extract_strided_slice %4 {offsets = [0, 32], sizes = [1, 32], strides = [1, 1]} : vector<6x64xf32> to vector<1x32xf32>
    %68 = vector.broadcast %67 : vector<1x32xf32> to vector<24x32xf32>
    %69 = arith.addf %66, %68 : vector<24x32xf32>
    %cst_18 = arith.constant 0.000000e+00 : f32
    %70 = vector.broadcast %cst_18 : f32 to vector<24x32xf32>
    %71 = arith.maximumf %69, %70 : vector<24x32xf32>
    %cst_19 = arith.constant dense<0.000000e+00> : vector<24xf32>
    %72 = vector.multi_reduction <add>, %71, %cst_19 [1] : vector<24x32xf32> to vector<24xf32>
    %73 = vector.shape_cast %72 : vector<24xf32> to vector<24x1xf32>
    %cst_20 = arith.constant 3.200000e+01 : f32
    %74 = vector.broadcast %cst_20 : f32 to vector<24x1xf32>
    %75 = arith.divf %73, %74 : vector<24x1xf32>
    %76 = vector.broadcast %75 : vector<24x1xf32> to vector<24x32xf32>
    %77 = arith.subf %71, %76 : vector<24x32xf32>
    %78 = arith.mulf %77, %77 : vector<24x32xf32>
    %cst_21 = arith.constant dense<0.000000e+00> : vector<24xf32>
    %79 = vector.multi_reduction <add>, %78, %cst_21 [1] : vector<24x32xf32> to vector<24xf32>
    %80 = vector.shape_cast %79 : vector<24xf32> to vector<24x1xf32>
    %cst_22 = arith.constant 3.200000e+01 : f32
    %81 = vector.broadcast %cst_22 : f32 to vector<24x1xf32>
    %82 = arith.divf %80, %81 : vector<24x1xf32>
    %83 = vector.broadcast %75 : vector<24x1xf32> to vector<24x32xf32>
    %84 = arith.subf %71, %83 : vector<24x32xf32>
    %cst_23 = arith.constant 9.99999974E-6 : f32
    %85 = vector.broadcast %cst_23 : f32 to vector<24x1xf32>
    %86 = arith.addf %82, %85 : vector<24x1xf32>
    %87 = math.rsqrt %86 : vector<24x1xf32>
    %88 = vector.broadcast %87 : vector<24x1xf32> to vector<24x32xf32>
    %89 = arith.mulf %84, %88 : vector<24x32xf32>
    %90 = vector.extract_strided_slice %4 {offsets = [2, 0], sizes = [1, 32], strides = [1, 1]} : vector<6x64xf32> to vector<1x32xf32>
    %91 = vector.broadcast %90 : vector<1x32xf32> to vector<24x32xf32>
    %92 = arith.mulf %89, %91 : vector<24x32xf32>
    %93 = vector.extract_strided_slice %4 {offsets = [2, 32], sizes = [1, 32], strides = [1, 1]} : vector<6x64xf32> to vector<1x32xf32>
    %94 = vector.broadcast %93 : vector<1x32xf32> to vector<24x32xf32>
    %95 = arith.addf %92, %94 : vector<24x32xf32>
    %c24_i32 = arith.constant 24 : i32
    %96 = arith.muli %arg0, %c24_i32 : i32
    %97 = tpu.assume_multiple %96, 8 : i32
    %98 = arith.index_cast %97 : i32 to index
    %c0_24 = arith.constant 0 : index
    %99 = vector.load %arg7[%98, %c0_24] : memref<24x32xf32, #tpu.memory_space<vmem>>, vector<24x32xf32>
    tpu.vector_store %arg7[%98, %c0_24], %95 {strides = array<i32>} : memref<24x32xf32, #tpu.memory_space<vmem>>, vector<24x32xf32>,
    %c0_i32 = arith.constant 0 : i32
    %100 = arith.cmpi eq, %arg0, %c0_i32 : i32
    %101 = arith.extui %100 : i1 to i32
    %c0_i32_25 = arith.constant 0 : i32
    %102 = arith.cmpi ne, %101, %c0_i32_25 : i32
    scf.if %102 {
      %c0_26 = arith.constant 0 : index
      %c0_27 = arith.constant 0 : index
      %103 = vector.load %arg7[%c0_26, %c0_27] : memref<24x32xf32, #tpu.memory_space<vmem>>, vector<24x32xf32>
      %104 = vector.extract_strided_slice %3 {offsets = [88, 0], sizes = [32, 64], strides = [1, 1]} : vector<120x64xf32> to vector<32x64xf32>
      %cst_28 = arith.constant dense<0.000000e+00> : vector<24x64xf32>
      %105 = tpu.matmul %103, %104, %cst_28 {dimension_numbers = #tpu.dot_dimension_numbers<[1], [0], [0], [1], [0, 0, 1, 1], [], []>} : vector<24x32xf32>, vector<32x64xf32>, vector<24x64xf32> -> vector<24x64xf32>
      %106 = vector.extract_strided_slice %105 {offsets = [0, 0], sizes = [8, 32], strides = [1, 1]} : vector<24x64xf32> to vector<8x32xf32>
      %107 = vector.extract_strided_slice %4 {offsets = [3, 0], sizes = [1, 32], strides = [1, 1]} : vector<6x64xf32> to vector<1x32xf32>
      %108 = vector.broadcast %107 : vector<1x32xf32> to vector<8x32xf32>
      %109 = arith.addf %106, %108 : vector<8x32xf32>
      %110 = vector.extract_strided_slice %105 {offsets = [8, 32], sizes = [8, 32], strides = [1, 1]} : vector<24x64xf32> to vector<8x32xf32>
      %111 = vector.extract_strided_slice %4 {offsets = [3, 32], sizes = [1, 32], strides = [1, 1]} : vector<6x64xf32> to vector<1x32xf32>
      %112 = vector.broadcast %111 : vector<1x32xf32> to vector<8x32xf32>
      %113 = arith.addf %110, %112 : vector<8x32xf32>
      %114 = vector.extract_strided_slice %105 {offsets = [16, 32], sizes = [8, 32], strides = [1, 1]} : vector<24x64xf32> to vector<8x32xf32>
      %115 = vector.extract_strided_slice %4 {offsets = [3, 32], sizes = [1, 32], strides = [1, 1]} : vector<6x64xf32> to vector<1x32xf32>
      %116 = vector.broadcast %115 : vector<1x32xf32> to vector<8x32xf32>
      %117 = arith.addf %114, %116 : vector<8x32xf32>
      %118 = arith.addf %109, %113 : vector<8x32xf32>
      %cst_29 = arith.constant 0.000000e+00 : f32
      %119 = vector.broadcast %cst_29 : f32 to vector<8x32xf32>
      %120 = arith.maximumf %118, %119 : vector<8x32xf32>
      %121 = vector.shape_cast %117 : vector<8x32xf32> to vector<1x8x32xf32>
      %122 = vector.shape_cast %109 : vector<8x32xf32> to vector<1x8x32xf32>
      %123 = arith.addf %121, %122 : vector<1x8x32xf32>
      %cst_30 = arith.constant 0.000000e+00 : f32
      %124 = vector.broadcast %cst_30 : f32 to vector<1x8x32xf32>
      %125 = arith.maximumf %123, %124 : vector<1x8x32xf32>
      %126 = vector.shape_cast %120 : vector<8x32xf32> to vector<1x8x32xf32>
      %127 = tpu.concatenate %126, %125 in 0 : vector<1x8x32xf32>, vector<1x8x32xf32> -> vector<2x8x32xf32>
      %128 = vector.extract_strided_slice %4 {offsets = [4, 0], sizes = [1, 32], strides = [1, 1]} : vector<6x64xf32> to vector<1x32xf32>
      %129 = vector.shape_cast %128 : vector<1x32xf32> to vector<1x1x32xf32>
      %130 = vector.broadcast %129 : vector<1x1x32xf32> to vector<2x8x32xf32>
      %131 = arith.mulf %127, %130 : vector<2x8x32xf32>
      %cst_31 = arith.constant dense<0.000000e+00> : vector<2x8xf32>
      %132 = vector.multi_reduction <add>, %131, %cst_31 [2] : vector<2x8x32xf32> to vector<2x8xf32>
      %133 = vector.extract_strided_slice %4 {offsets = [4, 32], sizes = [1, 1], strides = [1, 1]} : vector<6x64xf32> to vector<1x1xf32>
      %134 = vector.broadcast %133 : vector<1x1xf32> to vector<2x8xf32>
      %135 = arith.addf %132, %134 : vector<2x8xf32>
      %c0_32 = arith.constant 0 : index
      %c0_33 = arith.constant 0 : index
      %136 = vector.load %arg6[%c0_32, %c0_33] : memref<2x8xf32, #tpu.memory_space<vmem>>, vector<2x8xf32>
      tpu.vector_store %arg6[%c0_32, %c0_33], %135 {strides = array<i32>} : memref<2x8xf32, #tpu.memory_space<vmem>>, vector<2x8xf32>,
    } else {
    }
    return
  }
  func.func @transform_0(%arg0: i32) -> (i32, i32) {
    %c0_i32 = arith.constant 0 : i32
    %c0_i32_0 = arith.constant 0 : i32
    return %arg0, %c0_i32 : i32, i32
  }
  func.func @transform_1(%arg0: i32) -> (i32, i32) {
    %c0_i32 = arith.constant 0 : i32
    %c0_i32_0 = arith.constant 0 : i32
    return %arg0, %c0_i32 : i32, i32
  }
  func.func @transform_2(%arg0: i32) -> (i32, i32) {
    %c0_i32 = arith.constant 0 : i32
    %c0_i32_0 = arith.constant 0 : i32
    return %arg0, %c0_i32 : i32, i32
  }
  func.func @transform_3(%arg0: i32) -> (i32, i32) {
    %c0_i32 = arith.constant 0 : i32
    %c0_i32_0 = arith.constant 0 : i32
    %c0_i32_1 = arith.constant 0 : i32
    return %c0_i32, %c0_i32_0 : i32, i32
  }
  func.func @transform_4(%arg0: i32) -> (i32, i32) {
    %c0_i32 = arith.constant 0 : i32
    %c0_i32_0 = arith.constant 0 : i32
    %c0_i32_1 = arith.constant 0 : i32
    return %c0_i32, %c0_i32_0 : i32, i32
  }
  func.func @transform_5(%arg0: i32) -> (i32, i32) {
    %c0_i32 = arith.constant 0 : i32
    %c0_i32_0 = arith.constant 0 : i32
    %c0_i32_1 = arith.constant 0 : i32
    return %c0_i32, %c0_i32_0 : i32, i32
  }
}

</mosaic_0001>

<bundles_post_ra>
// kernel: tpu_custom_call.1
= control target key start
LH: loop header
LB: loop body
LE: loop exit
PB: predicated region body
PF: predicated region fallthrough
CT: control target
= control target key end

     0   :  { %v6082_v2 = vmov 8   ;;  %s10108_s0 = inlined_call_operand.vmem [shape: f32[24,16], index: 0, kind: input, shape index: {}]   ;;  %s10109_s1 = inlined_call_operand.vmem [shape: f32[24,9], index: 1, kind: input, shape index: {}]   ;;  %s10110_s2 = inlined_call_operand.vmem [shape: f32[192,24], index: 2, kind: input, shape index: {}]   ;;  %s10111_s3 = inlined_call_operand.vmem [shape: f32[120,64], index: 3, kind: input, shape index: {}]   ;;  %s10112_s4 = inlined_call_operand.vmem [shape: f32[6,64], index: 4, kind: input, shape index: {}]   ;;  %s10113_s5 = inlined_call_operand.hbm [shape: f32[2,8], index: 5, kind: output, shape index: {}]  }
   0x1   :  { %v24_v0 = vld [vmem:[%s10109_s1] sm:$0xff]  ;;  %v26_v1 = vld [vmem:[%s10109_s1 + $0x10] sm:$0xff]  ;;  %5846 = vset.pattern.permute.xlu0 %v6082_v2  ;;  %5847 = vset.pattern.permute.xlu1 %v6082_v2 }
   0x2   :  { %10 = vsyncpa [#allocation4], 0  ;;  %69 = vperm.xlu0 %5846, %v24_v0   ;;  %79 = vperm.xlu1 %5847, %v26_v1   ;;  %v25_v3 = vld [vmem:[%s10109_s1 + $0x8] sm:$0xff]  ;;  %v10114_v4 = vlaneseq  ;;  %v66_v10 = vld [vmem:[%s10112_s4] sm:$0x3f]  ;;  %s6083_s1 = smov 96  }
   0x3   :  { %v56_v48 = vld [vmem:[%s10111_s3 + $0x28] sm:$0xff]  ;;  %v57_v49 = vld [vmem:[%s10111_s3 + $0x30] sm:$0xff]  ;;  %s6094_s25 = smov 32  }
   0x4   :  { %v6136_v5 = vshrl.u32 %v10114_v4, 7  ;;  %v5682_v50 = vpack.c.bf16 %v57_v49, %v56_v48 }
   0x6   :  { %74 = vperm.xlu0 %5846, %v25_v3   ;;  %10304 = vst [vmem:[#allocation6_spill] sm:$0xff] %v6136_v5  ;;  %v6139_v6 = vsub.s32 0, %v6136_v5  ;;  %v6142_v7 = vsub.s32 1, %v6136_v5  ;;  %v122_v12 = vsub.s32 5, %v6136_v5  ;;  %v6151_v14 = vsub.s32 2, %v6136_v5  ;;  %5683 = vmatprep.subr.bf16.mxu1 %v5682_v50 }
   0x7   :  { %v6157_v17 = vsub.s32 4, %v6136_v5  ;;  %v6160_v18 = vsub.s32 3, %v6136_v5  ;;  %v129_v21 = vsub.s32 6, %v6136_v5  ;;  %v136_v26 = vsub.s32 7, %v6136_v5  ;;  %5685 = vmatpush3.bf16.msra.mxu1 %v5682_v50 }
   0x8   :  { %10305 = vst [vmem:[#allocation7_spill] sm:$0xff] %v6139_v6  ;;  %10306 = vst [vmem:[#allocation8_spill] sm:$0xff] %v6142_v7  ;;  %v6153_v15 = vrot.slane %v66_v10, %v122_v12 }
   0x9   :  { %10307 = vst [vmem:[#allocation9_spill] sm:$0xff] %v6151_v14  ;;  %10309 = vst [vmem:[#allocation11_spill] sm:$0xff] %v6157_v17 }
   0xa   :  { %10308 = vst [vmem:[#allocation10_spill] sm:$0xff] %v6153_v15  ;;  %10310 = vst [vmem:[#allocation12_spill] sm:$0xff] %v6160_v18 }
  0x81   :  { %v70_v8 = vpop.permute.xlu0 %69  ;;  %v80_v31 = vpop.permute.xlu1 %79 }
  0x82   :  { %v82_v9 = vsub.f32 %v70_v8, %v24_v0  ;;  %v84_v34 = vsub.f32 %v80_v31, %v26_v1 }
  0x84   :  { %v95_v11 = vrot.slane %v82_v9, %v6142_v7  ;;  %v88_v13 = vrot.slane %v82_v9, %v6139_v6  ;;  %v102_v16 = vrot.slane %v82_v9, %v6151_v14  ;;  %v116_v19 = vrot.slane %v82_v9, %v6157_v17 }
  0x85   :  { %v109_v20 = vrot.slane %v82_v9, %v6160_v18  ;;  %v75_v22 = vpop.permute.xlu0 %74  ;;  %v130_v24 = vrot.slane %v82_v9, %v129_v21  ;;  %v123_v25 = vrot.slane %v82_v9, %v122_v12  ;;  %v137_v27 = vrot.slane %v82_v9, %v136_v26 }
  0x86   :  { %97 = vbcast.lane.b32.xlu0 %v95_v11, 256  ;;  %90 = vbcast.lane.b32.xlu1 %v88_v13, 256  ;;  %v83_v23 = vsub.f32 %v75_v22, %v25_v3  ;;  %v200_v37 = vrot.slane %v84_v34, %v6139_v6  ;;  %v207_v39 = vrot.slane %v84_v34, %v6142_v7 }
  0x87   :  { %v214_v40 = vrot.slane %v84_v34, %v6151_v14  ;;  %v221_v41 = vrot.slane %v84_v34, %v6160_v18  ;;  %v228_v42 = vrot.slane %v84_v34, %v6157_v17  ;;  %v235_v43 = vrot.slane %v84_v34, %v122_v12 }
  0x88   :  { %v144_v28 = vrot.slane %v83_v23, %v6139_v6  ;;  %v151_v29 = vrot.slane %v83_v23, %v6142_v7  ;;  %v158_v30 = vrot.slane %v83_v23, %v6151_v14  ;;  %v165_v32 = vrot.slane %v83_v23, %v6160_v18 }
  0x89   :  { %v172_v33 = vrot.slane %v83_v23, %v6157_v17  ;;  %v179_v35 = vrot.slane %v83_v23, %v122_v12  ;;  %v186_v36 = vrot.slane %v83_v23, %v129_v21  ;;  %v193_v38 = vrot.slane %v83_v23, %v136_v26 }
  0x8a   :  { %104 = vbcast.lane.b32.xlu0 %v102_v16, 256  ;;  %282 = vrot.lane.b32.xlu1 %v6153_v15, %s6083_s1  ;;  %v242_v44 = vrot.slane %v84_v34, %v129_v21  ;;  %v249_v45 = vrot.slane %v84_v34, %v136_v26 }
  0x8e   :  { %118 = vbcast.lane.b32.xlu0 %v116_v19, 256  ;;  %111 = vbcast.lane.b32.xlu1 %v109_v20, 256 }
  0x92   :  { %132 = vbcast.lane.b32.xlu0 %v130_v24, 256  ;;  %125 = vbcast.lane.b32.xlu1 %v123_v25, 256 }
  0x96   :  { %139 = vbcast.lane.b32.xlu1 %v137_v27, 256  ;;  %146 = vbcast.lane.b32.xlu0 %v144_v28, 256 }
  0x9a   :  { %153 = vbcast.lane.b32.xlu1 %v151_v29, 256  ;;  %160 = vbcast.lane.b32.xlu0 %v158_v30, 256 }
  0x9e   :  { %167 = vbcast.lane.b32.xlu1 %v165_v32, 256  ;;  %174 = vbcast.lane.b32.xlu0 %v172_v33, 256 }
  0xa2   :  { %181 = vbcast.lane.b32.xlu1 %v179_v35, 256  ;;  %188 = vbcast.lane.b32.xlu0 %v186_v36, 256 }
  0xa6   :  { %195 = vbcast.lane.b32.xlu1 %v193_v38, 256  ;;  %202 = vbcast.lane.b32.xlu0 %v200_v37, 256 }
  0xaa   :  { %209 = vbcast.lane.b32.xlu1 %v207_v39, 256  ;;  %216 = vbcast.lane.b32.xlu0 %v214_v40, 256 }
  0xae   :  { %223 = vbcast.lane.b32.xlu1 %v221_v41, 256  ;;  %230 = vbcast.lane.b32.xlu0 %v228_v42, 256 }
  0xb2   :  { %237 = vbcast.lane.b32.xlu1 %v235_v43, 256  ;;  %244 = vbcast.lane.b32.xlu0 %v242_v44, 256 }
  0xb6   :  { %251 = vbcast.lane.b32.xlu1 %v249_v45, 256 }
  0xf8   :  { %v91_v46 = vpop.permute.xlu1 %90  ;;  %v98_v47 = vpop.permute.xlu0 %97 }
  0xf9   :  { %v257_v11 = vmul.f32 %v6153_v15, %v91_v46  ;;  %v258_v12 = vmul.f32 %v6153_v15, %v98_v47 }
  0xfc   :  { %v6184_v51 = vpop.permute.xlu1 %282  ;;  %v105_v52 = vpop.permute.xlu0 %104 }
  0xfd   :  { %10311 = vst [vmem:[#allocation13_spill] sm:$0xff] %v6184_v51  ;;  %v259_v53 = vmul.f32 %v6153_v15, %v105_v52  ;;  %v6209_v20 = vadd.f32 %v6184_v51, %v257_v11  ;;  %v6215_v23 = vadd.f32 %v6184_v51, %v258_v12 }
  0xff   :  { %v6188_v55 = vadd.f32 %v6184_v51, %v259_v53  ;;  %v10116_v26 = vand.u32 2147483647, %v6209_v20  ;;  %v312_v27 = vand.u32 2139095040, %v6209_v20  ;;  %v415_v31 = vand.u32 2139095040, %v6215_v23 }
 0x100   :  { %v112_v54 = vpop.permute.xlu1 %111  ;;  %v119_v56 = vpop.permute.xlu0 %118  ;;  %v10115_v33 = vand.u32 2147483647, %v6215_v23 }
 0x101   :  { %v260_v57 = vmul.f32 %v6153_v15, %v112_v54  ;;  %v518_v58 = vand.u32 2139095040, %v6188_v55  ;;  %v261_v59 = vmul.f32 %v6153_v15, %v119_v56  ;;  %v313_v38 = vshrl.u32 %v312_v27, 23 }
 0x102   :  { %v316_v39 = vand.u32 8388607, %v10116_v26  ;;  %v416_v42 = vshrl.u32 %v415_v31, 23  ;;  %v419_v44 = vand.u32 8388607, %v10115_v33 }
 0x103   :  { %v6194_v60 = vadd.f32 %v6184_v51, %v260_v57  ;;  %v519_v61 = vshrl.u32 %v518_v58, 23  ;;  %v6197_v62 = vadd.f32 %v6184_v51, %v261_v59  ;;  %v5229_v49 = vadd.s32 4294967169, %v313_v38 }
 0x104   :  { %v126_v63 = vpop.permute.xlu1 %125  ;;  %v133_v1 = vpop.permute.xlu0 %132  ;;  %v317_v54 = vor.u32 8388608, %v316_v39  ;;  %v5233_v56 = vadd.s32 4294967169, %v416_v42  ;;  %v10119_v27 = vmov 2102212464  }
 0x105   :  { %v621_v0 = vand.u32 2139095040, %v6194_v60  ;;  %v5237_v2 = vadd.s32 4294967169, %v519_v61  ;;  %v724_v3 = vand.u32 2139095040, %v6197_v62  ;;  %v262_v8 = vmul.f32 %v6153_v15, %v126_v63 }
 0x106   :  { %v263_v10 = vmul.f32 %v6153_v15, %v133_v1  ;;  %v420_v61 = vor.u32 8388608, %v419_v44 }
 0x107   :  { %v622_v9 = vshrl.u32 %v621_v0, 23  ;;  %v525_v13 = vadd.s32 1, %v5237_v2  ;;  %v725_v16 = vshrl.u32 %v724_v3, 23  ;;  %v6206_v19 = vadd.f32 %v6184_v51, %v262_v8 }
 0x108   :  { %v6212_v22 = vadd.f32 %v6184_v51, %v263_v10  ;;  %v140_v30 = vpop.permute.xlu1 %139  ;;  %v147_v36 = vpop.permute.xlu0 %146  ;;  %v6247_v8 = vadd.s32 1, %v5229_v49 }
 0x109   :  { %10312 = vst [vmem:[#allocation14_spill] sm:$0xff] %v6206_v19  ;;  %v5241_v21 = vadd.s32 4294967169, %v622_v9  ;;  %vm526_vm0 = vcmp.gt.s32.totalorder %v525_v13, 0  ;;  %v5245_v24 = vadd.s32 4294967169, %v725_v16  ;;  %v827_v25 = vand.u32 2139095040, %v6206_v19 }
 0x10a   :  { %10313 = vst [vmem:[#allocation15_spill] sm:$0xff] %v6212_v22  ;;  %v930_v29 = vand.u32 2139095040, %v6212_v22  ;;  %v527_v32 = vsel %vm526_vm0, %v525_v13, 0  ;;  %v264_v37 = vmul.f32 %v6153_v15, %v140_v30  ;;  %v265_v43 = vmul.f32 %v6153_v15, %v147_v36 }
 0x10b   :  { %v628_v28 = vadd.s32 1, %v5241_v21  ;;  %v731_v34 = vadd.s32 1, %v5245_v24  ;;  %v828_v35 = vshrl.u32 %v827_v25, 23  ;;  %v6226_v40 = vand.u32 31, %v527_v32 }
 0x10c   :  { %v931_v41 = vshrl.u32 %v930_v29, 23  ;;  %v154_v46 = vpop.permute.xlu1 %153  ;;  %v6232_v48 = vadd.f32 %v6184_v51, %v264_v37  ;;  %v161_v53 = vpop.permute.xlu0 %160  ;;  %v6238_v58 = vadd.f32 %v6184_v51, %v265_v43  ;;  %v6243_v1 = vshrl.u32 %v527_v32, 5 }
 0x10d   :  { %vm629_vm1 = vcmp.gt.s32.totalorder %v628_v28, 0  ;;  %vm732_vm2 = vcmp.gt.s32.totalorder %v731_v34, 0  ;;  %v5249_v45 = vadd.s32 4294967169, %v828_v35  ;;  %v6235_v50 = vsub.s32 32, %v6226_v40 }
 0x10e   :  { %v630_v47 = vsel %vm629_vm1, %v628_v28, 0  ;;  %10314 = vst [vmem:[#allocation16_spill] sm:$0xff] %v6232_v48  ;;  %v5253_v52 = vadd.s32 4294967169, %v931_v41  ;;  %v733_v57 = vsel %vm732_vm2, %v731_v34, 0  ;;  %10315 = vst [vmem:[#allocation17_spill] sm:$0xff] %v6238_v58  ;;  %v266_v59 = vmul.f32 %v6153_v15, %v154_v46 }
 0x10f   :  { %v6241_v63 = vand.u32 31, %v630_v47  ;;  %v834_v0 = vadd.s32 1, %v5249_v45  ;;  %v1033_v2 = vand.u32 2139095040, %v6232_v48  ;;  %v267_v3 = vmul.f32 %v6153_v15, %v161_v53 }
 0x110   :  { %v10137_v9 = vmov 920167782   ;;  %v6251_v11 = vand.u32 31, %v733_v57  ;;  %v937_v12 = vadd.s32 1, %v5253_v52  ;;  %v6253_v13 = vshll.u32 %v317_v54, 8  ;;  %v168_v49 = vpop.permute.xlu1 %167  ;;  %v175_v52 = vpop.permute.xlu0 %174 }
 0x111   :  { %v542_v10 = vshrl.u32 %v10137_v9, %v6235_v50  ;;  %v1136_v16 = vand.u32 2139095040, %v6238_v58  ;;  %v6257_v21 = vadd.f32 %v6184_v51, %v266_v59  ;;  %v6259_v24 = vadd.s32 1, %v5233_v56 }
 0x112   :  { %v6261_v25 = vshll.u32 %v420_v61, 8  ;;  %v541_v28 = vshll.u32 %v10119_v27, %v6226_v40  ;;  %v10123_v29 = vmov 1326507024   ;;  %v6268_v31 = vsub.s32 32, %v6241_v63 }
 0x113   :  { %10316 = vst [vmem:[#allocation18_spill] sm:$0xff] %v6257_v21  ;;  %v545_v30 = vshrl.u32 %v10123_v29, %v6235_v50  ;;  %vm835_vm3 = vcmp.gt.s32.totalorder %v834_v0, 0  ;;  %v544_v32 = vshll.u32 %v10137_v9, %v6226_v40  ;;  %vm550_vm4 = vcmp.lt.s32.totalorder %v6243_v1, 4 }
 0x114   :  { %v1034_v34 = vshrl.u32 %v1033_v2, 23  ;;  %v6274_v35 = vadd.f32 %v6184_v51, %v267_v3  ;;  %v6276_v36 = vor.u32 %v542_v10, %v541_v28  ;;  %v6278_v37 = vshrl.u32 %v630_v47, 5 }
 0x115   :  { %v6281_v38 = vsub.s32 32, %v6251_v11  ;;  %vm938_vm5 = vcmp.gt.s32.totalorder %v937_v12, 0  ;;  %v6283_v39 = vshrl.u32 %v733_v57, 5  ;;  %v836_v41 = vsel %vm835_vm3, %v834_v0, 0 }
 0x116   :  { %10317 = vst [vmem:[#allocation19_spill] sm:$0xff] %v6274_v35  ;;  %v1137_v42 = vshrl.u32 %v1136_v16, 23  ;;  %v1239_v43 = vand.u32 2139095040, %v6257_v21  ;;  %v546_v44 = vor.u32 %v545_v30, %v544_v32  ;;  %v644_v45 = vshll.u32 %v10119_v27, %v6241_v63 }
 0x117   :  { %10318 = vst [vmem:[#allocation20_spill] sm:$0xff] %v6283_v39  ;;  %v645_v46 = vshrl.u32 %v10137_v9, %v6268_v31  ;;  %v647_v47 = vshll.u32 %v10137_v9, %v6241_v63  ;;  %v648_v53 = vshrl.u32 %v10123_v29, %v6268_v31  ;;  %v939_v54 = vsel %vm938_vm5, %v937_v12, 0 }
 0x118   :  { %v5257_v56 = vadd.s32 4294967169, %v1034_v34  ;;  %v1342_v57 = vand.u32 2139095040, %v6274_v35  ;;  %v6298_v59 = vsel %vm550_vm4, %v6276_v36, 920167782  ;;  %vm653_vm6 = vcmp.lt.s32.totalorder %v6278_v37, 4 }
 0x119   :  { %v748_v61 = vshrl.u32 %v10137_v9, %v6281_v38  ;;  %v6303_v0 = vand.u32 31, %v836_v41  ;;  %v5261_v2 = vadd.s32 4294967169, %v1137_v42  ;;  %v1240_v3 = vshrl.u32 %v1239_v43, 23 }
 0x11a   :  { %v268_v10 = vmul.f32 %v6153_v15, %v168_v49  ;;  %v269_v12 = vmul.f32 %v6153_v15, %v175_v52  ;;  %v6307_v16 = vor.u32 %v645_v46, %v644_v45  ;;  %v747_v28 = vshll.u32 %v10119_v27, %v6251_v11 }
 0x11b   :  { %10319 = vst [vmem:[#allocation21_spill] sm:$0xff] %v6303_v0  ;;  %v751_v30 = vshrl.u32 %v10123_v29, %v6281_v38  ;;  %v6313_v32 = vand.u32 31, %v939_v54  ;;  %v6317_v34 = vsel %vm550_vm4, %v546_v44, 1326507024  ;;  %v649_v42 = vor.u32 %v648_v53, %v647_v47 }
 0x11c   :  { %v1040_v43 = vadd.s32 1, %v5257_v56  ;;  %v1343_v4 = vshrl.u32 %v1342_v57, 23  ;;  %v6319_v49 = vor.u32 %v748_v61, %v747_v28  ;;  %v750_v45 = vshll.u32 %v10137_v9, %v6251_v11 }
 0x11d   :  { %10320 = vst [vmem:[#allocation22_spill] sm:$0xff] %v6313_v32  ;;  %vm756_vm7 = vcmp.lt.s32.totalorder %v6283_v39, 4  ;;  %v6325_v46 = vsub.s32 32, %v6303_v0  ;;  %v1143_v52 = vadd.s32 1, %v5261_v2  ;;  %v5265_v33 = vadd.s32 4294967169, %v1240_v3 }
 0x11e   :  { %10321 = vst [vmem:[#allocation23_spill] sm:$0xff] %v6319_v49  ;;  %v6328_v26 = vadd.f32 %v6184_v51, %v268_v10  ;;  %v6331_v44 = vadd.f32 %v6184_v51, %v269_v12  ;;  %v6336_v47 = vsel %vm653_vm6, %v6307_v16, 920167782  ;;  %v752_v53 = vor.u32 %v751_v30, %v750_v45  ;;  %v182_v10 = vpop.permute.xlu1 %181 }
 0x11f   :  { %10322 = vst [vmem:[#allocation24_spill] sm:$0xff] %v6325_v46  ;;  %v6338_v56 = vshrl.u32 %v836_v41, 5  ;;  %v6341_v57 = vsub.s32 32, %v6313_v32  ;;  %v6345_v61 = vsel %vm653_vm6, %v649_v42, 1326507024  ;;  %v6347_v2 = vshrl.u32 %v939_v54, 5  ;;  %v189_v42 = vpop.permute.xlu0 %188 }
 0x120   :  { %10323 = vst [vmem:[#allocation25_spill] sm:$0xff] %v6328_v26  ;;  %10324 = vst [vmem:[#allocation26_spill] sm:$0xff] %v6331_v44  ;;  %vm1041_vm8 = vcmp.gt.s32.totalorder %v1040_v43, 0  ;;  %v5269_v3 = vadd.s32 4294967169, %v1343_v4  ;;  %v6352_v12 = vsel %vm756_vm7, %v6319_v49, 920167782  ;;  %v850_v41 = vshll.u32 %v10119_v27, %v6303_v0 }
 0x121   :  { %10325 = vst [vmem:[#allocation27_spill] sm:$0xff] %v6338_v56  ;;  %10326 = vst [vmem:[#allocation28_spill] sm:$0xff] %v6341_v57  ;;  %v851_v28 = vshrl.u32 %v10137_v9, %v6325_v46  ;;  %v854_v30 = vshrl.u32 %v10123_v29, %v6325_v46  ;;  %vm1144_vm9 = vcmp.gt.s32.totalorder %v1143_v52, 0  ;;  %v1246_v54 = vadd.s32 1, %v5265_v33 }
 0x122   :  { %10327 = vst [vmem:[#allocation29_spill] sm:$0xff] %v6347_v2  ;;  %10328 = vst [vmem:[#allocation30_spill] sm:$0xff] %v6352_v12  ;;  %v1445_v4 = vand.u32 2139095040, %v6328_v26  ;;  %v1548_v45 = vand.u32 2139095040, %v6331_v44  ;;  %v853_v17 = vshll.u32 %v10137_v9, %v6303_v0  ;;  %v954_v18 = vshrl.u32 %v10137_v9, %v6341_v57 }
 0x123   :  { %v1042_v27 = vsel %vm1041_vm8, %v1040_v43, 0  ;;  %v270_v14 = vmul.f32 %v6153_v15, %v182_v10  ;;  %v6369_v7 = vsel %vm756_vm7, %v752_v53, 1326507024  ;;  %v10330_v29 = vmov 2102212464   ;;  %v196_v53 = vpop.permute.xlu1 %195 }
 0x124   :  { %10329 = vst [vmem:[#allocation31_spill] sm:$0xff] %v6369_v7  ;;  %v953_v33 = vshll.u32 %v10330_v29, %v6313_v32  ;;  %v1349_v5 = vadd.s32 1, %v5269_v3  ;;  %v271_v6 = vmul.f32 %v6153_v15, %v189_v42  ;;  %v6374_v44 = vor.u32 %v851_v28, %v850_v41  ;;  %v203_v28 = vpop.permute.xlu0 %202 }
 0x125   :  { %v855_v26 = vor.u32 %v854_v30, %v853_v17  ;;  %v10332_v35 = vmov 1326507024   ;;  %v1145_v9 = vsel %vm1144_vm9, %v1143_v52, 0  ;;  %v6378_v43 = vand.u32 31, %v1042_v27 }
 0x126   :  { %10331 = vst [vmem:[#allocation32_spill] sm:$0xff] %v6374_v44  ;;  %v957_v21 = vshrl.u32 %v10332_v35, %v6341_v57  ;;  %vm1247_vm10 = vcmp.gt.s32.totalorder %v1246_v54, 0  ;;  %v1446_v10 = vshrl.u32 %v1445_v4, 23  ;;  %v1549_v58 = vshrl.u32 %v1548_v45, 23 }
 0x127   :  { %10333 = vst [vmem:[#allocation33_spill] sm:$0xff] %v6378_v43  ;;  %vm859_vm11 = vcmp.lt.s32.totalorder %v6338_v56, 4  ;;  %v6381_v48 = vor.u32 %v954_v18, %v953_v33  ;;  %v10335_v3 = vmov 920167782   ;;  %v6386_v41 = vadd.f32 %v6184_v51, %v270_v14 }
 0x128   :  { %v956_v42 = vshll.u32 %v10335_v3, %v6313_v32  ;;  %vm962_vm12 = vcmp.lt.s32.totalorder %v6347_v2, 4  ;;  %v6389_v17 = vand.u32 31, %v1145_v9  ;;  %vm1350_vm13 = vcmp.gt.s32.totalorder %v1349_v5, 0 }
 0x129   :  { %10334 = vst [vmem:[#allocation34_spill] sm:$0xff] %v6381_v48  ;;  %10336 = vst [vmem:[#allocation35_spill] sm:$0xff] %v6386_v41  ;;  %v6392_v52 = vadd.f32 %v6184_v51, %v271_v6  ;;  %v6397_v18 = vsel %vm859_vm11, %v6374_v44, 920167782  ;;  %v1248_v4 = vsel %vm1247_vm10, %v1246_v54, 0  ;;  %v272_v45 = vmul.f32 %v6153_v15, %v196_v53 }
 0x12a   :  { %10337 = vst [vmem:[#allocation36_spill] sm:$0xff] %v6389_v17  ;;  %10339 = vst [vmem:[#allocation38_spill] sm:$0xff] %v6397_v18  ;;  %v958_v30 = vor.u32 %v957_v21, %v956_v42  ;;  %v6402_v14 = vsel %vm859_vm11, %v855_v26, 1326507024  ;;  %v6405_v33 = vsub.s32 32, %v6378_v43  ;;  %v5273_v57 = vadd.s32 4294967169, %v1446_v10 }
 0x12b   :  { %10338 = vst [vmem:[#allocation37_spill] sm:$0xff] %v6392_v52  ;;  %10340 = vst [vmem:[#allocation39_spill] sm:$0xff] %v6402_v14  ;;  %v5277_v6 = vadd.s32 4294967169, %v1549_v58  ;;  %v6410_v32 = vsel %vm962_vm12, %v6381_v48, 920167782  ;;  %v1351_v22 = vsel %vm1350_vm13, %v1349_v5, 0  ;;  %v273_v54 = vmul.f32 %v6153_v15, %v203_v28 }
 0x12c   :  { %10341 = vst [vmem:[#allocation40_spill] sm:$0xff] %v6405_v33  ;;  %10342 = vst [vmem:[#allocation41_spill] sm:$0xff] %v6410_v32  ;;  %v1651_v21 = vand.u32 2139095040, %v6386_v41  ;;  %v6414_v53 = vshrl.u32 %v1042_v27, 5  ;;  %v6417_v26 = vsub.s32 32, %v6389_v17  ;;  %v6419_v42 = vand.u32 31, %v1248_v4 }
 0x12d   :  { %v1754_v10 = vand.u32 2139095040, %v6392_v52  ;;  %v6424_v58 = vsel %vm962_vm12, %v958_v30, 1326507024  ;;  %v1056_v5 = vshll.u32 %v10330_v29, %v6378_v43  ;;  %v6428_v48 = vshrl.u32 %v1145_v9, 5 }
 0x12e   :  { %10343 = vst [vmem:[#allocation42_spill] sm:$0xff] %v6414_v53  ;;  %10344 = vst [vmem:[#allocation43_spill] sm:$0xff] %v6417_v26  ;;  %v6431_v28 = vadd.f32 %v6184_v51, %v272_v45  ;;  %v1057_v27 = vshrl.u32 %v10335_v3, %v6405_v33  ;;  %v6435_v41 = vand.u32 31, %v1351_v22  ;;  %v1452_v32 = vadd.s32 1, %v5273_v57 }
 0x12f   :  { %10345 = vst [vmem:[#allocation44_spill] sm:$0xff] %v6419_v42  ;;  %10346 = vst [vmem:[#allocation45_spill] sm:$0xff] %v6424_v58  ;;  %v1555_v44 = vadd.s32 1, %v5277_v6  ;;  %v1059_v52 = vshll.u32 %v10335_v3, %v6378_v43  ;;  %v1060_v30 = vshrl.u32 %v10332_v35, %v6405_v33  ;;  %v1652_v58 = vshrl.u32 %v1651_v21, 23 }
 0x130   :  { %10347 = vst [vmem:[#allocation46_spill] sm:$0xff] %v6428_v48  ;;  %10348 = vst [vmem:[#allocation47_spill] sm:$0xff] %v6431_v28  ;;  %v6442_v9 = vadd.f32 %v6184_v51, %v273_v54  ;;  %vm1065_vm14 = vcmp.lt.s32.totalorder %v6414_v53, 4  ;;  %v1160_v45 = vshrl.u32 %v10335_v3, %v6417_v26  ;;  %v6448_v2 = vsub.s32 32, %v6419_v42 }
 0x131   :  { %10349 = vst [vmem:[#allocation48_spill] sm:$0xff] %v6435_v41  ;;  %v1755_v57 = vshrl.u32 %v1754_v10, 23  ;;  %v1159_v6 = vshll.u32 %v10330_v29, %v6389_v17  ;;  %v1162_v43 = vshll.u32 %v10335_v3, %v6389_v17  ;;  %v1163_v21 = vshrl.u32 %v10332_v35, %v6417_v26 }
 0x132   :  { %10350 = vst [vmem:[#allocation49_spill] sm:$0xff] %v6442_v9  ;;  %10351 = vst [vmem:[#allocation50_spill] sm:$0xff] %v6448_v2  ;;  %v1857_v54 = vand.u32 2139095040, %v6431_v28  ;;  %v6457_v33 = vor.u32 %v1057_v27, %v1056_v5  ;;  %v6460_v14 = vsub.s32 32, %v6435_v41  ;;  %vm1453_vm15 = vcmp.gt.s32.totalorder %v1452_v32, 0 }
 0x133   :  { %vm1556_vm0 = vcmp.gt.s32.totalorder %v1555_v44, 0  ;;  %v1061_v18 = vor.u32 %v1060_v30, %v1059_v52  ;;  %vm1168_vm1 = vcmp.lt.s32.totalorder %v6428_v48, 4  ;;  %v5281_v10 = vadd.s32 4294967169, %v1652_v58 }
 0x134   :  { %10352 = vst [vmem:[#allocation51_spill] sm:$0xff] %v6457_v33  ;;  %10353 = vst [vmem:[#allocation52_spill] sm:$0xff] %v6460_v14  ;;  %v1960_v56 = vand.u32 2139095040, %v6442_v9  ;;  %v6464_v46 = vor.u32 %v1160_v45, %v1159_v6  ;;  %v6466_v17 = vshrl.u32 %v1248_v4, 5  ;;  %v1263_v28 = vshrl.u32 %v10335_v3, %v6448_v2 }
 0x135   :  { %v5285_v5 = vadd.s32 4294967169, %v1755_v57  ;;  %v1266_v27 = vshrl.u32 %v10332_v35, %v6448_v2  ;;  %v1454_v26 = vsel %vm1453_vm15, %v1452_v32, 0  ;;  %v1557_v0 = vsel %vm1556_vm0, %v1555_v44, 0 }
 0x136   :  { %10354 = vst [vmem:[#allocation53_spill] sm:$0xff] %v6464_v46  ;;  %10355 = vst [vmem:[#allocation54_spill] sm:$0xff] %v6466_v17  ;;  %v1858_v19 = vshrl.u32 %v1857_v54, 23  ;;  %v6475_v52 = vsel %vm1065_vm14, %v6457_v33, 920167782  ;;  %v1164_v58 = vor.u32 %v1163_v21, %v1162_v43  ;;  %v6477_v30 = vshrl.u32 %v1351_v22, 5 }
 0x137   :  { %10356 = vst [vmem:[#allocation55_spill] sm:$0xff] %v6475_v52  ;;  %v1366_v4 = vshrl.u32 %v10335_v3, %v6460_v14  ;;  %v1262_v45 = vshll.u32 %v10330_v29, %v6419_v42  ;;  %v1265_v57 = vshll.u32 %v10335_v3, %v6419_v42  ;;  %v1658_v32 = vadd.s32 1, %v5281_v10 }
 0x138   :  { %10357 = vst [vmem:[#allocation56_spill] sm:$0xff] %v6477_v30  ;;  %v1961_v44 = vshrl.u32 %v1960_v56, 23  ;;  %v1365_v6 = vshll.u32 %v10330_v29, %v6435_v41  ;;  %v6487_v54 = vand.u32 31, %v1454_v26  ;;  %v6489_v9 = vand.u32 31, %v1557_v0 }
 0x139   :  { %v1761_v22 = vadd.s32 1, %v5285_v5  ;;  %v6493_v43 = vsel %vm1065_vm14, %v1061_v18, 1326507024  ;;  %v6495_v21 = vor.u32 %v1263_v28, %v1262_v45  ;;  %v1267_v2 = vor.u32 %v1266_v27, %v1265_v57  ;;  %v210_v18 = vpop.permute.xlu1 %209  ;;  %v217_v27 = vpop.permute.xlu0 %216 }
 0x13a   :  { %10358 = vst [vmem:[#allocation57_spill] sm:$0xff] %v6487_v54  ;;  %10359 = vst [vmem:[#allocation58_spill] sm:$0xff] %v6489_v9  ;;  %v5289_v52 = vadd.s32 4294967169, %v1858_v19  ;;  %v6500_v56 = vsel %vm1168_vm1, %v6464_v46, 920167782  ;;  %v6506_v42 = vor.u32 %v1366_v4, %v1365_v6  ;;  %v1369_v5 = vshrl.u32 %v10332_v35, %v6460_v14 }
 0x13b   :  { %10360 = vst [vmem:[#allocation59_spill] sm:$0xff] %v6493_v43  ;;  %10361 = vst [vmem:[#allocation60_spill] sm:$0xff] %v6495_v21  ;;  %v6504_v10 = vsel %vm1168_vm1, %v1164_v58, 1326507024  ;;  %vm1271_vm2 = vcmp.lt.s32.totalorder %v6466_v17, 4  ;;  %v1368_v19 = vshll.u32 %v10335_v3, %v6435_v41  ;;  %vm1659_vm3 = vcmp.gt.s32.totalorder %v1658_v32, 0 }
 0x13c   :  { %10362 = vst [vmem:[#allocation61_spill] sm:$0xff] %v6500_v56  ;;  %10363 = vst [vmem:[#allocation62_spill] sm:$0xff] %v6504_v10  ;;  %v5293_v28 = vadd.s32 4294967169, %v1961_v44  ;;  %vm10275_vm5 = vcmp.lt.s32.totalorder %v6477_v30, 4  ;;  %v6515_v45 = vsub.s32 32, %v6487_v54  ;;  %v6518_v58 = vsub.s32 32, %v6489_v9 }
 0x13d   :  { %10364 = vst [vmem:[#allocation63_spill] sm:$0xff] %v6506_v42  ;;  %vm1762_vm8 = vcmp.gt.s32.totalorder %v1761_v22, 0  ;;  %v6523_v4 = vsel %vm1271_vm2, %v6495_v21, 920167782  ;;  %v6527_v57 = vsel %vm1271_vm2, %v1267_v2, 1326507024  ;;  %v274_v6 = vmul.f32 %v6153_v15, %v210_v18  ;;  %v231_v48 = vpop.permute.xlu0 %230 }
 0x13e   :  { %10365 = vst [vmem:[#allocation64_spill] sm:$0xff] %v6515_v45  ;;  %10366 = vst [vmem:[#allocation65_spill] sm:$0xff] %v6518_v58  ;;  %v1864_v44 = vadd.s32 1, %v5289_v52  ;;  %v1370_v14 = vor.u32 %v1369_v5, %v1368_v19  ;;  %v6533_v41 = vsel %vm10275_vm5, %v6506_v42, 920167782  ;;  %v1660_v46 = vsel %vm1659_vm3, %v1658_v32, 0 }
 0x13f   :  { %10367 = vst [vmem:[#allocation66_spill] sm:$0xff] %v6523_v4  ;;  %10368 = vst [vmem:[#allocation67_spill] sm:$0xff] %v6527_v57  ;;  %v275_v10 = vmul.f32 %v6153_v15, %v217_v27  ;;  %v6536_v56 = vshrl.u32 %v1454_v26, 5  ;;  %v6538_v21 = vshrl.u32 %v1557_v0, 5  ;;  %v1763_v4 = vsel %vm1762_vm8, %v1761_v22, 0 }
 0x140   :  { %10369 = vst [vmem:[#allocation68_spill] sm:$0xff] %v6533_v41  ;;  %v1967_v17 = vadd.s32 1, %v5293_v28  ;;  %v1468_v2 = vshll.u32 %v10330_v29, %v6487_v54  ;;  %v1469_v52 = vshrl.u32 %v10335_v3, %v6515_v45  ;;  %v1472_v5 = vshrl.u32 %v10332_v35, %v6515_v45  ;;  %v224_v45 = vpop.permute.xlu1 %223 }
 0x141   :  { %10370 = vst [vmem:[#allocation69_spill] sm:$0xff] %v6536_v56  ;;  %10371 = vst [vmem:[#allocation70_spill] sm:$0xff] %v6538_v21  ;;  %v1572_v32 = vshrl.u32 %v10335_v3, %v6518_v58  ;;  %v1575_v26 = vshrl.u32 %v10332_v35, %v6518_v58  ;;  %v6550_v18 = vand.u32 31, %v1660_v46  ;;  %vm1865_vm9 = vcmp.gt.s32.totalorder %v1864_v44, 0 }
 0x142   :  { %v6553_v0 = vadd.f32 %v6184_v51, %v274_v6  ;;  %vm320_vm10 = vcmp.gt.s32.totalorder %v6247_v8, 0  ;;  %v1471_v22 = vshll.u32 %v10335_v3, %v6487_v54  ;;  %v1571_v19 = vshll.u32 %v10330_v29, %v6489_v9 }
 0x143   :  { %10372 = vst [vmem:[#allocation71_spill] sm:$0xff] %v6550_v18  ;;  %v6560_v28 = vand.u32 31, %v1763_v4  ;;  %v6563_v27 = vadd.f32 %v6184_v51, %v275_v10  ;;  %v6567_v58 = vsel %vm10275_vm5, %v1370_v14, 1326507024  ;;  %vm10273_vm13 = vcmp.lt.s32.totalorder %v6536_v56, 4 }
 0x144   :  { %10373 = vst [vmem:[#allocation72_spill] sm:$0xff] %v6553_v0  ;;  %10376 = vst [vmem:[#allocation75_spill] sm:$0xff] %v6567_v58  ;;  %v1574_v6 = vshll.u32 %v10335_v3, %v6489_v9  ;;  %vm1968_vm15 = vcmp.gt.s32.totalorder %v1967_v17, 0  ;;  %v6572_v54 = vor.u32 %v1469_v52, %v1468_v2  ;;  %v1473_v42 = vor.u32 %v1472_v5, %v1471_v22 }
 0x145   :  { %10374 = vst [vmem:[#allocation73_spill] sm:$0xff] %v6560_v28  ;;  %10375 = vst [vmem:[#allocation74_spill] sm:$0xff] %v6563_v27  ;;  %v6574_v41 = vor.u32 %v1572_v32, %v1571_v19  ;;  %v1866_v57 = vsel %vm1865_vm9, %v1864_v44, 0  ;;  %vm10231_vm0 = vcmp.lt.s32.totalorder %v6538_v21, 4  ;;  %v6578_v14 = vsub.s32 32, %v6550_v18 }
 0x146   :  { %10377 = vst [vmem:[#allocation76_spill] sm:$0xff] %v6572_v54  ;;  %v1576_v10 = vor.u32 %v1575_v26, %v1574_v6  ;;  %v2063_v58 = vand.u32 2139095040, %v6553_v0  ;;  %v6582_v30 = vsub.s32 32, %v6560_v28  ;;  %v1969_v9 = vsel %vm1968_vm15, %v1967_v17, 0 }
 0x147   :  { %10378 = vst [vmem:[#allocation77_spill] sm:$0xff] %v6574_v41  ;;  %10379 = vst [vmem:[#allocation78_spill] sm:$0xff] %v6578_v14  ;;  %v2166_v2 = vand.u32 2139095040, %v6563_v27  ;;  %v276_v52 = vmul.f32 %v6153_v15, %v224_v45  ;;  %v6586_v5 = vshrl.u32 %v1660_v46, 5  ;;  %v6588_v44 = vshrl.u32 %v1763_v4, 5 }
 0x148   :  { %10380 = vst [vmem:[#allocation79_spill] sm:$0xff] %v6582_v30  ;;  %v6590_v32 = vand.u32 31, %v1866_v57  ;;  %v277_v26 = vmul.f32 %v6153_v15, %v231_v48  ;;  %v6596_v22 = vsel %vm10273_vm13, %v6572_v54, 920167782  ;;  %v6600_v17 = vsel %vm10273_vm13, %v1473_v42, 1326507024 }
 0x149   :  { %10381 = vst [vmem:[#allocation80_spill] sm:$0xff] %v6586_v5  ;;  %10382 = vst [vmem:[#allocation81_spill] sm:$0xff] %v6588_v44  ;;  %v6605_v46 = vsel %vm10231_vm0, %v6574_v41, 920167782  ;;  %v1674_v45 = vshll.u32 %v10330_v29, %v6550_v18  ;;  %v6611_v48 = vsel %vm10231_vm0, %v1576_v10, 1326507024  ;;  %v1675_v4 = vshrl.u32 %v10335_v3, %v6578_v14 }
 0x14a   :  { %10383 = vst [vmem:[#allocation82_spill] sm:$0xff] %v6590_v32  ;;  %10384 = vst [vmem:[#allocation83_spill] sm:$0xff] %v6596_v22  ;;  %v6615_v19 = vand.u32 31, %v1969_v9  ;;  %v2064_v6 = vshrl.u32 %v2063_v58, 23  ;;  %v1678_v42 = vshrl.u32 %v10332_v35, %v6578_v14  ;;  %v1778_v27 = vshrl.u32 %v10335_v3, %v6582_v30 }
 0x14b   :  { %10385 = vst [vmem:[#allocation84_spill] sm:$0xff] %v6600_v17  ;;  %10386 = vst [vmem:[#allocation85_spill] sm:$0xff] %v6605_v46  ;;  %v2167_v0 = vshrl.u32 %v2166_v2, 23  ;;  %v6622_v41 = vadd.f32 %v6184_v51, %v276_v52  ;;  %v1677_v10 = vshll.u32 %v10335_v3, %v6550_v18  ;;  %vm10271_vm3 = vcmp.lt.s32.totalorder %v6586_v5, 4 }
 0x14c   :  { %10387 = vst [vmem:[#allocation86_spill] sm:$0xff] %v6611_v48  ;;  %10388 = vst [vmem:[#allocation87_spill] sm:$0xff] %v6615_v19  ;;  %v6628_v48 = vsub.s32 32, %v6590_v32  ;;  %v6631_v58 = vadd.f32 %v6184_v51, %v277_v26  ;;  %v1777_v14 = vshll.u32 %v10330_v29, %v6560_v28  ;;  %v1780_v2 = vshll.u32 %v10335_v3, %v6560_v28 }
 0x14d   :  { %10389 = vst [vmem:[#allocation88_spill] sm:$0xff] %v6622_v41  ;;  %v1781_v52 = vshrl.u32 %v10332_v35, %v6582_v30  ;;  %v321_v18 = vsel %vm320_vm10, %v6247_v8, 0  ;;  %v6642_v46 = vor.u32 %v1675_v4, %v1674_v45  ;;  %vm10252_vm8 = vcmp.lt.s32.totalorder %v6588_v44, 4 }
 0x14e   :  { %10390 = vst [vmem:[#allocation89_spill] sm:$0xff] %v6628_v48  ;;  %10391 = vst [vmem:[#allocation90_spill] sm:$0xff] %v6631_v58  ;;  %v6646_v26 = vsub.s32 32, %v6615_v19  ;;  %v5297_v21 = vadd.s32 4294967169, %v2064_v6  ;;  %v1679_v22 = vor.u32 %v1678_v42, %v1677_v10  ;;  %v6648_v54 = vor.u32 %v1778_v27, %v1777_v14 }
 0x14f   :  { %10392 = vst [vmem:[#allocation91_spill] sm:$0xff] %v6642_v46  ;;  %v5301_v17 = vadd.s32 4294967169, %v2167_v0  ;;  %v2269_v28 = vand.u32 2139095040, %v6622_v41  ;;  %v1881_v30 = vshrl.u32 %v10335_v3, %v6628_v48  ;;  %v1884_v8 = vshrl.u32 %v10332_v35, %v6628_v48 }
 0x150   :  { %10393 = vst [vmem:[#allocation92_spill] sm:$0xff] %v6646_v26  ;;  %10394 = vst [vmem:[#allocation93_spill] sm:$0xff] %v6648_v54  ;;  %v2372_v45 = vand.u32 2139095040, %v6631_v58  ;;  %v323_v4 = vand.u32 31, %v321_v18  ;;  %v1782_v56 = vor.u32 %v1781_v52, %v1780_v2  ;;  %v6656_v33 = vshrl.u32 %v1866_v57, 5 }
 0x151   :  { %v1880_v6 = vshll.u32 %v10330_v29, %v6590_v32  ;;  %v6660_v27 = vshrl.u32 %v1969_v9, 5  ;;  %v1883_v0 = vshll.u32 %v10335_v3, %v6590_v32  ;;  %v1984_v14 = vshrl.u32 %v10335_v3, %v6646_v26 }
 0x152   :  { %10395 = vst [vmem:[#allocation94_spill] sm:$0xff] %v6656_v33  ;;  %v1987_v42 = vshrl.u32 %v10332_v35, %v6646_v26  ;;  %v2070_v10 = vadd.s32 1, %v5297_v21  ;;  %v1983_v2 = vshll.u32 %v10330_v29, %v6615_v19  ;;  %v1986_v57 = vshll.u32 %v10335_v3, %v6615_v19 }
 0x153   :  { %10396 = vst [vmem:[#allocation95_spill] sm:$0xff] %v6660_v27  ;;  %v2173_v52 = vadd.s32 1, %v5301_v17  ;;  %v2270_v58 = vshrl.u32 %v2269_v28, 23  ;;  %v6672_v9 = vor.u32 %v1881_v30, %v1880_v6  ;;  %v1885_v41 = vor.u32 %v1884_v8, %v1883_v0 }
 0x154   :  { %v2373_v48 = vshrl.u32 %v2372_v45, 23  ;;  %v324_v32 = vsub.s32 32, %v323_v4  ;;  %v6677_v43 = vsel %vm10271_vm3, %v6642_v46, 920167782  ;;  %v6681_v21 = vsel %vm10271_vm3, %v1679_v22, 1326507024 }
 0x155   :  { %10397 = vst [vmem:[#allocation96_spill] sm:$0xff] %v6672_v9  ;;  %10398 = vst [vmem:[#allocation97_spill] sm:$0xff] %v6677_v43  ;;  %v6686_v19 = vsel %vm10252_vm8, %v6648_v54, 920167782  ;;  %v6690_v30 = vsel %vm10252_vm8, %v1782_v56, 1326507024  ;;  %v6692_v28 = vor.u32 %v1984_v14, %v1983_v2  ;;  %v1988_v17 = vor.u32 %v1987_v42, %v1986_v57 }
 0x156   :  { %10399 = vst [vmem:[#allocation98_spill] sm:$0xff] %v6681_v21  ;;  %10400 = vst [vmem:[#allocation99_spill] sm:$0xff] %v6686_v19  ;;  %vm2071_vm9 = vcmp.gt.s32.totalorder %v2070_v10, 0  ;;  %vm10251_vm10 = vcmp.lt.s32.totalorder %v6656_v33, 4  ;;  %vm10250_vm15 = vcmp.lt.s32.totalorder %v6660_v27, 4  ;;  %vm2174_vm0 = vcmp.gt.s32.totalorder %v2173_v52, 0  ;;  %v245_v27 = vpop.permute.xlu0 %244 }
 0x157   :  { %10401 = vst [vmem:[#allocation100_spill] sm:$0xff] %v6690_v30  ;;  %10402 = vst [vmem:[#allocation101_spill] sm:$0xff] %v6692_v28  ;;  %v5305_v22 = vadd.s32 4294967169, %v2270_v58  ;;  %v6699_v8 = vsel %vm10251_vm10, %v6672_v9, 920167782  ;;  %v5309_v56 = vadd.s32 4294967169, %v2373_v48  ;;  %v333_v57 = vshrl.u32 %v10330_v29, %v324_v32 }
 0x158   :  { %10403 = vst [vmem:[#allocation102_spill] sm:$0xff] %v6699_v8  ;;  %v6703_v45 = vsel %vm10251_vm10, %v1885_v41, 1326507024  ;;  %v10245_v6 = vmov 2475754826   ;;  %v2072_v14 = vsel %vm2071_vm9, %v2070_v10, 0  ;;  %v336_v58 = vshrl.u32 %v10335_v3, %v324_v32 }
 0x159   :  { %10404 = vst [vmem:[#allocation103_spill] sm:$0xff] %v6703_v45  ;;  %v327_v0 = vshrl.u32 %v10245_v6, %v324_v32  ;;  %v10247_v42 = vmov 2131351028   ;;  %v6712_v26 = vsel %vm10250_vm15, %v6692_v28, 920167782  ;;  %v2175_v48 = vsel %vm2174_vm0, %v2173_v52, 0 }
 0x15a   :  { %v330_v2 = vshrl.u32 %v10247_v42, %v324_v32  ;;  %10405 = vst [vmem:[#allocation104_spill] sm:$0xff] %v6712_v26  ;;  %v6716_v41 = vsel %vm10250_vm15, %v1988_v17, 1326507024  ;;  %v10243_v8 = vmov 683565275   ;;  %v329_v9 = vshll.u32 %v10245_v6, %v323_v4  ;;  %v238_v26 = vpop.permute.xlu1 %237 }
 0x15b   :  { %10406 = vst [vmem:[#allocation105_spill] sm:$0xff] %v6716_v41  ;;  %v326_v10 = vshll.u32 %v10243_v8, %v323_v4  ;;  %v332_v45 = vshll.u32 %v10247_v42, %v323_v4  ;;  %v335_v33 = vshll.u32 %v10330_v29, %v323_v4  ;;  %v339_v54 = vshrl.u32 %v10332_v35, %v324_v32 }
 0x15c   :  { %v6723_v30 = vshrl.u32 %v2072_v14, 5  ;;  %v6725_v28 = vand.u32 31, %v2072_v14  ;;  %v322_v17 = vshrl.u32 %v321_v18, 5  ;;  %v331_v52 = vor.u32 %v330_v2, %v329_v9 }
 0x15d   :  { %v328_v41 = vor.u32 %v327_v0, %v326_v10  ;;  %v334_v19 = vor.u32 %v333_v57, %v332_v45  ;;  %v337_v44 = vor.u32 %v336_v58, %v335_v33  ;;  %v338_v8 = vshll.u32 %v10335_v3, %v323_v4  ;;  %v54_v10 = vld [vmem:[%s10111_s3 + $0x18] sm:$0xff] }
 0x15e   :  { %10407 = vst [vmem:[#allocation106_spill] sm:$0xff] %v6725_v28  ;;  %v6728_v6 = vshrl.u32 %v2175_v48, 5  ;;  %v6730_v42 = vand.u32 31, %v2175_v48  ;;  %v6732_v46 = vadd.s32 1, %v5305_v22  ;;  %v6734_v21 = vadd.s32 1, %v5309_v56 }
 0x15f   :  { %v6737_v14 = vmul.f32 %v6153_v15, %v238_v26  ;;  %v6740_v43 = vmul.f32 %v6153_v15, %v245_v27  ;;  %v10412_v18 = vmov 683565275   ;;  %v340_v45 = vor.u32 %v339_v54, %v338_v8 }
 0x160   :  { %10408 = vst [vmem:[#allocation107_spill] sm:$0xff] %v6728_v6  ;;  %10409 = vst [vmem:[#allocation108_spill] sm:$0xff] %v6730_v42  ;;  %v325_v9 = vshrl.u32 %v10412_v18, %v324_v32  ;;  %v6744_v33 = vsub.s32 32, %v6725_v28  ;;  %vm341_vm0 = vcmp.lt.s32.totalorder %v322_v17, 1  ;;  %vm343_vm9 = vcmp.lt.s32.totalorder %v322_v17, 3 }
 0x161   :  { %10410 = vst [vmem:[#allocation109_spill] sm:$0xff] %v6737_v14  ;;  %10411 = vst [vmem:[#allocation110_spill] sm:$0xff] %v6740_v43  ;;  %vm344_vm15 = vcmp.lt.s32.totalorder %v322_v17, 4  ;;  %v349_v0 = vsel %vm341_vm0, %v328_v41, %v331_v52  ;;  %vm342_vm10 = vcmp.lt.s32.totalorder %v322_v17, 2  ;;  %v353_v27 = vsel %vm341_vm0, %v331_v52, %v334_v19 }
 0x162   :  { %10413 = vst [vmem:[#allocation111_spill] sm:$0xff] %v6744_v33  ;;  %v345_v4 = vsel %vm341_vm0, %v325_v9, %v328_v41  ;;  %v346_v22 = vsel %vm344_vm15, %v334_v19, 2102212464  ;;  %v350_v56 = vsel %vm344_vm15, %v337_v44, 920167782  ;;  %v6750_v32 = vshll.u32 %v10330_v29, %v6725_v28 }
 0x163   :  { %v347_v26 = vsel %vm343_vm9, %v331_v52, %v346_v22  ;;  %v351_v2 = vsel %vm343_vm9, %v334_v19, %v350_v56  ;;  %v354_v8 = vsel %vm344_vm15, %v340_v45, 1326507024  ;;  %vm423_vm8 = vcmp.gt.s32.totalorder %v6259_v24, 0  ;;  %v53_v19 = vld [vmem:[%s10111_s3 + $0x10] sm:$0xff] }
 0x164   :  { %v352_v54 = vsel %vm342_vm10, %v349_v0, %v351_v2  ;;  %v6755_v57 = vshll.u32 %v10335_v3, %v6725_v28  ;;  %v6758_v58 = vsub.s32 32, %v6730_v42  ;;  %v348_v41 = vsel %vm342_vm10, %v345_v4, %v347_v26 }
 0x165   :  { %v355_v48 = vsel %vm343_vm9, %v337_v44, %v354_v8  ;;  %v6768_v9 = vmul.u32.u64.low %v6253_v13, %v352_v54  ;;  %v6769_v45 = vmul.u32.u64.high %v6253_v13, %v352_v54, %v6768_v9  ;;  %v424_v22 = vsel %vm423_vm8, %v6259_v24, 0 }
 0x166   :  { %v356_v52 = vsel %vm342_vm10, %v353_v27, %v355_v48  ;;  %v6775_v17 = vshll.u32 %v10330_v29, %v6730_v42  ;;  %v426_v0 = vand.u32 31, %v424_v22  ;;  %v2087_v56 = vshrl.u32 %v10335_v3, %v6744_v33 }
 0x167   :  { %v6778_v44 = vmul.u32.u64.low %v6253_v13, %v356_v52  ;;  %v6779_v4 = vmul.u32.u64.high %v6253_v13, %v356_v52, %v6778_v44  ;;  %v6785_v26 = vshrl.u32 %v10332_v35, %v6744_v33  ;;  %v6789_v2 = vshll.u32 %v10335_v3, %v6730_v42 }
 0x168   :  { %v6791_v24 = vpack.c.bf16 %v54_v10, %v53_v19  ;;  %vm2277_vm8 = vcmp.gt.s32.totalorder %v6732_v46, 0  ;;  %v364_v27 = vmul.u32 %v6253_v13, %v348_v41  ;;  %v425_v54 = vshrl.u32 %v424_v22, 5 }
 0x169   :  { %v427_v8 = vsub.s32 32, %v426_v0  ;;  %vm2380_vm10 = vcmp.gt.s32.totalorder %v6734_v21, 0  ;;  %v367_v48 = vadd.s32 1, %v6769_v45  ;;  %v429_v52 = vshll.u32 %v10412_v18, %v426_v0 }
 0x16a   :  { %10414 = vst [vmem:[#allocation112_spill] sm:$0xff] %v6791_v24  ;;  %v10415_v44 = vmov 2475754826   ;;  %v10416_v33 = vmov 2131351028   ;;  %5687 = vmatprep.subr.bf16.mxu1 %v6791_v24  ;;  %vm366_vm15 = vc.u32 %v6779_v4, %v6768_v9  ;;  %v438_v13 = vshll.u32 %v10330_v29, %v426_v0 }
 0x16b   :  { %v432_v28 = vshll.u32 %v10415_v44, %v426_v0  ;;  %v435_v5 = vshll.u32 %v10416_v33, %v426_v0  ;;  %v430_v19 = vshrl.u32 %v10415_v44, %v427_v8  ;;  %v441_v41 = vshll.u32 %v10335_v3, %v426_v0 }
 0x16c   :  { %v368_v10 = vsel %vm366_vm15, %v367_v48, %v6769_v45  ;;  %v433_v22 = vshrl.u32 %v10416_v33, %v427_v8  ;;  %v436_v42 = vshrl.u32 %v10330_v29, %v427_v8  ;;  %v439_v15 = vshrl.u32 %v10335_v3, %v427_v8 }
 0x16d   :  { %v369_v43 = vadd.s32 %v368_v10, %v364_v27  ;;  %v431_v53 = vor.u32 %v430_v19, %v429_v52  ;;  %v442_v51 = vshrl.u32 %v10332_v35, %v427_v8  ;;  %vm444_vm0 = vcmp.lt.s32.totalorder %v425_v54, 1 }
 0x16e   :  { %v428_v14 = vshrl.u32 %v10412_v18, %v427_v8  ;;  %v434_v6 = vor.u32 %v433_v22, %v432_v28  ;;  %v437_v24 = vor.u32 %v436_v42, %v435_v5  ;;  %v440_v12 = vor.u32 %v439_v15, %v438_v13 }
 0x16f   :  { %v370_v49 = vadd.s32 536870912, %v369_v43  ;;  %v443_v0 = vor.u32 %v442_v51, %v441_v41  ;;  %vm446_vm9 = vcmp.lt.s32.totalorder %v425_v54, 3  ;;  %vm447_vm15 = vcmp.lt.s32.totalorder %v425_v54, 4 }
 0x170   :  { %v449_v45 = vsel %vm447_vm15, %v437_v24, 2102212464  ;;  %v452_v48 = vsel %vm444_vm0, %v431_v53, %v434_v6  ;;  %v453_v7 = vsel %vm447_vm15, %v440_v12, 920167782  ;;  %v456_v39 = vsel %vm444_vm0, %v434_v6, %v437_v24 }
 0x171   :  { %v6814_v27 = vshrl.u32 %v370_v49, 30  ;;  %vm445_vm3 = vcmp.lt.s32.totalorder %v425_v54, 2  ;;  %v454_v52 = vsel %vm446_vm9, %v437_v24, %v453_v7  ;;  %v457_v19 = vsel %vm447_vm15, %v443_v0, 1326507024 }
 0x172   :  { %v2278_v15 = vsel %vm2277_vm8, %v6732_v46, 0  ;;  %v455_v51 = vsel %vm445_vm3, %v452_v48, %v454_v52  ;;  %v458_v5 = vsel %vm446_vm9, %v440_v12, %v457_v19  ;;  %v10272_v28 = vand.u32 2147483647, %v6188_v55 }
 0x173   :  { %v372_v42 = vshll.u32 %v6814_v27, 30  ;;  %v448_v8 = vsel %vm444_vm0, %v428_v14, %v431_v53  ;;  %v450_v49 = vsel %vm446_vm9, %v434_v6, %v449_v45  ;;  %v459_v13 = vsel %vm445_vm3, %v456_v39, %v458_v5 }
 0x174   :  { %v6828_v7 = vmul.u32.u64.low %v6261_v25, %v459_v13  ;;  %v6829_v24 = vmul.u32.u64.high %v6261_v25, %v459_v13, %v6828_v7  ;;  %v6832_v46 = vmul.u32.u64.low %v6261_v25, %v455_v51  ;;  %v6833_v41 = vmul.u32.u64.high %v6261_v25, %v455_v51, %v6832_v46 }
 0x175   :  { %v2190_v12 = vshrl.u32 %v10335_v3, %v6758_v58  ;;  %v6840_v10 = vshrl.u32 %v10332_v35, %v6758_v58  ;;  %v6845_v39 = vsel %vm2380_vm10, %v6734_v21, 0  ;;  %v6847_v53 = vsub.s32 %v369_v43, %v372_v42 }
 0x176   :  { %v6850_v6 = vor.u32 %v2087_v56, %v6750_v32  ;;  %v451_v14 = vsel %vm445_vm3, %v448_v8, %v450_v49  ;;  %v533_v22 = vshrl.u32 %v10415_v44, %v6235_v50  ;;  %v536_v0 = vshrl.u32 %v10416_v33, %v6235_v50 }
 0x177   :  { %v2091_v45 = vor.u32 %v6785_v26, %v6755_v57  ;;  %v6859_v48 = vshrl.u32 %v2278_v15, 5  ;;  %vm311_vm8 = vcmp.lt.s32.totalorder %v6209_v20, 0  ;;  %v375_v43 = vsub.s32 0, %v6847_v53 }
 0x178   :  { %v522_v21 = vand.u32 8388607, %v10272_v28  ;;  %vm469_vm3 = vc.u32 %v6829_v24, %v6832_v46  ;;  %v470_v32 = vadd.s32 1, %v6833_v41  ;;  %v532_v56 = vshll.u32 %v10412_v18, %v6226_v40 }
 0x179   :  { %v535_v54 = vshll.u32 %v10415_v44, %v6226_v40  ;;  %v6872_v52 = vand.u32 31, %v2278_v15  ;;  %v5230_v19 = vmin.u32 %v375_v43, %v6847_v53  ;;  %v467_v51 = vmul.u32 %v6261_v25, %v451_v14 }
 0x17a   :  { %v538_v5 = vshll.u32 %v10416_v33, %v6226_v40  ;;  %v471_v42 = vsel %vm469_vm3, %v470_v32, %v6833_v41  ;;  %v534_v8 = vor.u32 %v533_v22, %v532_v56  ;;  %v539_v13 = vshrl.u32 %v10330_v29, %v6235_v50 }
 0x17b   :  { %10417 = vst [vmem:[#allocation113_spill] sm:$0xff] %v6872_v52  ;;  %v537_v49 = vor.u32 %v536_v0, %v535_v54  ;;  %v6882_v7 = vor.u32 %v2190_v12, %v6775_v17  ;;  %v10418_v15 = vand.u32 2147483647, %v6209_v20  ;;  %v377_v25 = vclz %v5230_v19 }
 0x17c   :  { %v472_v14 = vadd.s32 %v471_v42, %v467_v51  ;;  %v531_v40 = vshrl.u32 %v10412_v18, %v6235_v50  ;;  %v395_v41 = vsub.s32 4, %v6814_v27  ;;  %v523_v22 = vor.u32 8388608, %v522_v21 }
 0x17d   :  { %vm6886_vm10 = vcmp.le.f32.partialorder %v10418_v15, 0.7853982  ;;  %v540_v0 = vor.u32 %v539_v13, %v538_v5  ;;  %vm549_vm0 = vcmp.lt.s32.totalorder %v6243_v1, 3  ;;  %vm10274_vm9 = vcmp.lt.s32.totalorder %v6723_v30, 4 }
 0x17e   :  { %v5231_v17 = vadd.s32 4294967294, %v377_v25  ;;  %v473_v12 = vadd.s32 536870912, %v472_v14  ;;  %vm547_vm15 = vcmp.lt.s32.totalorder %v6243_v1, 1  ;;  %v561_v43 = vsel %vm549_vm0, %v6276_v36, %v6317_v34 }
 0x17f   :  { %v365_v50 = vadd.s32 %v6768_v9, %v6779_v4  ;;  %v555_v21 = vsel %vm547_vm15, %v534_v8, %v537_v49  ;;  %v557_v32 = vsel %vm549_vm0, %v540_v0, %v6298_v59  ;;  %v559_v56 = vsel %vm547_vm15, %v537_v49, %v540_v0 }
 0x180   :  { %vm5232_vm3 = vcmp.lt.s32.totalorder %v5231_v17, 0  ;;  %v474_v54 = vshrl.u32 %v473_v12, 30  ;;  %vm548_vm13 = vcmp.lt.s32.totalorder %v6243_v1, 2  ;;  %v552_v36 = vsel %vm550_vm4, %v540_v0, 2102212464 }
 0x181   :  { %v380_v34 = vsel %vm5232_vm3, 0, %v5231_v17  ;;  %v396_v9 = vsel %vm311_vm8, %v395_v41, %v6814_v27  ;;  %v562_v4 = vsel %vm548_vm13, %v559_v56, %v561_v43  ;;  %v563_v19 = vshll.u32 %v523_v22, 8 }
 0x182   :  { %v381_v59 = vsub.s32 32, %v380_v34  ;;  %v385_v51 = vsub.s32 4294967266, %v380_v34  ;;  %v475_v5 = vshll.u32 %v474_v54, 30  ;;  %v558_v42 = vsel %vm548_vm13, %v555_v21, %v557_v32 }
 0x183   :  { %v551_v13 = vsel %vm547_vm15, %v531_v40, %v534_v8  ;;  %v553_v15 = vsel %vm549_vm0, %v537_v49, %v552_v36  ;;  %v6923_v25 = vmul.u32.u64.low %v563_v19, %v562_v4  ;;  %v6924_v0 = vmul.u32.u64.high %v563_v19, %v562_v4, %v6923_v25 }
 0x184   :  { %v382_v27 = vshll.u32 %v6847_v53, %v380_v34  ;;  %v383_v41 = vshrl.u32 %v365_v50, %v381_v59  ;;  %v386_v17 = vadd.s32 127, %v385_v51  ;;  %v6927_v22 = vsub.s32 %v472_v14, %v475_v5 }
 0x185   :  { %v398_v12 = vsel %vm6886_vm10, 0, %v396_v9  ;;  %vm414_vm4 = vcmp.lt.s32.totalorder %v6215_v23, 0  ;;  %v6932_v43 = vmul.u32.u64.low %v563_v19, %v558_v42  ;;  %v6933_v21 = vmul.u32.u64.high %v563_v19, %v558_v42, %v6932_v43 }
 0x186   :  { %v618_v8 = vand.u32 2147483647, %v6194_v60  ;;  %v384_v49 = vor.u32 %v383_v41, %v382_v27  ;;  %v387_v40 = vshll.u32 %v386_v17, 23  ;;  %v478_v32 = vsub.s32 0, %v6927_v22 }
 0x187   :  { %v554_v53 = vsel %vm548_vm13, %v551_v13, %v553_v15  ;;  %v6943_v14 = vsel %vm10274_vm9, %v6850_v6, 920167782  ;;  %v2194_v50 = vor.u32 %v6840_v10, %v6789_v2  ;;  %v6948_v56 = vshrl.u32 %v6845_v39, 5 }
 0x188   :  { %v6951_v36 = vand.u32 31, %v6845_v39  ;;  %v388_v34 = vor.u32 4788187, %v387_v40  ;;  %v6953_v9 = vand.u32 3, %v398_v12  ;;  %v5234_v1 = vmin.u32 %v478_v32, %v6927_v22 }
 0x189   :  { %vm572_vm13 = vc.u32 %v6924_v0, %v6932_v43  ;;  %v498_v4 = vsub.s32 4, %v474_v54  ;;  %v570_v59 = vmul.u32 %v563_v19, %v554_v53  ;;  %v573_v51 = vadd.s32 1, %v6933_v21 }
 0x18a   :  { %10421 = vst [vmem:[#allocation114_spill] sm:$0xff] %v6951_v36  ;;  %v625_v5 = vand.u32 8388607, %v618_v8  ;;  %v389_v42 = vand.u32 2147483647, %v388_v34  ;;  %v391_v13 = vcvt.s32.f32 %v384_v49  ;;  %v480_v15 = vclz %v5234_v1 }
 0x18b   :  { %v636_v39 = vshrl.u32 %v10415_v44, %v6268_v31  ;;  %v574_v25 = vsel %vm572_vm13, %v573_v51, %v6933_v21  ;;  %v635_v27 = vshll.u32 %v10412_v18, %v6241_v63  ;;  %v638_v41 = vshll.u32 %v10415_v44, %v6241_v63 }
 0x18c   :  { %v639_v19 = vshrl.u32 %v10416_v33, %v6268_v31  ;;  %v392_v17 = vmul.f32 %v391_v13, %v389_v42  ;;  %v468_v12 = vadd.s32 %v6832_v46, %v6829_v24  ;;  %v5235_v49 = vadd.s32 4294967294, %v480_v15 }
 0x18d   :  { %v575_v40 = vadd.s32 %v574_v25, %v570_v59  ;;  %v10422_v32 = vand.u32 2147483647, %v6215_v23  ;;  %v637_v21 = vor.u32 %v636_v39, %v635_v27  ;;  %v641_v1 = vshll.u32 %v10416_v33, %v6241_v63 }
 0x18e   :  { %v640_v34 = vor.u32 %v639_v19, %v638_v41  ;;  %v642_v51 = vshrl.u32 %v10330_v29, %v6268_v31  ;;  %v393_v42 = vxor.u32 2147483648, %v392_v17  ;;  %vm5236_vm15 = vcmp.lt.s32.totalorder %v5235_v49, 0 }
 0x18f   :  { %vm6974_vm0 = vcmp.le.f32.partialorder %v10422_v32, 0.7853982  ;;  %v499_v24 = vsel %vm414_vm4, %v498_v4, %v474_v54  ;;  %v576_v46 = vadd.s32 536870912, %v575_v40  ;;  %v483_v59 = vsel %vm5236_vm15, 0, %v5235_v49 }
 0x190   :  { %v626_v13 = vor.u32 8388608, %v625_v5  ;;  %v643_v15 = vor.u32 %v642_v51, %v641_v1  ;;  %vm650_vm3 = vcmp.lt.s32.totalorder %v6278_v37, 1  ;;  %v394_v39 = vsel %vm311_vm8, %v393_v42, %v392_v17 }
 0x191   :  { %v484_v25 = vsub.s32 32, %v483_v59  ;;  %v488_v27 = vsub.s32 4294967266, %v483_v59  ;;  %vm652_vm13 = vcmp.lt.s32.totalorder %v6278_v37, 3  ;;  %v397_v63 = vsel %vm6886_vm10, %v6209_v20, %v394_v39 }
 0x192   :  { %v485_v41 = vshll.u32 %v6927_v22, %v483_v59  ;;  %v6992_v54 = vshrl.u32 %v576_v46, 30  ;;  %v658_v4 = vsel %vm650_vm3, %v637_v21, %v640_v34  ;;  %5858 = vcosq.f32 %v397_v63 }
 0x193   :  { %v486_v5 = vshrl.u32 %v468_v12, %v484_v25  ;;  %v489_v19 = vadd.s32 127, %v488_v27  ;;  %v660_v17 = vsel %vm652_vm13, %v643_v15, %v6336_v47  ;;  %5860 = vsinq.f32 %v397_v63 }
 0x194   :  { %v578_v49 = vshll.u32 %v6992_v54, 30  ;;  %v634_v28 = vshrl.u32 %v10412_v18, %v6268_v31  ;;  %vm651_vm8 = vcmp.lt.s32.totalorder %v6278_v37, 2  ;;  %v655_v1 = vsel %vm653_vm6, %v643_v15, 2102212464 }
 0x195   :  { %v487_v22 = vor.u32 %v486_v5, %v485_v41  ;;  %v490_v32 = vshll.u32 %v489_v19, 23  ;;  %v662_v12 = vsel %vm650_vm3, %v640_v34, %v643_v15  ;;  %v661_v47 = vsel %vm651_vm8, %v658_v4, %v660_v17 }
 0x196   :  { %v7007_v51 = vsub.s32 %v575_v40, %v578_v49  ;;  %v664_v31 = vsel %vm652_vm13, %v6307_v16, %v6345_v61  ;;  %v666_v42 = vshll.u32 %v626_v13, 8  ;;  %v501_v59 = vsel %vm6974_vm0, 0, %v499_v24 }
 0x197   :  { %v491_v46 = vor.u32 4788187, %v490_v32  ;;  %v654_v39 = vsel %vm650_vm3, %v634_v28, %v637_v21  ;;  %v665_v40 = vsel %vm651_vm8, %v662_v12, %v664_v31  ;;  %v656_v25 = vsel %vm652_vm13, %v640_v34, %v655_v1 }
 0x198   :  { %v581_v15 = vsub.s32 0, %v7007_v51  ;;  %v7024_v27 = vmul.u32.u64.low %v666_v42, %v665_v40  ;;  %v7025_v63 = vmul.u32.u64.high %v666_v42, %v665_v40, %v7024_v27  ;;  %v494_v61 = vcvt.s32.f32 %v487_v22 }
 0x199   :  { %v492_v16 = vand.u32 2147483647, %v491_v46  ;;  %v7027_v13 = vmul.u32.u64.low %v666_v42, %v661_v47  ;;  %v7028_v41 = vmul.u32.u64.high %v666_v42, %v661_v47, %v7027_v13  ;;  %v7036_v21 = vsel %vm10274_vm9, %v2091_v45, 1326507024 }
 0x19a   :  { %v7039_v24 = vsub.s32 32, %v6872_v52  ;;  %vm401_vm6 = vweird.f32 %v6209_v20  ;;  %vm2781_vm10 = vcmask 130048   ;;  %v5238_v34 = vmin.u32 %v581_v15, %v7007_v51 }
 0x19b   :  { %vm403_vm15 = vcmp.lt.s32.totalorder %v6953_v9, 2  ;;  %vm404_vm3 = vcmp.eq.s32.totalorder %v6953_v9, 0  ;;  %v495_v4 = vmul.f32 %v494_v61, %v492_v16  ;;  %v657_v57 = vsel %vm651_vm8, %v654_v39, %v656_v25 }
 0x19c   :  { %vm407_vm13 = vcmp.eq.s32.totalorder %v6953_v9, 2  ;;  %v7048_v26 = vand.u32 3, %v501_v59  ;;  %v583_v45 = vclz %v5238_v34  ;;  %vm675_vm9 = vc.u32 %v7025_v63, %v7027_v13  ;;  %v5859_v5 = vpop.eup %5858 }
 0x19d   :  { %v496_v19 = vxor.u32 2147483648, %v495_v4  ;;  %v571_v17 = vadd.s32 %v6932_v43, %v6924_v0  ;;  %v601_v49 = vsub.s32 4, %v6992_v54  ;;  %v676_v28 = vadd.s32 1, %v7028_v41  ;;  %v5861_v22 = vpop.eup %5860 }
 0x19e   :  { %v408_v37 = vxor.u32 2147483648, %v5859_v5  ;;  %v5239_v32 = vadd.s32 4294967294, %v583_v45  ;;  %v673_v1 = vmul.u32 %v666_v42, %v657_v57  ;;  %v721_v12 = vand.u32 2147483647, %v6197_v62 }
 0x19f   :  { %v405_v47 = vxor.u32 2147483648, %v5861_v22  ;;  %v497_v31 = vsel %vm414_vm4, %v496_v19, %v495_v4  ;;  %vm517_vm8 = vcmp.lt.s32.totalorder %v6188_v55, 0  ;;  %v677_v46 = vsel %vm675_vm9, %v676_v28, %v7028_v41 }
 0x1a0   :  { %v738_v0 = vshll.u32 %v10412_v18, %v6251_v11  ;;  %v409_v43 = vsel %vm407_vm13, %v408_v37, %v5861_v22  ;;  %v500_v42 = vsel %vm6974_vm0, %v6215_v23, %v497_v31  ;;  %vm5240_vm5 = vcmp.lt.s32.totalorder %v5239_v32, 0 }
 0x1a1   :  { %v678_v59 = vadd.s32 %v677_v46, %v673_v1  ;;  %v406_v39 = vsel %vm404_vm3, %v5859_v5, %v405_v47  ;;  %5862 = vcosq.f32 %v500_v42  ;;  %v586_v40 = vsel %vm5240_vm5, 0, %v5239_v32  ;;  %v10428_v46 = vld [vmem:[#allocation20_spill] sm:$0xff] }
 0x1a2   :  { %v739_v15 = vshrl.u32 %v10415_v44, %v6281_v38  ;;  %v410_v25 = vsel %vm403_vm15, %v406_v39, %v409_v43  ;;  %5864 = vsinq.f32 %v500_v42  ;;  %v587_v27 = vsub.s32 32, %v586_v40 }
 0x1a3   :  { %v588_v16 = vshll.u32 %v7007_v51, %v586_v40  ;;  %v411_v53 = vsel %vm401_vm6, nan, %v410_v25  ;;  %v591_v61 = vsub.s32 4294967266, %v586_v40  ;;  %v679_v41 = vadd.s32 536870912, %v678_v59 }
 0x1a4   :  { %v741_v34 = vshll.u32 %v10415_v44, %v6251_v11  ;;  %5523 = vmatprep.mubr.msk.f32.mxu1 %vm2781_vm10, %v411_v53  ;;  %v589_v4 = vshrl.u32 %v571_v17, %v587_v27  ;;  %v742_v57 = vshrl.u32 %v10416_v33, %v6281_v38  ;;  %v744_v9 = vshll.u32 %v10416_v33, %v6251_v11  ;;  %v10430_v53 = vld [vmem:[#allocation23_spill] sm:$0xff] }
 0x1a5   :  { %v745_v51 = vshrl.u32 %v10330_v29, %v6281_v38  ;;  %v10425_v20 = vand.u32 2147483647, %v6188_v55  ;;  %v592_v5 = vadd.s32 127, %v591_v61  ;;  %v7092_v19 = vshrl.u32 %v679_v41, 30 }
 0x1a6   :  { %v728_v17 = vand.u32 8388607, %v721_v12  ;;  %v590_v28 = vor.u32 %v589_v4, %v588_v16  ;;  %v740_v22 = vor.u32 %v739_v15, %v738_v0  ;;  %v743_v37 = vor.u32 %v742_v57, %v741_v34  ;;  %v10431_v4 = vld [vmem:[#allocation30_spill] sm:$0xff] }
 0x1a7   :  { %vm7088_vm5 = vcmp.le.f32.partialorder %v10425_v20, 0.7853982  ;;  %v746_v32 = vor.u32 %v745_v51, %v744_v9  ;;  %vm506_vm9 = vcmp.lt.s32.totalorder %v7048_v26, 2  ;;  %vm507_vm4 = vcmp.eq.s32.totalorder %v7048_v26, 0 }
 0x1a8   :  { %v593_v11 = vshll.u32 %v592_v5, 23  ;;  %v681_v1 = vshll.u32 %v7092_v19, 30  ;;  %vm504_vm0 = vweird.f32 %v6215_v23  ;;  %vm510_vm6 = vcmp.eq.s32.totalorder %v7048_v26, 2 }
 0x1a9   :  { %v602_v47 = vsel %vm517_vm8, %v601_v49, %v6992_v54  ;;  %v737_v31 = vshrl.u32 %v10412_v18, %v6281_v38  ;;  %v758_v0 = vsel %vm756_vm7, %v746_v32, 2102212464  ;;  %v729_v39 = vor.u32 8388608, %v728_v17  ;;  %v10429_v38 = vld [vmem:[#allocation31_spill] sm:$0xff] }
 0x1aa   :  { %v594_v43 = vor.u32 4788187, %v593_v11  ;;  %v7108_v42 = vsub.s32 %v678_v59, %v681_v1  ;;  %vm753_vm15 = vcmp.lt.s32.totalorder %v10428_v46, 1  ;;  %v597_v40 = vcvt.s32.f32 %v590_v28 }
 0x1ab   :  { %vm755_vm3 = vcmp.lt.s32.totalorder %v10428_v46, 3  ;;  %v757_v15 = vsel %vm753_vm15, %v737_v31, %v740_v22  ;;  %v765_v25 = vsel %vm753_vm15, %v743_v37, %v746_v32  ;;  %v5863_v27 = vpop.eup %5862  ;;  %vm754_vm7 = vcmp.lt.s32.totalorder %v10428_v46, 2 }
 0x1ac   :  { %v595_v16 = vand.u32 2147483647, %v594_v43  ;;  %v684_v54 = vsub.s32 0, %v7108_v42  ;;  %v759_v49 = vsel %vm755_vm3, %v743_v37, %v758_v0  ;;  %v767_v61 = vsel %vm755_vm3, %v10430_v53, %v10429_v38  ;;  %v5865_v41 = vpop.eup %5864 }
 0x1ad   :  { %v511_v34 = vxor.u32 2147483648, %v5863_v27  ;;  %v761_v59 = vsel %vm753_vm15, %v740_v22, %v743_v37  ;;  %v763_v57 = vsel %vm755_vm3, %v746_v32, %v10431_v4  ;;  %v508_v9 = vxor.u32 2147483648, %v5865_v41 }
 0x1ae   :  { %v598_v51 = vmul.f32 %v597_v40, %v595_v16  ;;  %v5242_v20 = vmin.u32 %v684_v54, %v7108_v42  ;;  %v768_v5 = vsel %vm754_vm7, %v765_v25, %v767_v61  ;;  %v604_v28 = vsel %vm7088_vm5, 0, %v602_v47  ;;  %v10432_v40 = vld [vmem:[#allocation14_spill] sm:$0xff] }
 0x1af   :  { %v512_v17 = vsel %vm510_vm6, %v511_v34, %v5865_v41  ;;  %v760_v11 = vsel %vm754_vm7, %v757_v15, %v759_v49  ;;  %v769_v1 = vshll.u32 %v729_v39, 8  ;;  %v509_v31 = vsel %vm507_vm4, %v5863_v27, %v508_v9  ;;  %v10433_v49 = vld [vmem:[#allocation112_spill] sm:$0xff]  ;;  %v10434_v41 = vld [vmem:[#allocation21_spill] sm:$0xff] }
 0x1b0   :  { %v599_v46 = vxor.u32 2147483648, %v598_v51  ;;  %v686_v22 = vclz %v5242_v20  ;;  %v764_v37 = vsel %vm754_vm7, %v761_v59, %v763_v57  ;;  %v513_v32 = vsel %vm506_vm9, %v509_v31, %v512_v17  ;;  %v10435_v57 = vld [vmem:[#allocation24_spill] sm:$0xff] }
 0x1b1   :  { %v7126_v0 = vmul.u32.u64.low %v769_v1, %v768_v5  ;;  %v7127_v43 = vmul.u32.u64.high %v769_v1, %v768_v5, %v7126_v0  ;;  %v824_v25 = vand.u32 2147483647, %v10432_v40  ;;  %v514_v16 = vsel %vm504_vm0, nan, %v513_v32 }
 0x1b2   :  { %v600_v47 = vsel %vm517_vm8, %v599_v46, %v598_v51  ;;  %v7134_v39 = vand.u32 3, %v604_v28  ;;  %vm620_vm13 = vcmp.lt.s32.totalorder %v6194_v60, 0  ;;  %v5243_v15 = vadd.s32 4294967294, %v686_v22  ;;  %5524 = vmatmul.mubr.msk.f32.vlgmr.msra.gmra.mrb[0].mxu1 %vm2781_vm10, %v514_v16 }
 0x1b3   :  { %v603_v26 = vsel %vm7088_vm5, %v6188_v55, %v600_v47  ;;  %v674_v27 = vadd.s32 %v7027_v13, %v7025_v63  ;;  %v7143_v54 = vmul.u32.u64.low %v769_v1, %v764_v37  ;;  %v7144_v23 = vmul.u32.u64.high %v769_v1, %v764_v37, %v7143_v54  ;;  %5689 = vmatpush3.bf16.msra.mxu1 %v10433_v49 }
 0x1b4   :  { %5866 = vcosq.f32 %v603_v26  ;;  %vm5244_vm8 = vcmp.lt.s32.totalorder %v5243_v15, 0  ;;  %v704_v38 = vsub.s32 4, %v7092_v19  ;;  %v776_v53 = vmul.u32 %v769_v1, %v760_v11 }
 0x1b5   :  { %5868 = vsinq.f32 %v603_v26  ;;  %v689_v61 = vsel %vm5244_vm8, 0, %v5243_v15  ;;  %v831_v45 = vand.u32 8388607, %v824_v25  ;;  %v841_v34 = vshll.u32 %v10412_v18, %v10434_v41 }
 0x1b6   :  { %v690_v63 = vsub.s32 32, %v689_v61  ;;  %v691_v13 = vshll.u32 %v7108_v42, %v689_v61  ;;  %v694_v59 = vsub.s32 4294967266, %v689_v61  ;;  %vm778_vm5 = vc.u32 %v7127_v43, %v7143_v54 }
 0x1b7   :  { %v779_v4 = vadd.s32 1, %v7144_v23  ;;  %v842_v9 = vshrl.u32 %v10415_v44, %v10435_v57  ;;  %v844_v51 = vshll.u32 %v10415_v44, %v10434_v41  ;;  %v845_v20 = vshrl.u32 %v10416_v33, %v10435_v57 }
 0x1b8   :  { %v692_v5 = vshrl.u32 %v674_v27, %v690_v63  ;;  %v695_v17 = vadd.s32 127, %v694_v59  ;;  %v847_v42 = vshll.u32 %v10416_v33, %v10434_v41  ;;  %v848_v28 = vshrl.u32 %v10330_v29, %v10435_v57  ;;  %v10436_v27 = vld [vmem:[#allocation27_spill] sm:$0xff] }
 0x1b9   :  { %vm610_vm9 = vcmp.eq.s32.totalorder %v7134_v39, 0  ;;  %v780_v11 = vsel %vm778_vm5, %v779_v4, %v7144_v23  ;;  %v843_v1 = vor.u32 %v842_v9, %v841_v34  ;;  %v846_v31 = vor.u32 %v845_v20, %v844_v51  ;;  %v10437_v23 = vld [vmem:[#allocation107_spill] sm:$0xff] }
 0x1ba   :  { %vm609_vm4 = vcmp.lt.s32.totalorder %v7134_v39, 2  ;;  %v693_v46 = vor.u32 %v692_v5, %v691_v13  ;;  %v696_v22 = vshll.u32 %v695_v17, 23  ;;  %v781_v37 = vadd.s32 %v780_v11, %v776_v53  ;;  %v10438_v53 = vld [vmem:[#allocation38_spill] sm:$0xff] }
 0x1bb   :  { %v849_v32 = vor.u32 %v848_v28, %v847_v42  ;;  %vm607_vm0 = vweird.f32 %v6188_v55  ;;  %vm613_vm6 = vcmp.eq.s32.totalorder %v7134_v39, 2  ;;  %v705_v0 = vsel %vm620_vm13, %v704_v38, %v7092_v19  ;;  %v10439_v38 = vld [vmem:[#allocation39_spill] sm:$0xff] }
 0x1bc   :  { %v832_v16 = vor.u32 8388608, %v831_v45  ;;  %v840_v47 = vshrl.u32 %v10412_v18, %v10435_v57  ;;  %v697_v15 = vor.u32 4788187, %v696_v22  ;;  %v782_v26 = vadd.s32 536870912, %v781_v37  ;;  %v10440_v45 = vld [vmem:[#allocation32_spill] sm:$0xff] }
 0x1bd   :  { %vm856_vm15 = vcmp.lt.s32.totalorder %v10436_v27, 1  ;;  %vm858_vm3 = vcmp.lt.s32.totalorder %v10436_v27, 3  ;;  %vm2198_vm7 = vcmp.lt.s32.totalorder %v10437_v23, 4  ;;  %v700_v13 = vcvt.s32.f32 %v693_v46 }
 0x1be   :  { %v864_v49 = vsel %vm856_vm15, %v843_v1, %v846_v31  ;;  %v866_v61 = vsel %vm858_vm3, %v849_v32, %v10438_v53  ;;  %v868_v19 = vsel %vm856_vm15, %v846_v31, %v849_v32  ;;  %v870_v41 = vsel %vm858_vm3, %v10440_v45, %v10439_v38  ;;  %v5867_v34 = vpop.eup %5866  ;;  %v10443_v45 = vld [vmem:[#allocation15_spill] sm:$0xff] }
 0x1bf   :  { %v698_v63 = vand.u32 2147483647, %v697_v15  ;;  %v7191_v59 = vshrl.u32 %v782_v26, 30  ;;  %vm857_vm8 = vcmp.lt.s32.totalorder %v10436_v27, 2  ;;  %v5869_v4 = vpop.eup %5868  ;;  %v614_v57 = vxor.u32 2147483648, %v5867_v34 }
 0x1c0   :  { %v861_v9 = vsel %vm859_vm11, %v849_v32, 2102212464  ;;  %v871_v51 = vsel %vm857_vm8, %v868_v19, %v870_v41  ;;  %v872_v20 = vshll.u32 %v832_v16, 8  ;;  %v611_v5 = vxor.u32 2147483648, %v5869_v4 }
 0x1c1   :  { %v701_v17 = vmul.f32 %v700_v13, %v698_v63  ;;  %v784_v42 = vshll.u32 %v7191_v59, 30  ;;  %v867_v28 = vsel %vm857_vm8, %v864_v49, %v866_v61  ;;  %v615_v11 = vsel %vm613_vm6, %v614_v57, %v5869_v4 }
 0x1c2   :  { %v860_v46 = vsel %vm856_vm15, %v840_v47, %v843_v1  ;;  %v7205_v22 = vmul.u32.u64.low %v872_v20, %v871_v51  ;;  %v7206_v15 = vmul.u32.u64.high %v872_v20, %v871_v51, %v7205_v22  ;;  %v612_v32 = vsel %vm610_vm9, %v5867_v34, %v611_v5 }
 0x1c3   :  { %v702_v16 = vxor.u32 2147483648, %v701_v17  ;;  %v7210_v26 = vsub.s32 %v781_v37, %v784_v42  ;;  %v862_v53 = vsel %vm858_vm3, %v846_v31, %v861_v9  ;;  %v616_v49 = vsel %vm609_vm4, %v612_v32, %v615_v11 }
 0x1c4   :  { %vm7218_vm11 = vcmp.le.f32.partialorder %v618_v8, 0.7853982  ;;  %v7222_v1 = vmul.u32.u64.low %v872_v20, %v867_v28  ;;  %v7223_v47 = vmul.u32.u64.high %v872_v20, %v867_v28, %v7222_v1  ;;  %v617_v37 = vsel %vm607_vm0, nan, %v616_v49 }
 0x1c5   :  { %v703_v19 = vsel %vm620_vm13, %v702_v16, %v701_v17  ;;  %v707_v39 = vsel %vm7218_vm11, 0, %v705_v0  ;;  %v787_v31 = vsub.s32 0, %v7210_v26  ;;  %v7235_v8 = vshll.u32 %v10330_v29, %v6872_v52  ;;  %5526 = vmatprep.mubr.msk.f32.mxu1 %vm2781_vm10, %v617_v37  ;;  %v10445_v17 = vld [vmem:[#allocation28_spill] sm:$0xff] }
 0x1c6   :  { %v706_v38 = vsel %vm7218_vm11, %v6194_v60, %v703_v19  ;;  %v863_v55 = vsel %vm857_vm8, %v860_v46, %v862_v53  ;;  %v10277_v41 = vand.u32 2147483647, %v10443_v45  ;;  %v7247_v0 = vsel %vm2198_vm7, %v6882_v7, 920167782 }
 0x1c7   :  { %5870 = vcosq.f32 %v706_v38  ;;  %v5246_v34 = vmin.u32 %v787_v31, %v7210_v26  ;;  %vm881_vm13 = vc.u32 %v7206_v15, %v7222_v1  ;;  %v7257_v27 = vsel %vm2198_vm7, %v2194_v50, 1326507024  ;;  %v10444_v50 = vld [vmem:[#allocation22_spill] sm:$0xff] }
 0x1c8   :  { %5872 = vsinq.f32 %v706_v38  ;;  %v7259_v63 = vand.u32 3, %v707_v39  ;;  %v882_v13 = vadd.s32 1, %v7223_v47  ;;  %v7264_v4 = vshrl.u32 %v10335_v3, %v7039_v24 }
 0x1c9   :  { %v7268_v57 = vshll.u32 %v10335_v3, %v6872_v52  ;;  %v789_v9 = vclz %v5246_v34  ;;  %v879_v51 = vmul.u32 %v872_v20, %v863_v55  ;;  %v934_v10 = vand.u32 8388607, %v10277_v41  ;;  %v10446_v34 = vld [vmem:[#allocation29_spill] sm:$0xff] }
 0x1ca   :  { %v883_v2 = vsel %vm881_vm13, %v882_v13, %v7223_v47  ;;  %v944_v5 = vshll.u32 %v10412_v18, %v10444_v50  ;;  %v945_v42 = vshrl.u32 %v10415_v44, %v10445_v17  ;;  %vm723_vm5 = vcmp.lt.s32.totalorder %v6197_v62, 0 }
 0x1cb   :  { %v5247_v28 = vadd.s32 4294967294, %v789_v9  ;;  %v884_v11 = vadd.s32 %v883_v2, %v879_v51  ;;  %v947_v46 = vshll.u32 %v10415_v44, %v10444_v50  ;;  %v948_v20 = vshrl.u32 %v10416_v33, %v10445_v17 }
 0x1cc   :  { %vm713_vm9 = vcmp.eq.s32.totalorder %v7259_v63, 0  ;;  %vm716_vm4 = vcmp.eq.s32.totalorder %v7259_v63, 2  ;;  %v946_v22 = vor.u32 %v945_v42, %v944_v5  ;;  %v950_v32 = vshll.u32 %v10416_v33, %v10444_v50  ;;  %v10449_v50 = vld [vmem:[#allocation41_spill] sm:$0xff] }
 0x1cd   :  { %v951_v16 = vshrl.u32 %v10330_v29, %v10445_v17  ;;  %vm712_vm0 = vcmp.lt.s32.totalorder %v7259_v63, 2  ;;  %v777_v53 = vadd.s32 %v7143_v54, %v7127_v43  ;;  %vm5248_vm6 = vcmp.lt.s32.totalorder %v5247_v28, 0 }
 0x1ce   :  { %v885_v49 = vadd.s32 536870912, %v884_v11  ;;  %v949_v61 = vor.u32 %v948_v20, %v947_v46  ;;  %vm710_vm15 = vweird.f32 %v6194_v60  ;;  %v792_v47 = vsel %vm5248_vm6, 0, %v5247_v28  ;;  %v10450_v46 = vld [vmem:[#allocation45_spill] sm:$0xff]  ;;  %v10451_v20 = vld [vmem:[#allocation34_spill] sm:$0xff] }
 0x1cf   :  { %v807_v37 = vsub.s32 4, %v7191_v59  ;;  %v935_v19 = vor.u32 8388608, %v934_v10  ;;  %v952_v39 = vor.u32 %v951_v16, %v950_v32  ;;  %v793_v31 = vsub.s32 32, %v792_v47 }
 0x1d0   :  { %v797_v38 = vsub.s32 4294967266, %v792_v47  ;;  %v7293_v55 = vshrl.u32 %v885_v49, 30  ;;  %vm959_vm3 = vcmp.lt.s32.totalorder %v10446_v34, 1  ;;  %vm7298_vm8 = vcmp.le.f32.partialorder %v721_v12, 0.7853982 }
 0x1d1   :  { %v794_v54 = vshll.u32 %v7210_v26, %v792_v47  ;;  %vm960_vm11 = vcmp.lt.s32.totalorder %v10446_v34, 2  ;;  %vm961_vm13 = vcmp.lt.s32.totalorder %v10446_v34, 3  ;;  %v967_v13 = vsel %vm959_vm3, %v946_v22, %v949_v61  ;;  %v5871_v9 = vpop.eup %5870 }
 0x1d2   :  { %v795_v51 = vshrl.u32 %v777_v53, %v793_v31  ;;  %v798_v2 = vadd.s32 127, %v797_v38  ;;  %v887_v10 = vshll.u32 %v7293_v55, 30  ;;  %v969_v12 = vsel %vm961_vm13, %v952_v39, %v10449_v50  ;;  %v5873_v5 = vpop.eup %5872 }
 0x1d3   :  { %v717_v42 = vxor.u32 2147483648, %v5871_v9  ;;  %v964_v26 = vsel %vm962_vm12, %v952_v39, 2102212464  ;;  %v971_v28 = vsel %vm959_vm3, %v949_v61, %v952_v39  ;;  %v973_v32 = vsel %vm961_vm13, %v10451_v20, %v10450_v46 }
 0x1d4   :  { %v714_v16 = vxor.u32 2147483648, %v5873_v5  ;;  %v796_v53 = vor.u32 %v795_v51, %v794_v54  ;;  %v799_v49 = vshll.u32 %v798_v2, 23  ;;  %v7319_v47 = vsub.s32 %v884_v11, %v887_v10 }
 0x1d5   :  { %v718_v31 = vsel %vm716_vm4, %v717_v42, %v5873_v5  ;;  %v808_v38 = vsel %vm723_vm5, %v807_v37, %v7191_v59  ;;  %v943_v39 = vshrl.u32 %v10412_v18, %v10445_v17  ;;  %v970_v50 = vsel %vm960_vm11, %v967_v13, %v969_v12 }
 0x1d6   :  { %v715_v46 = vsel %vm713_vm9, %v5871_v9, %v714_v16  ;;  %v800_v54 = vor.u32 4788187, %v799_v49  ;;  %v890_v11 = vsub.s32 0, %v7319_v47  ;;  %v974_v51 = vsel %vm960_vm11, %v971_v28, %v973_v32  ;;  %v10454_v49 = vld [vmem:[#allocation13_spill] sm:$0xff] }
 0x1d7   :  { %v719_v2 = vsel %vm712_vm0, %v715_v46, %v718_v31  ;;  %v963_v59 = vsel %vm959_vm3, %v943_v39, %v946_v22  ;;  %v965_v17 = vsel %vm961_vm13, %v949_v61, %v964_v26  ;;  %v975_v37 = vshll.u32 %v935_v19, 8 }
 0x1d8   :  { %v720_v13 = vsel %vm710_vm15, nan, %v719_v2  ;;  %v801_v9 = vand.u32 2147483647, %v800_v54  ;;  %v803_v10 = vcvt.s32.f32 %v796_v53  ;;  %v5250_v12 = vmin.u32 %v890_v11, %v7319_v47  ;;  %v10453_v53 = vld [vmem:[#allocation109_spill] sm:$0xff] }
 0x1d9   :  { %5527 = vmatmul.mubr.msk.f32.gmra.mrb[2].mxu1 %vm2781_vm10, %v720_v13  ;;  %v7345_v5 = vmul.u32.u64.low %v975_v37, %v974_v51  ;;  %v7346_v42 = vmul.u32.u64.high %v975_v37, %v974_v51, %v7345_v5  ;;  %v7348_v63 = vmul.u32.u64.low %v975_v37, %v970_v50  ;;  %v7349_v28 = vmul.u32.u64.high %v975_v37, %v970_v50, %v7348_v63  ;;  %v10456_v50 = vld [vmem:[#allocation16_spill] sm:$0xff] }
 0x1da   :  { %v7354_v22 = vshrl.u32 %v10332_v35, %v7039_v24  ;;  %v804_v61 = vmul.f32 %v803_v10, %v801_v9  ;;  %v810_v60 = vsel %vm7298_vm8, 0, %v808_v38  ;;  %v892_v19 = vclz %v5250_v12 }
 0x1db   :  { %v7359_v26 = vsub.s32 32, %v6951_v36  ;;  %v7363_v20 = vshll.u32 %v10330_v29, %v6951_v36  ;;  %v7367_v32 = vshll.u32 %v10335_v3, %v6951_v36  ;;  %v966_v16 = vsel %vm960_vm11, %v963_v59, %v965_v17  ;;  %v10457_v59 = vld [vmem:[#allocation40_spill] sm:$0xff] }
 0x1dc   :  { %v7373_v31 = vadd.f32 %v10454_v49, %v10453_v53  ;;  %v805_v38 = vxor.u32 2147483648, %v804_v61  ;;  %v5251_v39 = vadd.s32 4294967294, %v892_v19  ;;  %v10276_v46 = vand.u32 2147483647, %v10456_v50 }
 0x1dd   :  { %10452 = vst [vmem:[#allocation20_spill] sm:$0xff] %v7359_v26  ;;  %v7376_v54 = vand.u32 3, %v810_v60  ;;  %v880_v11 = vadd.s32 %v7222_v1, %v7206_v15  ;;  %vm984_vm12 = vc.u32 %v7346_v42, %v7348_v63  ;;  %v985_v51 = vadd.s32 1, %v7349_v28  ;;  %v10458_v1 = vld [vmem:[#allocation33_spill] sm:$0xff] }
 0x1de   :  { %10455 = vst [vmem:[#allocation31_spill] sm:$0xff] %v7373_v31  ;;  %v806_v34 = vsel %vm723_vm5, %v805_v38, %v804_v61  ;;  %vm5252_vm9 = vcmp.lt.s32.totalorder %v5251_v39, 0  ;;  %v982_v2 = vmul.u32 %v975_v37, %v966_v16  ;;  %v1048_v17 = vshrl.u32 %v10415_v44, %v10457_v59 }
 0x1df   :  { %v809_v13 = vsel %vm7298_vm8, %v6197_v62, %v806_v34  ;;  %v895_v9 = vsel %vm5252_vm9, 0, %v5251_v39  ;;  %v986_v15 = vsel %vm984_vm12, %v985_v51, %v7349_v28  ;;  %v1047_v10 = vshll.u32 %v10412_v18, %v10458_v1 }
 0x1e0   :  { %5874 = vcosq.f32 %v809_v13  ;;  %v896_v12 = vsub.s32 32, %v895_v9  ;;  %v900_v5 = vsub.s32 4294967266, %v895_v9  ;;  %v1037_v61 = vand.u32 8388607, %v10276_v46 }
 0x1e1   :  { %5876 = vsinq.f32 %v809_v13  ;;  %v897_v37 = vshll.u32 %v7319_v47, %v895_v9  ;;  %v987_v60 = vadd.s32 %v986_v15, %v982_v2  ;;  %v1050_v43 = vshll.u32 %v10415_v44, %v10458_v1  ;;  %v10461_v15 = vld [vmem:[#allocation42_spill] sm:$0xff] }
 0x1e2   :  { %v898_v19 = vshrl.u32 %v880_v11, %v896_v12  ;;  %v901_v16 = vadd.s32 127, %v900_v5  ;;  %v1049_v53 = vor.u32 %v1048_v17, %v1047_v10  ;;  %v1051_v28 = vshrl.u32 %v10416_v33, %v10457_v59  ;;  %v10462_v5 = vld [vmem:[#allocation59_spill] sm:$0xff] }
 0x1e3   :  { %vm826_vm5 = vcmp.lt.s32.totalorder %v10432_v40, 0  ;;  %v988_v38 = vadd.s32 536870912, %v987_v60  ;;  %v1053_v39 = vshll.u32 %v10416_v33, %v10458_v1  ;;  %v1054_v51 = vshrl.u32 %v10330_v29, %v10457_v59 }
 0x1e4   :  { %vm819_vm4 = vcmp.eq.s32.totalorder %v7376_v54, 2  ;;  %v899_v47 = vor.u32 %v898_v19, %v897_v37  ;;  %v902_v34 = vshll.u32 %v901_v16, 23  ;;  %v1038_v2 = vor.u32 8388608, %v1037_v61  ;;  %v10463_v61 = vld [vmem:[#allocation51_spill] sm:$0xff] }
 0x1e5   :  { %v1052_v11 = vor.u32 %v1051_v28, %v1050_v43  ;;  %vm7408_vm0 = vcmp.le.f32.partialorder %v824_v25, 0.7853982  ;;  %v7412_v13 = vshrl.u32 %v988_v38, 30  ;;  %v1055_v9 = vor.u32 %v1054_v51, %v1053_v39  ;;  %v10464_v19 = vld [vmem:[#allocation55_spill] sm:$0xff] }
 0x1e6   :  { %vm1062_vm6 = vcmp.lt.s32.totalorder %v10461_v15, 1  ;;  %vm1064_vm15 = vcmp.lt.s32.totalorder %v10461_v15, 3  ;;  %v903_v1 = vor.u32 4788187, %v902_v34  ;;  %v910_v10 = vsub.s32 4, %v7293_v55 }
 0x1e7   :  { %v1070_v12 = vsel %vm1062_vm6, %v1049_v53, %v1052_v11  ;;  %v1076_v25 = vsel %vm1064_vm15, %v10463_v61, %v10462_v5  ;;  %vm813_vm3 = vweird.f32 %v6197_v62  ;;  %v906_v37 = vcvt.s32.f32 %v899_v47  ;;  %v10468_v62 = vld [vmem:[#allocation17_spill] sm:$0xff] }
 0x1e8   :  { %v990_v43 = vshll.u32 %v7412_v13, 30  ;;  %vm1063_vm8 = vcmp.lt.s32.totalorder %v10461_v15, 2  ;;  %v1072_v16 = vsel %vm1064_vm15, %v1055_v9, %v10464_v19  ;;  %v904_v28 = vand.u32 2147483647, %v903_v1 }
 0x1e9   :  { %v1067_v38 = vsel %vm1065_vm14, %v1055_v9, 2102212464  ;;  %v1074_v39 = vsel %vm1062_vm6, %v1052_v11, %v1055_v9  ;;  %v1078_v51 = vshll.u32 %v1038_v2, 8  ;;  %v1046_v47 = vshrl.u32 %v10412_v18, %v10457_v59 }
 0x1ea   :  { %v7433_v34 = vsub.s32 %v987_v60, %v990_v43  ;;  %v1073_v5 = vsel %vm1063_vm8, %v1070_v12, %v1072_v16  ;;  %v1077_v61 = vsel %vm1063_vm8, %v1074_v39, %v1076_v25  ;;  %v5875_v19 = vpop.eup %5874  ;;  %v907_v1 = vmul.f32 %v906_v37, %v904_v28 }
 0x1eb   :  { %v911_v46 = vsel %vm826_vm5, %v910_v10, %v7293_v55  ;;  %v7444_v41 = vmul.u32.u64.low %v1078_v51, %v1077_v61  ;;  %v7445_v9 = vmul.u32.u64.high %v1078_v51, %v1077_v61, %v7444_v41  ;;  %v5877_v60 = vpop.eup %5876  ;;  %v820_v2 = vxor.u32 2147483648, %v5875_v19 }
 0x1ec   :  { %v993_v43 = vsub.s32 0, %v7433_v34  ;;  %v1066_v59 = vsel %vm1062_vm6, %v1046_v47, %v1049_v53  ;;  %v1068_v12 = vsel %vm1064_vm15, %v1052_v11, %v1067_v38  ;;  %v817_v25 = vxor.u32 2147483648, %v5877_v60 }
 0x1ed   :  { %v908_v16 = vxor.u32 2147483648, %v907_v1  ;;  %v7452_v37 = vmul.u32.u64.low %v1078_v51, %v1073_v5  ;;  %v7453_v28 = vmul.u32.u64.high %v1078_v51, %v1073_v5, %v7452_v37  ;;  %vm815_vm14 = vcmp.lt.s32.totalorder %v7376_v54, 2 }
 0x1ee   :  { %vm816_vm11 = vcmp.eq.s32.totalorder %v7376_v54, 0  ;;  %v821_v41 = vsel %vm819_vm4, %v820_v2, %v5877_v60  ;;  %v5254_v55 = vmin.u32 %v993_v43, %v7433_v34  ;;  %v913_v11 = vsel %vm7408_vm0, 0, %v911_v46  ;;  %v10465_v54 = vld [vmem:[#allocation110_spill] sm:$0xff] }
 0x1ef   :  { %v818_v10 = vsel %vm816_vm11, %v5875_v19, %v817_v25  ;;  %v909_v53 = vsel %vm826_vm5, %v908_v16, %v907_v1  ;;  %v1069_v38 = vsel %vm1063_vm8, %v1066_v59, %v1068_v12  ;;  %vm1087_vm13 = vc.u32 %v7445_v9, %v7452_v37 }
 0x1f0   :  { %v822_v39 = vsel %vm815_vm14, %v818_v10, %v821_v41  ;;  %v912_v47 = vsel %vm7408_vm0, %v10432_v40, %v909_v53  ;;  %v995_v5 = vclz %v5254_v55  ;;  %v7474_v61 = vadd.f32 %v10454_v49, %v10465_v54  ;;  %v10469_v41 = vld [vmem:[#allocation43_spill] sm:$0xff]  ;;  %v10470_v53 = vld [vmem:[#allocation36_spill] sm:$0xff] }
 0x1f1   :  { %v823_v19 = vsel %vm813_vm3, nan, %v822_v39  ;;  %5878 = vcosq.f32 %v912_v47  ;;  %v1088_v46 = vadd.s32 1, %v7453_v28  ;;  %v917_v15 = vand.u32 3, %v913_v11 }
 0x1f2   :  { %10466 = vst [vmem:[#allocation23_spill] sm:$0xff] %v7474_v61  ;;  %5529 = vmatprep.mubr.msk.f32.mxu1 %vm2781_vm10, %v823_v19  ;;  %5880 = vsinq.f32 %v912_v47  ;;  %v5255_v17 = vadd.s32 4294967294, %v995_v5  ;;  %v1085_v1 = vmul.u32 %v1078_v51, %v1069_v38  ;;  %v7482_v60 = vor.u32 %v7264_v4, %v7235_v8 }
 0x1f3   :  { %v1089_v43 = vsel %vm1087_vm13, %v1088_v46, %v7453_v28  ;;  %v10278_v59 = vand.u32 2147483647, %v10468_v62  ;;  %vm929_vm12 = vcmp.lt.s32.totalorder %v10443_v45, 0  ;;  %v983_v12 = vadd.s32 %v7348_v63, %v7346_v42 }
 0x1f4   :  { %10467 = vst [vmem:[#allocation30_spill] sm:$0xff] %v7482_v60  ;;  %vm5256_vm9 = vcmp.lt.s32.totalorder %v5255_v17, 0  ;;  %v1090_v25 = vadd.s32 %v1089_v43, %v1085_v1  ;;  %v1013_v51 = vsub.s32 4, %v7412_v13  ;;  %v1151_v8 = vshrl.u32 %v10415_v44, %v10469_v41 }
 0x1f5   :  { %v998_v16 = vsel %vm5256_vm9, 0, %v5255_v17  ;;  %v1154_v4 = vshrl.u32 %v10416_v33, %v10469_v41  ;;  %vm919_vm5 = vcmp.eq.s32.totalorder %v917_v15, 0  ;;  %v1150_v11 = vshll.u32 %v10412_v18, %v10470_v53 }
 0x1f6   :  { %v999_v28 = vsub.s32 32, %v998_v16  ;;  %v1003_v55 = vsub.s32 4294967266, %v998_v16  ;;  %v1091_v10 = vadd.s32 536870912, %v1090_v25  ;;  %vm918_vm4 = vcmp.lt.s32.totalorder %v917_v15, 2 }
 0x1f7   :  { %v1140_v42 = vand.u32 8388607, %v10278_v59  ;;  %v1153_v63 = vshll.u32 %v10415_v44, %v10470_v53  ;;  %v1156_v38 = vshll.u32 %v10416_v33, %v10470_v53  ;;  %v1157_v39 = vshrl.u32 %v10330_v29, %v10469_v41 }
 0x1f8   :  { %vm916_vm0 = vweird.f32 %v10432_v40  ;;  %v1000_v47 = vshll.u32 %v7433_v34, %v998_v16  ;;  %v1001_v5 = vshrl.u32 %v983_v12, %v999_v28  ;;  %v1004_v54 = vadd.s32 127, %v1003_v55  ;;  %v10471_v12 = vld [vmem:[#allocation46_spill] sm:$0xff] }
 0x1f9   :  { %v7508_v19 = vshrl.u32 %v1091_v10, 30  ;;  %vm922_vm6 = vcmp.eq.s32.totalorder %v917_v15, 2  ;;  %v1152_v46 = vor.u32 %v1151_v8, %v1150_v11  ;;  %v1155_v17 = vor.u32 %v1154_v4, %v1153_v63  ;;  %v10472_v63 = vld [vmem:[#allocation61_spill] sm:$0xff] }
 0x1fa   :  { %v1158_v1 = vor.u32 %v1157_v39, %v1156_v38  ;;  %v1002_v43 = vor.u32 %v1001_v5, %v1000_v47  ;;  %v1005_v59 = vshll.u32 %v1004_v54, 23  ;;  %v1014_v53 = vsel %vm929_vm12, %v1013_v51, %v7412_v13  ;;  %v10473_v39 = vld [vmem:[#allocation62_spill] sm:$0xff]  ;;  %v10474_v47 = vld [vmem:[#allocation53_spill] sm:$0xff] }
 0x1fb   :  { %v1093_v2 = vshll.u32 %v7508_v19, 30  ;;  %v5879_v36 = vpop.eup %5878  ;;  %v1141_v52 = vor.u32 8388608, %v1140_v42  ;;  %v1149_v34 = vshrl.u32 %v10412_v18, %v10469_v41  ;;  %vm1165_vm15 = vcmp.lt.s32.totalorder %v10471_v12, 1 }
 0x1fc   :  { %vm1166_vm3 = vcmp.lt.s32.totalorder %v10471_v12, 2  ;;  %v5881_v16 = vpop.eup %5880  ;;  %v923_v8 = vxor.u32 2147483648, %v5879_v36  ;;  %v1006_v4 = vor.u32 4788187, %v1005_v59  ;;  %vm1167_vm8 = vcmp.lt.s32.totalorder %v10471_v12, 3 }
 0x1fd   :  { %v7518_v28 = vsub.s32 %v1090_v25, %v1093_v2  ;;  %v920_v55 = vxor.u32 2147483648, %v5881_v16  ;;  %v1169_v13 = vsel %vm1165_vm15, %v1149_v34, %v1152_v46  ;;  %v1170_v51 = vsel %vm1168_vm1, %v1158_v1, 2102212464 }
 0x1fe   :  { %v1177_v41 = vsel %vm1165_vm15, %v1155_v17, %v1158_v1  ;;  %v924_v10 = vsel %vm922_vm6, %v923_v8, %v5881_v16  ;;  %v1007_v11 = vand.u32 2147483647, %v1006_v4  ;;  %v1009_v42 = vcvt.s32.f32 %v1002_v43 }
 0x1ff   :  { %v1096_v59 = vsub.s32 0, %v7518_v28  ;;  %v921_v2 = vsel %vm919_vm5, %v5879_v36, %v920_v55  ;;  %v1173_v25 = vsel %vm1165_vm15, %v1152_v46, %v1155_v17  ;;  %v1175_v38 = vsel %vm1167_vm8, %v1158_v1, %v10472_v63 }
 0x200   :  { %v1179_v5 = vsel %vm1167_vm8, %v10474_v47, %v10473_v39  ;;  %v925_v54 = vsel %vm918_vm4, %v921_v2, %v924_v10  ;;  %v1010_v34 = vmul.f32 %v1009_v42, %v1007_v11  ;;  %v1171_v36 = vsel %vm1167_vm8, %v1155_v17, %v1170_v51 }
 0x201   :  { %v5258_v43 = vmin.u32 %v1096_v59, %v7518_v28  ;;  %v7545_v46 = vshrl.u32 %v10335_v3, %v7359_v26  ;;  %v926_v1 = vsel %vm916_vm0, nan, %v925_v54  ;;  %v10475_v16 = vand.u32 2147483647, %v10443_v45  ;;  %v10479_v54 = vld [vmem:[#allocation50_spill] sm:$0xff] }
 0x202   :  { %v1180_v15 = vsel %vm1166_vm3, %v1177_v41, %v1179_v5  ;;  %5530 = vmatmul.mubr.msk.f32.gmra.mrb[4].mxu1 %vm2781_vm10, %v926_v1  ;;  %v1011_v4 = vxor.u32 2147483648, %v1010_v34  ;;  %v1176_v55 = vsel %vm1166_vm3, %v1173_v25, %v1175_v38  ;;  %v1181_v51 = vshll.u32 %v1141_v52, 8 }
 0x203   :  { %vm7551_vm1 = vcmp.le.f32.partialorder %v10475_v16, 0.7853982  ;;  %v1098_v17 = vclz %v5258_v43  ;;  %v7562_v40 = vshrl.u32 %v10332_v35, %v7359_v26  ;;  %v1172_v41 = vsel %vm1166_vm3, %v1169_v13, %v1171_v36  ;;  %v10480_v16 = vld [vmem:[#allocation44_spill] sm:$0xff] }
 0x204   :  { %v1016_v11 = vsel %vm7551_vm1, 0, %v1014_v53  ;;  %v1012_v42 = vsel %vm929_vm12, %v1011_v4, %v1010_v34  ;;  %vm1032_vm14 = vcmp.lt.s32.totalorder %v10456_v50, 0  ;;  %v10478_v53 = vld [vmem:[#allocation18_spill] sm:$0xff]  ;;  %v1086_v39 = vadd.s32 %v7452_v37, %v7445_v9 }
 0x205   :  { %v5259_v59 = vadd.s32 4294967294, %v1098_v17  ;;  %v7572_v2 = vmul.u32.u64.low %v1181_v51, %v1180_v15  ;;  %v7573_v52 = vmul.u32.u64.high %v1181_v51, %v1180_v15, %v7572_v2  ;;  %v1015_v25 = vsel %vm7551_vm1, %v10443_v45, %v1012_v42 }
 0x206   :  { %v7578_v63 = vmul.u32.u64.low %v1181_v51, %v1176_v55  ;;  %v7579_v38 = vmul.u32.u64.high %v1181_v51, %v1176_v55, %v7578_v63  ;;  %v10283_v12 = vand.u32 2147483647, %v10478_v53  ;;  %5882 = vcosq.f32 %v1015_v25 }
 0x207   :  { %v7583_v13 = vand.u32 3, %v1016_v11  ;;  %vm5260_vm11 = vcmp.lt.s32.totalorder %v5259_v59, 0  ;;  %5884 = vsinq.f32 %v1015_v25  ;;  %v1116_v5 = vsub.s32 4, %v7508_v19 }
 0x208   :  { %v1101_v47 = vsel %vm5260_vm11, 0, %v5259_v59  ;;  %v1254_v34 = vshrl.u32 %v10415_v44, %v10479_v54  ;;  %v1188_v1 = vmul.u32 %v1181_v51, %v1172_v41  ;;  %v1253_v8 = vshll.u32 %v10412_v18, %v10480_v16 }
 0x209   :  { %v1102_v43 = vsub.s32 32, %v1101_v47  ;;  %v1106_v36 = vsub.s32 4294967266, %v1101_v47  ;;  %vm1190_vm13 = vc.u32 %v7573_v52, %v7578_v63  ;;  %v1191_v15 = vadd.s32 1, %v7579_v38 }
 0x20a   :  { %v1243_v9 = vand.u32 8388607, %v10283_v12  ;;  %v1256_v37 = vshll.u32 %v10415_v44, %v10480_v16  ;;  %vm1025_vm12 = vcmp.eq.s32.totalorder %v7583_v13, 2  ;;  %v1103_v4 = vshll.u32 %v7518_v28, %v1101_v47 }
 0x20b   :  { %v1104_v17 = vshrl.u32 %v1086_v39, %v1102_v43  ;;  %v1107_v55 = vadd.s32 127, %v1106_v36  ;;  %v1257_v51 = vshrl.u32 %v10416_v33, %v10479_v54  ;;  %vm1022_vm9 = vcmp.eq.s32.totalorder %v7583_v13, 0 }
 0x20c   :  { %v1192_v11 = vsel %vm1190_vm13, %v1191_v15, %v7579_v38  ;;  %v1255_v41 = vor.u32 %v1254_v34, %v1253_v8  ;;  %v1259_v42 = vshll.u32 %v10416_v33, %v10480_v16  ;;  %v1260_v59 = vshrl.u32 %v10330_v29, %v10479_v54  ;;  %v10481_v8 = vld [vmem:[#allocation54_spill] sm:$0xff] }
 0x20d   :  { %vm1021_vm5 = vcmp.lt.s32.totalorder %v7583_v13, 2  ;;  %v1105_v2 = vor.u32 %v1104_v17, %v1103_v4  ;;  %v1108_v28 = vshll.u32 %v1107_v55, 23  ;;  %v1193_v25 = vadd.s32 %v1192_v11, %v1188_v1  ;;  %v10482_v15 = vld [vmem:[#allocation66_spill] sm:$0xff] }
 0x20e   :  { %v1258_v39 = vor.u32 %v1257_v51, %v1256_v37  ;;  %vm1019_vm4 = vweird.f32 %v10443_v45  ;;  %v1117_v47 = vsel %vm1032_vm14, %v1116_v5, %v7508_v19  ;;  %v1244_v38 = vor.u32 8388608, %v1243_v9  ;;  %v10483_v5 = vld [vmem:[#allocation67_spill] sm:$0xff]  ;;  %v10484_v9 = vld [vmem:[#allocation60_spill] sm:$0xff] }
 0x20f   :  { %v1252_v34 = vshrl.u32 %v10412_v18, %v10479_v54  ;;  %v1261_v43 = vor.u32 %v1260_v59, %v1259_v42  ;;  %v1109_v36 = vor.u32 4788187, %v1108_v28  ;;  %v1194_v16 = vadd.s32 536870912, %v1193_v25  ;;  %v55_v11 = vld [vmem:[%s10111_s3 + $0x20] sm:$0xff] }
 0x210   :  { %vm1268_vm0 = vcmp.lt.s32.totalorder %v10481_v8, 1  ;;  %vm1270_vm6 = vcmp.lt.s32.totalorder %v10481_v8, 3  ;;  %v5883_v4 = vpop.eup %5882  ;;  %vm2301_vm15 = vcmp.lt.s32.totalorder %v6859_v48, 4  ;;  %v1112_v55 = vcvt.s32.f32 %v1105_v2  ;;  %5563 = vmatprep.subr.mxu1 %v55_v11 }
 0x211   :  { %v1276_v1 = vsel %vm1268_vm0, %v1255_v41, %v1258_v39  ;;  %v1278_v37 = vsel %vm1270_vm6, %v1261_v43, %v10482_v15  ;;  %v1280_v19 = vsel %vm1268_vm0, %v1258_v39, %v1261_v43  ;;  %v1282_v54 = vsel %vm1270_vm6, %v10484_v9, %v10483_v5  ;;  %v5885_v42 = vpop.eup %5884  ;;  %5564 = vmatpush3.msra.mxu1 %v55_v11 }
 0x212   :  { %v1110_v17 = vand.u32 2147483647, %v1109_v36  ;;  %v7630_v51 = vshrl.u32 %v1194_v16, 30  ;;  %vm1269_vm3 = vcmp.lt.s32.totalorder %v10481_v8, 2  ;;  %v1026_v59 = vxor.u32 2147483648, %v5883_v4 }
 0x213   :  { %v1273_v28 = vsel %vm1271_vm2, %v1261_v43, 2102212464  ;;  %v1283_v15 = vsel %vm1269_vm3, %v1280_v19, %v1282_v54  ;;  %v1284_v5 = vshll.u32 %v1244_v38, 8  ;;  %v1023_v36 = vxor.u32 2147483648, %v5885_v42 }
 0x214   :  { %v1113_v2 = vmul.f32 %v1112_v55, %v1110_v17  ;;  %v1196_v16 = vshll.u32 %v7630_v51, 30  ;;  %v1279_v9 = vsel %vm1269_vm3, %v1276_v1, %v1278_v37  ;;  %v1027_v12 = vsel %vm1025_vm12, %v1026_v59, %v5885_v42  ;;  %v252_v1 = vpop.permute.xlu1 %251  ;;  %v10488_v59 = vld [vmem:[#allocation19_spill] sm:$0xff] }
 0x215   :  { %v1272_v10 = vsel %vm1268_vm0, %v1252_v34, %v1255_v41  ;;  %v7647_v43 = vmul.u32.u64.low %v1284_v5, %v1283_v15  ;;  %v7648_v26 = vmul.u32.u64.high %v1284_v5, %v1283_v15, %v7647_v43  ;;  %v1024_v38 = vsel %vm1022_vm9, %v5883_v4, %v1023_v36  ;;  %v10489_v15 = vld [vmem:[#allocation10_spill] sm:$0xff]  ;;  %v10494_v41 = vld [vmem:[#allocation52_spill] sm:$0xff] }
 0x216   :  { %v1114_v19 = vxor.u32 2147483648, %v1113_v2  ;;  %v7652_v54 = vsub.s32 %v1193_v25, %v1196_v16  ;;  %v1274_v17 = vsel %vm1270_vm6, %v1258_v39, %v1273_v28  ;;  %v1028_v37 = vsel %vm1021_vm5, %v1024_v38, %v1027_v12 }
 0x217   :  { %v10485_v55 = vand.u32 2147483647, %v10456_v50  ;;  %v7664_v34 = vmul.u32.u64.low %v1284_v5, %v1279_v9  ;;  %v7665_v11 = vmul.u32.u64.high %v1284_v5, %v1279_v9, %v7664_v34  ;;  %v1029_v25 = vsel %vm1019_vm4, nan, %v1028_v37  ;;  %v10493_v37 = vld [vmem:[#allocation48_spill] sm:$0xff] }
 0x218   :  { %v1115_v39 = vsel %vm1032_vm14, %v1114_v19, %v1113_v2  ;;  %v1199_v12 = vsub.s32 0, %v7652_v54  ;;  %5532 = vmatprep.mubr.msk.f32.mxu1 %vm2781_vm10, %v1029_v25  ;;  %v1275_v45 = vsel %vm1269_vm3, %v1272_v10, %v1274_v17  ;;  %v10286_v28 = vand.u32 2147483647, %v10488_v59 }
 0x219   :  { %vm7660_vm2 = vcmp.le.f32.partialorder %v10485_v55, 0.7853982  ;;  %v7684_v36 = vmul.f32 %v10489_v15, %v252_v1  ;;  %vm1293_vm8 = vc.u32 %v7648_v26, %v7664_v34  ;;  %v7692_v2 = vsel %vm2301_vm15, %v7482_v60, 920167782 }
 0x21a   :  { %v1119_v13 = vsel %vm7660_vm2, 0, %v1117_v47  ;;  %v1118_v42 = vsel %vm7660_vm2, %v10456_v50, %v1115_v39  ;;  %v5262_v47 = vmin.u32 %v1199_v12, %v7652_v54  ;;  %10490 = vst [vmem:[#allocation14_spill] sm:$0xff] %v7692_v2  ;;  %v1294_v10 = vadd.s32 1, %v7665_v11 }
 0x21b   :  { %5886 = vcosq.f32 %v1118_v42  ;;  %v7694_v16 = vand.u32 3, %v1119_v13  ;;  %v10491_v8 = vor.u32 %v7354_v22, %v7268_v57  ;;  %v7706_v43 = vor.u32 %v7545_v46, %v7363_v20 }
 0x21c   :  { %5888 = vsinq.f32 %v1118_v42  ;;  %v1201_v38 = vclz %v5262_v47  ;;  %v1291_v19 = vmul.u32 %v1284_v5, %v1275_v45  ;;  %v1295_v17 = vsel %vm1293_vm8, %v1294_v10, %v7665_v11 }
 0x21d   :  { %v7702_v9 = vsel %vm2301_vm15, %v10491_v8, 1326507024  ;;  %v1346_v1 = vand.u32 8388607, %v10286_v28  ;;  %v1356_v55 = vshll.u32 %v10412_v18, %v10493_v37  ;;  %v1357_v57 = vshrl.u32 %v10415_v44, %v10494_v41  ;;  %v10502_v28 = vld [vmem:[#allocation63_spill] sm:$0xff] }
 0x21e   :  { %10492 = vst [vmem:[#allocation112_spill] sm:$0xff] %v7702_v9  ;;  %vm1135_vm1 = vcmp.lt.s32.totalorder %v10468_v62, 0  ;;  %v5263_v22 = vadd.s32 4294967294, %v1201_v38  ;;  %v1296_v25 = vadd.s32 %v1295_v17, %v1291_v19  ;;  %v1359_v20 = vshll.u32 %v10415_v44, %v10493_v37  ;;  %v10495_v17 = vld [vmem:[#allocation56_spill] sm:$0xff] }
 0x21f   :  { %v1360_v46 = vshrl.u32 %v10416_v33, %v10494_v41  ;;  %vm1125_vm14 = vcmp.eq.s32.totalorder %v7694_v16, 0  ;;  %vm1128_vm11 = vcmp.eq.s32.totalorder %v7694_v16, 2  ;;  %v1358_v5 = vor.u32 %v1357_v57, %v1356_v55 }
 0x220   :  { %v1362_v11 = vshll.u32 %v10416_v33, %v10493_v37  ;;  %v1363_v39 = vshrl.u32 %v10330_v29, %v10494_v41  ;;  %vm1124_vm13 = vcmp.lt.s32.totalorder %v7694_v16, 2  ;;  %v1189_v13 = vadd.s32 %v7578_v63, %v7573_v52 }
 0x221   :  { %vm5264_vm12 = vcmp.lt.s32.totalorder %v5263_v22, 0  ;;  %v1297_v12 = vadd.s32 536870912, %v1296_v25  ;;  %v1361_v42 = vor.u32 %v1360_v46, %v1359_v20  ;;  %vm1122_vm9 = vweird.f32 %v10456_v50  ;;  %v10499_v46 = vld [vmem:[#allocation68_spill] sm:$0xff] }
 0x222   :  { %v1204_v45 = vsel %vm5264_vm12, 0, %v5263_v22  ;;  %v1219_v15 = vsub.s32 4, %v7630_v51  ;;  %v1347_v47 = vor.u32 8388608, %v1346_v1  ;;  %v1364_v10 = vor.u32 %v1363_v39, %v1362_v11 }
 0x223   :  { %v1205_v8 = vsub.s32 32, %v1204_v45  ;;  %v1209_v38 = vsub.s32 4294967266, %v1204_v45  ;;  %v7731_v19 = vshrl.u32 %v1297_v12, 30  ;;  %vm1371_vm5 = vcmp.lt.s32.totalorder %v10495_v17, 1 }
 0x224   :  { %v10496_v37 = vand.u32 2147483647, %v10468_v62  ;;  %v1206_v63 = vshll.u32 %v7652_v54, %v1204_v45  ;;  %vm1372_vm0 = vcmp.lt.s32.totalorder %v10495_v17, 2  ;;  %vm1373_vm6 = vcmp.lt.s32.totalorder %v10495_v17, 3 }
 0x225   :  { %v1379_v1 = vsel %vm1371_vm5, %v1358_v5, %v1361_v42  ;;  %v5887_v55 = vpop.eup %5886  ;;  %v1207_v57 = vshrl.u32 %v1189_v13, %v1205_v8  ;;  %v1210_v22 = vadd.s32 127, %v1209_v38  ;;  %v1299_v20 = vshll.u32 %v7731_v19, 30 }
 0x226   :  { %vm7736_vm4 = vcmp.le.f32.partialorder %v10496_v37, 0.7853982  ;;  %v1381_v11 = vsel %vm1373_vm6, %v1364_v10, %v10499_v46  ;;  %v5889_v39 = vpop.eup %5888  ;;  %vm2404_vm3 = vcmp.lt.s32.totalorder %v6948_v56, 4  ;;  %v1129_v54 = vxor.u32 2147483648, %v5887_v55  ;;  %v10501_v37 = vld [vmem:[#allocation75_spill] sm:$0xff] }
 0x227   :  { %vm10500_vm2 = vcmp.lt.s32.totalorder %v10495_v17, 4  ;;  %v1383_v45 = vsel %vm1371_vm5, %v1361_v42, %v1364_v10  ;;  %v1385_v13 = vsel %vm1373_vm6, %v10502_v28, %v10501_v37  ;;  %v1126_v8 = vxor.u32 2147483648, %v5889_v39 }
 0x228   :  { %v1376_v12 = vsel %vm10500_vm2, %v1364_v10, 2102212464  ;;  %v1208_v38 = vor.u32 %v1207_v57, %v1206_v63  ;;  %v1211_v4 = vshll.u32 %v1210_v22, 23  ;;  %v7758_v2 = vsub.s32 %v1296_v25, %v1299_v20 }
 0x229   :  { %v1130_v46 = vsel %vm1128_vm11, %v1129_v54, %v5889_v39  ;;  %v1220_v60 = vsel %vm1135_vm1, %v1219_v15, %v7630_v51  ;;  %v1355_v10 = vshrl.u32 %v10412_v18, %v10494_v41  ;;  %v1382_v9 = vsel %vm1372_vm0, %v1379_v1, %v1381_v11 }
 0x22a   :  { %v1127_v28 = vsel %vm1125_vm14, %v5887_v55, %v1126_v8  ;;  %v1212_v63 = vor.u32 4788187, %v1211_v4  ;;  %v1302_v25 = vsub.s32 0, %v7758_v2  ;;  %v1386_v57 = vsel %vm1372_vm0, %v1383_v45, %v1385_v13 }
 0x22b   :  { %v1131_v22 = vsel %vm1124_vm13, %v1127_v28, %v1130_v46  ;;  %v1375_v51 = vsel %vm1371_vm5, %v1355_v10, %v1358_v5  ;;  %v1377_v41 = vsel %vm1373_vm6, %v1361_v42, %v1376_v12  ;;  %v1387_v15 = vshll.u32 %v1347_v47, 8  ;;  %v10507_v10 = vld [vmem:[#allocation25_spill] sm:$0xff] }
 0x22c   :  { %v1132_v1 = vsel %vm1122_vm9, nan, %v1131_v22  ;;  %v1213_v55 = vand.u32 2147483647, %v1212_v63  ;;  %v1215_v4 = vcvt.s32.f32 %v1208_v38  ;;  %v5266_v20 = vmin.u32 %v1302_v25, %v7758_v2 }
 0x22d   :  { %5533 = vmatmul.mubr.msk.f32.gmra.mrb[6].mxu1 %vm2781_vm10, %v1132_v1  ;;  %v7784_v11 = vmul.u32.u64.low %v1387_v15, %v1386_v57  ;;  %v7785_v39 = vmul.u32.u64.high %v1387_v15, %v1386_v57, %v7784_v11  ;;  %v7787_v16 = vmul.u32.u64.low %v1387_v15, %v1382_v9  ;;  %v7788_v54 = vmul.u32.u64.high %v1387_v15, %v1382_v9, %v7787_v16  ;;  %v10508_v57 = vld [vmem:[#allocation64_spill] sm:$0xff] }
 0x22e   :  { %v1216_v42 = vmul.f32 %v1215_v4, %v1213_v55  ;;  %v1222_v50 = vsel %vm7736_vm4, 0, %v1220_v60  ;;  %v1304_v47 = vclz %v5266_v20  ;;  %v10503_v12 = vand.u32 2139095040, %v7373_v31 }
 0x22f   :  { %v10504_v37 = vand.u32 2139095040, %v7474_v61  ;;  %v7805_v9 = vadd.f32 %v10454_v49, %v7684_v36  ;;  %v1378_v8 = vsel %vm1372_vm0, %v1375_v51, %v1377_v41  ;;  %v7812_v60 = vsel %vm2404_vm3, %v7706_v43, 920167782 }
 0x230   :  { %v7797_v45 = vshrl.u32 %v10503_v12, 23  ;;  %10506 = vst [vmem:[#allocation24_spill] sm:$0xff] %v7812_v60  ;;  %v1217_v38 = vxor.u32 2147483648, %v1216_v42  ;;  %v5267_v46 = vadd.s32 4294967294, %v1304_v47  ;;  %v10289_v28 = vand.u32 2147483647, %v10507_v10 }
 0x231   :  { %v7801_v13 = vshrl.u32 %v10504_v37, 23  ;;  %10505 = vst [vmem:[#allocation21_spill] sm:$0xff] %v7805_v9  ;;  %v7815_v63 = vand.u32 3, %v1222_v50  ;;  %v1292_v25 = vadd.s32 %v7664_v34, %v7648_v26  ;;  %vm1396_vm8 = vc.u32 %v7785_v39, %v7787_v16  ;;  %v10509_v34 = vld [vmem:[#allocation57_spill] sm:$0xff] }
 0x232   :  { %v1397_v49 = vadd.s32 1, %v7788_v54  ;;  %v1218_v36 = vsel %vm1135_vm1, %v1217_v38, %v1216_v42  ;;  %vm5268_vm14 = vcmp.lt.s32.totalorder %v5267_v46, 0  ;;  %v1394_v17 = vmul.u32 %v1387_v15, %v1378_v8 }
 0x233   :  { %v1460_v22 = vshrl.u32 %v10415_v44, %v10508_v57  ;;  %v1221_v51 = vsel %vm7736_vm4, %v10468_v62, %v1218_v36  ;;  %v1307_v41 = vsel %vm5268_vm14, 0, %v5267_v46  ;;  %v1459_v1 = vshll.u32 %v10412_v18, %v10509_v34 }
 0x234   :  { %v1398_v26 = vsel %vm1396_vm8, %v1397_v49, %v7788_v54  ;;  %5890 = vcosq.f32 %v1221_v51  ;;  %v1308_v55 = vsub.s32 32, %v1307_v41  ;;  %v1312_v4 = vsub.s32 4294967266, %v1307_v41 }
 0x235   :  { %v1449_v20 = vand.u32 8388607, %v10289_v28  ;;  %5892 = vsinq.f32 %v1221_v51  ;;  %v1309_v15 = vshll.u32 %v7758_v2, %v1307_v41  ;;  %v1399_v11 = vadd.s32 %v1398_v26, %v1394_v17  ;;  %v10513_v51 = vld [vmem:[#allocation69_spill] sm:$0xff] }
 0x236   :  { %v1462_v52 = vshll.u32 %v10415_v44, %v10509_v34  ;;  %v1310_v42 = vshrl.u32 %v1292_v25, %v1308_v55  ;;  %v1313_v50 = vadd.s32 127, %v1312_v4  ;;  %v1461_v47 = vor.u32 %v1460_v22, %v1459_v1  ;;  %v10514_v1 = vld [vmem:[#allocation84_spill] sm:$0xff] }
 0x237   :  { %v1463_v54 = vshrl.u32 %v10416_v33, %v10508_v57  ;;  %vm1238_vm1 = vcmp.lt.s32.totalorder %v10478_v53, 0  ;;  %v1400_v12 = vadd.s32 536870912, %v1399_v11  ;;  %v1465_v37 = vshll.u32 %v10416_v33, %v10509_v34  ;;  %v10515_v55 = vld [vmem:[#allocation76_spill] sm:$0xff] }
 0x238   :  { %v1466_v8 = vshrl.u32 %v10330_v29, %v10508_v57  ;;  %vm1231_vm11 = vcmp.eq.s32.totalorder %v7815_v63, 2  ;;  %v1311_v2 = vor.u32 %v1310_v42, %v1309_v15  ;;  %v1314_v38 = vshll.u32 %v1313_v50, 23 }
 0x239   :  { %v1450_v46 = vor.u32 8388608, %v1449_v20  ;;  %v1464_v25 = vor.u32 %v1463_v54, %v1462_v52  ;;  %v10510_v49 = vand.u32 2147483647, %v10478_v53  ;;  %v7851_v17 = vshrl.u32 %v1400_v12, 30  ;;  %v10516_v52 = vld [vmem:[#allocation83_spill] sm:$0xff] }
 0x23a   :  { %v1467_v22 = vor.u32 %v1466_v8, %v1465_v37  ;;  %vm1474_vm12 = vcmp.lt.s32.totalorder %v10513_v51, 1  ;;  %vm1476_vm9 = vcmp.lt.s32.totalorder %v10513_v51, 3  ;;  %v1315_v41 = vor.u32 4788187, %v1314_v38 }
 0x23b   :  { %vm7847_vm13 = vcmp.le.f32.partialorder %v10510_v49, 0.7853982  ;;  %v1322_v26 = vsub.s32 4, %v7731_v19  ;;  %v1482_v34 = vsel %vm1474_vm12, %v1461_v47, %v1464_v25  ;;  %v1488_v4 = vsel %vm1476_vm9, %v10515_v55, %v10514_v1 }
 0x23c   :  { %vm1225_vm5 = vweird.f32 %v10468_v62  ;;  %v1318_v20 = vcvt.s32.f32 %v1311_v2  ;;  %v1402_v15 = vshll.u32 %v7851_v17, 30  ;;  %vm1475_vm4 = vcmp.lt.s32.totalorder %v10513_v51, 2 }
 0x23d   :  { %v1484_v42 = vsel %vm1476_vm9, %v1467_v22, %v10516_v52  ;;  %v1316_v50 = vand.u32 2147483647, %v1315_v41  ;;  %vm10517_vm0 = vcmp.lt.s32.totalorder %v10513_v51, 4  ;;  %v1486_v12 = vsel %vm1474_vm12, %v1464_v25, %v1467_v22 }
 0x23e   :  { %v1479_v54 = vsel %vm10517_vm0, %v1467_v22, 2102212464  ;;  %v1490_v37 = vshll.u32 %v1450_v46, 8  ;;  %v7872_v8 = vsub.s32 %v1399_v11, %v1402_v15  ;;  %v1458_v2 = vshrl.u32 %v10412_v18, %v10508_v57  ;;  %v5891_v1 = vpop.eup %5890 }
 0x23f   :  { %v1485_v38 = vsel %vm1475_vm4, %v1482_v34, %v1484_v42  ;;  %v1489_v49 = vsel %vm1475_vm4, %v1486_v12, %v1488_v4  ;;  %v1319_v41 = vmul.f32 %v1318_v20, %v1316_v50  ;;  %v1323_v55 = vsel %vm1238_vm1, %v1322_v26, %v7731_v19  ;;  %v5893_v11 = vpop.eup %5892 }
 0x240   :  { %v7883_v52 = vmul.u32.u64.low %v1490_v37, %v1489_v49  ;;  %v7884_v22 = vmul.u32.u64.high %v1490_v37, %v1489_v49, %v7883_v52  ;;  %v1232_v46 = vxor.u32 2147483648, %v5891_v1  ;;  %v1405_v15 = vsub.s32 0, %v7872_v8 }
 0x241   :  { %v1478_v57 = vsel %vm1474_vm12, %v1458_v2, %v1461_v47  ;;  %v1480_v34 = vsel %vm1476_vm9, %v1464_v25, %v1479_v54  ;;  %v1229_v4 = vxor.u32 2147483648, %v5893_v11  ;;  %v1320_v42 = vxor.u32 2147483648, %v1319_v41 }
 0x242   :  { %v7891_v20 = vmul.u32.u64.low %v1490_v37, %v1485_v38  ;;  %v7892_v50 = vmul.u32.u64.high %v1490_v37, %v1485_v38, %v7891_v20  ;;  %vm1227_vm6 = vcmp.lt.s32.totalorder %v7815_v63, 2  ;;  %vm1228_vm2 = vcmp.eq.s32.totalorder %v7815_v63, 0 }
 0x243   :  { %v1233_v19 = vsel %vm1231_vm11, %v1232_v46, %v5893_v11  ;;  %v5270_v26 = vmin.u32 %v1405_v15, %v7872_v8  ;;  %v1230_v12 = vsel %vm1228_vm2, %v5891_v1, %v1229_v4  ;;  %v1321_v47 = vsel %vm1238_vm1, %v1320_v42, %v1319_v41  ;;  %v10518_v46 = vld [vmem:[#allocation26_spill] sm:$0xff] }
 0x244   :  { %v1325_v25 = vsel %vm7847_vm13, 0, %v1323_v55  ;;  %v1481_v54 = vsel %vm1475_vm4, %v1478_v57, %v1480_v34  ;;  %v1234_v2 = vsel %vm1227_vm6, %v1230_v12, %v1233_v19  ;;  %v1324_v38 = vsel %vm7847_vm13, %v10478_v53, %v1321_v47  ;;  %v10520_v12 = vld [vmem:[#allocation58_spill] sm:$0xff] }
 0x245   :  { %v1407_v49 = vclz %v5270_v26  ;;  %vm1499_vm8 = vc.u32 %v7884_v22, %v7891_v20  ;;  %v7912_v63 = vadd.s32 4294967169, %v7797_v45  ;;  %v1235_v1 = vsel %vm1225_vm5, nan, %v1234_v2 }
 0x246   :  { %5894 = vcosq.f32 %v1324_v38  ;;  %v1500_v41 = vadd.s32 1, %v7892_v50  ;;  %5535 = vmatprep.mubr.msk.f32.mxu1 %vm2781_vm10, %v1235_v1  ;;  %v1329_v51 = vand.u32 3, %v1325_v25  ;;  %v1497_v36 = vmul.u32 %v1490_v37, %v1481_v54  ;;  %v10519_v37 = vld [vmem:[#allocation65_spill] sm:$0xff] }
 0x247   :  { %5896 = vsinq.f32 %v1324_v38  ;;  %v5271_v55 = vadd.s32 4294967294, %v1407_v49  ;;  %v7919_v52 = vadd.s32 4294967169, %v7801_v13  ;;  %v10288_v15 = vand.u32 2147483647, %v10518_v46 }
 0x248   :  { %v1501_v45 = vsel %vm1499_vm8, %v1500_v41, %v7892_v50  ;;  %vm1341_vm14 = vcmp.lt.s32.totalorder %v10488_v59, 0  ;;  %v1395_v62 = vadd.s32 %v7787_v16, %v7785_v39  ;;  %v1425_v4 = vsub.s32 4, %v7851_v17 }
 0x249   :  { %vm5272_vm1 = vcmp.lt.s32.totalorder %v5271_v55, 0  ;;  %v1502_v57 = vadd.s32 %v1501_v45, %v1497_v36  ;;  %v1563_v13 = vshrl.u32 %v10415_v44, %v10519_v37  ;;  %v1566_v42 = vshrl.u32 %v10416_v33, %v10519_v37 }
 0x24a   :  { %v1410_v34 = vsel %vm5272_vm1, 0, %v5271_v55  ;;  %vm1331_vm11 = vcmp.eq.s32.totalorder %v1329_v51, 0  ;;  %v1562_v47 = vshll.u32 %v10412_v18, %v10520_v12  ;;  %vm1330_vm13 = vcmp.lt.s32.totalorder %v1329_v51, 2 }
 0x24b   :  { %v1411_v50 = vsub.s32 32, %v1410_v34  ;;  %v1415_v19 = vsub.s32 4294967266, %v1410_v34  ;;  %v1503_v26 = vadd.s32 536870912, %v1502_v57  ;;  %v1552_v39 = vand.u32 8388607, %v10288_v15 }
 0x24c   :  { %v1565_v16 = vshll.u32 %v10415_v44, %v10520_v12  ;;  %v1568_v25 = vshll.u32 %v10416_v33, %v10520_v12  ;;  %v1569_v54 = vshrl.u32 %v10330_v29, %v10519_v37  ;;  %vm1328_vm12 = vweird.f32 %v10478_v53 }
 0x24d   :  { %v1412_v2 = vshll.u32 %v7872_v8, %v1410_v34  ;;  %v1413_v38 = vshrl.u32 %v1395_v62, %v1411_v50  ;;  %v1416_v49 = vadd.s32 127, %v1415_v19  ;;  %v7944_v1 = vshrl.u32 %v1503_v26, 30  ;;  %v10521_v62 = vld [vmem:[#allocation70_spill] sm:$0xff] }
 0x24e   :  { %vm1334_vm9 = vcmp.eq.s32.totalorder %v1329_v51, 2  ;;  %v1564_v41 = vor.u32 %v1563_v13, %v1562_v47  ;;  %v1567_v55 = vor.u32 %v1566_v42, %v1565_v16  ;;  %v1570_v36 = vor.u32 %v1569_v54, %v1568_v25  ;;  %v10523_v16 = vld [vmem:[#allocation85_spill] sm:$0xff]  ;;  %v10524_v54 = vld [vmem:[#allocation86_spill] sm:$0xff] }
 0x24f   :  { %v1414_v45 = vor.u32 %v1413_v38, %v1412_v2  ;;  %v1417_v15 = vshll.u32 %v1416_v49, 23  ;;  %v1426_v12 = vsel %vm1341_vm14, %v1425_v4, %v7851_v17  ;;  %v1505_v5 = vshll.u32 %v7944_v1, 30  ;;  %v10525_v2 = vld [vmem:[#allocation77_spill] sm:$0xff] }
 0x250   :  { %v5895_v28 = vpop.eup %5894  ;;  %v1553_v11 = vor.u32 8388608, %v1552_v39  ;;  %v1561_v8 = vshrl.u32 %v10412_v18, %v10519_v37  ;;  %vm1577_vm5 = vcmp.lt.s32.totalorder %v10521_v62, 1  ;;  %vm1578_vm4 = vcmp.lt.s32.totalorder %v10521_v62, 2 }
 0x251   :  { %v5897_v34 = vpop.eup %5896  ;;  %v1335_v13 = vxor.u32 2147483648, %v5895_v28  ;;  %v1418_v42 = vor.u32 4788187, %v1417_v15  ;;  %v7954_v50 = vsub.s32 %v1502_v57, %v1505_v5  ;;  %vm1579_vm0 = vcmp.lt.s32.totalorder %v10521_v62, 3 }
 0x252   :  { %v1332_v19 = vxor.u32 2147483648, %v5897_v34  ;;  %v1581_v17 = vsel %vm1577_vm5, %v1561_v8, %v1564_v41  ;;  %vm10522_vm6 = vcmp.lt.s32.totalorder %v10521_v62, 4  ;;  %v1589_v37 = vsel %vm1577_vm5, %v1567_v55, %v1570_v36 }
 0x253   :  { %v1582_v4 = vsel %vm10522_vm6, %v1570_v36, 2102212464  ;;  %v1336_v26 = vsel %vm1334_vm9, %v1335_v13, %v5897_v34  ;;  %v1419_v47 = vand.u32 2147483647, %v1418_v42  ;;  %v1421_v39 = vcvt.s32.f32 %v1414_v45 }
 0x254   :  { %v1508_v15 = vsub.s32 0, %v7954_v50  ;;  %v1333_v5 = vsel %vm1331_vm11, %v5895_v28, %v1332_v19  ;;  %v1585_v57 = vsel %vm1577_vm5, %v1564_v41, %v1567_v55  ;;  %v1587_v25 = vsel %vm1579_vm0, %v1570_v36, %v10523_v16 }
 0x255   :  { %v1591_v38 = vsel %vm1579_vm0, %v10525_v2, %v10524_v54  ;;  %v1337_v49 = vsel %vm1330_vm13, %v1333_v5, %v1336_v26  ;;  %v1422_v8 = vmul.f32 %v1421_v39, %v1419_v47  ;;  %v1583_v28 = vsel %vm1579_vm0, %v1567_v55, %v1582_v4 }
 0x256   :  { %v5274_v45 = vmin.u32 %v1508_v15, %v7954_v50  ;;  %v7980_v34 = vadd.s32 1, %v7912_v63  ;;  %v1338_v41 = vsel %vm1328_vm12, nan, %v1337_v49  ;;  %v10526_v36 = vand.u32 2147483647, %v10488_v59 }
 0x257   :  { %v1592_v51 = vsel %vm1578_vm4, %v1589_v37, %v1591_v38  ;;  %5536 = vmatmul.mubr.msk.f32.gmra.mrb[8].mxu1 %vm2781_vm10, %v1338_v41  ;;  %v1423_v42 = vxor.u32 2147483648, %v1422_v8  ;;  %v1588_v63 = vsel %vm1578_vm4, %v1585_v57, %v1587_v25  ;;  %v1593_v55 = vshll.u32 %v1553_v11, 8  ;;  %v10531_v38 = vld [vmem:[#allocation78_spill] sm:$0xff]  ;;  %v10532_v41 = vld [vmem:[#allocation71_spill] sm:$0xff] }
 0x258   :  { %vm7986_vm2 = vcmp.le.f32.partialorder %v10526_v36, 0.7853982  ;;  %v1510_v19 = vclz %v5274_v45  ;;  %v7996_v53 = vadd.s32 1, %v7919_v52  ;;  %v10529_v4 = vand.u32 2139095040, %v7805_v9 }
 0x259   :  { %v1428_v47 = vsel %vm7986_vm2, 0, %v1426_v12  ;;  %v1584_v37 = vsel %vm1578_vm4, %v1581_v17, %v1583_v28  ;;  %v1424_v39 = vsel %vm1341_vm14, %v1423_v42, %v1422_v8  ;;  %vm1444_vm8 = vcmp.lt.s32.totalorder %v10507_v10, 0  ;;  %v10530_v12 = vld [vmem:[#allocation35_spill] sm:$0xff] }
 0x25a   :  { %v8000_v26 = vshrl.u32 %v10529_v4, 23  ;;  %v5275_v15 = vadd.s32 4294967294, %v1510_v19  ;;  %v8009_v11 = vmul.u32.u64.low %v1593_v55, %v1592_v51  ;;  %v8010_v5 = vmul.u32.u64.high %v1593_v55, %v1592_v51, %v8009_v11 }
 0x25b   :  { %v1427_v52 = vsel %vm7986_vm2, %v10488_v59, %v1424_v39  ;;  %v8015_v57 = vmul.u32.u64.low %v1593_v55, %v1588_v63  ;;  %v8016_v16 = vmul.u32.u64.high %v1593_v55, %v1588_v63, %v8015_v57  ;;  %v10290_v62 = vand.u32 2147483647, %v10530_v12 }
 0x25c   :  { %5898 = vcosq.f32 %v1427_v52  ;;  %v8020_v17 = vand.u32 3, %v1428_v47  ;;  %v1498_v25 = vadd.s32 %v7891_v20, %v7884_v22  ;;  %vm5276_vm14 = vcmp.lt.s32.totalorder %v5275_v15, 0 }
 0x25d   :  { %5900 = vsinq.f32 %v1427_v52  ;;  %v1513_v54 = vsel %vm5276_vm14, 0, %v5275_v15  ;;  %v1528_v2 = vsub.s32 4, %v7944_v1  ;;  %v1666_v49 = vshrl.u32 %v10415_v44, %v10531_v38 }
 0x25e   :  { %v1514_v8 = vsub.s32 32, %v1513_v54  ;;  %v1518_v45 = vsub.s32 4294967266, %v1513_v54  ;;  %v1600_v28 = vmul.u32 %v1593_v55, %v1584_v37  ;;  %v1665_v36 = vshll.u32 %v10412_v18, %v10532_v41 }
 0x25f   :  { %vm1602_vm1 = vc.u32 %v8010_v5, %v8015_v57  ;;  %v1603_v13 = vadd.s32 1, %v8016_v16  ;;  %v1655_v22 = vand.u32 8388607, %v10290_v62  ;;  %v1668_v20 = vshll.u32 %v10415_v44, %v10532_v41 }
 0x260   :  { %vm1437_vm11 = vcmp.eq.s32.totalorder %v8020_v17, 2  ;;  %v1515_v51 = vshll.u32 %v7954_v50, %v1513_v54  ;;  %v1516_v42 = vshrl.u32 %v1498_v25, %v1514_v8  ;;  %v1519_v19 = vadd.s32 127, %v1518_v45  ;;  %v10533_v45 = vld [vmem:[#allocation80_spill] sm:$0xff] }
 0x261   :  { %v1669_v63 = vshrl.u32 %v10416_v33, %v10531_v38  ;;  %vm1434_vm13 = vcmp.eq.s32.totalorder %v8020_v17, 0  ;;  %v1604_v55 = vsel %vm1602_vm1, %v1603_v13, %v8016_v16  ;;  %v1667_v4 = vor.u32 %v1666_v49, %v1665_v36  ;;  %v10536_v36 = vld [vmem:[#allocation91_spill] sm:$0xff] }
 0x262   :  { %v1671_v47 = vshll.u32 %v10416_v33, %v10532_v41  ;;  %v1672_v37 = vshrl.u32 %v10330_v29, %v10531_v38  ;;  %vm2483_vm12 = vcmp.gt.s32.totalorder %v7980_v34, 0  ;;  %vm1433_vm9 = vcmp.lt.s32.totalorder %v8020_v17, 2  ;;  %v10534_v41 = vld [vmem:[#allocation97_spill] sm:$0xff] }
 0x263   :  { %v1517_v50 = vor.u32 %v1516_v42, %v1515_v51  ;;  %v1520_v39 = vshll.u32 %v1519_v19, 23  ;;  %v1605_v15 = vadd.s32 %v1604_v55, %v1600_v28  ;;  %v1670_v11 = vor.u32 %v1669_v63, %v1668_v20 }
 0x264   :  { %vm1431_vm5 = vweird.f32 %v10488_v59  ;;  %v1529_v52 = vsel %vm1444_vm8, %v1528_v2, %v7944_v1  ;;  %v1656_v16 = vor.u32 8388608, %v1655_v22  ;;  %v1664_v25 = vshrl.u32 %v10412_v18, %v10531_v38  ;;  %v10535_v38 = vld [vmem:[#allocation98_spill] sm:$0xff] }
 0x265   :  { %v1673_v54 = vor.u32 %v1672_v37, %v1671_v47  ;;  %v1521_v49 = vor.u32 4788187, %v1520_v39  ;;  %v1606_v8 = vadd.s32 536870912, %v1605_v15  ;;  %vm1680_vm4 = vcmp.lt.s32.totalorder %v10533_v45, 1 }
 0x266   :  { %vm1682_vm0 = vcmp.lt.s32.totalorder %v10533_v45, 3  ;;  %vm2586_vm6 = vcmp.gt.s32.totalorder %v7996_v53, 0  ;;  %v1688_v28 = vsel %vm1680_vm4, %v1667_v4, %v1670_v11  ;;  %v5899_v22 = vpop.eup %5898  ;;  %v1524_v51 = vcvt.s32.f32 %v1517_v50 }
 0x267   :  { %v1690_v1 = vsel %vm1682_vm0, %v1673_v54, %v10534_v41  ;;  %v1692_v2 = vsel %vm1680_vm4, %v1670_v11, %v1673_v54  ;;  %v1694_v13 = vsel %vm1682_vm0, %v10536_v36, %v10535_v38  ;;  %v1522_v20 = vand.u32 2147483647, %v1521_v49  ;;  %v5901_v19 = vpop.eup %5900 }
 0x268   :  { %v8068_v42 = vshrl.u32 %v1606_v8, 30  ;;  %vm1681_vm2 = vcmp.lt.s32.totalorder %v10533_v45, 2  ;;  %v1438_v63 = vxor.u32 2147483648, %v5899_v22  ;;  %vm10537_vm14 = vcmp.lt.s32.totalorder %v10533_v45, 4 }
 0x269   :  { %v1685_v55 = vsel %vm10537_vm14, %v1673_v54, 2102212464  ;;  %v1695_v47 = vsel %vm1681_vm2, %v1692_v2, %v1694_v13  ;;  %v1696_v37 = vshll.u32 %v1656_v16, 8  ;;  %v1435_v39 = vxor.u32 2147483648, %v5901_v19 }
 0x26a   :  { %v1525_v41 = vmul.f32 %v1524_v51, %v1522_v20  ;;  %v1608_v38 = vshll.u32 %v8068_v42, 30  ;;  %v1691_v50 = vsel %vm1681_vm2, %v1688_v28, %v1690_v1  ;;  %v1439_v49 = vsel %vm1437_vm11, %v1438_v63, %v5901_v19  ;;  %v10541_v63 = vld [vmem:[#allocation37_spill] sm:$0xff] }
 0x26b   :  { %v1684_v8 = vsel %vm1680_vm4, %v1664_v25, %v1667_v4  ;;  %v8082_v36 = vmul.u32.u64.low %v1696_v37, %v1695_v47  ;;  %v8083_v62 = vmul.u32.u64.high %v1696_v37, %v1695_v47, %v8082_v36  ;;  %v1436_v54 = vsel %vm1434_vm13, %v5899_v22, %v1435_v39 }
 0x26c   :  { %v1526_v16 = vxor.u32 2147483648, %v1525_v41  ;;  %v8087_v2 = vsub.s32 %v1605_v15, %v1608_v38  ;;  %v1686_v13 = vsel %vm1682_vm0, %v1670_v11, %v1685_v55  ;;  %v1440_v28 = vsel %vm1433_vm9, %v1436_v54, %v1439_v49  ;;  %v10545_v54 = vld [vmem:[#allocation79_spill] sm:$0xff] }
 0x26d   :  { %v10538_v1 = vand.u32 2147483647, %v10507_v10  ;;  %v8099_v4 = vmul.u32.u64.low %v1696_v37, %v1691_v50  ;;  %v8100_v25 = vmul.u32.u64.high %v1696_v37, %v1691_v50, %v8099_v4  ;;  %v1441_v15 = vsel %vm1431_vm5, nan, %v1440_v28 }
 0x26e   :  { %v1527_v22 = vsel %vm1444_vm8, %v1526_v16, %v1525_v41  ;;  %v1611_v11 = vsub.s32 0, %v8087_v2  ;;  %v8113_v51 = vsel %vm2483_vm12, %v7980_v34, 0  ;;  %5538 = vmatprep.mubr.msk.f32.mxu1 %vm2781_vm10, %v1441_v15  ;;  %v1687_v19 = vsel %vm1681_vm2, %v1684_v8, %v1686_v13  ;;  %v10544_v8 = vld [vmem:[#allocation73_spill] sm:$0xff] }
 0x26f   :  { %vm8095_vm1 = vcmp.le.f32.partialorder %v10538_v1, 0.7853982  ;;  %v10291_v55 = vand.u32 2147483647, %v10541_v63  ;;  %vm1705_vm8 = vc.u32 %v8083_v62, %v8099_v4  ;;  %v8133_v39 = vadd.s32 4294967169, %v8000_v26 }
 0x270   :  { %v1531_v17 = vsel %vm8095_vm1, 0, %v1529_v52  ;;  %v1530_v59 = vsel %vm8095_vm1, %v10507_v10, %v1527_v22  ;;  %v10542_v52 = vor.u32 %v7562_v40, %v7367_v32  ;;  %v5278_v34 = vmin.u32 %v1611_v11, %v8087_v2 }
 0x271   :  { %5902 = vcosq.f32 %v1530_v59  ;;  %v8135_v45 = vand.u32 3, %v1531_v17  ;;  %v1706_v41 = vadd.s32 1, %v8100_v25  ;;  %v8139_v32 = vand.u32 31, %v8113_v51 }
 0x272   :  { %v8127_v47 = vsel %vm2404_vm3, %v10542_v52, 1326507024  ;;  %5904 = vsinq.f32 %v1530_v59  ;;  %v8144_v40 = vsel %vm2586_vm6, %v7996_v53, 0  ;;  %v1613_v38 = vclz %v5278_v34 }
 0x273   :  { %10543 = vst [vmem:[#allocation27_spill] sm:$0xff] %v8139_v32  ;;  %v1703_v50 = vmul.u32 %v1696_v37, %v1687_v19  ;;  %v1707_v49 = vsel %vm1705_vm8, %v1706_v41, %v8100_v25  ;;  %v1758_v26 = vand.u32 8388607, %v10291_v55  ;;  %v1768_v36 = vshll.u32 %v10412_v18, %v10544_v8 }
 0x274   :  { %v1769_v16 = vshrl.u32 %v10415_v44, %v10545_v54  ;;  %vm1547_vm11 = vcmp.lt.s32.totalorder %v10518_v46, 0  ;;  %v5279_v13 = vadd.s32 4294967294, %v1613_v38  ;;  %v1771_v53 = vshll.u32 %v10415_v44, %v10544_v8 }
 0x275   :  { %v1708_v28 = vadd.s32 %v1707_v49, %v1703_v50  ;;  %v1772_v37 = vshrl.u32 %v10416_v33, %v10545_v54  ;;  %vm1537_vm13 = vcmp.eq.s32.totalorder %v8135_v45, 0  ;;  %vm1540_vm12 = vcmp.eq.s32.totalorder %v8135_v45, 2  ;;  %v10546_v50 = vld [vmem:[#allocation81_spill] sm:$0xff] }
 0x276   :  { %v1770_v1 = vor.u32 %v1769_v16, %v1768_v36  ;;  %v1774_v20 = vshll.u32 %v10416_v33, %v10544_v8  ;;  %v1775_v25 = vshrl.u32 %v10330_v29, %v10545_v54  ;;  %vm1536_vm9 = vcmp.lt.s32.totalorder %v8135_v45, 2 }
 0x277   :  { %v1601_v15 = vadd.s32 %v8015_v57, %v8010_v5  ;;  %vm5280_vm5 = vcmp.lt.s32.totalorder %v5279_v13, 0  ;;  %v1709_v22 = vadd.s32 536870912, %v1708_v28  ;;  %v1773_v17 = vor.u32 %v1772_v37, %v1771_v53  ;;  %v10550_v53 = vld [vmem:[#allocation99_spill] sm:$0xff] }
 0x278   :  { %vm1534_vm4 = vweird.f32 %v10507_v10  ;;  %v1616_v11 = vsel %vm5280_vm5, 0, %v5279_v13  ;;  %v1631_v59 = vsub.s32 4, %v8068_v42  ;;  %v1759_v19 = vor.u32 8388608, %v1758_v26 }
 0x279   :  { %v1776_v52 = vor.u32 %v1775_v25, %v1774_v20  ;;  %v1617_v34 = vsub.s32 32, %v1616_v11  ;;  %v1621_v41 = vsub.s32 4294967266, %v1616_v11  ;;  %v8169_v38 = vshrl.u32 %v1709_v22, 30 }
 0x27a   :  { %vm1783_vm0 = vcmp.lt.s32.totalorder %v10546_v50, 1  ;;  %v10547_v49 = vand.u32 2147483647, %v10518_v46  ;;  %v1618_v57 = vshll.u32 %v8087_v2, %v1616_v11  ;;  %vm1784_vm2 = vcmp.lt.s32.totalorder %v10546_v50, 2  ;;  %v10552_v11 = vld [vmem:[#allocation100_spill] sm:$0xff] }
 0x27b   :  { %vm1785_vm14 = vcmp.lt.s32.totalorder %v10546_v50, 3  ;;  %v1791_v26 = vsel %vm1783_vm0, %v1770_v1, %v1773_v17  ;;  %v5903_v8 = vpop.eup %5902  ;;  %v1619_v36 = vshrl.u32 %v1601_v15, %v1617_v34  ;;  %v1622_v16 = vadd.s32 127, %v1621_v41 }
 0x27c   :  { %vm8174_vm6 = vcmp.le.f32.partialorder %v10547_v49, 0.7853982  ;;  %v1711_v13 = vshll.u32 %v8169_v38, 30  ;;  %v1793_v37 = vsel %vm1785_vm14, %v1776_v52, %v10550_v53  ;;  %v5905_v20 = vpop.eup %5904  ;;  %v1541_v25 = vxor.u32 2147483648, %v5903_v8  ;;  %v10553_v49 = vld [vmem:[#allocation93_spill] sm:$0xff] }
 0x27d   :  { %vm10551_vm1 = vcmp.lt.s32.totalorder %v10546_v50, 4  ;;  %v1795_v22 = vsel %vm1783_vm0, %v1773_v17, %v1776_v52  ;;  %v1797_v15 = vsel %vm1785_vm14, %v10553_v49, %v10552_v11  ;;  %v1538_v34 = vxor.u32 2147483648, %v5905_v20 }
 0x27e   :  { %v1788_v2 = vsel %vm10551_vm1, %v1776_v52, 2102212464  ;;  %v1620_v41 = vor.u32 %v1619_v36, %v1618_v57  ;;  %v1623_v55 = vshll.u32 %v1622_v16, 23  ;;  %v8195_v9 = vsub.s32 %v1708_v28, %v1711_v13 }
 0x27f   :  { %v1542_v53 = vsel %vm1540_vm12, %v1541_v25, %v5905_v20  ;;  %v1632_v61 = vsel %vm1547_vm11, %v1631_v59, %v8068_v42  ;;  %v1767_v52 = vshrl.u32 %v10412_v18, %v10545_v54  ;;  %v1794_v31 = vsel %vm1784_vm2, %v1791_v26, %v1793_v37 }
 0x280   :  { %v1539_v11 = vsel %vm1537_vm13, %v5903_v8, %v1538_v34  ;;  %v1624_v57 = vor.u32 4788187, %v1623_v55  ;;  %v1714_v28 = vsub.s32 0, %v8195_v9  ;;  %v1798_v36 = vsel %vm1784_vm2, %v1795_v22, %v1797_v15 }
 0x281   :  { %v1543_v16 = vsel %vm1536_vm9, %v1539_v11, %v1542_v53  ;;  %v1787_v42 = vsel %vm1783_vm0, %v1767_v52, %v1770_v1  ;;  %v1789_v54 = vsel %vm1785_vm14, %v1773_v17, %v1788_v2  ;;  %v1799_v59 = vshll.u32 %v1759_v19, 8  ;;  %v10556_v11 = vld [vmem:[#allocation89_spill] sm:$0xff] }
 0x282   :  { %v1544_v26 = vsel %vm1534_vm4, nan, %v1543_v16  ;;  %v1625_v8 = vand.u32 2147483647, %v1624_v57  ;;  %v1627_v55 = vcvt.s32.f32 %v1620_v41  ;;  %v5282_v13 = vmin.u32 %v1714_v28, %v8195_v9  ;;  %v10555_v41 = vld [vmem:[#allocation47_spill] sm:$0xff] }
 0x283   :  { %5539 = vmatmul.mubr.msk.f32.gmra.mrb[10].mxu1 %vm2781_vm10, %v1544_v26  ;;  %v8221_v37 = vmul.u32.u64.low %v1799_v59, %v1798_v36  ;;  %v8222_v20 = vmul.u32.u64.high %v1799_v59, %v1798_v36, %v8221_v37  ;;  %v8224_v45 = vmul.u32.u64.low %v1799_v59, %v1794_v31  ;;  %v8225_v25 = vmul.u32.u64.high %v1799_v59, %v1794_v31, %v8224_v45 }
 0x284   :  { %v8229_v1 = vshrl.u32 %v8113_v51, 5  ;;  %v1628_v17 = vmul.f32 %v1627_v55, %v1625_v8  ;;  %v1634_v10 = vsel %vm8174_vm6, 0, %v1632_v61  ;;  %v1716_v19 = vclz %v5282_v13 }
 0x285   :  { %v8234_v2 = vshrl.u32 %v8144_v40, 5  ;;  %v8237_v22 = vand.u32 31, %v8144_v40  ;;  %v8240_v49 = vadd.s32 1, %v8133_v39  ;;  %v1790_v31 = vsel %vm1784_vm2, %v1787_v42, %v1789_v54 }
 0x286   :  { %v8245_v51 = vsub.s32 32, %v8139_v32  ;;  %v1629_v15 = vxor.u32 2147483648, %v1628_v17  ;;  %v5283_v34 = vadd.s32 4294967294, %v1716_v19  ;;  %v10299_v61 = vand.u32 2147483647, %v10555_v41 }
 0x287   :  { %10554 = vst [vmem:[#allocation107_spill] sm:$0xff] %v8234_v2  ;;  %v8248_v53 = vand.u32 3, %v1634_v10  ;;  %v1704_v52 = vadd.s32 %v8099_v4, %v8083_v62  ;;  %vm1808_vm8 = vc.u32 %v8222_v20, %v8224_v45  ;;  %v1809_v39 = vadd.s32 1, %v8225_v25  ;;  %v10557_v4 = vld [vmem:[#allocation82_spill] sm:$0xff] }
 0x288   :  { %v1630_v40 = vsel %vm1547_vm11, %v1629_v15, %v1628_v17  ;;  %vm5284_vm13 = vcmp.lt.s32.totalorder %v5283_v34, 0  ;;  %v1806_v50 = vmul.u32 %v1799_v59, %v1790_v31  ;;  %v1872_v57 = vshrl.u32 %v10415_v44, %v10556_v11 }
 0x289   :  { %v1633_v28 = vsel %vm8174_vm6, %v10518_v46, %v1630_v40  ;;  %v1719_v36 = vsel %vm5284_vm13, 0, %v5283_v34  ;;  %v1810_v62 = vsel %vm1808_vm8, %v1809_v39, %v8225_v25  ;;  %v1871_v16 = vshll.u32 %v10412_v18, %v10557_v4 }
 0x28a   :  { %5906 = vcosq.f32 %v1633_v28  ;;  %v1720_v42 = vsub.s32 32, %v1719_v36  ;;  %v1724_v54 = vsub.s32 4294967266, %v1719_v36  ;;  %v1861_v26 = vand.u32 8388607, %v10299_v61 }
 0x28b   :  { %5908 = vsinq.f32 %v1633_v28  ;;  %v1721_v59 = vshll.u32 %v8195_v9, %v1719_v36  ;;  %v1811_v8 = vadd.s32 %v1810_v62, %v1806_v50  ;;  %v1874_v5 = vshll.u32 %v10415_v44, %v10557_v4 }
 0x28c   :  { %v1722_v55 = vshrl.u32 %v1704_v52, %v1720_v42  ;;  %v1725_v13 = vadd.s32 127, %v1724_v54  ;;  %v1873_v37 = vor.u32 %v1872_v57, %v1871_v16  ;;  %v1875_v25 = vshrl.u32 %v10416_v33, %v10556_v11  ;;  %v10561_v57 = vld [vmem:[#allocation94_spill] sm:$0xff]  ;;  %v10563_v16 = vld [vmem:[#allocation96_spill] sm:$0xff] }
 0x28d   :  { %vm1650_vm11 = vcmp.lt.s32.totalorder %v10530_v12, 0  ;;  %v1812_v17 = vadd.s32 536870912, %v1811_v8  ;;  %v1877_v10 = vshll.u32 %v10416_v33, %v10557_v4  ;;  %v1878_v19 = vshrl.u32 %v10330_v29, %v10556_v11  ;;  %v10562_v4 = vld [vmem:[#allocation103_spill] sm:$0xff] }
 0x28e   :  { %vm1643_vm12 = vcmp.eq.s32.totalorder %v8248_v53, 2  ;;  %v1723_v9 = vor.u32 %v1722_v55, %v1721_v59  ;;  %v1726_v31 = vshll.u32 %v1725_v13, 23  ;;  %v1862_v15 = vor.u32 8388608, %v1861_v26  ;;  %v10564_v59 = vld [vmem:[#allocation102_spill] sm:$0xff] }
 0x28f   :  { %v1876_v34 = vor.u32 %v1875_v25, %v1874_v5  ;;  %v10558_v52 = vand.u32 2147483647, %v10530_v12  ;;  %v8284_v40 = vshrl.u32 %v1812_v17, 30  ;;  %v1879_v50 = vor.u32 %v1878_v19, %v1877_v10 }
 0x290   :  { %vm1886_vm5 = vcmp.lt.s32.totalorder %v10561_v57, 1  ;;  %vm1888_vm4 = vcmp.lt.s32.totalorder %v10561_v57, 3  ;;  %v1727_v28 = vor.u32 4788187, %v1726_v31  ;;  %v1734_v36 = vsub.s32 4, %v8169_v38 }
 0x291   :  { %vm8280_vm9 = vcmp.le.f32.partialorder %v10558_v52, 0.7853982  ;;  %v1894_v62 = vsel %vm1886_vm5, %v1873_v37, %v1876_v34  ;;  %v1900_v42 = vsel %vm1888_vm4, %v10563_v16, %v10562_v4  ;;  %vm1637_vm0 = vweird.f32 %v10518_v46  ;;  %v10566_v46 = vld [vmem:[#allocation49_spill] sm:$0xff] }
 0x292   :  { %v1730_v54 = vcvt.s32.f32 %v1723_v9  ;;  %v1814_v26 = vshll.u32 %v8284_v40, 30  ;;  %vm1887_vm6 = vcmp.lt.s32.totalorder %v10561_v57, 2  ;;  %v1896_v5 = vsel %vm1888_vm4, %v1879_v50, %v10564_v59 }
 0x293   :  { %v1728_v55 = vand.u32 2147483647, %v1727_v28  ;;  %vm10565_vm2 = vcmp.lt.s32.totalorder %v10561_v57, 4  ;;  %v1898_v25 = vsel %vm1886_vm5, %v1876_v34, %v1879_v50  ;;  %v1902_v17 = vshll.u32 %v1862_v15, 8 }
 0x294   :  { %v1891_v13 = vsel %vm10565_vm2, %v1879_v50, 2102212464  ;;  %v8305_v10 = vsub.s32 %v1811_v8, %v1814_v26  ;;  %v1870_v19 = vshrl.u32 %v10412_v18, %v10556_v11  ;;  %v1897_v9 = vsel %vm1887_vm6, %v1894_v62, %v1896_v5  ;;  %v5907_v52 = vpop.eup %5906 }
 0x295   :  { %v1901_v31 = vsel %vm1887_vm6, %v1898_v25, %v1900_v42  ;;  %v1731_v28 = vmul.f32 %v1730_v54, %v1728_v55  ;;  %v1735_v4 = vsel %vm1650_vm11, %v1734_v36, %v8169_v38  ;;  %v5909_v8 = vpop.eup %5908  ;;  %v1644_v15 = vxor.u32 2147483648, %v5907_v52 }
 0x296   :  { %v8316_v16 = vmul.u32.u64.low %v1902_v17, %v1901_v31  ;;  %v8317_v50 = vmul.u32.u64.high %v1902_v17, %v1901_v31, %v8316_v16  ;;  %v1817_v26 = vsub.s32 0, %v8305_v10  ;;  %v1890_v11 = vsel %vm1886_vm5, %v1870_v19, %v1873_v37 }
 0x297   :  { %v1892_v62 = vsel %vm1888_vm4, %v1876_v34, %v1891_v13  ;;  %v1641_v42 = vxor.u32 2147483648, %v5909_v8  ;;  %v1732_v59 = vxor.u32 2147483648, %v1731_v28  ;;  %vm1639_vm14 = vcmp.lt.s32.totalorder %v8248_v53, 2 }
 0x298   :  { %v8324_v54 = vmul.u32.u64.low %v1902_v17, %v1897_v9  ;;  %v8325_v5 = vmul.u32.u64.high %v1902_v17, %v1897_v9, %v8324_v54  ;;  %vm1640_vm1 = vcmp.eq.s32.totalorder %v8248_v53, 0  ;;  %v1645_v38 = vsel %vm1643_vm12, %v1644_v15, %v5909_v8 }
 0x299   :  { %v5286_v36 = vmin.u32 %v1817_v26, %v8305_v10  ;;  %v1642_v55 = vsel %vm1640_vm1, %v5907_v52, %v1641_v42  ;;  %v1733_v37 = vsel %vm1650_vm11, %v1732_v59, %v1731_v28  ;;  %v1737_v34 = vsel %vm8280_vm9, 0, %v1735_v4  ;;  %v10567_v42 = vld [vmem:[#allocation92_spill] sm:$0xff] }
 0x29a   :  { %v1893_v13 = vsel %vm1887_vm6, %v1890_v11, %v1892_v62  ;;  %v1646_v25 = vsel %vm1639_vm14, %v1642_v55, %v1645_v38  ;;  %v1736_v19 = vsel %vm8280_vm9, %v10530_v12, %v1733_v37  ;;  %vm1911_vm8 = vc.u32 %v8317_v50, %v8324_v54  ;;  %v10568_v37 = vld [vmem:[#allocation87_spill] sm:$0xff] }
 0x29b   :  { %v1819_v9 = vclz %v5286_v36  ;;  %v8346_v53 = vshll.u32 %v10330_v29, %v8139_v32  ;;  %v1647_v31 = vsel %vm1637_vm0, nan, %v1646_v25  ;;  %5910 = vcosq.f32 %v1736_v19 }
 0x29c   :  { %v1912_v57 = vadd.s32 1, %v8325_v5  ;;  %5541 = vmatprep.mubr.msk.f32.mxu1 %vm2781_vm10, %v1647_v31  ;;  %5912 = vsinq.f32 %v1736_v19  ;;  %v1741_v52 = vand.u32 3, %v1737_v34  ;;  %v1909_v28 = vmul.u32 %v1902_v17, %v1893_v13 }
 0x29d   :  { %v5287_v39 = vadd.s32 4294967294, %v1819_v9  ;;  %v8354_v4 = vshll.u32 %v10335_v3, %v8139_v32  ;;  %v8357_v16 = vsub.s32 32, %v8237_v22  ;;  %v10298_v15 = vand.u32 2147483647, %v10566_v46 }
 0x29e   :  { %v1913_v8 = vsel %vm1911_vm8, %v1912_v57, %v8325_v5  ;;  %vm1753_vm13 = vcmp.lt.s32.totalorder %v10541_v63, 0  ;;  %v1807_v26 = vadd.s32 %v8224_v45, %v8222_v20  ;;  %v1837_v17 = vsub.s32 4, %v8284_v40 }
 0x29f   :  { %vm5288_vm11 = vcmp.lt.s32.totalorder %v5287_v39, 0  ;;  %v1914_v11 = vadd.s32 %v1913_v8, %v1909_v28  ;;  %v1975_v59 = vshrl.u32 %v10415_v44, %v10567_v42  ;;  %v1978_v38 = vshrl.u32 %v10416_v33, %v10567_v42 }
 0x2a0   :  { %v1822_v62 = vsel %vm5288_vm11, 0, %v5287_v39  ;;  %vm1743_vm12 = vcmp.eq.s32.totalorder %v1741_v52, 0  ;;  %v1974_v34 = vshll.u32 %v10412_v18, %v10568_v37  ;;  %vm1742_vm9 = vcmp.lt.s32.totalorder %v1741_v52, 2 }
 0x2a1   :  { %v1823_v5 = vsub.s32 32, %v1822_v62  ;;  %v1827_v36 = vsub.s32 4294967266, %v1822_v62  ;;  %v1915_v55 = vadd.s32 536870912, %v1914_v11  ;;  %v1964_v20 = vand.u32 8388607, %v10298_v15 }
 0x2a2   :  { %v1977_v45 = vshll.u32 %v10415_v44, %v10568_v37  ;;  %v1980_v13 = vshll.u32 %v10416_v33, %v10568_v37  ;;  %v1981_v25 = vshrl.u32 %v10330_v29, %v10567_v42  ;;  %vm1740_vm5 = vweird.f32 %v10530_v12 }
 0x2a3   :  { %v1824_v19 = vshll.u32 %v8305_v10, %v1822_v62  ;;  %v1825_v9 = vshrl.u32 %v1807_v26, %v1823_v5  ;;  %v1828_v31 = vadd.s32 127, %v1827_v36  ;;  %v8381_v57 = vshrl.u32 %v1915_v55, 30  ;;  %v10569_v26 = vld [vmem:[#allocation95_spill] sm:$0xff] }
 0x2a4   :  { %vm1746_vm4 = vcmp.eq.s32.totalorder %v1741_v52, 2  ;;  %v1976_v39 = vor.u32 %v1975_v59, %v1974_v34  ;;  %v1979_v28 = vor.u32 %v1978_v38, %v1977_v45  ;;  %v1982_v8 = vor.u32 %v1981_v25, %v1980_v13  ;;  %v10571_v45 = vld [vmem:[#allocation104_spill] sm:$0xff]  ;;  %v10572_v25 = vld [vmem:[#allocation105_spill] sm:$0xff] }
 0x2a5   :  { %v1826_v15 = vor.u32 %v1825_v9, %v1824_v19  ;;  %v1829_v61 = vshll.u32 %v1828_v31, 23  ;;  %v1838_v37 = vsel %vm1753_vm13, %v1837_v17, %v8284_v40  ;;  %v1917_v2 = vshll.u32 %v8381_v57, 30  ;;  %v5911_v32 = vpop.eup %5910  ;;  %v10573_v19 = vld [vmem:[#allocation101_spill] sm:$0xff] }
 0x2a6   :  { %v1965_v60 = vor.u32 8388608, %v1964_v20  ;;  %v1973_v10 = vshrl.u32 %v10412_v18, %v10567_v42  ;;  %vm1989_vm0 = vcmp.lt.s32.totalorder %v10569_v26, 1  ;;  %vm1990_vm6 = vcmp.lt.s32.totalorder %v10569_v26, 2  ;;  %v5913_v62 = vpop.eup %5912 }
 0x2a7   :  { %v1747_v59 = vxor.u32 2147483648, %v5911_v32  ;;  %v1830_v38 = vor.u32 4788187, %v1829_v61  ;;  %v8391_v5 = vsub.s32 %v1914_v11, %v1917_v2  ;;  %vm1991_vm2 = vcmp.lt.s32.totalorder %v10569_v26, 3 }
 0x2a8   :  { %v1744_v36 = vxor.u32 2147483648, %v5913_v62  ;;  %v1993_v40 = vsel %vm1989_vm0, %v1973_v10, %v1976_v39  ;;  %vm10570_vm14 = vcmp.lt.s32.totalorder %v10569_v26, 4  ;;  %v2001_v42 = vsel %vm1989_vm0, %v1979_v28, %v1982_v8 }
 0x2a9   :  { %v1994_v17 = vsel %vm10570_vm14, %v1982_v8, 2102212464  ;;  %v1748_v55 = vsel %vm1746_vm4, %v1747_v59, %v5913_v62  ;;  %v1831_v34 = vand.u32 2147483647, %v1830_v38  ;;  %v1833_v20 = vcvt.s32.f32 %v1826_v15 }
 0x2aa   :  { %v1920_v61 = vsub.s32 0, %v8391_v5  ;;  %v1745_v2 = vsel %vm1743_vm12, %v5911_v32, %v1744_v36  ;;  %v1997_v11 = vsel %vm1989_vm0, %v1976_v39, %v1979_v28  ;;  %v1999_v13 = vsel %vm1991_vm2, %v1982_v8, %v10571_v45 }
 0x2ab   :  { %v2003_v9 = vsel %vm1991_vm2, %v10573_v19, %v10572_v25  ;;  %v1749_v31 = vsel %vm1742_vm9, %v1745_v2, %v1748_v55  ;;  %v1834_v10 = vmul.f32 %v1833_v20, %v1831_v34  ;;  %v1995_v32 = vsel %vm1991_vm2, %v1979_v28, %v1994_v17 }
 0x2ac   :  { %v5290_v15 = vmin.u32 %v1920_v61, %v8391_v5  ;;  %v8418_v39 = vshll.u32 %v10330_v29, %v8237_v22  ;;  %v1750_v8 = vsel %vm1740_vm5, nan, %v1749_v31  ;;  %v10574_v62 = vand.u32 2147483647, %v10541_v63  ;;  %v10578_v31 = vld [vmem:[#allocation111_spill] sm:$0xff] }
 0x2ad   :  { %v2004_v52 = vsel %vm1990_vm6, %v2001_v42, %v2003_v9  ;;  %5542 = vmatmul.mubr.msk.f32.gmra.mrb[12].mxu1 %vm2781_vm10, %v1750_v8  ;;  %v1835_v38 = vxor.u32 2147483648, %v1834_v10  ;;  %v2000_v36 = vsel %vm1990_vm6, %v1997_v11, %v1999_v13  ;;  %v2005_v17 = vshll.u32 %v1965_v60, 8 }
 0x2ae   :  { %vm8424_vm1 = vcmp.le.f32.partialorder %v10574_v62, 0.7853982  ;;  %v1922_v28 = vclz %v5290_v15  ;;  %v8435_v12 = vshrl.u32 %v10335_v3, %v8245_v51  ;;  %v8439_v55 = vshll.u32 %v10335_v3, %v8237_v22  ;;  %v10579_v62 = vld [vmem:[#allocation106_spill] sm:$0xff] }
 0x2af   :  { %v1840_v34 = vsel %vm8424_vm1, 0, %v1838_v37  ;;  %v1996_v42 = vsel %vm1990_vm6, %v1993_v40, %v1995_v32  ;;  %v1836_v20 = vsel %vm1753_vm13, %v1835_v38, %v1834_v10  ;;  %vm1856_vm8 = vcmp.lt.s32.totalorder %v10555_v41, 0  ;;  %v10577_v37 = vld [vmem:[#allocation72_spill] sm:$0xff] }
 0x2b0   :  { %v5291_v60 = vadd.s32 4294967294, %v1922_v28  ;;  %v8448_v61 = vmul.u32.u64.low %v2005_v17, %v2004_v52  ;;  %v8449_v2 = vmul.u32.u64.high %v2005_v17, %v2004_v52, %v8448_v61  ;;  %v1839_v11 = vsel %vm8424_vm1, %v10541_v63, %v1836_v20 }
 0x2b1   :  { %v8454_v45 = vmul.u32.u64.low %v2005_v17, %v2000_v36  ;;  %v8455_v13 = vmul.u32.u64.high %v2005_v17, %v2000_v36, %v8454_v45  ;;  %v2060_v26 = vand.u32 2147483647, %v10577_v37  ;;  %5914 = vcosq.f32 %v1839_v11 }
 0x2b2   :  { %v8459_v40 = vand.u32 3, %v1840_v34  ;;  %v1910_v25 = vadd.s32 %v8324_v54, %v8317_v50  ;;  %vm5292_vm13 = vcmp.lt.s32.totalorder %v5291_v60, 0  ;;  %5916 = vsinq.f32 %v1839_v11 }
 0x2b3   :  { %v1925_v19 = vsel %vm5292_vm13, 0, %v5291_v60  ;;  %v1940_v9 = vsub.s32 4, %v8381_v57  ;;  %v2078_v10 = vshrl.u32 %v10415_v44, %v10578_v31  ;;  %v2012_v8 = vmul.u32 %v2005_v17, %v1996_v42 }
 0x2b4   :  { %v1926_v15 = vsub.s32 32, %v1925_v19  ;;  %v1930_v32 = vsub.s32 4294967266, %v1925_v19  ;;  %v2077_v59 = vshll.u32 %v10412_v18, %v10579_v62  ;;  %vm2014_vm11 = vc.u32 %v8449_v2, %v8454_v45 }
 0x2b5   :  { %v2015_v52 = vadd.s32 1, %v8455_v13  ;;  %v2067_v50 = vand.u32 8388607, %v2060_v26  ;;  %v2080_v54 = vshll.u32 %v10415_v44, %v10579_v62  ;;  %vm1849_vm12 = vcmp.eq.s32.totalorder %v8459_v40, 2 }
 0x2b6   :  { %v1927_v38 = vshll.u32 %v8391_v5, %v1925_v19  ;;  %v1928_v28 = vshrl.u32 %v1910_v25, %v1926_v15  ;;  %v1931_v36 = vadd.s32 127, %v1930_v32  ;;  %v2081_v17 = vshrl.u32 %v10416_v33, %v10578_v31 }
 0x2b7   :  { %vm1846_vm9 = vcmp.eq.s32.totalorder %v8459_v40, 0  ;;  %v2016_v34 = vsel %vm2014_vm11, %v2015_v52, %v8455_v13  ;;  %v2079_v42 = vor.u32 %v2078_v10, %v2077_v59  ;;  %v2083_v20 = vshll.u32 %v10416_v33, %v10579_v62 }
 0x2b8   :  { %v2084_v60 = vshrl.u32 %v10330_v29, %v10578_v31  ;;  %vm1845_vm5 = vcmp.lt.s32.totalorder %v8459_v40, 2  ;;  %v1929_v61 = vor.u32 %v1928_v28, %v1927_v38  ;;  %v1932_v5 = vshll.u32 %v1931_v36, 23 }
 0x2b9   :  { %v2017_v11 = vadd.s32 %v2016_v34, %v2012_v8  ;;  %v2082_v25 = vor.u32 %v2081_v17, %v2080_v54  ;;  %vm1843_vm4 = vweird.f32 %v10541_v63  ;;  %v1941_v19 = vsel %vm1856_vm8, %v1940_v9, %v8381_v57 }
 0x2ba   :  { %v2068_v13 = vor.u32 8388608, %v2067_v50  ;;  %v2076_v10 = vshrl.u32 %v10412_v18, %v10578_v31  ;;  %v2085_v15 = vor.u32 %v2084_v60, %v2083_v20  ;;  %v1933_v32 = vor.u32 4788187, %v1932_v5 }
 0x2bb   :  { %v2018_v62 = vadd.s32 536870912, %v2017_v11  ;;  %vm2092_vm0 = vcmp.lt.s32.totalorder %v6723_v30, 1  ;;  %vm2094_vm6 = vcmp.lt.s32.totalorder %v6723_v30, 3  ;;  %v5915_v31 = vpop.eup %5914  ;;  %v1936_v50 = vcvt.s32.f32 %v1929_v61 }
 0x2bc   :  { %v2100_v8 = vsel %vm2092_vm0, %v2079_v42, %v2082_v25  ;;  %v2102_v59 = vsel %vm2094_vm6, %v2085_v15, %v6943_v14  ;;  %v2104_v57 = vsel %vm2092_vm0, %v2082_v25, %v2085_v15  ;;  %v2106_v9 = vsel %vm2094_vm6, %v6850_v6, %v7036_v21  ;;  %v5917_v38 = vpop.eup %5916 }
 0x2bd   :  { %v1934_v52 = vand.u32 2147483647, %v1933_v32  ;;  %v8505_v54 = vshrl.u32 %v2018_v62, 30  ;;  %vm2093_vm2 = vcmp.lt.s32.totalorder %v6723_v30, 2  ;;  %v1850_v28 = vxor.u32 2147483648, %v5915_v31 }
 0x2be   :  { %vm10580_vm14 = vcmp.lt.s32.totalorder %v6723_v30, 4  ;;  %v2107_v36 = vsel %vm2093_vm2, %v2104_v57, %v2106_v9  ;;  %v2108_v17 = vshll.u32 %v2068_v13, 8  ;;  %v1847_v34 = vxor.u32 2147483648, %v5917_v38 }
 0x2bf   :  { %v2097_v14 = vsel %vm10580_vm14, %v2085_v15, 2102212464  ;;  %v1937_v20 = vmul.f32 %v1936_v50, %v1934_v52  ;;  %v2020_v6 = vshll.u32 %v8505_v54, 30  ;;  %v2103_v21 = vsel %vm2093_vm2, %v2100_v8, %v2102_v59  ;;  %v10584_v50 = vld [vmem:[#allocation74_spill] sm:$0xff] }
 0x2c0   :  { %v1851_v60 = vsel %vm1849_vm12, %v1850_v28, %v5917_v38  ;;  %v2096_v61 = vsel %vm2092_vm0, %v2076_v10, %v2079_v42  ;;  %v8519_v5 = vmul.u32.u64.low %v2108_v17, %v2107_v36  ;;  %v8520_v32 = vmul.u32.u64.high %v2108_v17, %v2107_v36, %v8519_v5 }
 0x2c1   :  { %v1848_v15 = vsel %vm1846_vm9, %v5915_v31, %v1847_v34  ;;  %v1938_v13 = vxor.u32 2147483648, %v1937_v20  ;;  %v8524_v62 = vsub.s32 %v2017_v11, %v2020_v6  ;;  %v2098_v57 = vsel %vm2094_vm6, %v2082_v25, %v2097_v14  ;;  %v10585_v5 = vld [vmem:[#allocation108_spill] sm:$0xff] }
 0x2c2   :  { %v1852_v8 = vsel %vm1845_vm5, %v1848_v15, %v1851_v60  ;;  %v10581_v59 = vand.u32 2147483647, %v10555_v41  ;;  %v8536_v42 = vmul.u32.u64.low %v2108_v17, %v2103_v21  ;;  %v8537_v10 = vmul.u32.u64.high %v2108_v17, %v2103_v21, %v8536_v42 }
 0x2c3   :  { %v1853_v11 = vsel %vm1843_vm4, nan, %v1852_v8  ;;  %v1939_v31 = vsel %vm1856_vm8, %v1938_v13, %v1937_v20  ;;  %v2023_v25 = vsub.s32 0, %v8524_v62  ;;  %vm2689_vm13 = vcmp.gt.s32.totalorder %v8240_v49, 0 }
 0x2c4   :  { %vm8532_vm1 = vcmp.le.f32.partialorder %v10581_v59, 0.7853982  ;;  %5544 = vmatprep.mubr.msk.f32.mxu1 %vm2781_vm10, %v1853_v11  ;;  %v2099_v63 = vsel %vm2093_vm2, %v2096_v61, %v2098_v57  ;;  %v10303_v38 = vand.u32 2147483647, %v10584_v50  ;;  %v8557_v28 = vshrl.u32 %v10332_v35, %v8245_v51 }
 0x2c5   :  { %v1943_v40 = vsel %vm8532_vm1, 0, %v1941_v19  ;;  %v1942_v52 = vsel %vm8532_vm1, %v10555_v41, %v1939_v31  ;;  %v5294_v19 = vmin.u32 %v2023_v25, %v8524_v62  ;;  %vm2117_vm8 = vc.u32 %v8520_v32, %v8536_v42 }
 0x2c6   :  { %5918 = vcosq.f32 %v1942_v52  ;;  %v8564_v14 = vshrl.u32 %v10335_v3, %v8357_v16  ;;  %v1947_v36 = vand.u32 3, %v1943_v40  ;;  %v2118_v30 = vadd.s32 1, %v8537_v10 }
 0x2c7   :  { %5920 = vsinq.f32 %v1942_v52  ;;  %v8569_v34 = vshrl.u32 %v10332_v35, %v8357_v16  ;;  %v8572_v20 = vsel %vm2689_vm13, %v8240_v49, 0  ;;  %v2025_v6 = vclz %v5294_v19 }
 0x2c8   :  { %v2115_v21 = vmul.u32 %v2108_v17, %v2099_v63  ;;  %v2119_v60 = vsel %vm2117_vm8, %v2118_v30, %v8537_v10  ;;  %v2170_v61 = vand.u32 8388607, %v10303_v38  ;;  %v2180_v15 = vshll.u32 %v10412_v18, %v10585_v5 }
 0x2c9   :  { %v2181_v13 = vshrl.u32 %v10415_v44, %v6758_v58  ;;  %vm1959_vm11 = vcmp.lt.s32.totalorder %v10566_v46, 0  ;;  %v5295_v57 = vadd.s32 4294967294, %v2025_v6  ;;  %v2183_v49 = vshll.u32 %v10415_v44, %v10585_v5 }
 0x2ca   :  { %v2120_v8 = vadd.s32 %v2119_v60, %v2115_v21  ;;  %v2184_v17 = vshrl.u32 %v10416_v33, %v6758_v58  ;;  %vm1949_vm12 = vcmp.eq.s32.totalorder %v1947_v36, 0  ;;  %vm1952_vm9 = vcmp.eq.s32.totalorder %v1947_v36, 2 }
 0x2cb   :  { %v2182_v59 = vor.u32 %v2181_v13, %v2180_v15  ;;  %v2186_v9 = vshll.u32 %v10416_v33, %v10585_v5  ;;  %v2187_v10 = vshrl.u32 %v10330_v29, %v6758_v58  ;;  %vm1948_vm5 = vcmp.lt.s32.totalorder %v1947_v36, 2 }
 0x2cc   :  { %v2013_v11 = vadd.s32 %v8454_v45, %v8449_v2  ;;  %vm5296_vm4 = vcmp.lt.s32.totalorder %v5295_v57, 0  ;;  %v2121_v31 = vadd.s32 536870912, %v2120_v8  ;;  %v2185_v40 = vor.u32 %v2184_v17, %v2183_v49 }
 0x2cd   :  { %vm1946_vm0 = vweird.f32 %v10555_v41  ;;  %v2028_v25 = vsel %vm5296_vm4, 0, %v5295_v57  ;;  %v2043_v52 = vsub.s32 4, %v8505_v54  ;;  %v2171_v63 = vor.u32 8388608, %v2170_v61 }
 0x2ce   :  { %v2188_v19 = vor.u32 %v2187_v10, %v2186_v9  ;;  %v2029_v30 = vsub.s32 32, %v2028_v25  ;;  %v2033_v6 = vsub.s32 4294967266, %v2028_v25  ;;  %v8594_v21 = vshrl.u32 %v2121_v31, 30 }
 0x2cf   :  { %vm2195_vm6 = vcmp.lt.s32.totalorder %v10437_v23, 1  ;;  %v2030_v60 = vshll.u32 %v8524_v62, %v2028_v25  ;;  %vm2196_vm2 = vcmp.lt.s32.totalorder %v10437_v23, 2  ;;  %vm2197_vm14 = vcmp.lt.s32.totalorder %v10437_v23, 3 }
 0x2d0   :  { %v2203_v2 = vsel %vm2195_vm6, %v2182_v59, %v2185_v40  ;;  %v5919_v45 = vpop.eup %5918  ;;  %v2031_v5 = vshrl.u32 %v2013_v11, %v2029_v30  ;;  %v2034_v15 = vadd.s32 127, %v2033_v6  ;;  %v2123_v61 = vshll.u32 %v8594_v21, 30 }
 0x2d1   :  { %v2205_v13 = vsel %vm2197_vm14, %v2188_v19, %v7247_v0  ;;  %v5921_v57 = vpop.eup %5920  ;;  %v1953_v49 = vxor.u32 2147483648, %v5919_v45  ;;  %v2200_v62 = vsel %vm2198_vm7, %v2188_v19, 2102212464  ;;  %v2207_v17 = vsel %vm2195_vm6, %v2185_v40, %v2188_v19 }
 0x2d2   :  { %v2209_v9 = vsel %vm2197_vm14, %v6882_v7, %v7257_v27  ;;  %v1950_v10 = vxor.u32 2147483648, %v5921_v57  ;;  %v2032_v11 = vor.u32 %v2031_v5, %v2030_v60  ;;  %v2035_v31 = vshll.u32 %v2034_v15, 23 }
 0x2d3   :  { %v8614_v25 = vsub.s32 %v2120_v8, %v2123_v61  ;;  %v1954_v0 = vsel %vm1952_vm9, %v1953_v49, %v5921_v57  ;;  %v2044_v30 = vsel %vm1959_vm11, %v2043_v52, %v8505_v54  ;;  %v2179_v6 = vshrl.u32 %v10412_v18, %v6758_v58 }
 0x2d4   :  { %v2206_v19 = vsel %vm2196_vm2, %v2203_v2, %v2205_v13  ;;  %v1951_v38 = vsel %vm1949_vm12, %v5919_v45, %v1950_v10  ;;  %v2036_v7 = vor.u32 4788187, %v2035_v31  ;;  %v2210_v8 = vsel %vm2196_vm2, %v2207_v17, %v2209_v9 }
 0x2d5   :  { %v2126_v27 = vsub.s32 0, %v8614_v25  ;;  %v1955_v60 = vsel %vm1948_vm5, %v1951_v38, %v1954_v0  ;;  %v2199_v5 = vsel %vm2195_vm6, %v2179_v6, %v2182_v59  ;;  %v2201_v54 = vsel %vm2197_vm14, %v2185_v40, %v2200_v62 }
 0x2d6   :  { %v2211_v58 = vshll.u32 %v2171_v63, 8  ;;  %v1956_v52 = vsel %vm1946_vm0, nan, %v1955_v60  ;;  %v2037_v2 = vand.u32 2147483647, %v2036_v7  ;;  %v2039_v45 = vcvt.s32.f32 %v2032_v11  ;;  %v10589_v11 = vld [vmem:[#allocation88_spill] sm:$0xff] }
 0x2d7   :  { %v5298_v15 = vmin.u32 %v2126_v27, %v8614_v25  ;;  %5545 = vmatmul.mubr.msk.f32.gmra.mrb[14].mxu1 %vm2781_vm10, %v1956_v52  ;;  %v8646_v59 = vor.u32 %v8435_v12, %v8346_v53  ;;  %v10586_v41 = vand.u32 2147483647, %v10566_v46  ;;  %v2503_v49 = vor.u32 %v8557_v28, %v8354_v4 }
 0x2d8   :  { %v8637_v61 = vmul.u32.u64.low %v2211_v58, %v2210_v8  ;;  %v8638_v13 = vmul.u32.u64.high %v2211_v58, %v2210_v8, %v8637_v61  ;;  %v8640_v38 = vmul.u32.u64.low %v2211_v58, %v2206_v19  ;;  %v8641_v36 = vmul.u32.u64.high %v2211_v58, %v2206_v19, %v8640_v38 }
 0x2d9   :  { %vm8650_vm7 = vcmp.le.f32.partialorder %v10586_v41, 0.7853982  ;;  %v2040_v63 = vmul.f32 %v2039_v45, %v2037_v2  ;;  %v2128_v57 = vclz %v5298_v15  ;;  %v8657_v62 = vand.u32 31, %v8572_v20 }
 0x2da   :  { %v2046_v17 = vsel %vm8650_vm7, 0, %v2044_v30  ;;  %v2202_v12 = vsel %vm2196_vm2, %v2199_v5, %v2201_v54  ;;  %v6090_v10 = vmov 0.0|0.0   ;;  %v2266_v31 = vand.u32 2147483647, %v10589_v11 }
 0x2db   :  { %v2041_v9 = vxor.u32 2147483648, %v2040_v63  ;;  %v5299_v53 = vadd.s32 4294967294, %v2128_v57  ;;  %5679 = vmatprep.subr.bf16.mxu0 %v6090_v10  ;;  %v8667_v0 = vor.u32 %v8564_v14, %v8418_v39  ;;  %v2606_v6 = vor.u32 %v8569_v34, %v8439_v55 }
 0x2dc   :  { %vm2220_vm1 = vc.u32 %v8638_v13, %v8640_v38  ;;  %v2221_v30 = vadd.s32 1, %v8641_v36  ;;  %v8676_v19 = vand.u32 3, %v2046_v17  ;;  %v2116_v7 = vadd.s32 %v8536_v42, %v8520_v32 }
 0x2dd   :  { %v2042_v23 = vsel %vm1959_vm11, %v2041_v9, %v2040_v63  ;;  %vm5300_vm13 = vcmp.lt.s32.totalorder %v5299_v53, 0  ;;  %v2218_v27 = vmul.u32 %v2211_v58, %v2202_v12  ;;  %vm2062_vm8 = vcmp.lt.s32.totalorder %v10577_v37, 0  ;;  %v10590_v58 = vld [vmem:[#allocation113_spill] sm:$0xff] }
 0x2de   :  { %v2045_v39 = vsel %vm8650_vm7, %v10566_v46, %v2042_v23  ;;  %v2131_v14 = vsel %vm5300_vm13, 0, %v5299_v53  ;;  %v2222_v8 = vsel %vm2220_vm1, %v2221_v30, %v8641_v36  ;;  %v2273_v54 = vand.u32 8388607, %v2266_v31  ;;  %v10596_v53 = vld [vmem:[#allocation90_spill] sm:$0xff] }
 0x2df   :  { %5922 = vcosq.f32 %v2045_v39  ;;  %v2132_v60 = vsub.s32 32, %v2131_v14  ;;  %v2136_v5 = vsub.s32 4294967266, %v2131_v14  ;;  %v2133_v32 = vshll.u32 %v8614_v25, %v2131_v14  ;;  %v10593_v14 = vld [vmem:[#allocation112_spill] sm:$0xff] }
 0x2e0   :  { %5924 = vsinq.f32 %v2045_v39  ;;  %v2223_v42 = vadd.s32 %v2222_v8, %v2218_v27  ;;  %v2284_v52 = vshrl.u32 %v10415_v44, %v7039_v24  ;;  %v2286_v15 = vshll.u32 %v10415_v44, %v10590_v58  ;;  %v10594_v27 = vld [vmem:[#allocation30_spill] sm:$0xff] }
 0x2e1   :  { %v2134_v2 = vshrl.u32 %v2116_v7, %v2132_v60  ;;  %v2137_v45 = vadd.s32 127, %v2136_v5  ;;  %v2287_v61 = vshrl.u32 %v10416_v33, %v7039_v24  ;;  %v2283_v41 = vshll.u32 %v10412_v18, %v10590_v58 }
 0x2e2   :  { %v2224_v36 = vadd.s32 536870912, %v2223_v42  ;;  %v2289_v40 = vshll.u32 %v10416_v33, %v10590_v58  ;;  %v2290_v25 = vshrl.u32 %v10330_v29, %v7039_v24  ;;  %v2146_v17 = vsub.s32 4, %v8594_v21 }
 0x2e3   :  { %v2135_v63 = vor.u32 %v2134_v2, %v2133_v32  ;;  %v2138_v57 = vshll.u32 %v2137_v45, 23  ;;  %v2288_v9 = vor.u32 %v2287_v61, %v2286_v15  ;;  %vm8703_vm11 = vcmp.le.f32.partialorder %v2060_v26, 0.7853982  ;;  %v51_v2 = vld [vmem:[%s10111_s3] sm:$0xff]  ;;  %v52_v45 = vld [vmem:[%s10111_s3 + $0x8] sm:$0xff] }
 0x2e4   :  { %v8707_v12 = vshrl.u32 %v2224_v36, 30  ;;  %v2285_v30 = vor.u32 %v2284_v52, %v2283_v41  ;;  %v2291_v23 = vor.u32 %v2290_v25, %v2289_v40  ;;  %vm2300_vm12 = vcmp.lt.s32.totalorder %v6859_v48, 3  ;;  %v10595_v25 = vld [vmem:[#allocation14_spill] sm:$0xff] }
 0x2e5   :  { %vm2055_vm9 = vcmp.eq.s32.totalorder %v8676_v19, 2  ;;  %v2139_v7 = vor.u32 4788187, %v2138_v57  ;;  %v2274_v39 = vor.u32 8388608, %v2273_v54  ;;  %v2312_v8 = vsel %vm2300_vm12, %v10594_v27, %v10593_v14 }
 0x2e6   :  { %vm2049_vm5 = vweird.f32 %v10566_v46  ;;  %v2226_v26 = vshll.u32 %v8707_v12, 30  ;;  %v2282_v60 = vshrl.u32 %v10412_v18, %v7039_v24  ;;  %vm2298_vm4 = vcmp.lt.s32.totalorder %v6859_v48, 1 }
 0x2e7   :  { %vm2299_vm0 = vcmp.lt.s32.totalorder %v6859_v48, 2  ;;  %v2140_v5 = vand.u32 2147483647, %v2139_v7  ;;  %v2142_v32 = vcvt.s32.f32 %v2135_v63  ;;  %v2303_v54 = vsel %vm2301_vm15, %v2291_v23, 2102212464 }
 0x2e8   :  { %v2310_v52 = vsel %vm2298_vm4, %v2288_v9, %v2291_v23  ;;  %v2147_v24 = vsel %vm2062_vm8, %v2146_v17, %v8594_v21  ;;  %v8732_v58 = vsub.s32 %v2223_v42, %v2226_v26  ;;  %v2302_v15 = vsel %vm2298_vm4, %v2282_v60, %v2285_v30 }
 0x2e9   :  { %v2313_v61 = vsel %vm2299_vm0, %v2310_v52, %v2312_v8  ;;  %v5923_v36 = vpop.eup %5922  ;;  %v2143_v41 = vmul.f32 %v2142_v32, %v2140_v5  ;;  %v2306_v40 = vsel %vm2298_vm4, %v2285_v30, %v2288_v9  ;;  %v2308_v63 = vsel %vm2300_vm12, %v2291_v23, %v10595_v25 }
 0x2ea   :  { %v2314_v57 = vshll.u32 %v2274_v39, 8  ;;  %v5925_v7 = vpop.eup %5924  ;;  %v2056_v14 = vxor.u32 2147483648, %v5923_v36  ;;  %v2229_v27 = vsub.s32 0, %v8732_v58  ;;  %v2304_v21 = vsel %vm2300_vm12, %v2288_v9, %v2303_v54 }
 0x2eb   :  { %v5680_v42 = vpack.c.bf16 %v52_v45, %v51_v2  ;;  %v2053_v17 = vxor.u32 2147483648, %v5925_v7  ;;  %v2144_v26 = vxor.u32 2147483648, %v2143_v41  ;;  %vm2052_vm15 = vcmp.eq.s32.totalorder %v8676_v19, 0 }
 0x2ec   :  { %v8742_v60 = vmul.u32.u64.low %v2314_v57, %v2313_v61  ;;  %v8743_v8 = vmul.u32.u64.high %v2314_v57, %v2313_v61, %v8742_v60  ;;  %v2057_v30 = vsel %vm2055_vm9, %v2056_v14, %v5925_v7  ;;  %v5302_v23 = vmin.u32 %v2229_v27, %v8732_v58 }
 0x2ed   :  { %v2309_v39 = vsel %vm2299_vm0, %v2306_v40, %v2308_v63  ;;  %5681 = vmatpush3.bf16.msra.mxu0 %v5680_v42  ;;  %vm2051_vm6 = vcmp.lt.s32.totalorder %v8676_v19, 2  ;;  %v2054_v9 = vsel %vm2052_vm15, %v5923_v36, %v2053_v17  ;;  %v2145_v5 = vsel %vm2062_vm8, %v2144_v26, %v2143_v41  ;;  %v10597_v63 = vld [vmem:[#allocation20_spill] sm:$0xff] }
 0x2ee   :  { %v2149_v32 = vsel %vm8703_vm11, 0, %v2147_v24  ;;  %v2058_v54 = vsel %vm2051_vm6, %v2054_v9, %v2057_v30  ;;  %v2148_v52 = vsel %vm8703_vm11, %v10577_v37, %v2145_v5  ;;  %v2231_v2 = vclz %v5302_v23  ;;  %v22_v5 = vld [vmem:[%s10108_s0 + $0x8] sm:$0xff] }
 0x2ef   :  { %v2305_v45 = vsel %vm2299_vm0, %v2302_v15, %v2304_v21  ;;  %v2059_v61 = vsel %vm2049_vm5, nan, %v2058_v54  ;;  %5926 = vcosq.f32 %v2148_v52  ;;  %v8768_v24 = vand.u32 3, %v2149_v32  ;;  %v10598_v21 = vld [vmem:[#allocation114_spill] sm:$0xff] }
 0x2f0   :  { %v8763_v19 = vmul.u32.u64.low %v2314_v57, %v2309_v39  ;;  %v8764_v36 = vmul.u32.u64.high %v2314_v57, %v2309_v39, %v8763_v19  ;;  %5547 = vmatprep.mubr.msk.f32.mxu1 %vm2781_vm10, %v2059_v61  ;;  %5928 = vsinq.f32 %v2148_v52  ;;  %v5303_v41 = vadd.s32 4294967294, %v2231_v2 }
 0x2f1   :  { %v2369_v40 = vand.u32 2147483647, %v10596_v53  ;;  %v8772_v25 = vsub.s32 32, %v8657_v62  ;;  %vm2165_vm2 = vcmp.lt.s32.totalorder %v10584_v50, 0  ;;  %v2219_v48 = vadd.s32 %v8640_v38, %v8638_v13 }
 0x2f2   :  { %v2249_v46 = vsub.s32 4, %v8707_v12  ;;  %vm5304_vm14 = vcmp.lt.s32.totalorder %v5303_v41, 0  ;;  %v2321_v15 = vmul.u32 %v2314_v57, %v2305_v45  ;;  %vm2323_vm7 = vc.u32 %v8743_v8, %v8763_v19 }
 0x2f3   :  { %v2387_v7 = vshrl.u32 %v10415_v44, %v10597_v63  ;;  %v2234_v14 = vsel %vm5304_vm14, 0, %v5303_v41  ;;  %v2324_v27 = vadd.s32 1, %v8764_v36  ;;  %v2389_v42 = vshll.u32 %v10415_v44, %v10598_v21 }
 0x2f4   :  { %v2390_v17 = vshrl.u32 %v10416_v33, %v10597_v63  ;;  %vm2155_vm1 = vcmp.eq.s32.totalorder %v8768_v24, 0  ;;  %v2235_v13 = vsub.s32 32, %v2234_v14  ;;  %v2239_v38 = vsub.s32 4294967266, %v2234_v14 }
 0x2f5   :  { %v2376_v57 = vand.u32 8388607, %v2369_v40  ;;  %v2386_v26 = vshll.u32 %v10412_v18, %v10598_v21  ;;  %vm2154_vm13 = vcmp.lt.s32.totalorder %v8768_v24, 2  ;;  %v2325_v60 = vsel %vm2323_vm7, %v2324_v27, %v8764_v36 }
 0x2f6   :  { %v2391_v30 = vor.u32 %v2390_v17, %v2389_v42  ;;  %v2392_v23 = vshll.u32 %v10416_v33, %v10598_v21  ;;  %v2393_v39 = vshrl.u32 %v10330_v29, %v10597_v63  ;;  %vm2152_vm8 = vweird.f32 %v10577_v37  ;;  %v21_v37 = vld [vmem:[%s10108_s0] sm:$0xff] }
 0x2f7   :  { %v10599_v9 = vand.u32 2147483647, %v10584_v50  ;;  %v2236_v32 = vshll.u32 %v8732_v58, %v2234_v14  ;;  %v2237_v54 = vshrl.u32 %v2219_v48, %v2235_v13  ;;  %v2240_v52 = vadd.s32 127, %v2239_v38 }
 0x2f8   :  { %v2326_v2 = vadd.s32 %v2325_v60, %v2321_v15  ;;  %vm2158_vm12 = vcmp.eq.s32.totalorder %v8768_v24, 2  ;;  %v2388_v45 = vor.u32 %v2387_v7, %v2386_v26  ;;  %v2394_v61 = vor.u32 %v2393_v39, %v2392_v23 }
 0x2f9   :  { %vm8801_vm11 = vcmp.le.f32.partialorder %v10599_v9, 0.7853982  ;;  %vm2401_vm9 = vcmp.lt.s32.totalorder %v6948_v56, 1  ;;  %v2238_v36 = vor.u32 %v2237_v54, %v2236_v32  ;;  %v2241_v41 = vshll.u32 %v2240_v52, 23  ;;  %v5927_v21 = vpop.eup %5926 }
 0x2fa   :  { %v2327_v27 = vadd.s32 536870912, %v2326_v2  ;;  %vm2403_vm5 = vcmp.lt.s32.totalorder %v6948_v56, 3  ;;  %vm2507_vm4 = vcmp.lt.s32.totalorder %v8229_v1, 4  ;;  %v2250_v58 = vsel %vm2165_vm2, %v2249_v46, %v8707_v12  ;;  %v5929_v14 = vpop.eup %5928  ;;  %v10602_v46 = vld [vmem:[#allocation24_spill] sm:$0xff] }
 0x2fb   :  { %v2377_v48 = vor.u32 8388608, %v2376_v57  ;;  %v2413_v15 = vsel %vm2401_vm9, %v2391_v30, %v2394_v61  ;;  %v2415_v7 = vsel %vm2403_vm5, %v7706_v43, %v8127_v47  ;;  %v2159_v42 = vxor.u32 2147483648, %v5927_v21 }
 0x2fc   :  { %v2242_v17 = vor.u32 4788187, %v2241_v41  ;;  %v8819_v13 = vshrl.u32 %v2327_v27, 30  ;;  %vm2402_vm0 = vcmp.lt.s32.totalorder %v6948_v56, 2  ;;  %v2156_v38 = vxor.u32 2147483648, %v5929_v14 }
 0x2fd   :  { %v2245_v26 = vcvt.s32.f32 %v2238_v36  ;;  %v2409_v12 = vsel %vm2401_vm9, %v2388_v45, %v2391_v30  ;;  %v2411_v57 = vsel %vm2403_vm5, %v2394_v61, %v10602_v46  ;;  %v2160_v60 = vsel %vm2158_vm12, %v2159_v42, %v5929_v14  ;;  %v10603_v46 = vld [vmem:[#allocation31_spill] sm:$0xff] }
 0x2fe   :  { %v2243_v43 = vand.u32 2147483647, %v2242_v17  ;;  %v2329_v47 = vshll.u32 %v8819_v13, 30  ;;  %v2416_v23 = vsel %vm2402_vm0, %v2413_v15, %v2415_v7  ;;  %v2157_v39 = vsel %vm2155_vm1, %v5927_v21, %v2156_v38 }
 0x2ff   :  { %v2385_v9 = vshrl.u32 %v10412_v18, %v10597_v63  ;;  %v2406_v32 = vsel %vm2404_vm3, %v2394_v61, 2102212464  ;;  %v2417_v54 = vshll.u32 %v2377_v48, 8  ;;  %v2161_v52 = vsel %vm2154_vm13, %v2157_v39, %v2160_v60 }
 0x300   :  { %v2246_v36 = vmul.f32 %v2245_v26, %v2243_v43  ;;  %v8840_v41 = vsub.s32 %v2326_v2, %v2329_v47  ;;  %v2412_v27 = vsel %vm2402_vm0, %v2409_v12, %v2411_v57  ;;  %v2162_v15 = vsel %vm2152_vm8, nan, %v2161_v52  ;;  %v10604_v52 = vld [vmem:[#allocation27_spill] sm:$0xff] }
 0x301   :  { %v2252_v21 = vsel %vm8801_vm11, 0, %v2250_v58  ;;  %v8848_v63 = vmul.u32.u64.low %v2417_v54, %v2416_v23  ;;  %v8849_v7 = vmul.u32.u64.high %v2417_v54, %v2416_v23, %v8848_v63  ;;  %5548 = vmatmul.mubr.msk.f32.gmra.mrb[16].mxu1 %vm2781_vm10, %v2162_v15  ;;  %v2405_v2 = vsel %vm2401_vm9, %v2385_v9, %v2388_v45 }
 0x302   :  { %v2247_v61 = vxor.u32 2147483648, %v2246_v36  ;;  %v2332_v24 = vsub.s32 0, %v8840_v41  ;;  %v2407_v48 = vsel %vm2403_vm5, %v2391_v30, %v2406_v32  ;;  %v8867_v42 = vsel %vm2507_vm4, %v8646_v59, 920167782 }
 0x303   :  { %v8860_v14 = vmul.u32.u64.low %v2417_v54, %v2412_v27  ;;  %v8861_v58 = vmul.u32.u64.high %v2417_v54, %v2412_v27, %v8860_v14  ;;  %v2517_v45 = vsel %vm2507_vm4, %v2503_v49, 1326507024  ;;  %vm6091_vm3 = vmmov 0  }
 0x304   :  { %v2248_v30 = vsel %vm2165_vm2, %v2247_v61, %v2246_v36  ;;  %v5306_v17 = vmin.u32 %v2332_v24, %v8840_v41  ;;  %v6092_v38 = vmov 0.0   ;;  %v8881_v26 = vshrl.u32 %v10335_v3, %v8772_v25 }
 0x305   :  { %5510 = vmatprep.mubr.msk.f32.mxu0 %vm6091_vm3, %v6092_v38  ;;  %v2251_v4 = vsel %vm8801_vm11, %v10584_v50, %v2248_v30  ;;  %v8886_v28 = vand.u32 3, %v2252_v21  ;;  %v2408_v49 = vsel %vm2402_vm0, %v2405_v2, %v2407_v48  ;;  %vm2426_vm15 = vc.u32 %v8849_v7, %v8860_v14 }
 0x306   :  { %5511 = vmatmul.mubr.msk.f32.vlgmr.msra.gmra.mrb[0].mxu0 %vm2781_vm10, %v21_v37  ;;  %5930 = vcosq.f32 %v2251_v4  ;;  %v2334_v12 = vclz %v5306_v17  ;;  %v2472_v57 = vand.u32 2147483647, %v10603_v46  ;;  %v8901_v56 = vshrl.u32 %v10332_v35, %v8772_v25 }
 0x307   :  { %5513 = vmatprep.mubr.msk.f32.mxu0 %vm6091_vm3, %v6092_v38  ;;  %5932 = vsinq.f32 %v2251_v4  ;;  %vm2268_vm6 = vcmp.lt.s32.totalorder %v10589_v11, 0  ;;  %v2427_v60 = vadd.s32 1, %v8861_v58  ;;  %v2322_v43 = vadd.s32 %v8763_v19, %v8743_v8 }
 0x308   :  { %v5307_v47 = vadd.s32 4294967294, %v2334_v12  ;;  %v2352_v23 = vsub.s32 4, %v8819_v13  ;;  %v2424_v39 = vmul.u32 %v2417_v54, %v2408_v49  ;;  %v2490_v32 = vshrl.u32 %v10415_v44, %v8245_v51 }
 0x309   :  { %v2428_v9 = vsel %vm2426_vm15, %v2427_v60, %v8861_v58  ;;  %v2492_v35 = vshll.u32 %v10415_v44, %v10604_v52  ;;  %v2493_v36 = vshrl.u32 %v10416_v33, %v8245_v51  ;;  %vm2261_vm2 = vcmp.eq.s32.totalorder %v8886_v28, 2 }
 0x30a   :  { %5514 = vmatmul.mubr.msk.f32.gmra.mrb[2].mxu0 %vm2781_vm10, %v22_v5  ;;  %vm5308_vm14 = vcmp.lt.s32.totalorder %v5307_v47, 0  ;;  %v2429_v8 = vadd.s32 %v2428_v9, %v2424_v39  ;;  %v2479_v19 = vand.u32 8388607, %v2472_v57  ;;  %v2489_v54 = vshll.u32 %v10412_v18, %v10604_v52 }
 0x30b   :  { %5516 = vmatprep.mubr.msk.f32.mxu0 %vm6091_vm3, %v6092_v38  ;;  %vm2258_vm7 = vcmp.eq.s32.totalorder %v8886_v28, 0  ;;  %v2337_v27 = vsel %vm5308_vm14, 0, %v5307_v47  ;;  %v2494_v15 = vor.u32 %v2493_v36, %v2492_v35  ;;  %v2495_v21 = vshll.u32 %v10416_v33, %v10604_v52  ;;  %v10605_v47 = vld [vmem:[#allocation107_spill] sm:$0xff] }
 0x30c   :  { %v2496_v63 = vshrl.u32 %v10330_v29, %v8245_v51  ;;  %vm2257_vm1 = vcmp.lt.s32.totalorder %v8886_v28, 2  ;;  %v2338_v61 = vsub.s32 32, %v2337_v27  ;;  %v2342_v24 = vsub.s32 4294967266, %v2337_v27 }
 0x30d   :  { %v8932_v2 = vsel %vm2268_vm6, %v2352_v23, %v8819_v13  ;;  %v2430_v48 = vadd.s32 536870912, %v2429_v8  ;;  %vm2255_vm13 = vweird.f32 %v10584_v50  ;;  %v2339_v37 = vshll.u32 %v8840_v41, %v2337_v27 }
 0x30e   :  { %v2491_v58 = vor.u32 %v2490_v32, %v2489_v54  ;;  %v2497_v30 = vor.u32 %v2496_v63, %v2495_v21  ;;  %vm2504_vm8 = vcmp.lt.s32.totalorder %v8229_v1, 1  ;;  %v2340_v17 = vshrl.u32 %v2322_v43, %v2338_v61 }
 0x30f   :  { %v2343_v4 = vadd.s32 127, %v2342_v24  ;;  %v8937_v49 = vshrl.u32 %v2430_v48, 30  ;;  %vm2506_vm11 = vcmp.lt.s32.totalorder %v8229_v1, 3  ;;  %v2480_v12 = vor.u32 8388608, %v2479_v19  ;;  %v23_v48 = vld [vmem:[%s10108_s0 + $0x10] sm:$0xff] }
 0x310   :  { %v2488_v13 = vshrl.u32 %v10412_v18, %v8245_v51  ;;  %v2516_v5 = vsel %vm2504_vm8, %v2494_v15, %v2497_v30  ;;  %v2518_v41 = vsel %vm2506_vm11, %v8646_v59, %v2517_v45  ;;  %v5931_v60 = vpop.eup %5930  ;;  %vm2610_vm12 = vcmp.lt.s32.totalorder %v10605_v47, 4  ;;  %5517 = vmatmul.mubr.msk.f32.gmra.mrb[4].mxu0 %vm2781_vm10, %v23_v48 }
 0x311   :  { %v2341_v43 = vor.u32 %v2340_v17, %v2339_v37  ;;  %v2344_v23 = vshll.u32 %v2343_v4, 23  ;;  %v2432_v39 = vshll.u32 %v8937_v49, 30  ;;  %v2509_v9 = vsel %vm2507_vm4, %v2497_v30, 2102212464  ;;  %v5933_v32 = vpop.eup %5932 }
 0x312   :  { %v2262_v52 = vxor.u32 2147483648, %v5931_v60  ;;  %vm2505_vm9 = vcmp.lt.s32.totalorder %v8229_v1, 2  ;;  %v2512_v51 = vsel %vm2504_vm8, %v2491_v58, %v2494_v15  ;;  %v2514_v59 = vsel %vm2506_vm11, %v2497_v30, %v8867_v42 }
 0x313   :  { %v2259_v45 = vxor.u32 2147483648, %v5933_v32  ;;  %v2345_v35 = vor.u32 4788187, %v2344_v23  ;;  %v8957_v36 = vsub.s32 %v2429_v8, %v2432_v39  ;;  %v2519_v19 = vsel %vm2505_vm9, %v2516_v5, %v2518_v41 }
 0x314   :  { %v2263_v54 = vsel %vm2261_vm2, %v2262_v52, %v5933_v32  ;;  %v2508_v27 = vsel %vm2504_vm8, %v2488_v13, %v2491_v58  ;;  %v2510_v21 = vsel %vm2506_vm11, %v2494_v15, %v2509_v9  ;;  %v2520_v63 = vshll.u32 %v2480_v12, 8 }
 0x315   :  { %v2260_v42 = vsel %vm2258_vm7, %v5931_v60, %v2259_v45  ;;  %v2346_v61 = vand.u32 2147483647, %v2345_v35  ;;  %v2348_v24 = vcvt.s32.f32 %v2341_v43  ;;  %v2435_v8 = vsub.s32 0, %v8957_v36 }
 0x316   :  { %v2264_v37 = vsel %vm2257_vm1, %v2260_v42, %v2263_v54  ;;  %v2515_v58 = vsel %vm2505_vm9, %v2512_v51, %v2514_v59  ;;  %v8977_v30 = vmul.u32.u64.low %v2520_v63, %v2519_v19  ;;  %v8978_v15 = vmul.u32.u64.high %v2520_v63, %v2519_v19, %v8977_v30 }
 0x317   :  { %v2265_v17 = vsel %vm2255_vm13, nan, %v2264_v37  ;;  %vm8985_vm5 = vcmp.le.f32.partialorder %v2266_v31, 0.7853982  ;;  %v2349_v12 = vmul.f32 %v2348_v24, %v2346_v61  ;;  %v5310_v28 = vmin.u32 %v2435_v8, %v8957_v36 }
 0x318   :  { %v2704_v13 = vshll.u32 %v10330_v29, %v8657_v62  ;;  %v8994_v5 = vshll.u32 %v10335_v3, %v8657_v62  ;;  %5550 = vmatprep.mubr.msk.f32.mxu1 %vm2781_vm10, %v2265_v17  ;;  %v2355_v50 = vsel %vm8985_vm5, 0, %v8932_v2  ;;  %v2511_v31 = vsel %vm2505_vm9, %v2508_v27, %v2510_v21 }
 0x319   :  { %v2350_v41 = vxor.u32 2147483648, %v2349_v12  ;;  %v2437_v60 = vclz %v5310_v28  ;;  %v9002_v43 = vmul.u32.u64.low %v2520_v63, %v2515_v58  ;;  %v9003_v23 = vmul.u32.u64.high %v2520_v63, %v2515_v58, %v9002_v43 }
 0x31a   :  { %v2616_v3 = vsel %vm2610_vm12, %v8667_v0, 920167782  ;;  %v2620_v39 = vsel %vm2610_vm12, %v2606_v6, 1326507024  ;;  %v9015_v2 = vshrl.u32 %v8572_v20, 5  ;;  %v9018_v1 = vor.u32 %v8881_v26, %v2704_v13  ;;  %v10608_v26 = vld [vmem:[#allocation23_spill] sm:$0xff] }
 0x31b   :  { %v2709_v9 = vor.u32 %v8901_v56, %v8994_v5  ;;  %v2351_v32 = vsel %vm2268_vm6, %v2350_v41, %v2349_v12  ;;  %v9024_v52 = vand.u32 3, %v2355_v50  ;;  %v5311_v51 = vadd.s32 4294967294, %v2437_v60 }
 0x31c   :  { %v2354_v55 = vsel %vm8985_vm5, %v10589_v11, %v2351_v32  ;;  %v2425_v34 = vadd.s32 %v8860_v14, %v8849_v7  ;;  %v2527_v20 = vmul.u32 %v2520_v63, %v2511_v31  ;;  %vm2529_vm4 = vc.u32 %v8978_v15, %v9002_v43 }
 0x31d   :  { %5934 = vcosq.f32 %v2354_v55  ;;  %vm2371_vm0 = vcmp.lt.s32.totalorder %v10596_v53, 0  ;;  %vm5312_vm15 = vcmp.lt.s32.totalorder %v5311_v51, 0  ;;  %v2530_v6 = vadd.s32 1, %v9003_v23 }
 0x31e   :  { %v2575_v59 = vand.u32 2147483647, %v10608_v26  ;;  %5936 = vsinq.f32 %v2354_v55  ;;  %v2440_v45 = vsel %vm5312_vm15, 0, %v5311_v51  ;;  %v2592_v35 = vshll.u32 %v10412_v18, %v8237_v22 }
 0x31f   :  { %v2593_v7 = vshrl.u32 %v10415_v44, %v8357_v16  ;;  %v2441_v14 = vsub.s32 32, %v2440_v45  ;;  %v2445_v19 = vsub.s32 4294967266, %v2440_v45  ;;  %v2531_v54 = vsel %vm2529_vm4, %v2530_v6, %v9003_v23 }
 0x320   :  { %v2595_v27 = vshll.u32 %v10415_v44, %v8237_v22  ;;  %v2532_v21 = vadd.s32 %v2531_v54, %v2527_v20  ;;  %v2596_v63 = vshrl.u32 %v10416_v33, %v8357_v16  ;;  %v2598_v42 = vshll.u32 %v10416_v33, %v8237_v22 }
 0x321   :  { %v2599_v61 = vshrl.u32 %v10330_v29, %v8357_v16  ;;  %v2442_v24 = vshll.u32 %v8957_v36, %v2440_v45  ;;  %v2443_v8 = vshrl.u32 %v2425_v34, %v2441_v14  ;;  %v2446_v48 = vadd.s32 127, %v2445_v19 }
 0x322   :  { %v2582_v37 = vand.u32 8388607, %v2575_v59  ;;  %v2455_v58 = vsub.s32 4, %v8937_v49  ;;  %v2533_v30 = vadd.s32 536870912, %v2532_v21  ;;  %v2597_v17 = vor.u32 %v2596_v63, %v2595_v27 }
 0x323   :  { %v2600_v4 = vor.u32 %v2599_v61, %v2598_v42  ;;  %vm2360_vm6 = vcmp.lt.s32.totalorder %v9024_v52, 2  ;;  %v2444_v12 = vor.u32 %v2443_v8, %v2442_v24  ;;  %v2447_v28 = vshll.u32 %v2446_v48, 23 }
 0x324   :  { %v2594_v22 = vor.u32 %v2593_v7, %v2592_v35  ;;  %vm2358_vm2 = vweird.f32 %v10589_v11  ;;  %vm2361_vm14 = vcmp.eq.s32.totalorder %v9024_v52, 0  ;;  %vm2364_vm7 = vcmp.eq.s32.totalorder %v9024_v52, 2 }
 0x325   :  { %vm9059_vm1 = vcmp.le.f32.partialorder %v2369_v40, 0.7853982  ;;  %v9063_v13 = vshrl.u32 %v2533_v30, 30  ;;  %vm2609_vm13 = vcmp.lt.s32.totalorder %v10605_v47, 3  ;;  %v2448_v50 = vor.u32 4788187, %v2447_v28 }
 0x326   :  { %v2583_v31 = vor.u32 8388608, %v2582_v37  ;;  %vm2607_vm8 = vcmp.lt.s32.totalorder %v10605_v47, 1  ;;  %v2621_v41 = vsel %vm2609_vm13, %v8667_v0, %v2620_v39  ;;  %v2456_v60 = vsel %vm2371_vm0, %v2455_v58, %v8937_v49  ;;  %v10611_v37 = vld [vmem:[#allocation21_spill] sm:$0xff] }
 0x327   :  { %v2535_v40 = vshll.u32 %v9063_v13, 30  ;;  %vm2608_vm11 = vcmp.lt.s32.totalorder %v10605_v47, 2  ;;  %v2619_v23 = vsel %vm2607_vm8, %v2597_v17, %v2600_v4  ;;  %v5935_v32 = vpop.eup %5934  ;;  %v2449_v51 = vand.u32 2147483647, %v2448_v50 }
 0x328   :  { %v2451_v55 = vcvt.s32.f32 %v2444_v12  ;;  %v2615_v34 = vsel %vm2607_vm8, %v2594_v22, %v2597_v17  ;;  %v2617_v0 = vsel %vm2609_vm13, %v2600_v4, %v2616_v3  ;;  %v5937_v39 = vpop.eup %5936  ;;  %v2365_v20 = vxor.u32 2147483648, %v5935_v32 }
 0x329   :  { %v9081_v6 = vsub.s32 %v2532_v21, %v2535_v40  ;;  %v2591_v49 = vshrl.u32 %v10412_v18, %v8357_v16  ;;  %v2622_v45 = vsel %vm2608_vm11, %v2619_v23, %v2621_v41  ;;  %v2362_v35 = vxor.u32 2147483648, %v5937_v39 }
 0x32a   :  { %v2452_v7 = vmul.f32 %v2451_v55, %v2449_v51  ;;  %v2612_v14 = vsel %vm2610_vm12, %v2600_v4, 2102212464  ;;  %v2623_v19 = vshll.u32 %v2583_v31, 8  ;;  %v2366_v54 = vsel %vm2364_vm7, %v2365_v20, %v5937_v39 }
 0x32b   :  { %v2538_v3 = vsub.s32 0, %v9081_v6  ;;  %v2611_v27 = vsel %vm2607_vm8, %v2591_v49, %v2594_v22  ;;  %v2618_v16 = vsel %vm2608_vm11, %v2615_v34, %v2617_v0  ;;  %v2363_v21 = vsel %vm2361_vm14, %v5935_v32, %v2362_v35 }
 0x32c   :  { %v2453_v63 = vxor.u32 2147483648, %v2452_v7  ;;  %v9098_v42 = vmul.u32.u64.low %v2623_v19, %v2622_v45  ;;  %v9099_v61 = vmul.u32.u64.high %v2623_v19, %v2622_v45, %v9098_v42  ;;  %v2367_v24 = vsel %vm2360_vm6, %v2363_v21, %v2366_v54 }
 0x32d   :  { %v5314_v8 = vmin.u32 %v2538_v3, %v9081_v6  ;;  %v2613_v48 = vsel %vm2609_vm13, %v2597_v17, %v2612_v14  ;;  %v2678_v58 = vand.u32 2147483647, %v10611_v37  ;;  %vm2713_vm12 = vcmp.lt.s32.totalorder %v9015_v2, 4 }
 0x32e   :  { %v2368_v30 = vsel %vm2358_vm2, nan, %v2367_v24  ;;  %v2454_v4 = vsel %vm2371_vm0, %v2453_v63, %v2452_v7  ;;  %v2458_v12 = vsel %vm9059_vm1, 0, %v2456_v60  ;;  %v2719_v11 = vsel %vm2713_vm12, %v9018_v1, 920167782 }
 0x32f   :  { %5551 = vmatmul.mubr.msk.f32.gmra.mrb[18].mxu1 %vm2781_vm10, %v2368_v30  ;;  %v2457_v52 = vsel %vm9059_vm1, %v10596_v53, %v2454_v4  ;;  %v2540_v17 = vclz %v5314_v8  ;;  %v9118_v28 = vmul.u32.u64.low %v2623_v19, %v2618_v16  ;;  %v9119_v22 = vmul.u32.u64.high %v2623_v19, %v2618_v16, %v9118_v28 }
 0x330   :  { %v2723_v50 = vsel %vm2713_vm12, %v2709_v9, 1326507024  ;;  %5938 = vcosq.f32 %v2457_v52  ;;  %v2614_v36 = vsel %vm2608_vm11, %v2611_v27, %v2613_v48  ;;  %v2462_v31 = vand.u32 3, %v2458_v12 }
 0x331   :  { %5940 = vsinq.f32 %v2457_v52  ;;  %v5315_v41 = vadd.s32 4294967294, %v2540_v17  ;;  %v2685_v60 = vand.u32 8388607, %v2678_v58  ;;  %vm2632_vm9 = vc.u32 %v9099_v61, %v9118_v28 }
 0x332   :  { %v2696_v40 = vshrl.u32 %v10415_v44, %v8772_v25  ;;  %v2698_v56 = vshll.u32 %v10415_v44, %v8657_v62  ;;  %v2699_v5 = vshrl.u32 %v10416_v33, %v8772_v25  ;;  %v2630_v47 = vmul.u32 %v2623_v19, %v2614_v36 }
 0x333   :  { %vm5316_vm5 = vcmp.lt.s32.totalorder %v5315_v41, 0  ;;  %v2633_v9 = vadd.s32 1, %v9119_v22  ;;  %v2702_v23 = vshrl.u32 %v10330_v29, %v8772_v25  ;;  %v2695_v51 = vshll.u32 %v10412_v18, %v8657_v62 }
 0x334   :  { %v2543_v32 = vsel %vm5316_vm5, 0, %v5315_v41  ;;  %v2700_v55 = vor.u32 %v2699_v5, %v2698_v56  ;;  %v2701_v34 = vshll.u32 %v10416_v33, %v8657_v62  ;;  %v2528_v44 = vadd.s32 %v9002_v43, %v8978_v15 }
 0x335   :  { %v2544_v0 = vsub.s32 32, %v2543_v32  ;;  %v2548_v39 = vsub.s32 4294967266, %v2543_v32  ;;  %v2634_v20 = vsel %vm2632_vm9, %v2633_v9, %v9119_v22  ;;  %vm2463_vm4 = vcmp.lt.s32.totalorder %v2462_v31, 2 }
 0x336   :  { %v2635_v49 = vadd.s32 %v2634_v20, %v2630_v47  ;;  %v2686_v45 = vor.u32 8388608, %v2685_v60  ;;  %v2697_v35 = vor.u32 %v2696_v40, %v2695_v51  ;;  %v2703_v29 = vor.u32 %v2702_v23, %v2701_v34 }
 0x337   :  { %v2545_v7 = vshll.u32 %v9081_v6, %v2543_v32  ;;  %v2546_v14 = vshrl.u32 %v2528_v44, %v2544_v0  ;;  %v2549_v19 = vadd.s32 127, %v2548_v39  ;;  %vm2710_vm0 = vcmp.lt.s32.totalorder %v9015_v2, 1 }
 0x338   :  { %vm2464_vm15 = vcmp.eq.s32.totalorder %v2462_v31, 0  ;;  %vm2467_vm6 = vcmp.eq.s32.totalorder %v2462_v31, 2  ;;  %v2636_v33 = vadd.s32 536870912, %v2635_v49  ;;  %v2722_v62 = vsel %vm2710_vm0, %v2700_v55, %v2703_v29 }
 0x339   :  { %v2547_v15 = vor.u32 %v2546_v14, %v2545_v7  ;;  %v2550_v43 = vshll.u32 %v2549_v19, 23  ;;  %vm2711_vm2 = vcmp.lt.s32.totalorder %v9015_v2, 2  ;;  %vm2712_vm14 = vcmp.lt.s32.totalorder %v9015_v2, 3 }
 0x33a   :  { %v5939_v54 = vpop.eup %5938  ;;  %v9158_v3 = vshrl.u32 %v2636_v33, 30  ;;  %v2718_v6 = vsel %vm2710_vm0, %v2697_v35, %v2700_v55  ;;  %v2720_v27 = vsel %vm2712_vm14, %v2703_v29, %v2719_v11  ;;  %v2724_v16 = vsel %vm2712_vm14, %v9018_v1, %v2723_v50 }
 0x33b   :  { %v5941_v21 = vpop.eup %5940  ;;  %v2468_v63 = vxor.u32 2147483648, %v5939_v54  ;;  %v2551_v42 = vor.u32 4788187, %v2550_v43  ;;  %v2725_v24 = vsel %vm2711_vm2, %v2722_v62, %v2724_v16  ;;  %v2726_v8 = vshll.u32 %v2686_v45, 8 }
 0x33c   :  { %v2465_v48 = vxor.u32 2147483648, %v5941_v21  ;;  %v2554_v30 = vcvt.s32.f32 %v2547_v15  ;;  %v2638_v4 = vshll.u32 %v9158_v3, 30  ;;  %v2715_v12 = vsel %vm2713_vm12, %v2703_v29, 2102212464 }
 0x33d   :  { %v2469_v52 = vsel %vm2467_vm6, %v2468_v63, %v5941_v21  ;;  %v2552_v17 = vand.u32 2147483647, %v2551_v42  ;;  %v9173_v22 = vmul.u32.u64.low %v2726_v8, %v2725_v24  ;;  %v9174_v11 = vmul.u32.u64.high %v2726_v8, %v2725_v24, %v9173_v22 }
 0x33e   :  { %v2466_v1 = vsel %vm2464_vm15, %v5939_v54, %v2465_v48  ;;  %v2639_v50 = vsub.s32 %v2635_v49, %v2638_v4  ;;  %v2694_v36 = vshrl.u32 %v10412_v18, %v8772_v25  ;;  %v2721_v41 = vsel %vm2711_vm2, %v2718_v6, %v2720_v27 }
 0x33f   :  { %vm2461_vm7 = vweird.f32 %v10596_v53  ;;  %v2470_v60 = vsel %vm2463_vm4, %v2466_v1, %v2469_v52  ;;  %v2555_v40 = vmul.f32 %v2554_v30, %v2552_v17  ;;  %v2716_v9 = vsel %vm2712_vm14, %v2700_v55, %v2715_v12 }
 0x340   :  { %v2471_v56 = vsel %vm2461_vm7, nan, %v2470_v60  ;;  %v2641_v5 = vsub.s32 0, %v2639_v50  ;;  %v2714_v47 = vsel %vm2710_vm0, %v2694_v36, %v2697_v35  ;;  %vm2474_vm1 = vcmp.lt.s32.totalorder %v10603_v46, 0  ;;  %v42_v36 = vld [vmem:[%s10110_s2 + $0x78] sm:$0xff] }
 0x341   :  { %5553 = vmatprep.mubr.msk.f32.mxu1 %vm2781_vm10, %v2471_v56  ;;  %v2556_v23 = vxor.u32 2147483648, %v2555_v40  ;;  %v9188_v18 = vmul.u32.u64.low %v2726_v8, %v2721_v41  ;;  %v9189_v25 = vmul.u32.u64.high %v2726_v8, %v2721_v41, %v9188_v18  ;;  %v2558_v53 = vsub.s32 4, %v9063_v13 }
 0x342   :  { %v5318_v31 = vmin.u32 %v2641_v5, %v2639_v50  ;;  %vm9196_vm13 = vcmp.le.f32.partialorder %v2472_v57, 0.7853982  ;;  %v2717_v55 = vsel %vm2711_vm2, %v2714_v47, %v2716_v9  ;;  %v2631_v29 = vadd.s32 %v9118_v28, %v9099_v61 }
 0x343   :  { %v2557_v51 = vsel %vm2474_vm1, %v2556_v23, %v2555_v40  ;;  %vm2735_vm8 = vc.u32 %v9174_v11, %v9188_v18  ;;  %v2736_v0 = vadd.s32 1, %v9189_v25  ;;  %v2559_v57 = vsel %vm2474_vm1, %v2558_v53, %v9063_v13 }
 0x344   :  { %v2560_v34 = vsel %vm9196_vm13, %v10603_v46, %v2557_v51  ;;  %v2643_v44 = vclz %v5318_v31  ;;  %v2733_v20 = vmul.u32 %v2726_v8, %v2717_v55  ;;  %v2561_v45 = vsel %vm9196_vm13, 0, %v2559_v57  ;;  %v9238_v55 = vld [vmem:[%s10111_s3 + $0x38] sm:$0xff] }
 0x345   :  { %5942 = vcosq.f32 %v2560_v34  ;;  %v2737_v49 = vsel %vm2735_vm8, %v2736_v0, %v9189_v25  ;;  %v2565_v43 = vand.u32 3, %v2561_v45  ;;  %vm2564_vm4 = vweird.f32 %v10603_v46 }
 0x346   :  { %5944 = vsinq.f32 %v2560_v34  ;;  %v5319_v39 = vadd.s32 4294967294, %v2643_v44  ;;  %v2738_v2 = vadd.s32 %v2737_v49, %v2733_v20  ;;  %vm2577_vm0 = vcmp.lt.s32.totalorder %v10608_v26, 0 }
 0x347   :  { %vm2567_vm12 = vcmp.eq.s32.totalorder %v2565_v43, 0  ;;  %vm2570_vm9 = vcmp.eq.s32.totalorder %v2565_v43, 2  ;;  %vm2566_vm5 = vcmp.lt.s32.totalorder %v2565_v43, 2  ;;  %vm9222_vm15 = vcmp.le.f32.partialorder %v2575_v59, 0.7853982 }
 0x348   :  { %vm5320_vm11 = vcmp.lt.s32.totalorder %v5319_v39, 0  ;;  %v2739_v19 = vadd.s32 536870912, %v2738_v2  ;;  %v2661_v60 = vsub.s32 4, %v9158_v3  ;;  %v2734_v59 = vadd.s32 %v9188_v18, %v9174_v11 }
 0x349   :  { %v2646_v35 = vsel %vm5320_vm11, 0, %v5319_v39  ;;  %vm2667_vm1 = vweird.f32 %v10608_v26  ;;  %vm2680_vm13 = vcmp.lt.s32.totalorder %v10611_v37, 0  ;;  %vm2679_vm8 = vcmp.le.f32.partialorder %v2678_v58, 0.7853982 }
 0x34a   :  { %v2647_v7 = vsub.s32 32, %v2646_v35  ;;  %v2651_v14 = vsub.s32 4294967266, %v2646_v35  ;;  %v2648_v33 = vshll.u32 %v2639_v50, %v2646_v35  ;;  %v9214_v15 = vshrl.u32 %v2739_v19, 30 }
 0x34b   :  { %v2662_v5 = vsel %vm2577_vm0, %v2661_v60, %v9158_v3  ;;  %v9243_v3 = vld [vmem:[%s10111_s3 + $0x40] sm:$0xff]  ;;  %v44_v60 = vld [vmem:[%s10110_s2 + $0x88] sm:$0xff] }
 0x34c   :  { %v2649_v62 = vshrl.u32 %v2631_v29, %v2647_v7  ;;  %v2652_v13 = vadd.s32 127, %v2651_v14  ;;  %v2741_v27 = vshll.u32 %v9214_v15, 30  ;;  %v2664_v31 = vsel %vm9222_vm15, 0, %v2662_v5  ;;  %v48_v5 = vld [vmem:[%s10110_s2 + $0xa8] sm:$0xff] }
 0x34d   :  { %v2668_v11 = vand.u32 3, %v2664_v31  ;;  %v5690_v34 = vpack.c.bf16 %v9243_v3, %v9238_v55 }
 0x34e   :  { %v2650_v54 = vor.u32 %v2649_v62, %v2648_v33  ;;  %v2653_v6 = vshll.u32 %v2652_v13, 23  ;;  %v2742_v24 = vsub.s32 %v2738_v2, %v2741_v27  ;;  %v2764_v33 = vsub.s32 4, %v9214_v15 }
 0x34f   :  { %v5943_v16 = vpop.eup %5942  ;;  %5691 = vmatprep.subr.bf16.mxu0 %v5690_v34  ;;  %vm2673_vm2 = vcmp.eq.s32.totalorder %v2668_v11, 2  ;;  %vm2670_vm14 = vcmp.eq.s32.totalorder %v2668_v11, 0  ;;  %vm2669_vm7 = vcmp.lt.s32.totalorder %v2668_v11, 2 }
 0x350   :  { %v5945_v21 = vpop.eup %5944  ;;  %v2571_v63 = vxor.u32 2147483648, %v5943_v16  ;;  %v2654_v42 = vor.u32 4788187, %v2653_v6  ;;  %v2657_v48 = vcvt.s32.f32 %v2650_v54  ;;  %v2744_v30 = vsub.s32 0, %v2742_v24  ;;  %5693 = vmatpush3.bf16.msra.mxu0 %v5690_v34 }
 0x351   :  { %v2568_v61 = vxor.u32 2147483648, %v5945_v21  ;;  %v2765_v13 = vsel %vm2680_vm13, %v2764_v33, %v9214_v15 }
 0x352   :  { %v2572_v28 = vsel %vm2570_vm9, %v2571_v63, %v5945_v21  ;;  %v2655_v8 = vand.u32 2147483647, %v2654_v42  ;;  %v5322_v17 = vmin.u32 %v2744_v30, %v2742_v24  ;;  %v2767_v43 = vsel %vm2679_vm8, 0, %v2765_v13  ;;  %v27_v42 = vld [vmem:[%s10110_s2] sm:$0xff]  ;;  %v34_v30 = vld [vmem:[%s10110_s2 + $0x38] sm:$0xff] }
 0x353   :  { %v2569_v4 = vsel %vm2567_vm12, %v5943_v16, %v2568_v61  ;;  %v29_v61 = vld [vmem:[%s10110_s2 + $0x10] sm:$0xff] }
 0x354   :  { %v2573_v12 = vsel %vm2566_vm5, %v2569_v4, %v2572_v28  ;;  %v2658_v52 = vmul.f32 %v2657_v48, %v2655_v8  ;;  %v2746_v50 = vclz %v5322_v17  ;;  %vm2770_vm5 = vweird.f32 %v10611_v37  ;;  %v31_v28 = vld [vmem:[%s10110_s2 + $0x20] sm:$0xff]  ;;  %v32_v8 = vld [vmem:[%s10110_s2 + $0x28] sm:$0xff]  ;;  %v33_v48 = vld [vmem:[%s10110_s2 + $0x30] sm:$0xff] }
 0x355   :  { %v2574_v22 = vsel %vm2564_vm4, nan, %v2573_v12  ;;  %vm3135_vm4 = vcmask 195584   ;;  %v35_v4 = vld [vmem:[%s10110_s2 + $0x40] sm:$0xff]  ;;  %v36_v12 = vld [vmem:[%s10110_s2 + $0x48] sm:$0xff]  ;;  %v38_v17 = vld [vmem:[%s10110_s2 + $0x58] sm:$0xff] }
 0x356   :  { %5554 = vmatmul.mubr.msk.f32.gmra.mrb[20].mxu1 %vm2781_vm10, %v2574_v22  ;;  %v2659_v1 = vxor.u32 2147483648, %v2658_v52  ;;  %v5323_v46 = vadd.s32 4294967294, %v2746_v50  ;;  %v39_v22 = vld [vmem:[%s10110_s2 + $0x60] sm:$0xff]  ;;  %v41_v50 = vld [vmem:[%s10110_s2 + $0x70] sm:$0xff] }
 0x358   :  { %v2660_v41 = vsel %vm2577_vm0, %v2659_v1, %v2658_v52  ;;  %vm5324_vm6 = vcmp.lt.s32.totalorder %v5323_v46, 0  ;;  %v37_v52 = vld [vmem:[%s10110_s2 + $0x50] sm:$0xff]  ;;  %v40_v1 = vld [vmem:[%s10110_s2 + $0x68] sm:$0xff] }
 0x359   :  { %v2663_v40 = vsel %vm9222_vm15, %v10608_v26, %v2660_v41  ;;  %v2749_v56 = vsel %vm5324_vm6, 0, %v5323_v46  ;;  %v2771_v26 = vand.u32 3, %v2767_v43  ;;  %v43_v41 = vld [vmem:[%s10110_s2 + $0x80] sm:$0xff]  ;;  %v45_v46 = vld [vmem:[%s10110_s2 + $0x90] sm:$0xff] }
 0x35a   :  { %5946 = vcosq.f32 %v2663_v40  ;;  %v2750_v47 = vsub.s32 32, %v2749_v56  ;;  %v2754_v9 = vsub.s32 4294967266, %v2749_v56  ;;  %v2751_v23 = vshll.u32 %v2742_v24, %v2749_v56  ;;  %v28_v24 = vld [vmem:[%s10110_s2 + $0x8] sm:$0xff]  ;;  %v47_v56 = vld [vmem:[%s10110_s2 + $0xa0] sm:$0xff] }
 0x35b   :  { %5948 = vsinq.f32 %v2663_v40  ;;  %vm2776_vm11 = vcmp.eq.s32.totalorder %v2771_v26, 2  ;;  %vm2773_vm12 = vcmp.eq.s32.totalorder %v2771_v26, 0  ;;  %vm2772_vm9 = vcmp.lt.s32.totalorder %v2771_v26, 2  ;;  %v46_v40 = vld [vmem:[%s10110_s2 + $0x98] sm:$0xff] }
 0x35c   :  { %v2752_v25 = vshrl.u32 %v2734_v59, %v2750_v47  ;;  %v2755_v53 = vadd.s32 127, %v2754_v9  ;;  %v49_v59 = vld [vmem:[%s10110_s2 + $0xb0] sm:$0xff]  ;;  %v50_v47 = vld [vmem:[%s10110_s2 + $0xb8] sm:$0xff]  ;;  %v9356_v9 = vld [vmem:[%s10111_s3 + $0x48] sm:$0xff] }
 0x35e   :  { %v2753_v32 = vor.u32 %v2752_v25, %v2751_v23  ;;  %v2756_v51 = vshll.u32 %v2755_v53, 23  ;;  %v9361_v23 = vld [vmem:[%s10111_s3 + $0x50] sm:$0xff] }
 0x35f   :  { %v5694_v25 = vpack.c.bf16 %v9361_v23, %v9356_v9  ;;  %v5853_v11 = vpack.i.bf16 %v9361_v23, %v9356_v9 }
 0x360   :  { %v2757_v18 = vor.u32 4788187, %v2756_v51  ;;  %v2760_v57 = vcvt.s32.f32 %v2753_v32 }
 0x361   :  { %5695 = vmatprep.subr.bf16.mxu0 %v5694_v25 }
 0x362   :  { %v2758_v0 = vand.u32 2147483647, %v2757_v18  ;;  %5697 = vmatpush3.bf16.msra.mxu0 %v5694_v25 }
 0x363   :  { %5698 = vmatprep.subr.bf16.mxu0 %v6090_v10 }
 0x364   :  { %v5947_v44 = vpop.eup %5946  ;;  %v2761_v2 = vmul.f32 %v2760_v57, %v2758_v0 }
 0x365   :  { %v5949_v39 = vpop.eup %5948  ;;  %v2674_v20 = vxor.u32 2147483648, %v5947_v44 }
 0x366   :  { %v2671_v49 = vxor.u32 2147483648, %v5949_v39  ;;  %v2762_v29 = vxor.u32 2147483648, %v2761_v2 }
 0x367   :  { %v2675_v45 = vsel %vm2673_vm2, %v2674_v20, %v5949_v39  ;;  %v6056_v39 = vld [vmem:[%s10112_s4] sm:$0x3f] }
 0x368   :  { %v2672_v35 = vsel %vm2670_vm14, %v5947_v44, %v2671_v49  ;;  %v2763_v19 = vsel %vm2680_vm13, %v2762_v29, %v2761_v2  ;;  %v6093_v44 = vmov 1966171168   ;;  %v10616_v20 = vld [vmem:[#allocation7_spill] sm:$0xff]  ;;  %v10617_v2 = vld [vmem:[#allocation6_spill] sm:$0xff] }
 0x369   :  { %v2676_v7 = vsel %vm2669_vm7, %v2672_v35, %v2675_v45  ;;  %v2766_v62 = vsel %vm2679_vm8, %v10611_v37, %v2763_v19  ;;  %v30_v37 = vld [vmem:[%s10110_s2 + $0x18] sm:$0xff]  ;;  %v3426_v0 = vunpack.c.l.s4 %v6093_v44  ;;  %v9378_v49 = vrot.slane %v6056_v39, %v10616_v20 }
 0x36a   :  { %v2677_v14 = vsel %vm2667_vm1, nan, %v2676_v7  ;;  %5950 = vcosq.f32 %v2766_v62 }
 0x36b   :  { %5556 = vmatprep.mubr.msk.f32.mxu1 %vm2781_vm10, %v2677_v14  ;;  %5952 = vsinq.f32 %v2766_v62  ;;  %v3427_v57 = vunpack.c.0.s8 %v3426_v0  ;;  %v10618_v62 = vld [vmem:[#allocation8_spill] sm:$0xff] }
 0x36c   :  { %v9389_v13 = vrot.slane %v6056_v39, %v10618_v62 }
 0x36d   :  { %v9381_v45 = vsub.s32 %v3427_v57, %v10617_v2 }
 0x374   :  { %v5951_v54 = vpop.eup %5950 }
 0x375   :  { %v5953_v6 = vpop.eup %5952  ;;  %v2777_v27 = vxor.u32 2147483648, %v5951_v54 }
 0x376   :  { %v2774_v16 = vxor.u32 2147483648, %v5953_v6 }
 0x377   :  { %v2778_v58 = vsel %vm2776_vm11, %v2777_v27, %v5953_v6 }
 0x378   :  { %v2775_v21 = vsel %vm2773_vm12, %v5951_v54, %v2774_v16 }
 0x379   :  { %v2779_v63 = vsel %vm2772_vm9, %v2775_v21, %v2778_v58 }
 0x37a   :  { %v2780_v15 = vsel %vm2770_vm5, nan, %v2779_v63 }
 0x37b   :  { %5557 = vmatmul.mubr.msk.f32.gmra.mrb[22].mxu1 %vm2781_vm10, %v2780_v15  ;;  %vm3715_vm10 = vcmask 261120  }
 0x37c   :  { %5565 = vmatprep.mubr.msk.f32.mxu1 %vm3135_vm4, %v27_v42 }
 0x37f   :  { %5566 = vmatmul.mubr.msk.f32.vlgmr.msra.gmra.mrb[0].mxu1 %vm3135_vm4, %v28_v24 }
 0x380   :  { %5568 = vmatprep.mubr.msk.f32.mxu1 %vm3135_vm4, %v29_v61 }
 0x383   :  { %5569 = vmatmul.mubr.msk.f32.gmra.mrb[2].mxu1 %vm3135_vm4, %v30_v37 }
 0x384   :  { %5571 = vmatprep.mubr.msk.f32.mxu1 %vm3135_vm4, %v31_v28 }
 0x387   :  { %5572 = vmatmul.mubr.msk.f32.gmra.mrb[4].mxu1 %vm3135_vm4, %v32_v8 }
 0x388   :  { %5574 = vmatprep.mubr.msk.f32.mxu1 %vm3135_vm4, %v33_v48 }
 0x38b   :  { %5575 = vmatmul.mubr.msk.f32.gmra.mrb[6].mxu1 %vm3135_vm4, %v34_v30 }
 0x38c   :  { %5577 = vmatprep.mubr.msk.f32.mxu1 %vm3135_vm4, %v35_v4 }
 0x38f   :  { %5578 = vmatmul.mubr.msk.f32.gmra.mrb[8].mxu1 %vm3135_vm4, %v36_v12 }
 0x390   :  { %5580 = vmatprep.mubr.msk.f32.mxu1 %vm3135_vm4, %v37_v52 }
 0x393   :  { %5581 = vmatmul.mubr.msk.f32.gmra.mrb[10].mxu1 %vm3135_vm4, %v38_v17 }
 0x394   :  { %5583 = vmatprep.mubr.msk.f32.mxu1 %vm3135_vm4, %v39_v22 }
 0x397   :  { %5584 = vmatmul.mubr.msk.f32.gmra.mrb[12].mxu1 %vm3135_vm4, %v40_v1 }
 0x398   :  { %5586 = vmatprep.mubr.msk.f32.mxu1 %vm3135_vm4, %v41_v50 }
 0x39b   :  { %5587 = vmatmul.mubr.msk.f32.gmra.mrb[14].mxu1 %vm3135_vm4, %v42_v36 }
 0x39c   :  { %5589 = vmatprep.mubr.msk.f32.mxu1 %vm3135_vm4, %v43_v41 }
 0x39f   :  { %5590 = vmatmul.mubr.msk.f32.gmra.mrb[16].mxu1 %vm3135_vm4, %v44_v60 }
 0x3a0   :  { %5592 = vmatprep.mubr.msk.f32.mxu1 %vm3135_vm4, %v45_v46 }
 0x3a3   :  { %5593 = vmatmul.mubr.msk.f32.gmra.mrb[18].mxu1 %vm3135_vm4, %v46_v40 }
 0x3a4   :  { %5595 = vmatprep.mubr.msk.f32.mxu1 %vm3135_vm4, %v47_v56 }
 0x3a7   :  { %5596 = vmatmul.mubr.msk.f32.gmra.mrb[20].mxu1 %vm3135_vm4, %v48_v5 }
 0x3a8   :  { %5598 = vmatprep.mubr.msk.f32.mxu1 %vm3135_vm4, %v49_v59 }
 0x3ab   :  { %5599 = vmatmul.mubr.msk.f32.gmra.mrb[22].mxu1 %vm3135_vm4, %v50_v47 }
 0x3d9   :  { %v9365_v53 = vpop.f32.mrb[0].mxu0 }
 0x3da   :  { %v5512_v31 = vpop.f32.mrb[1].mxu0  ;;  %v2875_v35 = vadd.f32 %v9378_v49, %v9365_v53 }
 0x3dc   :  { %v3431_v29 = vrot.slane %v2875_v35, %v9381_v45  ;;  %v3424_v14 = vcombine.high %v2875_v35, %v2875_v35 }
 0x3dd   :  { %v9368_v32 = vpop.f32.mrb[2].mxu0 }
 0x3de   :  { %v5515_v51 = vpop.f32.mrb[3].mxu0  ;;  %v3439_v7 = vcombine.high %v3431_v29, %v3431_v29  ;;  %v3447_v33 = vrot.slane %v3431_v29, %v9381_v45  ;;  %v3438_v43 = vrot.slane %v3424_v14, %v9381_v45  ;;  %v2876_v26 = vadd.f32 %v9378_v49, %v9368_v32 }
 0x3e0   :  { %v3461_v19 = vrot.slane %v3439_v7, %v9381_v45  ;;  %v3574_v16 = vrot.slane %v3447_v33, %v10616_v20  ;;  %v3440_v58 = vcombine.high %v3438_v43, %v3438_v43  ;;  %v3469_v15 = vcombine.high %v3447_v33, %v3447_v33 }
 0x3e1   :  { %v3480_v24 = vrot.slane %v2876_v26, %v9381_v45  ;;  %v3473_v4 = vcombine.high %v2876_v26, %v2876_v26  ;;  %v3454_v1 = vrot.slane %v3438_v43, %v9381_v45 }
 0x3e2   :  { %v3578_v54 = vrot.slane %v3461_v19, %v10616_v20  ;;  %v3471_v6 = vcombine.high %v3461_v19, %v3461_v19  ;;  %v3468_v12 = vrot.slane %v3440_v58, %v9381_v45  ;;  %v3582_v17 = vrot.slane %v3469_v15, %v10616_v20 }
 0x3e3   :  { %v9372_v18 = vpop.f32.mrb[4].mxu0  ;;  %v3488_v22 = vcombine.high %v3480_v24, %v3480_v24  ;;  %v3487_v60 = vrot.slane %v3473_v4, %v9381_v45  ;;  %v3590_v47 = vrot.slane %v3454_v1, %v10616_v20  ;;  %v3470_v25 = vcombine.high %v3454_v1, %v3454_v1 }
 0x3e4   :  { %v5518_v34 = vpop.f32.mrb[5].mxu0  ;;  %v3586_v37 = vrot.slane %v3471_v6, %v10616_v20  ;;  %v3594_v40 = vrot.slane %v3468_v12, %v10616_v20  ;;  %v3472_v5 = vcombine.high %v3468_v12, %v3468_v12  ;;  %v2877_v43 = vadd.f32 %v9378_v49, %v9372_v18 }
 0x3e5   :  { %v3510_v31 = vrot.slane %v3488_v22, %v9381_v45  ;;  %v3496_v34 = vrot.slane %v3480_v24, %v9381_v45  ;;  %v3489_v29 = vcombine.high %v3487_v60, %v3487_v60  ;;  %v3598_v14 = vrot.slane %v3470_v25, %v10616_v20 }
 0x3e6   :  { %v3602_v39 = vrot.slane %v3472_v5, %v10616_v20  ;;  %v3522_v23 = vcombine.high %v2877_v43, %v2877_v43 }
 0x3e7   :  { %v3610_v19 = vrot.slane %v3510_v31, %v10616_v20  ;;  %v3520_v62 = vcombine.high %v3510_v31, %v3510_v31  ;;  %v3606_v6 = vrot.slane %v3496_v34, %v10616_v20 }
 0x452   :  { %v5567_v27 = vpop.f32.mrb[0].mxu1 }
 0x453   :  { %v3398_v21 = vadd.f32 %v5567_v27, %v9389_v13  ;;  %v3274_v63 = vpop.f32.mrb[1].mxu1  ;;  %v5848_v27 = vpack.i.bf16 %v9243_v3, %v9238_v55  ;;  %v3618_v55 = vrot.slane %v3520_v62, %v10616_v20  ;;  %v3529_v3 = vrot.slane %v2877_v43, %v9381_v45 }
 0x454   :  { %v3397_v42 = vadd.f32 %v9389_v13, %v3274_v63 }
 0x455   :  { %v3692_v61 = vmul.f32 %v3578_v54, %v3398_v21  ;;  %4527 = vrot.lane.b32.xlu1 %v3398_v21, %s6083_s1  ;;  %v3537_v4 = vcombine.high %v3529_v3, %v3529_v3  ;;  %v3545_v5 = vrot.slane %v3529_v3, %v9381_v45 }
 0x456   :  { %v3691_v28 = vmul.f32 %v3574_v16, %v3397_v42  ;;  %4525 = vrot.lane.b32.xlu0 %v3397_v42, %s6083_s1  ;;  %v5570_v8 = vpop.f32.mrb[2].mxu1  ;;  %v3518_v16 = vcombine.high %v3496_v34, %v3496_v34  ;;  %v3517_v42 = vrot.slane %v3489_v29, %v9381_v45 }
 0x457   :  { %v3400_v48 = vadd.f32 %v5570_v8, %v9389_v13  ;;  %v3284_v30 = vpop.f32.mrb[3].mxu1 }
 0x458   :  { %v3399_v52 = vadd.f32 %v9389_v13, %v3284_v30  ;;  %5609 = vmatprep.mubr.msk.f32.mxu0 %vm3715_vm10, %v3691_v28  ;;  %v3503_v28 = vrot.slane %v3487_v60, %v9381_v45  ;;  %v3521_v12 = vcombine.high %v3517_v42, %v3517_v42 }
 0x459   :  { %v3694_v50 = vmul.f32 %v3586_v37, %v3400_v48  ;;  %4531 = vrot.lane.b32.xlu1 %v3400_v48, %s6083_s1  ;;  %5610 = vmatmul.mubr.msk.f32.vlgmr.msra.gmra.mrb[6].mxu0 %vm3715_vm10, %v3692_v61  ;;  %v3614_v37 = vrot.slane %v3518_v16, %v10616_v20 }
 0x45a   :  { %v3693_v36 = vmul.f32 %v3582_v17, %v3399_v52  ;;  %4529 = vrot.lane.b32.xlu0 %v3399_v52, %s6083_s1  ;;  %v5573_v41 = vpop.f32.mrb[4].mxu1  ;;  %v3622_v22 = vrot.slane %v3503_v28, %v10616_v20  ;;  %v3519_v1 = vcombine.high %v3503_v28, %v3503_v28 }
 0x45b   :  { %v3402_v46 = vadd.f32 %v5573_v41, %v9389_v13  ;;  %v3294_v56 = vpop.f32.mrb[5].mxu1  ;;  %v3536_v41 = vrot.slane %v3522_v23, %v9381_v45 }
 0x45c   :  { %v3401_v59 = vadd.f32 %v9389_v13, %v3294_v56  ;;  %5612 = vmatprep.mubr.msk.f32.mxu0 %vm3715_vm10, %v3693_v36  ;;  %v3559_v56 = vrot.slane %v3537_v4, %v9381_v45  ;;  %v3630_v25 = vrot.slane %v3519_v1, %v10616_v20 }
 0x45d   :  { %v3696_v51 = vmul.f32 %v3594_v40, %v3402_v46  ;;  %4535 = vrot.lane.b32.xlu1 %v3402_v46, %s6083_s1  ;;  %5613 = vmatmul.mubr.msk.f32.gmra.mrb[8].mxu0 %vm3715_vm10, %v3694_v50  ;;  %v3634_v40 = vrot.slane %v3521_v12, %v10616_v20  ;;  %v3538_v34 = vcombine.high %v3536_v41, %v3536_v41 }
 0x45e   :  { %v3695_v44 = vmul.f32 %v3590_v47, %v3401_v59  ;;  %4533 = vrot.lane.b32.xlu0 %v3401_v59, %s6083_s1  ;;  %v5576_v0 = vpop.f32.mrb[6].mxu1 }
 0x45f   :  { %v3404_v57 = vadd.f32 %v5576_v0, %v9389_v13  ;;  %v3304_v35 = vpop.f32.mrb[7].mxu1 }
 0x460   :  { %v3403_v7 = vadd.f32 %v9389_v13, %v3304_v35  ;;  %5615 = vmatprep.mubr.msk.f32.mxu0 %vm3715_vm10, %v3695_v44 }
 0x461   :  { %v3698_v33 = vmul.f32 %v3602_v39, %v3404_v57  ;;  %4539 = vrot.lane.b32.xlu1 %v3404_v57, %s6083_s1  ;;  %5616 = vmatmul.mubr.msk.f32.gmra.mrb[10].mxu0 %vm3715_vm10, %v3696_v51  ;;  %v3642_v57 = vrot.slane %v3559_v56, %v10616_v20  ;;  %v3569_v39 = vcombine.high %v3559_v56, %v3559_v56 }
 0x462   :  { %v3697_v26 = vmul.f32 %v3598_v14, %v3403_v7  ;;  %4537 = vrot.lane.b32.xlu0 %v3403_v7, %s6083_s1  ;;  %v5579_v54 = vpop.f32.mrb[8].mxu1  ;;  %v3638_v7 = vrot.slane %v3545_v5, %v10616_v20  ;;  %v3567_v14 = vcombine.high %v3545_v5, %v3545_v5 }
 0x463   :  { %v3406_v58 = vadd.f32 %v5579_v54, %v9389_v13  ;;  %v3314_v21 = vpop.f32.mrb[9].mxu1  ;;  %v3566_v54 = vrot.slane %v3538_v34, %v9381_v45 }
 0x464   :  { %v3405_v63 = vadd.f32 %v9389_v13, %v3314_v21  ;;  %5618 = vmatprep.mubr.msk.f32.mxu0 %vm3715_vm10, %v3697_v26  ;;  %v3650_v26 = vrot.slane %v3569_v39, %v10616_v20  ;;  %v3646_v16 = vrot.slane %v3567_v14, %v10616_v20 }
 0x465   :  { %v3700_v15 = vmul.f32 %v3610_v19, %v3406_v58  ;;  %5854 = vrot.lane.b32.xlu1 %v5853_v11, %s6083_s1  ;;  %5619 = vmatmul.mubr.msk.f32.gmra.mrb[12].mxu0 %vm3715_vm10, %v3698_v33  ;;  %v3626_v11 = vrot.slane %v3517_v42, %v10616_v20  ;;  %v3570_v3 = vcombine.high %v3566_v54, %v3566_v54 }
 0x466   :  { %v3699_v24 = vmul.f32 %v3606_v6, %v3405_v63  ;;  %5849 = vrot.lane.b32.xlu0 %v5848_v27, %s6083_s1  ;;  %v5582_v61 = vpop.f32.mrb[10].mxu1 }
 0x467   :  { %v3408_v8 = vadd.f32 %v5582_v61, %v9389_v13  ;;  %v3324_v48 = vpop.f32.mrb[11].mxu1  ;;  %v3666_v23 = vrot.slane %v3570_v3, %v10616_v20 }
 0x468   :  { %v3407_v9 = vadd.f32 %v9389_v13, %v3324_v48  ;;  %5621 = vmatprep.mubr.msk.f32.mxu0 %vm3715_vm10, %v3699_v24 }
 0x469   :  { %v3702_v30 = vmul.f32 %v3618_v55, %v3408_v8  ;;  %4543 = vrot.lane.b32.xlu1 %v3406_v58, %s6083_s1  ;;  %5622 = vmatmul.mubr.msk.f32.gmra.mrb[14].mxu0 %vm3715_vm10, %v3700_v15  ;;  %v3552_v58 = vrot.slane %v3536_v41, %v9381_v45  ;;  %v3658_v55 = vrot.slane %v3566_v54, %v10616_v20 }
 0x46a   :  { %v3701_v52 = vmul.f32 %v3614_v37, %v3407_v9  ;;  %4541 = vrot.lane.b32.xlu0 %v3405_v63, %s6083_s1  ;;  %v5585_v17 = vpop.f32.mrb[12].mxu1 }
 0x46b   :  { %v3410_v50 = vadd.f32 %v5585_v17, %v9389_v13  ;;  %v3334_v36 = vpop.f32.mrb[13].mxu1  ;;  %v3654_v45 = vrot.slane %v3552_v58, %v10616_v20  ;;  %v3568_v37 = vcombine.high %v3552_v58, %v3552_v58 }
 0x46c   :  { %v3409_v60 = vadd.f32 %v9389_v13, %v3334_v36  ;;  %5624 = vmatprep.mubr.msk.f32.mxu0 %vm3715_vm10, %v3701_v52 }
 0x46d   :  { %v3704_v46 = vmul.f32 %v3626_v11, %v3410_v50  ;;  %4547 = vrot.lane.b32.xlu1 %v3408_v8, %s6083_s1  ;;  %5625 = vmatmul.mubr.msk.f32.gmra.mrb[16].mxu0 %vm3715_vm10, %v3702_v30  ;;  %v3662_v4 = vrot.slane %v3568_v37, %v10616_v20 }
 0x46e   :  { %v3703_v59 = vmul.f32 %v3622_v22, %v3409_v60  ;;  %4545 = vrot.lane.b32.xlu0 %v3407_v9, %s6083_s1  ;;  %v5588_v47 = vpop.f32.mrb[14].mxu1 }
 0x46f   :  { %v3412_v31 = vadd.f32 %v5588_v47, %v9389_v13  ;;  %v3344_v51 = vpop.f32.mrb[15].mxu1 }
 0x470   :  { %v3411_v44 = vadd.f32 %v9389_v13, %v3344_v51  ;;  %5627 = vmatprep.mubr.msk.f32.mxu0 %vm3715_vm10, %v3703_v59 }
 0x471   :  { %v3706_v0 = vmul.f32 %v3634_v40, %v3412_v31  ;;  %4551 = vrot.lane.b32.xlu1 %v3410_v50, %s6083_s1  ;;  %5628 = vmatmul.mubr.msk.f32.gmra.mrb[18].mxu0 %vm3715_vm10, %v3704_v46 }
 0x472   :  { %v3705_v35 = vmul.f32 %v3630_v25, %v3411_v44  ;;  %4549 = vrot.lane.b32.xlu0 %v3409_v60, %s6083_s1  ;;  %v5591_v29 = vpop.f32.mrb[16].mxu1 }
 0x473   :  { %v3414_v19 = vadd.f32 %v5591_v29, %v9389_v13  ;;  %v3354_v33 = vpop.f32.mrb[17].mxu1 }
 0x474   :  { %v3413_v62 = vadd.f32 %v9389_v13, %v3354_v33  ;;  %5630 = vmatprep.mubr.msk.f32.mxu0 %vm3715_vm10, %v3705_v35 }
 0x475   :  { %v3708_v43 = vmul.f32 %v3642_v57, %v3414_v19  ;;  %4559 = vrot.lane.b32.xlu1 %v3414_v19, %s6083_s1  ;;  %5631 = vmatmul.mubr.msk.f32.gmra.mrb[20].mxu0 %vm3715_vm10, %v3706_v0 }
 0x476   :  { %v3707_v6 = vmul.f32 %v3638_v7, %v3413_v62  ;;  %4555 = vrot.lane.b32.xlu0 %v3412_v31, %s6083_s1  ;;  %v5594_v27 = vpop.f32.mrb[18].mxu1 }
 0x477   :  { %v3416_v21 = vadd.f32 %v5594_v27, %v9389_v13  ;;  %v3364_v63 = vpop.f32.mrb[19].mxu1 }
 0x478   :  { %v3415_v42 = vadd.f32 %v9389_v13, %v3364_v63  ;;  %5633 = vmatprep.mubr.msk.f32.mxu0 %vm3715_vm10, %v3707_v6 }
 0x479   :  { %v3710_v15 = vmul.f32 %v3650_v26, %v3416_v21  ;;  %4563 = vrot.lane.b32.xlu1 %v3416_v21, %s6083_s1  ;;  %5634 = vmatmul.mubr.msk.f32.gmra.mrb[22].mxu0 %vm3715_vm10, %v3708_v43 }
 0x47a   :  { %v3709_v24 = vmul.f32 %v3646_v16, %v3415_v42  ;;  %4553 = vrot.lane.b32.xlu0 %v3411_v44, %s6083_s1  ;;  %v5597_v61 = vpop.f32.mrb[20].mxu1 }
 0x47b   :  { %v3418_v28 = vadd.f32 %v5597_v61, %v9389_v13  ;;  %v3374_v8 = vpop.f32.mrb[21].mxu1 }
 0x47c   :  { %v3417_v48 = vadd.f32 %v9389_v13, %v3374_v8  ;;  %5636 = vmatprep.mubr.msk.f32.mxu0 %vm3715_vm10, %v3709_v24 }
 0x47d   :  { %v3712_v9 = vmul.f32 %v3658_v55, %v3418_v28  ;;  %4561 = vrot.lane.b32.xlu1 %v3415_v42, %s6083_s1  ;;  %5637 = vmatmul.mubr.msk.f32.gmra.mrb[24].mxu0 %vm3715_vm10, %v3710_v15 }
 0x47e   :  { %v3711_v11 = vmul.f32 %v3654_v45, %v3417_v48  ;;  %4557 = vrot.lane.b32.xlu0 %v3413_v62, %s6083_s1  ;;  %v5600_v30 = vpop.f32.mrb[22].mxu1 }
 0x47f   :  { %v3420_v12 = vadd.f32 %v5600_v30, %v9389_v13  ;;  %v3384_v52 = vpop.f32.mrb[23].mxu1 }
 0x480   :  { %v3419_v17 = vadd.f32 %v9389_v13, %v3384_v52  ;;  %5639 = vmatprep.mubr.msk.f32.mxu0 %vm3715_vm10, %v3711_v11 }
 0x481   :  { %v3714_v22 = vmul.f32 %v3666_v23, %v3420_v12  ;;  %4567 = vrot.lane.b32.xlu1 %v3418_v28, %s6083_s1  ;;  %5640 = vmatmul.mubr.msk.f32.gmra.mrb[26].mxu0 %vm3715_vm10, %v3712_v9 }
 0x482   :  { %v3713_v1 = vmul.f32 %v3662_v4, %v3419_v17  ;;  %4565 = vrot.lane.b32.xlu0 %v3417_v48, %s6083_s1 }
 0x484   :  { %5642 = vmatprep.mubr.msk.f32.mxu0 %vm3715_vm10, %v3713_v1 }
 0x485   :  { %4571 = vrot.lane.b32.xlu1 %v3420_v12, %s6083_s1  ;;  %5643 = vmatmul.mubr.msk.f32.gmra.mrb[28].mxu0 %vm3715_vm10, %v3714_v22 }
 0x486   :  { %4569 = vrot.lane.b32.xlu0 %v3419_v17, %s6083_s1  ;;  %5653 = vmatprep.mubr.msk.f32.mxu0 %vm6091_vm3, %v6092_v38 }
 0x4c7   :  { %v9515_v20 = vpop.permute.xlu1 %4527 }
 0x4c8   :  { %v9517_v13 = vpop.permute.xlu0 %4525 }
 0x4cb   :  { %v9519_v50 = vpop.permute.xlu1 %4531 }
 0x4cc   :  { %v9521_v36 = vpop.permute.xlu0 %4529 }
 0x4cf   :  { %v9523_v41 = vpop.permute.xlu1 %4535 }
 0x4d0   :  { %v9525_v60 = vpop.permute.xlu0 %4533 }
 0x4d3   :  { %v9527_v46 = vpop.permute.xlu1 %4539 }
 0x4d4   :  { %v9529_v40 = vpop.permute.xlu0 %4537 }
 0x4d7   :  { %v5855_v56 = vpop.permute.xlu1 %5854 }
 0x4d8   :  { %v5850_v5 = vpop.permute.xlu0 %5849  ;;  %v5857_v59 = vunpack.i.h.bf16 %v5855_v56  ;;  %v5856_v47 = vunpack.i.l.bf16 %v5855_v56 }
 0x4d9   :  { %v5852_v25 = vunpack.i.h.bf16 %v5850_v5  ;;  %v5851_v31 = vunpack.i.l.bf16 %v5850_v5 }
 0x4da   :  { %v5702_v34 = vpack.c.bf16 %v5857_v59, %v5856_v47 }
 0x4db   :  { %v5699_v51 = vpack.c.bf16 %v5852_v25, %v5851_v31 }
 0x4dd   :  { %5700 = vmatpush3.bf16.msra.mxu0 %v5699_v51 }
 0x4de   :  { %5701 = vmatprep.subr.bf16.mxu0 %v6090_v10 }
 0x4e1   :  { %5703 = vmatpush3.bf16.msra.mxu0 %v5702_v34 }
 0x4e2   :  { %5704 = vmatprep.subr.bf16.mxu0 %v6090_v10 }
 0x52c   :  { %v5611_v44 = vpop.f32.mrb[6].mxu0 }
 0x52d   :  { %vm3974_vm0 = vcmp.gt.f32.partialorder %v5611_v44, 0.0  ;;  %v3998_v0 = vmul.f32 0.2, %v5611_v44  ;;  %v3854_v57 = vpop.f32.mrb[7].mxu0 }
 0x52e   :  { %vm3973_vm15 = vcmp.gt.f32.partialorder %v3854_v57, 0.0  ;;  %v3997_v39 = vmul.f32 0.2, %v3854_v57 }
 0x52f   :  { %v4022_v35 = vsel %vm3974_vm0, %v5611_v44, %v3998_v0 }
 0x530   :  { %v4052_v29 = vsel %vm3715_vm10, %v4022_v35, -inf  ;;  %v9534_v7 = vsel %vm3973_vm15, %v3854_v57, %v3997_v39  ;;  %v5614_v14 = vpop.f32.mrb[8].mxu0 }
 0x531   :  { %v4053_v19 = vrot.slane %v4052_v29, 4  ;;  %v4045_v33 = vsel %vm3715_vm10, %v9534_v7, -inf  ;;  %vm3976_vm6 = vcmp.gt.f32.partialorder %v5614_v14, 0.0  ;;  %v4000_v62 = vmul.f32 0.2, %v5614_v14  ;;  %v3864_v43 = vpop.f32.mrb[9].mxu0 }
 0x532   :  { %v4046_v26 = vrot.slane %v4045_v33, 4  ;;  %vm3975_vm2 = vcmp.gt.f32.partialorder %v3864_v43, 0.0  ;;  %v3999_v54 = vmul.f32 0.2, %v3864_v43 }
 0x533   :  { %v4054_v6 = vmax.f32 %v4052_v29, %v4053_v19  ;;  %v9538_v27 = vsel %vm3976_vm6, %v5614_v14, %v4000_v62 }
 0x534   :  { %v4047_v16 = vmax.f32 %v4045_v33, %v4046_v26  ;;  %v4066_v58 = vsel %vm3715_vm10, %v9538_v27, -inf  ;;  %v9542_v21 = vsel %vm3975_vm2, %v3864_v43, %v3999_v54  ;;  %v5617_v63 = vpop.f32.mrb[10].mxu0 }
 0x535   :  { %v4055_v42 = vrot.slane %v4054_v6, 2  ;;  %v4067_v15 = vrot.slane %v4066_v58, 4  ;;  %v4059_v55 = vsel %vm3715_vm10, %v9542_v21, -inf  ;;  %vm3978_vm14 = vcmp.gt.f32.partialorder %v5617_v63, 0.0  ;;  %v3874_v3 = vpop.f32.mrb[11].mxu0 }
 0x536   :  { %v4048_v24 = vrot.slane %v4047_v16, 2  ;;  %v4060_v61 = vrot.slane %v4059_v55, 4  ;;  %v4002_v45 = vmul.f32 0.2, %v5617_v63  ;;  %vm3977_vm7 = vcmp.gt.f32.partialorder %v3874_v3, 0.0 }
 0x537   :  { %v4056_v37 = vmax.f32 %v4054_v6, %v4055_v42  ;;  %v4068_v28 = vmax.f32 %v4066_v58, %v4067_v15  ;;  %v4001_v8 = vmul.f32 0.2, %v3874_v3 }
 0x538   :  { %v4049_v48 = vmax.f32 %v4047_v16, %v4048_v24  ;;  %v4061_v9 = vmax.f32 %v4059_v55, %v4060_v61  ;;  %v9546_v23 = vsel %vm3978_vm14, %v5617_v63, %v4002_v45  ;;  %v5620_v11 = vpop.f32.mrb[12].mxu0 }
 0x539   :  { %v4057_v30 = vrot.slane %v4056_v37, 1  ;;  %v4069_v4 = vrot.slane %v4068_v28, 2  ;;  %v4080_v12 = vsel %vm3715_vm10, %v9546_v23, -inf  ;;  %v9550_v52 = vsel %vm3977_vm7, %v3874_v3, %v4001_v8  ;;  %v3884_v17 = vpop.f32.mrb[13].mxu0 }
 0x53a   :  { %v4050_v22 = vrot.slane %v4049_v48, 1  ;;  %v4062_v1 = vrot.slane %v4061_v9, 2  ;;  %v4081_v56 = vrot.slane %v4080_v12, 4  ;;  %v4073_v5 = vsel %vm3715_vm10, %v9550_v52, -inf }
 0x53b   :  { %v4058_v59 = vmax.f32 %v4056_v37, %v4057_v30  ;;  %v4070_v47 = vmax.f32 %v4068_v28, %v4069_v4  ;;  %v4074_v25 = vrot.slane %v4073_v5, 4  ;;  %vm3980_vm1 = vcmp.gt.f32.partialorder %v5620_v11, 0.0 }
 0x53c   :  { %v4051_v31 = vmax.f32 %v4049_v48, %v4050_v22  ;;  %v4063_v51 = vmax.f32 %v4061_v9, %v4062_v1  ;;  %v4082_v34 = vmax.f32 %v4080_v12, %v4081_v56  ;;  %v4004_v44 = vmul.f32 0.2, %v5620_v11  ;;  %v5623_v0 = vpop.f32.mrb[14].mxu0 }
 0x53d   :  { %v4214_v57 = vsub.f32 %v4022_v35, %v4058_v59  ;;  %v4071_v39 = vrot.slane %v4070_v47, 1  ;;  %v4075_v29 = vmax.f32 %v4073_v5, %v4074_v25  ;;  %vm3979_vm13 = vcmp.gt.f32.partialorder %v3884_v17, 0.0  ;;  %v3894_v14 = vpop.f32.mrb[15].mxu0 }
 0x53e   :  { %v4213_v19 = vsub.f32 %v9534_v7, %v4051_v31  ;;  %v4064_v33 = vrot.slane %v4063_v51, 1  ;;  %v4083_v62 = vrot.slane %v4082_v34, 2  ;;  %v9555_v43 = vsel %vm3980_vm1, %v5620_v11, %v4004_v44 }
 0x53f   :  { %v4239_v26 = vmul.f32 1.442695, %v4214_v57  ;;  %v4072_v54 = vmax.f32 %v4070_v47, %v4071_v39  ;;  %v4076_v6 = vrot.slane %v4075_v29, 2  ;;  %v4094_v16 = vsel %vm3715_vm10, %v9555_v43, -inf }
 0x540   :  { %v4237_v58 = vmul.f32 1.442695, %v4213_v19  ;;  %v4065_v63 = vmax.f32 %v4063_v51, %v4064_v33  ;;  %v4084_v42 = vmax.f32 %v4082_v34, %v4083_v62  ;;  %v4095_v35 = vrot.slane %v4094_v16, 4  ;;  %v5626_v15 = vpop.f32.mrb[16].mxu0 }
 0x541   :  { %5954 = vpow2.f32 %v4239_v26  ;;  %v4216_v55 = vsub.f32 %v9538_v27, %v4072_v54  ;;  %v4077_v3 = vmax.f32 %v4075_v29, %v4076_v6  ;;  %v4003_v7 = vmul.f32 0.2, %v3884_v17  ;;  %v9560_v24 = vpop.f32.mrb[17].mxu0 }
 0x542   :  { %5956 = vpow2.f32 %v4237_v58  ;;  %v4215_v61 = vsub.f32 %v9542_v21, %v4065_v63  ;;  %v4085_v45 = vrot.slane %v4084_v42, 1  ;;  %v4096_v37 = vmax.f32 %v4094_v16, %v4095_v35 }
 0x543   :  { %v4243_v28 = vmul.f32 1.442695, %v4216_v55  ;;  %v4078_v8 = vrot.slane %v4077_v3, 1  ;;  %v9564_v48 = vsel %vm3979_vm13, %v3884_v17, %v4003_v7  ;;  %vm3982_vm8 = vcmp.gt.f32.partialorder %v5623_v0, 0.0 }
 0x544   :  { %v4241_v9 = vmul.f32 1.442695, %v4215_v61  ;;  %v4086_v11 = vmax.f32 %v4084_v42, %v4085_v45  ;;  %v4097_v30 = vrot.slane %v4096_v37, 2  ;;  %v4087_v27 = vsel %vm3715_vm10, %v9564_v48, -inf  ;;  %v9568_v4 = vpop.f32.mrb[18].mxu0 }
 0x545   :  { %5958 = vpow2.f32 %v4243_v28  ;;  %v4079_v12 = vmax.f32 %v4077_v3, %v4078_v8  ;;  %v4088_v22 = vrot.slane %v4087_v27, 4  ;;  %v4006_v21 = vmul.f32 0.2, %v5623_v0  ;;  %v9570_v1 = vpop.f32.mrb[19].mxu0 }
 0x546   :  { %5960 = vpow2.f32 %v4241_v9  ;;  %v4218_v56 = vsub.f32 %v9546_v23, %v4086_v11  ;;  %v4098_v17 = vmax.f32 %v4096_v37, %v4097_v30  ;;  %vm3981_vm11 = vcmp.gt.f32.partialorder %v3894_v14, 0.0 }
 0x547   :  { %v4217_v5 = vsub.f32 %v9550_v52, %v4079_v12  ;;  %v4089_v59 = vmax.f32 %v4087_v27, %v4088_v22  ;;  %v9575_v47 = vsel %vm3982_vm8, %v5623_v0, %v4006_v21  ;;  %v4005_v25 = vmul.f32 0.2, %v3894_v14 }
 0x548   :  { %v4247_v31 = vmul.f32 1.442695, %v4218_v56  ;;  %v4099_v51 = vrot.slane %v4098_v17, 1  ;;  %v4108_v34 = vsel %vm3715_vm10, %v9575_v47, -inf  ;;  %vm3984_vm12 = vcmp.gt.f32.partialorder %v5626_v15, 0.0  ;;  %v9579_v44 = vpop.f32.mrb[20].mxu0 }
 0x549   :  { %v4245_v57 = vmul.f32 1.442695, %v4217_v5  ;;  %v4090_v39 = vrot.slane %v4089_v59, 2  ;;  %v4109_v23 = vrot.slane %v4108_v34, 4  ;;  %v9581_v29 = vsel %vm3981_vm11, %v3894_v14, %v4005_v25  ;;  %v9583_v19 = vpop.f32.mrb[21].mxu0 }
 0x54a   :  { %5962 = vpow2.f32 %v4247_v31  ;;  %v4100_v52 = vmax.f32 %v4098_v17, %v4099_v51  ;;  %v4101_v0 = vsel %vm3715_vm10, %v9581_v29, -inf  ;;  %v4008_v33 = vmul.f32 0.2, %v5626_v15 }
 0x54b   :  { %v9587_v62 = vpop.eup %5954  ;;  %5964 = vpow2.f32 %v4245_v57  ;;  %v4091_v26 = vmax.f32 %v4089_v59, %v4090_v39  ;;  %v4110_v54 = vmax.f32 %v4108_v34, %v4109_v23  ;;  %v4102_v6 = vrot.slane %v4101_v0, 4 }
 0x54c   :  { %v9589_v16 = vpop.eup %5956  ;;  %v4292_v14 = vsel %vm3715_vm10, %v9587_v62, 0.0  ;;  %v4220_v58 = vsub.f32 %v9555_v43, %v4100_v52  ;;  %v9595_v63 = vsel %vm3984_vm12, %v5626_v15, %v4008_v33  ;;  %v9597_v42 = vpop.f32.mrb[22].mxu0  ;;  %vm3983_vm9 = vcmp.gt.f32.partialorder %v9560_v24, 0.0 }
 0x54d   :  { %v4293_v35 = vrot.slane %v4292_v14, 4  ;;  %v4285_v55 = vsel %vm3715_vm10, %v9589_v16, 0.0  ;;  %v4092_v3 = vrot.slane %v4091_v26, 1  ;;  %v4111_v7 = vrot.slane %v4110_v54, 2  ;;  %v9601_v61 = vpop.f32.mrb[23].mxu0 }
 0x54e   :  { %v4286_v45 = vrot.slane %v4285_v55, 4  ;;  %v4251_v37 = vmul.f32 1.442695, %v4220_v58  ;;  %v4103_v28 = vmax.f32 %v4101_v0, %v4102_v6  ;;  %v4122_v8 = vsel %vm3715_vm10, %v9595_v63, -inf }
 0x54f   :  { %v9605_v43 = vpop.eup %5958  ;;  %v4294_v15 = vadd.f32 %v4293_v35, %v4292_v14  ;;  %v4093_v9 = vmax.f32 %v4091_v26, %v4092_v3  ;;  %v4112_v11 = vmax.f32 %v4110_v54, %v4111_v7  ;;  %v4123_v30 = vrot.slane %v4122_v8, 4 }
 0x550   :  { %v9607_v27 = vpop.eup %5960  ;;  %v4287_v12 = vadd.f32 %v4286_v45, %v4285_v55  ;;  %v4306_v22 = vsel %vm3715_vm10, %v9605_v43, 0.0  ;;  %5966 = vpow2.f32 %v4251_v37  ;;  %v4104_v21 = vrot.slane %v4103_v28, 2  ;;  %v9611_v56 = vpop.f32.mrb[24].mxu0 }
 0x551   :  { %v4295_v17 = vrot.slane %v4294_v15, 2  ;;  %v4307_v5 = vrot.slane %v4306_v22, 4  ;;  %v4299_v59 = vsel %vm3715_vm10, %v9607_v27, 0.0  ;;  %v4219_v25 = vsub.f32 %v9564_v48, %v4093_v9  ;;  %v9616_v31 = vpop.f32.mrb[25].mxu0 }
 0x552   :  { %v4288_v51 = vrot.slane %v4287_v12, 2  ;;  %v4300_v34 = vrot.slane %v4299_v59, 4  ;;  %v4113_v57 = vrot.slane %v4112_v11, 1  ;;  %v4105_v39 = vmax.f32 %v4103_v28, %v4104_v21 }
 0x553   :  { %v4296_v23 = vadd.f32 %v4295_v17, %v4294_v15  ;;  %v4308_v52 = vadd.f32 %v4307_v5, %v4306_v22  ;;  %v4249_v0 = vmul.f32 1.442695, %v4219_v25  ;;  %v4124_v33 = vmax.f32 %v4122_v8, %v4123_v30 }
 0x554   :  { %v9618_v26 = vpop.eup %5962  ;;  %v4289_v54 = vadd.f32 %v4288_v51, %v4287_v12  ;;  %v4301_v6 = vadd.f32 %v4300_v34, %v4299_v59  ;;  %v4114_v14 = vmax.f32 %v4112_v11, %v4113_v57  ;;  %v4106_v58 = vrot.slane %v4105_v39, 1  ;;  %v9621_v35 = vpop.f32.mrb[26].mxu0 }
 0x555   :  { %v9623_v48 = vpop.eup %5964  ;;  %v4297_v55 = vrot.slane %v4296_v23, 1  ;;  %v4309_v3 = vrot.slane %v4308_v52, 2  ;;  %v4320_v7 = vsel %vm3715_vm10, %v9618_v26, 0.0  ;;  %5968 = vpow2.f32 %v4249_v0  ;;  %v9627_v45 = vpop.f32.mrb[27].mxu0 }
 0x556   :  { %v4290_v37 = vrot.slane %v4289_v54, 1  ;;  %v4302_v28 = vrot.slane %v4301_v6, 2  ;;  %v4321_v8 = vrot.slane %v4320_v7, 4  ;;  %v4313_v15 = vsel %vm3715_vm10, %v9623_v48, 0.0 }
 0x557   :  { %v4298_v9 = vadd.f32 %v4297_v55, %v4296_v23  ;;  %v4310_v11 = vadd.f32 %v4309_v3, %v4308_v52  ;;  %v4314_v30 = vrot.slane %v4313_v15, 4  ;;  %v4222_v12 = vsub.f32 %v9575_v47, %v4114_v14 }
 0x558   :  { %v4291_v22 = vadd.f32 %v4290_v37, %v4289_v54  ;;  %v4303_v21 = vadd.f32 %v4302_v28, %v4301_v6  ;;  %v4322_v17 = vadd.f32 %v4321_v8, %v4320_v7  ;;  %v4107_v5 = vmax.f32 %v4105_v39, %v4106_v58  ;;  %v9632_v59 = vpop.f32.mrb[28].mxu0 }
 0x559   :  { %5970 = vrcp.f32 %v4298_v9  ;;  %v4311_v25 = vrot.slane %v4310_v11, 1  ;;  %v4315_v51 = vadd.f32 %v4314_v30, %v4313_v15  ;;  %v4255_v34 = vmul.f32 1.442695, %v4222_v12  ;;  %v9634_v57 = vpop.f32.mrb[29].mxu0 }
 0x55a   :  { %v9636_v0 = vpop.eup %5966  ;;  %5972 = vrcp.f32 %v4291_v22  ;;  %v4304_v23 = vrot.slane %v4303_v21, 1  ;;  %v4323_v52 = vrot.slane %v4322_v17, 2  ;;  %v4221_v55 = vsub.f32 %v9581_v29, %v4107_v5 }
 0x55b   :  { %v4312_v47 = vadd.f32 %v4311_v25, %v4310_v11  ;;  %v4316_v54 = vrot.slane %v4315_v51, 2  ;;  %v4334_v39 = vsel %vm3715_vm10, %v9636_v0, 0.0  ;;  %5974 = vpow2.f32 %v4255_v34 }
 0x55c   :  { %v4305_v6 = vadd.f32 %v4304_v23, %v4303_v21  ;;  %v4324_v14 = vadd.f32 %v4323_v52, %v4322_v17  ;;  %v4335_v58 = vrot.slane %v4334_v39, 4  ;;  %v4253_v3 = vmul.f32 1.442695, %v4221_v55 }
 0x55d   :  { %5976 = vrcp.f32 %v4312_v47  ;;  %v4317_v7 = vadd.f32 %v4316_v54, %v4315_v51  ;;  %v4125_v37 = vrot.slane %v4124_v33, 2  ;;  %v4007_v28 = vmul.f32 0.2, %v9560_v24 }
 0x55e   :  { %5978 = vrcp.f32 %v4305_v6  ;;  %v4325_v8 = vrot.slane %v4324_v14, 1  ;;  %v4336_v15 = vadd.f32 %v4335_v58, %v4334_v39  ;;  %vm3986_vm5 = vcmp.gt.f32.partialorder %v9568_v4, 0.0 }
 0x55f   :  { %v9643_v29 = vpop.eup %5968  ;;  %v4318_v9 = vrot.slane %v4317_v7, 1  ;;  %5980 = vpow2.f32 %v4253_v3  ;;  %v4126_v11 = vmax.f32 %v4124_v33, %v4125_v37  ;;  %v9648_v30 = vsel %vm3983_vm9, %v9560_v24, %v4007_v28 }
 0x560   :  { %v4326_v12 = vadd.f32 %v4325_v8, %v4324_v14  ;;  %v4337_v22 = vrot.slane %v4336_v15, 2  ;;  %v4327_v21 = vsel %vm3715_vm10, %v9643_v29, 0.0  ;;  %v4115_v17 = vsel %vm3715_vm10, %v9648_v30, -inf }
 0x561   :  { %v4319_v5 = vadd.f32 %v4318_v9, %v4317_v7  ;;  %v4328_v25 = vrot.slane %v4327_v21, 4  ;;  %v4127_v51 = vrot.slane %v4126_v11, 1  ;;  %v4116_v34 = vrot.slane %v4115_v17, 4 }
 0x562   :  { %5982 = vrcp.f32 %v4326_v12  ;;  %v4338_v23 = vadd.f32 %v4337_v22, %v4336_v15  ;;  %v4010_v33 = vmul.f32 0.2, %v9568_v4  ;;  %v9662_v58 = vmul.f32 0.2, %v9570_v1 }
 0x563   :  { %v5971_v52 = vpop.eup %5970  ;;  %5984 = vrcp.f32 %v4319_v5  ;;  %v4329_v24 = vadd.f32 %v4328_v25, %v4327_v21  ;;  %v4128_v55 = vmax.f32 %v4126_v11, %v4127_v51  ;;  %v4117_v47 = vmax.f32 %v4115_v17, %v4116_v34 }
 0x564   :  { %v5973_v54 = vpop.eup %5972  ;;  %v4478_v39 = vmul.f32 %v5971_v52, %v9587_v62  ;;  %v4339_v6 = vrot.slane %v4338_v23, 1  ;;  %v9659_v14 = vsel %vm3986_vm5, %v9568_v4, %v4010_v33  ;;  %vm3985_vm4 = vcmp.gt.f32.partialorder %v9570_v1, 0.0 }
 0x565   :  { %v9664_v3 = vpop.eup %5974  ;;  %v4477_v7 = vmul.f32 %v5973_v54, %v9589_v16  ;;  %v4330_v37 = vrot.slane %v4329_v24, 2  ;;  %v4224_v28 = vsub.f32 %v9595_v63, %v4128_v55  ;;  %v4118_v8 = vrot.slane %v4117_v47, 2 }
 0x566   :  { %v4598_v15 = vmul.f32 %v9515_v20, %v4478_v39  ;;  %v4340_v62 = vadd.f32 %v4339_v6, %v4338_v23  ;;  %v4348_v9 = vsel %vm3715_vm10, %v9664_v3, 0.0  ;;  %v9673_v4 = vsel %vm3715_vm10, %v9659_v14, -inf }
 0x567   :  { %v5977_v11 = vpop.eup %5976  ;;  %v4597_v12 = vmul.f32 %v9517_v13, %v4477_v7  ;;  %v4331_v22 = vadd.f32 %v4330_v37, %v4329_v24  ;;  %v4349_v21 = vrot.slane %v4348_v9, 4  ;;  %v4259_v16 = vmul.f32 1.442695, %v4224_v28 }
 0x568   :  { %v5979_v17 = vpop.eup %5978  ;;  %v4628_v63 = vsel %vm3715_vm10, %v4598_v15, 0.0  ;;  %v4480_v5 = vmul.f32 %v5977_v11, %v9605_v43  ;;  %5986 = vrcp.f32 %v4340_v62  ;;  %v9678_v20 = vmax.f32 %v4117_v47, %v4118_v8 }
 0x569   :  { %v9680_v25 = vpop.eup %5980  ;;  %v4629_v51 = vrot.slane %v4628_v63, 4  ;;  %v4621_v34 = vsel %vm3715_vm10, %v4597_v12, 0.0  ;;  %v4479_v23 = vmul.f32 %v5979_v17, %v9607_v27  ;;  %v4332_v33 = vrot.slane %v4331_v22, 1 }
 0x56a   :  { %v4622_v13 = vrot.slane %v4621_v34, 4  ;;  %v4600_v52 = vmul.f32 %v9519_v50, %v4480_v5  ;;  %v4350_v24 = vadd.f32 %v4349_v21, %v4348_v9  ;;  %v4341_v55 = vsel %vm3715_vm10, %v9680_v25, 0.0 }
 0x56b   :  { %v4630_v54 = vadd.f32 %v4629_v51, %v4628_v63  ;;  %v4599_v43 = vmul.f32 %v9521_v36, %v4479_v23  ;;  %v4333_v47 = vadd.f32 %v4332_v33, %v4331_v22  ;;  %v4342_v39 = vrot.slane %v4341_v55, 4 }
 0x56c   :  { %v5983_v6 = vpop.eup %5982  ;;  %v4623_v7 = vadd.f32 %v4622_v13, %v4621_v34  ;;  %v4642_v37 = vsel %vm3715_vm10, %v4600_v52, 0.0  ;;  %v4351_v27 = vrot.slane %v4350_v24, 2  ;;  %5988 = vpow2.f32 %v4259_v16 }
 0x56d   :  { %v5985_v28 = vpop.eup %5984  ;;  %v4631_v8 = vrot.slane %v4630_v54, 2  ;;  %v4643_v50 = vrot.slane %v4642_v37, 4  ;;  %v4635_v15 = vsel %vm3715_vm10, %v4599_v43, 0.0  ;;  %v4482_v62 = vmul.f32 %v5983_v6, %v9618_v26 }
 0x56e   :  { %v4624_v9 = vrot.slane %v4623_v7, 2  ;;  %v4636_v11 = vrot.slane %v4635_v15, 4  ;;  %v4481_v36 = vmul.f32 %v5985_v28, %v9623_v48  ;;  %5990 = vrcp.f32 %v4333_v47 }
 0x56f   :  { %v4632_v12 = vadd.f32 %v4631_v8, %v4630_v54  ;;  %v4644_v22 = vadd.f32 %v4643_v50, %v4642_v37  ;;  %v4602_v21 = vmul.f32 %v9523_v41, %v4482_v62  ;;  %v4352_v17 = vadd.f32 %v4351_v27, %v4350_v24 }
 0x570   :  { %v4625_v63 = vadd.f32 %v4624_v9, %v4623_v7  ;;  %v4637_v5 = vadd.f32 %v4636_v11, %v4635_v15  ;;  %v4601_v16 = vmul.f32 %v9525_v60, %v4481_v36  ;;  %v4343_v51 = vadd.f32 %v4342_v39, %v4341_v55 }
 0x571   :  { %v4633_v34 = vrot.slane %v4632_v12, 1  ;;  %v4645_v23 = vrot.slane %v4644_v22, 2  ;;  %v9696_v33 = vsel %vm3715_vm10, %v4602_v21, 0.0  ;;  %v4353_v26 = vrot.slane %v4352_v17, 1 }
 0x572   :  { %v5987_v13 = vpop.eup %5986  ;;  %v4626_v52 = vrot.slane %v4625_v63, 1  ;;  %v4638_v48 = vrot.slane %v4637_v5, 2  ;;  %v4657_v54 = vrot.slane %v9696_v33, 4  ;;  %v4649_v43 = vsel %vm3715_vm10, %v4601_v16, 0.0 }
 0x573   :  { %v9700_v41 = vadd.f32 %v4633_v34, %v4632_v12  ;;  %v9702_v24 = vadd.f32 %v4645_v23, %v4644_v22  ;;  %v4650_v47 = vrot.slane %v4649_v43, 4  ;;  %v4484_v60 = vmul.f32 %v5987_v13, %v9636_v0 }
 0x574   :  { %v9705_v55 = vadd.f32 %v4626_v52, %v4625_v63  ;;  %v9707_v39 = vadd.f32 %v4638_v48, %v4637_v5  ;;  %v4354_v6 = vadd.f32 %v4353_v26, %v4352_v17  ;;  %v4344_v7 = vrot.slane %v4343_v51, 2 }
 0x575   :  { %v9709_v37 = vadd.f32 %v4650_v47, %v4649_v43  ;;  %v9712_v27 = vmul.f32 %v9527_v46, %v4484_v60  ;;  %v4120_v28 = vrot.slane %v9678_v20, 1  ;;  %v4137_v8 = vrot.slane %v9673_v4, 4 }
 0x576   :  { %v9716_v50 = vpop.eup %5988  ;;  %v4640_v15 = vrot.slane %v9707_v39, 1  ;;  %5992 = vrcp.f32 %v4354_v6  ;;  %v4345_v0 = vadd.f32 %v4344_v7, %v4343_v51  ;;  %v9723_v62 = vsel %vm3985_vm4, %v9570_v1, %v9662_v58 }
 0x577   :  { %v4652_v9 = vrot.slane %v9709_v37, 2  ;;  %v4362_v46 = vsel %vm3715_vm10, %v9716_v50, 0.0  ;;  %v4121_v11 = vmax.f32 %v9678_v20, %v4120_v28  ;;  %v4138_v36 = vmax.f32 %v9673_v4, %v4137_v8 }
 0x578   :  { %v5991_v12 = vpop.eup %5990  ;;  %v4346_v22 = vrot.slane %v4345_v0, 1  ;;  %v4363_v21 = vrot.slane %v4362_v46, 4  ;;  %v4129_v17 = vsel %vm3715_vm10, %v9723_v62, -inf  ;;  %vm3988_vm0 = vcmp.gt.f32.partialorder %v9579_v44, 0.0 }
 0x579   :  { %v4483_v1 = vmul.f32 %v5991_v12, %v9643_v29  ;;  %v4223_v58 = vsub.f32 %v9648_v30, %v4121_v11  ;;  %v4139_v63 = vrot.slane %v4138_v36, 2  ;;  %v4130_v5 = vrot.slane %v4129_v17, 4 }
 0x57a   :  { %v4347_v16 = vadd.f32 %v4346_v22, %v4345_v0  ;;  %v4364_v51 = vadd.f32 %v4363_v21, %v4362_v46  ;;  %v4012_v20 = vmul.f32 0.2, %v9579_v44  ;;  %vm3987_vm15 = vcmp.gt.f32.partialorder %v9583_v19, 0.0  ;;  %v4544_v21 = vpop.permute.xlu1 %4543 }
 0x57b   :  { %v9738_v4 = vmul.f32 %v9529_v40, %v4483_v1  ;;  %v4257_v34 = vmul.f32 1.442695, %v4223_v58  ;;  %v4140_v23 = vmax.f32 %v4138_v36, %v4139_v63  ;;  %v4131_v26 = vmax.f32 %v4129_v17, %v4130_v5 }
 0x57c   :  { %5994 = vrcp.f32 %v4347_v16  ;;  %v4365_v13 = vrot.slane %v4364_v51, 2  ;;  %v9741_v29 = vsel %vm3988_vm0, %v9579_v44, %v4012_v20  ;;  %v4011_v30 = vmul.f32 0.2, %v9583_v19 }
 0x57d   :  { %5996 = vpow2.f32 %v4257_v34  ;;  %v4141_v52 = vrot.slane %v4140_v23, 1  ;;  %v4132_v48 = vrot.slane %v4131_v26, 2  ;;  %v4150_v43 = vsel %vm3715_vm10, %v9741_v29, -inf }
 0x57e   :  { %v4366_v47 = vadd.f32 %v4365_v13, %v4364_v51  ;;  %v4151_v60 = vrot.slane %v4150_v43, 4  ;;  %v9747_v40 = vsel %vm3987_vm15, %v9583_v19, %v4011_v30  ;;  %vm3990_vm6 = vcmp.gt.f32.partialorder %v9597_v42, 0.0 }
 0x57f   :  { %v4142_v6 = vmax.f32 %v4140_v23, %v4141_v52  ;;  %v4133_v7 = vmax.f32 %v4131_v26, %v4132_v48  ;;  %v4143_v44 = vsel %vm3715_vm10, %v9747_v40, -inf  ;;  %v4014_v28 = vmul.f32 0.2, %v9597_v42 }
 0x580   :  { %v5993_v8 = vpop.eup %5992  ;;  %v4367_v0 = vrot.slane %v4366_v47, 1  ;;  %v4152_v46 = vmax.f32 %v4150_v43, %v4151_v60  ;;  %v4144_v11 = vrot.slane %v4143_v44, 4  ;;  %vm3989_vm2 = vcmp.gt.f32.partialorder %v9601_v61, 0.0 }
 0x581   :  { %v4486_v36 = vmul.f32 %v5993_v8, %v9664_v3  ;;  %v4226_v19 = vsub.f32 %v9659_v14, %v4142_v6  ;;  %v4134_v12 = vrot.slane %v4133_v7, 1  ;;  %v9757_v22 = vsel %vm3990_vm6, %v9597_v42, %v4014_v28 }
 0x582   :  { %v4368_v17 = vadd.f32 %v4367_v0, %v4366_v47  ;;  %v4153_v1 = vrot.slane %v4152_v46, 2  ;;  %v4145_v58 = vmax.f32 %v4143_v44, %v4144_v11  ;;  %v4164_v63 = vsel %vm3715_vm10, %v9757_v22, -inf }
 0x583   :  { %v4606_v5 = vmul.f32 %v4544_v21, %v4486_v36  ;;  %v4263_v16 = vmul.f32 1.442695, %v4226_v19  ;;  %v4135_v51 = vmax.f32 %v4133_v7, %v4134_v12  ;;  %v4165_v20 = vrot.slane %v4164_v63, 4 }
 0x584   :  { %5998 = vrcp.f32 %v4368_v17  ;;  %v4154_v34 = vmax.f32 %v4152_v46, %v4153_v1  ;;  %v4146_v3 = vrot.slane %v4145_v58, 2  ;;  %v4013_v14 = vmul.f32 0.2, %v9601_v61 }
 0x585   :  { %v4684_v23 = vsel %vm3715_vm10, %v4606_v5, 0.0  ;;  %6000 = vpow2.f32 %v4263_v16  ;;  %v4225_v42 = vsub.f32 %v9723_v62, %v4135_v51  ;;  %v4166_v26 = vmax.f32 %v4164_v63, %v4165_v20  ;;  %v4542_v62 = vpop.permute.xlu0 %4541 }
 0x586   :  { %v5995_v13 = vpop.eup %5994  ;;  %v4685_v30 = vrot.slane %v4684_v23, 4  ;;  %v4155_v52 = vrot.slane %v4154_v34, 1  ;;  %v4147_v48 = vmax.f32 %v4145_v58, %v4146_v3  ;;  %v9767_v43 = vsel %vm3989_vm2, %v9601_v61, %v4013_v14 }
 0x587   :  { %v9769_v47 = vpop.eup %5996  ;;  %v4485_v60 = vmul.f32 %v5995_v13, %v9680_v25  ;;  %v4261_v6 = vmul.f32 1.442695, %v4225_v42  ;;  %v4167_v7 = vrot.slane %v4166_v26, 2  ;;  %v4157_v44 = vsel %vm3715_vm10, %v9767_v43, -inf }
 0x588   :  { %v9774_v28 = vadd.f32 %v4685_v30, %v4684_v23  ;;  %v4355_v8 = vsel %vm3715_vm10, %v9769_v47, 0.0  ;;  %v4156_v0 = vmax.f32 %v4154_v34, %v4155_v52  ;;  %v4148_v46 = vrot.slane %v4147_v48, 1 }
 0x589   :  { %v4605_v11 = vmul.f32 %v4542_v62, %v4485_v60  ;;  %v4356_v61 = vrot.slane %v4355_v8, 4  ;;  %6002 = vpow2.f32 %v4261_v6  ;;  %v4168_v36 = vmax.f32 %v4166_v26, %v4167_v7 }
 0x58a   :  { %v4687_v19 = vrot.slane %v9774_v28, 2  ;;  %v4228_v25 = vsub.f32 %v9741_v29, %v4156_v0  ;;  %v4149_v12 = vmax.f32 %v4147_v48, %v4148_v46  ;;  %v4158_v21 = vrot.slane %v4157_v44, 4  ;;  %v4548_v48 = vpop.permute.xlu1 %4547 }
 0x58b   :  { %v4677_v17 = vsel %vm3715_vm10, %v4605_v11, 0.0  ;;  %v4357_v1 = vadd.f32 %v4356_v61, %v4355_v8  ;;  %v4169_v58 = vrot.slane %v4168_v36, 1  ;;  %vm3992_vm14 = vcmp.gt.f32.partialorder %v9611_v56, 0.0 }
 0x58c   :  { %v4678_v63 = vrot.slane %v4677_v17, 4  ;;  %v4267_v5 = vmul.f32 1.442695, %v4228_v25  ;;  %v4227_v16 = vsub.f32 %v9747_v40, %v4149_v12  ;;  %v4159_v51 = vmax.f32 %v4157_v44, %v4158_v21 }
 0x58d   :  { %v4358_v20 = vrot.slane %v4357_v1, 2  ;;  %v4170_v34 = vmax.f32 %v4168_v36, %v4169_v58  ;;  %v4016_v3 = vmul.f32 0.2, %v9611_v56  ;;  %vm3991_vm7 = vcmp.gt.f32.partialorder %v9616_v31, 0.0 }
 0x58e   :  { %v5999_v29 = vpop.eup %5998  ;;  %v9785_v14 = vadd.f32 %v4678_v63, %v4677_v17  ;;  %6004 = vpow2.f32 %v4267_v5  ;;  %v4265_v23 = vmul.f32 1.442695, %v4227_v16  ;;  %v4160_v42 = vrot.slane %v4159_v51, 2 }
 0x58f   :  { %v9787_v26 = vpop.eup %6000  ;;  %v4488_v13 = vmul.f32 %v5999_v29, %v9716_v50  ;;  %v4359_v30 = vadd.f32 %v4358_v20, %v4357_v1  ;;  %v4230_v40 = vsub.f32 %v9757_v22, %v4170_v34  ;;  %v9794_v52 = vsel %vm3992_vm14, %v9611_v56, %v4016_v3 }
 0x590   :  { %v4680_v60 = vrot.slane %v9785_v14, 2  ;;  %v4376_v6 = vsel %vm3715_vm10, %v9787_v26, 0.0  ;;  %6006 = vpow2.f32 %v4265_v23  ;;  %v4161_v7 = vmax.f32 %v4159_v51, %v4160_v42 }
 0x591   :  { %v4608_v44 = vmul.f32 %v4548_v48, %v4488_v13  ;;  %v4360_v62 = vrot.slane %v4359_v30, 1  ;;  %v4377_v8 = vrot.slane %v4376_v6, 4  ;;  %v4271_v50 = vmul.f32 1.442695, %v4230_v40 }
 0x592   :  { %v4162_v0 = vrot.slane %v4161_v7, 1  ;;  %v4178_v22 = vsel %vm3715_vm10, %v9794_v52, -inf  ;;  %v4015_v46 = vmul.f32 0.2, %v9616_v31  ;;  %vm3994_vm1 = vcmp.gt.f32.partialorder %v9621_v35, 0.0 }
 0x593   :  { %v9803_v56 = vpop.eup %6002  ;;  %v9806_v11 = vsel %vm3715_vm10, %v4608_v44, 0.0  ;;  %v4361_v61 = vadd.f32 %v4360_v62, %v4359_v30  ;;  %v4378_v36 = vadd.f32 %v4377_v8, %v4376_v6  ;;  %6008 = vpow2.f32 %v4271_v50 }
 0x594   :  { %v4699_v25 = vrot.slane %v9806_v11, 4  ;;  %v4369_v12 = vsel %vm3715_vm10, %v9803_v56, 0.0  ;;  %v4163_v21 = vmax.f32 %v4161_v7, %v4162_v0  ;;  %v4179_v17 = vrot.slane %v4178_v22, 4 }
 0x595   :  { %6010 = vrcp.f32 %v4361_v61  ;;  %v4379_v1 = vrot.slane %v4378_v36, 2  ;;  %v4370_v58 = vrot.slane %v4369_v12, 4  ;;  %v9814_v63 = vsel %vm3991_vm7, %v9616_v31, %v4015_v46 }
 0x596   :  { %v4229_v5 = vsub.f32 %v9767_v43, %v4163_v21  ;;  %v4180_v16 = vmax.f32 %v4178_v22, %v4179_v17  ;;  %v4171_v51 = vsel %vm3715_vm10, %v9814_v63, -inf  ;;  %v4018_v20 = vmul.f32 0.2, %v9621_v35 }
 0x597   :  { %v4380_v34 = vadd.f32 %v4379_v1, %v4378_v36  ;;  %v4371_v3 = vadd.f32 %v4370_v58, %v4369_v12  ;;  %v4172_v29 = vrot.slane %v4171_v51, 4  ;;  %vm3993_vm13 = vcmp.gt.f32.partialorder %v9627_v45, 0.0 }
 0x598   :  { %v9821_v23 = vpop.eup %6004  ;;  %v4269_v42 = vmul.f32 1.442695, %v4229_v5  ;;  %v4181_v13 = vrot.slane %v4180_v16, 2  ;;  %v9826_v31 = vsel %vm3994_vm1, %v9621_v35, %v4018_v20  ;;  %v4017_v43 = vmul.f32 0.2, %v9627_v45 }
 0x599   :  { %v4381_v30 = vrot.slane %v4380_v34, 1  ;;  %v4372_v40 = vrot.slane %v4371_v3, 2  ;;  %v4390_v48 = vsel %vm3715_vm10, %v9821_v23, 0.0  ;;  %v4173_v6 = vmax.f32 %v4171_v51, %v4172_v29 }
 0x59a   :  { %v9831_v7 = vpop.eup %6006  ;;  %v4391_v44 = vrot.slane %v4390_v48, 4  ;;  %6012 = vpow2.f32 %v4269_v42  ;;  %v4182_v62 = vmax.f32 %v4180_v16, %v4181_v13  ;;  %v4192_v8 = vsel %vm3715_vm10, %v9826_v31, -inf }
 0x59b   :  { %v4382_v50 = vadd.f32 %v4381_v30, %v4380_v34  ;;  %v4373_v0 = vadd.f32 %v4372_v40, %v4371_v3  ;;  %v4383_v35 = vsel %vm3715_vm10, %v9831_v7, 0.0  ;;  %v4174_v22 = vrot.slane %v4173_v6, 2 }
 0x59c   :  { %v4392_v46 = vadd.f32 %v4391_v44, %v4390_v48  ;;  %v4384_v61 = vrot.slane %v4383_v35, 4  ;;  %v4183_v36 = vrot.slane %v4182_v62, 1  ;;  %v4193_v12 = vrot.slane %v4192_v8, 4  ;;  %v4546_v44 = vpop.permute.xlu0 %4545 }
 0x59d   :  { %v9837_v21 = vpop.eup %6008  ;;  %6014 = vrcp.f32 %v4382_v50  ;;  %v4374_v17 = vrot.slane %v4373_v0, 1  ;;  %v4175_v1 = vmax.f32 %v4173_v6, %v4174_v22  ;;  %v9842_v58 = vsel %vm3993_vm13, %v9627_v45, %v4017_v43 }
 0x59e   :  { %v4393_v5 = vrot.slane %v4392_v46, 2  ;;  %v4385_v16 = vadd.f32 %v4384_v61, %v4383_v35  ;;  %v4404_v51 = vsel %vm3715_vm10, %v9837_v21, 0.0  ;;  %v4184_v20 = vmax.f32 %v4182_v62, %v4183_v36 }
 0x59f   :  { %v6011_v34 = vpop.eup %6010  ;;  %v4375_v3 = vadd.f32 %v4374_v17, %v4373_v0  ;;  %v4405_v29 = vrot.slane %v4404_v51, 4  ;;  %v4176_v42 = vrot.slane %v4175_v1, 1  ;;  %v4194_v13 = vmax.f32 %v4192_v8, %v4193_v12 }
 0x5a0   :  { %v4487_v30 = vmul.f32 %v6011_v34, %v9769_v47  ;;  %v4394_v40 = vadd.f32 %v4393_v5, %v4392_v46  ;;  %v4386_v48 = vrot.slane %v4385_v16, 2  ;;  %v4232_v6 = vsub.f32 %v9794_v52, %v4184_v20 }
 0x5a1   :  { %6016 = vrcp.f32 %v4375_v3  ;;  %v4406_v45 = vadd.f32 %v4405_v29, %v4404_v51  ;;  %v4177_v43 = vmax.f32 %v4175_v1, %v4176_v42  ;;  %v4195_v50 = vrot.slane %v4194_v13, 2 }
 0x5a2   :  { %v4607_v35 = vmul.f32 %v4546_v44, %v4487_v30  ;;  %v4395_v22 = vrot.slane %v4394_v40, 1  ;;  %v4387_v61 = vadd.f32 %v4386_v48, %v4385_v16  ;;  %v4275_v62 = vmul.f32 1.442695, %v4232_v6  ;;  %v4552_v6 = vpop.permute.xlu1 %4551 }
 0x5a3   :  { %v4407_v36 = vrot.slane %v4406_v45, 2  ;;  %v4231_v0 = vsub.f32 %v9814_v63, %v4177_v43  ;;  %v4196_v17 = vmax.f32 %v4194_v13, %v4195_v50  ;;  %v4185_v47 = vsel %vm3715_vm10, %v9842_v58, -inf }
 0x5a4   :  { %v9851_v8 = vpop.eup %6012  ;;  %v4691_v52 = vsel %vm3715_vm10, %v4607_v35, 0.0  ;;  %v4396_v46 = vadd.f32 %v4395_v22, %v4394_v40  ;;  %v4388_v12 = vrot.slane %v4387_v61, 1  ;;  %6018 = vpow2.f32 %v4275_v62 }
 0x5a5   :  { %v4692_v1 = vrot.slane %v4691_v52, 4  ;;  %v4408_v5 = vadd.f32 %v4407_v36, %v4406_v45  ;;  %v4397_v16 = vsel %vm3715_vm10, %v9851_v8, 0.0  ;;  %v4273_v51 = vmul.f32 1.442695, %v4231_v0  ;;  %v4550_v0 = vpop.permute.xlu0 %4549 }
 0x5a6   :  { %6020 = vrcp.f32 %v4396_v46  ;;  %v4389_v20 = vadd.f32 %v4388_v12, %v4387_v61  ;;  %v4398_v63 = vrot.slane %v4397_v16, 4  ;;  %v4197_v34 = vrot.slane %v4196_v17, 1 }
 0x5a7   :  { %v6015_v3 = vpop.eup %6014  ;;  %v9856_v29 = vadd.f32 %v4692_v1, %v4691_v52  ;;  %v4409_v42 = vrot.slane %v4408_v5, 1  ;;  %6022 = vpow2.f32 %v4273_v51  ;;  %v4186_v13 = vrot.slane %v4185_v47, 4 }
 0x5a8   :  { %v4490_v30 = vmul.f32 %v6015_v3, %v9787_v26  ;;  %6024 = vrcp.f32 %v4389_v20  ;;  %v4399_v40 = vadd.f32 %v4398_v63, %v4397_v16  ;;  %v4198_v48 = vmax.f32 %v4196_v17, %v4197_v34 }
 0x5a9   :  { %v4410_v44 = vadd.f32 %v4409_v42, %v4408_v5  ;;  %v4187_v45 = vmax.f32 %v4185_v47, %v4186_v13  ;;  %vm3996_vm8 = vcmp.gt.f32.partialorder %v9632_v59, 0.0  ;;  %v4020_v43 = vmul.f32 0.2, %v9632_v59 }
 0x5aa   :  { %v9861_v50 = vmul.f32 %v4552_v6, %v4490_v30  ;;  %v4400_v35 = vrot.slane %v4399_v40, 2  ;;  %v4234_v22 = vsub.f32 %v9826_v31, %v4198_v48  ;;  %vm3995_vm11 = vcmp.gt.f32.partialorder %v9634_v57, 0.0 }
 0x5ab   :  { %v6017_v61 = vpop.eup %6016  ;;  %6026 = vrcp.f32 %v4410_v44  ;;  %v4188_v26 = vrot.slane %v4187_v45, 2  ;;  %v9866_v62 = vsel %vm3996_vm8, %v9632_v59, %v4020_v43  ;;  %v4019_v36 = vmul.f32 0.2, %v9634_v57  ;;  %v9897_v43 = vpop.permute.xlu0 %4555 }
 0x5ac   :  { %v4489_v17 = vmul.f32 %v6017_v61, %v9803_v56  ;;  %v4401_v47 = vadd.f32 %v4400_v35, %v4399_v40  ;;  %v4279_v52 = vmul.f32 1.442695, %v4234_v22  ;;  %v4206_v46 = vsel %vm3715_vm10, %v9866_v62, -inf }
 0x5ad   :  { %v4189_v12 = vmax.f32 %v4187_v45, %v4188_v26  ;;  %v4207_v31 = vrot.slane %v4206_v46, 4  ;;  %v9873_v1 = vsel %vm3995_vm11, %v9634_v57, %v4019_v36  ;;  %v9878_v59 = vadd.f32 %v4640_v15, %v9707_v39 }
 0x5ae   :  { %v9880_v5 = vpop.eup %6018  ;;  %v9882_v16 = vmul.f32 %v4550_v0, %v4489_v17  ;;  %v4402_v56 = vrot.slane %v4401_v47, 1  ;;  %6028 = vpow2.f32 %v4279_v52  ;;  %v4199_v51 = vsel %vm3715_vm10, %v9873_v1, -inf }
 0x5af   :  { %v4418_v20 = vsel %vm3715_vm10, %v9880_v5, 0.0  ;;  %v4190_v63 = vrot.slane %v4189_v12, 1  ;;  %v4208_v57 = vmax.f32 %v4206_v46, %v4207_v31  ;;  %v4200_v34 = vrot.slane %v4199_v51, 4 }
 0x5b0   :  { %v6021_v3 = vpop.eup %6020  ;;  %v4403_v42 = vadd.f32 %v4402_v56, %v4401_v47  ;;  %v4419_v13 = vrot.slane %v4418_v20, 4  ;;  %v4647_v39 = vrot.slane %v9702_v24, 1  ;;  %v4653_v15 = vadd.f32 %v4652_v9, %v9709_v37 }
 0x5b1   :  { %v9892_v30 = vpop.eup %6022  ;;  %v9895_v40 = vmul.f32 %v6021_v3, %v9821_v23  ;;  %v4191_v48 = vmax.f32 %v4189_v12, %v4190_v63  ;;  %v4209_v6 = vrot.slane %v4208_v57, 2  ;;  %v4201_v44 = vmax.f32 %v4199_v51, %v4200_v34 }
 0x5b2   :  { %v6025_v45 = vpop.eup %6024  ;;  %6030 = vrcp.f32 %v4403_v42  ;;  %v4420_v35 = vadd.f32 %v4419_v13, %v4418_v20  ;;  %v4411_v22 = vsel %vm3715_vm10, %v9892_v30, 0.0  ;;  %v9902_v61 = vadd.f32 %v4647_v39, %v9702_v24  ;;  %v4560_v20 = vpop.permute.xlu1 %4559 }
 0x5b3   :  { %v9905_v37 = vmul.f32 %v6025_v45, %v9831_v7  ;;  %v4412_v9 = vrot.slane %v4411_v22, 4  ;;  %v4233_v23 = vsub.f32 %v9842_v58, %v4191_v48  ;;  %v4210_v26 = vmax.f32 %v4208_v57, %v4209_v6 }
 0x5b4   :  { %v4421_v36 = vrot.slane %v4420_v35, 2  ;;  %v4202_v0 = vrot.slane %v4201_v44, 2  ;;  %v4654_v17 = vrot.slane %v4653_v15, 1  ;;  %v4658_v47 = vadd.f32 %v4657_v54, %v9696_v33  ;;  %v9918_v33 = vpop.permute.xlu0 %4553 }
 0x5b5   :  { %v6027_v52 = vpop.eup %6026  ;;  %v4413_v46 = vadd.f32 %v4412_v9, %v4411_v22  ;;  %v4277_v12 = vmul.f32 1.442695, %v4233_v23  ;;  %v4211_v31 = vrot.slane %v4210_v26, 1  ;;  %v4663_v24 = vsel %vm3715_vm10, %v9738_v4, 0.0 }
 0x5b6   :  { %v4494_v7 = vmul.f32 %v6027_v52, %v9837_v21  ;;  %v4422_v56 = vadd.f32 %v4421_v36, %v4420_v35  ;;  %v4203_v51 = vmax.f32 %v4201_v44, %v4202_v0  ;;  %v9914_v58 = vadd.f32 %v4654_v17, %v4653_v15 }
 0x5b7   :  { %v4414_v63 = vrot.slane %v4413_v46, 2  ;;  %6032 = vpow2.f32 %v4277_v12  ;;  %v4212_v57 = vmax.f32 %v4210_v26, %v4211_v31  ;;  %v4659_v34 = vrot.slane %v4658_v47, 2 }
 0x5b8   :  { %v9916_v3 = vpop.eup %6028  ;;  %v4614_v54 = vmul.f32 %v4560_v20, %v4494_v7  ;;  %v4423_v42 = vrot.slane %v4422_v56, 1  ;;  %v4204_v13 = vrot.slane %v4203_v51, 1  ;;  %v4664_v39 = vrot.slane %v4663_v24, 4  ;;  %v4558_v12 = vpop.permute.xlu0 %4557 }
 0x5b9   :  { %v4415_v4 = vadd.f32 %v4414_v63, %v4413_v46  ;;  %v4432_v21 = vsel %vm3715_vm10, %v9916_v3, 0.0  ;;  %v4236_v15 = vsub.f32 %v9866_v62, %v4212_v57  ;;  %v4660_v48 = vadd.f32 %v4659_v34, %v4658_v47 }
 0x5ba   :  { %v4740_v6 = vsel %vm3715_vm10, %v4614_v54, 0.0  ;;  %v4424_v44 = vadd.f32 %v4423_v42, %v4422_v56  ;;  %v4433_v45 = vrot.slane %v4432_v21, 4  ;;  %v4205_v35 = vmax.f32 %v4203_v51, %v4204_v13 }
 0x5bb   :  { %v4741_v22 = vrot.slane %v4740_v6, 4  ;;  %v4416_v9 = vrot.slane %v4415_v4, 1  ;;  %v4283_v23 = vmul.f32 1.442695, %v4236_v15  ;;  %v4661_v26 = vrot.slane %v4660_v48, 1 }
 0x5bc   :  { %v6031_v36 = vpop.eup %6030  ;;  %6034 = vrcp.f32 %v4424_v44  ;;  %v4434_v0 = vadd.f32 %v4433_v45, %v4432_v21  ;;  %v4235_v17 = vsub.f32 %v9873_v1, %v4205_v35  ;;  %v4665_v52 = vadd.f32 %v4664_v39, %v4663_v24  ;;  %v4564_v35 = vpop.permute.xlu1 %4563 }
 0x5bd   :  { %v9925_v46 = vadd.f32 %v4741_v22, %v4740_v6  ;;  %v4493_v62 = vmul.f32 %v6031_v36, %v9851_v8  ;;  %v4417_v47 = vadd.f32 %v4416_v9, %v4415_v4  ;;  %6036 = vpow2.f32 %v4283_v23 }
 0x5be   :  { %v4435_v31 = vrot.slane %v4434_v0, 2  ;;  %v4281_v7 = vmul.f32 1.442695, %v4235_v17  ;;  %v4662_v56 = vadd.f32 %v4661_v26, %v4660_v48  ;;  %v4666_v51 = vrot.slane %v4665_v52, 2 }
 0x5bf   :  { %v4743_v20 = vrot.slane %v9925_v46, 2  ;;  %v4613_v63 = vmul.f32 %v4558_v12, %v4493_v62  ;;  %6038 = vrcp.f32 %v4417_v47  ;;  %v4670_v57 = vsel %vm3715_vm10, %v9712_v27, 0.0 }
 0x5c0   :  { %v4436_v1 = vadd.f32 %v4435_v31, %v4434_v0  ;;  %6040 = vpow2.f32 %v4281_v7  ;;  %v4667_v24 = vadd.f32 %v4666_v51, %v4665_v52  ;;  %v4671_v34 = vrot.slane %v4670_v57, 4 }
 0x5c1   :  { %v9931_v54 = vpop.eup %6032  ;;  %v4733_v8 = vsel %vm3715_vm10, %v4613_v63, 0.0  ;;  %vm4813_vm12 = vcmask 1041409   ;;  %vm4815_vm9 = vcmask 1042434   ;;  %vm4817_vm5 = vcmask 1043459  }
 0x5c2   :  { %v4734_v42 = vrot.slane %v4733_v8, 4  ;;  %v4437_v13 = vrot.slane %v4436_v1, 1  ;;  %v4425_v39 = vsel %vm3715_vm10, %v9931_v54, 0.0  ;;  %v4668_v4 = vrot.slane %v4667_v24, 1 }
 0x5c3   :  { %v4426_v21 = vrot.slane %v4425_v39, 4  ;;  %v4672_v15 = vadd.f32 %v4671_v34, %v4670_v57  ;;  %v4814_v27 = vsel %vm4813_vm12, %v9700_v41, %v9705_v55  ;;  %vm4819_vm4 = vcmask 1044484  }
 0x5c4   :  { %v9939_v48 = vadd.f32 %v4734_v42, %v4733_v8  ;;  %v4438_v6 = vadd.f32 %v4437_v13, %v4436_v1  ;;  %v4669_v44 = vadd.f32 %v4668_v4, %v4667_v24  ;;  %v4816_v45 = vsel %vm4815_vm9, %v9878_v59, %v4814_v27 }
 0x5c5   :  { %v4427_v22 = vadd.f32 %v4426_v21, %v4425_v39  ;;  %v4673_v9 = vrot.slane %v4672_v15, 2  ;;  %v4818_v23 = vsel %vm4817_vm5, %v9902_v61, %v4816_v45  ;;  %vm4821_vm0 = vcmask 1045509  }
 0x5c6   :  { %v6035_v26 = vpop.eup %6034  ;;  %v4736_v36 = vrot.slane %v9939_v48, 2  ;;  %6042 = vrcp.f32 %v4438_v6  ;;  %v4820_v41 = vsel %vm4819_vm4, %v9914_v58, %v4818_v23  ;;  %vm4823_vm15 = vcmask 1046534  }
 0x5c7   :  { %v9948_v55 = vpop.eup %6036  ;;  %v4496_v0 = vmul.f32 %v6035_v26, %v9880_v5  ;;  %v4428_v59 = vrot.slane %v4427_v22, 2  ;;  %v4674_v17 = vadd.f32 %v4673_v9, %v4672_v15  ;;  %v4822_v52 = vsel %vm4821_vm0, %v4662_v56, %v4820_v41 }
 0x5c8   :  { %v4446_v61 = vsel %vm3715_vm10, %v9948_v55, 0.0  ;;  %v4824_v62 = vsel %vm4823_vm15, %v4669_v44, %v4822_v52  ;;  %vm4825_vm6 = vcmask 1047559   ;;  %v4611_v47 = vmul.f32 %v9918_v33, %v9905_v37  ;;  %v4562_v33 = vpop.permute.xlu1 %4561 }
 0x5c9   :  { %v6039_v12 = vpop.eup %6038  ;;  %v4616_v58 = vmul.f32 %v4564_v35, %v4496_v0  ;;  %v4429_v31 = vadd.f32 %v4428_v59, %v4427_v22  ;;  %v4447_v7 = vrot.slane %v4446_v61, 4  ;;  %v4675_v51 = vrot.slane %v4674_v17, 1 }
 0x5ca   :  { %v9957_v63 = vpop.eup %6040  ;;  %v4495_v5 = vmul.f32 %v6039_v12, %v9892_v30  ;;  %v4612_v56 = vmul.f32 %v9897_v43, %v9895_v40  ;;  %v4681_v57 = vadd.f32 %v4680_v60, %v9785_v14  ;;  %v4688_v37 = vadd.f32 %v4687_v19, %v9774_v28 }
 0x5cb   :  { %v9969_v1 = vsel %vm3715_vm10, %v4616_v58, 0.0  ;;  %v4430_v24 = vrot.slane %v4429_v31, 1  ;;  %v4448_v34 = vadd.f32 %v4447_v7, %v4446_v61  ;;  %v4439_v30 = vsel %vm3715_vm10, %v9957_v63, 0.0 }
 0x5cc   :  { %v4755_v8 = vrot.slane %v9969_v1, 4  ;;  %v4615_v40 = vmul.f32 %v4562_v33, %v4495_v5  ;;  %v4440_v43 = vrot.slane %v4439_v30, 4  ;;  %v4676_v42 = vadd.f32 %v4675_v51, %v4674_v17  ;;  %v4568_v59 = vpop.permute.xlu1 %4567 }
 0x5cd   :  { %v4431_v13 = vadd.f32 %v4430_v24, %v4429_v31  ;;  %v4449_v14 = vrot.slane %v4448_v34, 2  ;;  %v4682_v60 = vrot.slane %v4681_v57, 1  ;;  %v4689_v39 = vrot.slane %v4688_v37, 1 }
 0x5ce   :  { %v4747_v28 = vsel %vm3715_vm10, %v4615_v40, 0.0  ;;  %v4441_v19 = vadd.f32 %v4440_v43, %v4439_v30  ;;  %v4826_v4 = vsel %vm4825_vm6, %v4676_v42, %v4824_v62  ;;  %v4694_v21 = vrot.slane %v9856_v29, 2 }
 0x5cf   :  { %v4748_v15 = vrot.slane %v4747_v28, 4  ;;  %6044 = vrcp.f32 %v4431_v13  ;;  %v4450_v27 = vadd.f32 %v4449_v14, %v4448_v34  ;;  %5654 = vmatmul.mubr.msk.f32.vlgmr.msra.gmra.mrb[30].mxu0 %vm3715_vm10, %v4826_v4  ;;  %v4683_v6 = vadd.f32 %v4682_v60, %v4681_v57 }
 0x5d0   :  { %v6043_v44 = vpop.eup %6042  ;;  %v4442_v45 = vrot.slane %v4441_v19, 2  ;;  %5656 = vmatprep.mubr.msk.f32.mxu0 %vm6091_vm3, %v6092_v38  ;;  %v4690_v35 = vadd.f32 %v4689_v39, %v4688_v37  ;;  %v4695_v22 = vadd.f32 %v4694_v21, %v9856_v29  ;;  %v4700_v9 = vadd.f32 %v4699_v25, %v9806_v11 }
 0x5d1   :  { %v4749_v23 = vadd.f32 %v4748_v15, %v4747_v28  ;;  %v4498_v26 = vmul.f32 %v6043_v44, %v9916_v3  ;;  %v4451_v41 = vrot.slane %v4450_v27, 1  ;;  %v4705_v0 = vsel %vm3715_vm10, %v9882_v16, 0.0  ;;  %v4566_v15 = vpop.permute.xlu0 %4565 }
 0x5d2   :  { %v4443_v17 = vadd.f32 %v4442_v45, %v4441_v19  ;;  %v4696_v52 = vrot.slane %v4695_v22, 1  ;;  %v4701_v61 = vrot.slane %v4700_v9, 2  ;;  %v4706_v62 = vrot.slane %v4705_v0, 4 }
 0x5d3   :  { %v4618_v12 = vmul.f32 %v4568_v59, %v4498_v26  ;;  %v4452_v58 = vadd.f32 %v4451_v41, %v4450_v27  ;;  %v4712_v29 = vsel %vm3715_vm10, %v9861_v50, 0.0  ;;  %v4719_v31 = vsel %vm3715_vm10, %v4611_v47, 0.0 }
 0x5d4   :  { %v4444_v11 = vrot.slane %v4443_v17, 1  ;;  %v4697_v25 = vadd.f32 %v4696_v52, %v4695_v22  ;;  %v4702_v7 = vadd.f32 %v4701_v61, %v4700_v9  ;;  %v4707_v3 = vadd.f32 %v4706_v62, %v4705_v0 }
 0x5d5   :  { %6046 = vrcp.f32 %v4452_v58  ;;  %v4713_v51 = vrot.slane %v4712_v29, 4  ;;  %v4720_v5 = vrot.slane %v4719_v31, 4  ;;  %v4726_v16 = vsel %vm3715_vm10, %v4612_v56, 0.0 }
 0x5d6   :  { %v4445_v57 = vadd.f32 %v4444_v11, %v4443_v17  ;;  %v4703_v37 = vrot.slane %v4702_v7, 1  ;;  %v4708_v33 = vrot.slane %v4707_v3, 2  ;;  %v4727_v24 = vrot.slane %v4726_v16, 4 }
 0x5d7   :  { %v4714_v34 = vadd.f32 %v4713_v51, %v4712_v29  ;;  %v4721_v30 = vadd.f32 %v4720_v5, %v4719_v31  ;;  %v4827_v40 = vsel %vm4813_vm12, %v4690_v35, %v4683_v6  ;;  %v4737_v50 = vadd.f32 %v4736_v36, %v9939_v48 }
 0x5d8   :  { %6048 = vrcp.f32 %v4445_v57  ;;  %v4704_v47 = vadd.f32 %v4703_v37, %v4702_v7  ;;  %v4709_v43 = vadd.f32 %v4708_v33, %v4707_v3  ;;  %v4728_v42 = vadd.f32 %v4727_v24, %v4726_v16  ;;  %v4572_v7 = vpop.permute.xlu1 %4571 }
 0x5d9   :  { %v6045_v13 = vpop.eup %6044  ;;  %v4715_v14 = vrot.slane %v4714_v34, 2  ;;  %v4722_v60 = vrot.slane %v4721_v30, 2  ;;  %v4828_v56 = vsel %vm4815_vm9, %v4697_v25, %v4827_v40  ;;  %v4738_v39 = vrot.slane %v4737_v50, 1 }
 0x5da   :  { %v4497_v28 = vmul.f32 %v6045_v13, %v9931_v54  ;;  %v4710_v19 = vrot.slane %v4709_v43, 1  ;;  %v4729_v4 = vrot.slane %v4728_v42, 2  ;;  %v4829_v21 = vsel %vm4817_vm5, %v4704_v47, %v4828_v56 }
 0x5db   :  { %v4716_v27 = vadd.f32 %v4715_v14, %v4714_v34  ;;  %v4723_v6 = vadd.f32 %v4722_v60, %v4721_v30  ;;  %v4739_v48 = vadd.f32 %v4738_v39, %v4737_v50  ;;  %v4744_v36 = vadd.f32 %v4743_v20, %v9925_v46  ;;  %v4570_v30 = vpop.permute.xlu0 %4569 }
 0x5dc   :  { %v4617_v44 = vmul.f32 %v4566_v15, %v4497_v28  ;;  %v4711_v45 = vadd.f32 %v4710_v19, %v4709_v43  ;;  %v4730_v35 = vadd.f32 %v4729_v4, %v4728_v42  ;;  %v4750_v22 = vrot.slane %v4749_v23, 2 }
 0x5dd   :  { %v4717_v9 = vrot.slane %v4716_v27, 1  ;;  %v4724_v26 = vrot.slane %v4723_v6, 1  ;;  %v4745_v41 = vrot.slane %v4744_v36, 1  ;;  %v4756_v54 = vadd.f32 %v4755_v8, %v9969_v1 }
 0x5de   :  { %v4731_v0 = vrot.slane %v4730_v35, 1  ;;  %v4830_v59 = vsel %vm4819_vm4, %v4711_v45, %v4829_v21  ;;  %v4751_v17 = vadd.f32 %v4750_v22, %v4749_v23  ;;  %v4761_v52 = vsel %vm3715_vm10, %v4617_v44, 0.0 }
 0x5df   :  { %v6047_v61 = vpop.eup %6046  ;;  %v4718_v62 = vadd.f32 %v4717_v9, %v4716_v27  ;;  %v4725_v46 = vadd.f32 %v4724_v26, %v4723_v6  ;;  %v4746_v20 = vadd.f32 %v4745_v41, %v4744_v36  ;;  %v4757_v58 = vrot.slane %v4756_v54, 2 }
 0x5e0   :  { %v4500_v29 = vmul.f32 %v6047_v61, %v9948_v55  ;;  %v4732_v31 = vadd.f32 %v4731_v0, %v4730_v35  ;;  %v4752_v11 = vrot.slane %v4751_v17, 1  ;;  %v4762_v25 = vrot.slane %v4761_v52, 4 }
 0x5e1   :  { %v4831_v3 = vsel %vm4821_vm0, %v4718_v62, %v4830_v59  ;;  %v4758_v1 = vadd.f32 %v4757_v58, %v4756_v54  ;;  %v4768_v8 = vsel %vm3715_vm10, %v4618_v12, 0.0  ;;  %v4834_v23 = vsel %vm4813_vm12, %v4746_v20, %v4739_v48 }
 0x5e2   :  { %v6049_v51 = vpop.eup %6048  ;;  %v4832_v5 = vsel %vm4823_vm15, %v4725_v46, %v4831_v3  ;;  %v4620_v16 = vmul.f32 %v4572_v7, %v4500_v29  ;;  %v4753_v57 = vadd.f32 %v4752_v11, %v4751_v17  ;;  %v4763_v37 = vadd.f32 %v4762_v25, %v4761_v52 }
 0x5e3   :  { %v4499_v33 = vmul.f32 %v6049_v51, %v9957_v63  ;;  %v4833_v55 = vsel %vm4825_vm6, %v4732_v31, %v4832_v5  ;;  %v4759_v24 = vrot.slane %v4758_v1, 1  ;;  %v4769_v34 = vrot.slane %v4768_v8, 4 }
 0x5e4   :  { %5657 = vmatmul.mubr.msk.f32.gmra.mrb[32].mxu0 %vm3715_vm10, %v4833_v55  ;;  %v4764_v40 = vrot.slane %v4763_v37, 2  ;;  %v4782_v12 = vsel %vm3715_vm10, %v4620_v16, 0.0  ;;  %v4835_v50 = vsel %vm4815_vm9, %v4753_v57, %v4834_v23 }
 0x5e5   :  { %5659 = vmatprep.mubr.msk.f32.mxu0 %vm6091_vm3, %v6092_v38  ;;  %v4619_v47 = vmul.f32 %v4570_v30, %v4499_v33  ;;  %v4760_v43 = vadd.f32 %v4759_v24, %v4758_v1  ;;  %v4770_v42 = vadd.f32 %v4769_v34, %v4768_v8  ;;  %v4783_v13 = vrot.slane %v4782_v12, 4 }
 0x5e6   :  { %v4765_v63 = vadd.f32 %v4764_v40, %v4763_v37 }
 0x5e7   :  { %v4771_v14 = vrot.slane %v4770_v42, 2  ;;  %v4775_v60 = vsel %vm3715_vm10, %v4619_v47, 0.0  ;;  %v4784_v56 = vadd.f32 %v4783_v13, %v4782_v12  ;;  %v4836_v39 = vsel %vm4817_vm5, %v4760_v43, %v4835_v50  ;;  %v10048_v13 = vld [vmem:[%s10112_s4] sm:$0x3f] }
 0x5e8   :  { %v4766_v28 = vrot.slane %v4765_v63, 1  ;;  %v4776_v19 = vrot.slane %v4775_v60, 4 }
 0x5e9   :  { %v4772_v4 = vadd.f32 %v4771_v14, %v4770_v42  ;;  %v4785_v21 = vrot.slane %v4784_v56, 2 }
 0x5ea   :  { %v4767_v15 = vadd.f32 %v4766_v28, %v4765_v63  ;;  %v4777_v27 = vadd.f32 %v4776_v19, %v4775_v60  ;;  %v10619_v63 = vld [vmem:[#allocation9_spill] sm:$0xff] }
 0x5eb   :  { %v4773_v6 = vrot.slane %v4772_v4, 1  ;;  %v4786_v48 = vadd.f32 %v4785_v21, %v4784_v56  ;;  %v5031_v14 = vrot.slane %v10048_v13, %v10619_v63  ;;  %v62_v21 = vld [vmem:[%s10111_s3 + $0x58] sm:$0xff] }
 0x5ec   :  { %v4778_v36 = vrot.slane %v4777_v27, 2  ;;  %v4837_v44 = vsel %vm4819_vm4, %v4767_v15, %v4836_v39  ;;  %v63_v15 = vld [vmem:[%s10111_s3 + $0x60] sm:$0xff] }
 0x5ed   :  { %v4774_v45 = vadd.f32 %v4773_v6, %v4772_v4  ;;  %v4787_v22 = vrot.slane %v4786_v48, 1 }
 0x5ee   :  { %v4779_v35 = vadd.f32 %v4778_v36, %v4777_v27  ;;  %v5705_v27 = vpack.c.bf16 %v63_v15, %v62_v21 }
 0x5ef   :  { %v4838_v9 = vsel %vm4821_vm0, %v4774_v45, %v4837_v44  ;;  %v4788_v54 = vadd.f32 %v4787_v22, %v4786_v48  ;;  %v64_v44 = vld [vmem:[%s10111_s3 + $0x68] sm:$0xff]  ;;  %v65_v45 = vld [vmem:[%s10111_s3 + $0x70] sm:$0xff] }
 0x5f0   :  { %v4780_v26 = vrot.slane %v4779_v35, 1  ;;  %5706 = vmatpush3.bf16.msra.mxu0 %v5705_v27 }
 0x5f1   :  { %5707 = vmatprep.subr.bf16.mxu0 %v6090_v10 }
 0x5f2   :  { %v4781_v41 = vadd.f32 %v4780_v26, %v4779_v35  ;;  %v5708_v35 = vpack.c.bf16 %v65_v45, %v64_v44 }
 0x5f4   :  { %v4839_v0 = vsel %vm4823_vm15, %v4781_v41, %v4838_v9  ;;  %5709 = vmatpush3.bf16.msra.mxu0 %v5708_v35 }
 0x5f5   :  { %v4840_v59 = vsel %vm4825_vm6, %v4788_v54, %v4839_v0 }
 0x5f6   :  { %5660 = vmatmul.mubr.msk.f32.gmra.mrb[34].mxu0 %vm3715_vm10, %v4840_v59 }
 0x5f7   :  { %5670 = vmatprep.mubr.msk.f32.mxu0 %vm6091_vm3, %v6092_v38 }
 0x6a2   :  { %v4929_v17 = vpop.f32.mrb[30].mxu0 }
 0x6a3   :  { %4946 = vrot.lane.b32.xlu0 %v4929_v17, %s6094_s25  ;;  %v5655_v52 = vpop.f32.mrb[31].mxu0 }
 0x6b7   :  { %v4934_v61 = vpop.f32.mrb[32].mxu0 }
 0x6b8   :  { %4948 = vrot.lane.b32.xlu1 %v4934_v61, %s6094_s25  ;;  %v5658_v62 = vpop.f32.mrb[33].mxu0 }
 0x6c9   :  { %v4939_v46 = vpop.f32.mrb[34].mxu0 }
 0x6ca   :  { %4950 = vrot.lane.b32.xlu0 %v4939_v46, %s6094_s25  ;;  %v5661_v20 = vpop.f32.mrb[35].mxu0 }
 0x715   :  { %v4947_v58 = vpop.permute.xlu0 %4946 }
 0x716   :  { %v4955_v29 = vadd.f32 %v4947_v58, %v9365_v53 }
 0x718   :  { %v4958_v31 = vadd.f32 %v4955_v29, %v9378_v49 }
 0x71a   :  { %v4961_v11 = vmax.f32 %v4958_v31, 0.0 }
 0x71c   :  { %4967 = vrot.lane.b32.xlu1 %v4961_v11, %s6083_s1 }
 0x72a   :  { %v4949_v25 = vpop.permute.xlu1 %4948 }
 0x72b   :  { %v4956_v7 = vadd.f32 %v4949_v25, %v9368_v32 }
 0x72d   :  { %v4959_v3 = vadd.f32 %v4956_v7, %v9378_v49 }
 0x72f   :  { %v4962_v1 = vmax.f32 %v4959_v3, 0.0 }
 0x731   :  { %4969 = vrot.lane.b32.xlu0 %v4962_v1, %s6083_s1 }
 0x73c   :  { %v4951_v8 = vpop.permute.xlu0 %4950 }
 0x73d   :  { %v4957_v23 = vadd.f32 %v4951_v8, %v9372_v18 }
 0x73f   :  { %v4960_v51 = vadd.f32 %v4957_v23, %v9378_v49 }
 0x741   :  { %v4963_v5 = vmax.f32 %v4960_v51, 0.0 }
 0x743   :  { %4971 = vrot.lane.b32.xlu1 %v4963_v5, %s6083_s1 }
 0x78e   :  { %v4968_v53 = vpop.permute.xlu1 %4967 }
 0x78f   :  { %v4976_v16 = vsel %vm3715_vm10, %v4968_v53, 0.0 }
 0x790   :  { %4977 = vadd.xlane.f32.xlu0 %v4976_v16 }
 0x7a3   :  { %v4970_v57 = vpop.permute.xlu0 %4969 }
 0x7a4   :  { %v4979_v32 = vsel %vm3715_vm10, %v4970_v57, 0.0 }
 0x7a5   :  { %4980 = vadd.xlane.f32.xlu1 %v4979_v32 }
 0x7b5   :  { %v4972_v37 = vpop.permute.xlu1 %4971 }
 0x7b6   :  { %v4982_v33 = vsel %vm3715_vm10, %v4972_v37, 0.0 }
 0x7b7   :  { %4983 = vadd.xlane.f32.xlu0 %v4982_v33 }
 0x81d   :  { %v4978_v55 = vpop.xlane.xlu0 %4977 }
 0x81e   :  { %v4986_v24 = vmul.f32 0.03125, %v4978_v55 }
 0x820   :  { %v4989_v18 = vsub.f32 %v4961_v11, %v4986_v24 }
 0x822   :  { %v4992_v34 = vmul.f32 %v4989_v18, %v4989_v18 }
 0x824   :  { %4998 = vrot.lane.b32.xlu0 %v4992_v34, %s6083_s1 }
 0x832   :  { %v4981_v49 = vpop.xlane.xlu1 %4980 }
 0x833   :  { %v4987_v30 = vmul.f32 0.03125, %v4981_v49 }
 0x835   :  { %v4990_v40 = vsub.f32 %v4962_v1, %v4987_v30 }
 0x837   :  { %v4993_v12 = vmul.f32 %v4990_v40, %v4990_v40 }
 0x839   :  { %5000 = vrot.lane.b32.xlu1 %v4993_v12, %s6083_s1 }
 0x844   :  { %v4984_v50 = vpop.xlane.xlu0 %4983 }
 0x845   :  { %v4988_v47 = vmul.f32 0.03125, %v4984_v50 }
 0x847   :  { %v4991_v43 = vsub.f32 %v4963_v5, %v4988_v47  ;;  %v10620_v5 = vld [vmem:[#allocation12_spill] sm:$0xff] }
 0x848   :  { %v5158_v53 = vrot.slane %v10048_v13, %v10620_v5 }
 0x849   :  { %v4994_v42 = vmul.f32 %v4991_v43, %v4991_v43 }
 0x84b   :  { %5002 = vrot.lane.b32.xlu1 %v4994_v42, %s6083_s1  ;;  %v10621_v42 = vld [vmem:[#allocation11_spill] sm:$0xff] }
 0x84c   :  { %v5181_v63 = vrot.slane %v10048_v13, %v10621_v42 }
 0x84f   :  { %5033 = vrot.lane.b32.xlu1 %v5031_v14, %s6094_s25 }
 0x896   :  { %v4999_v60 = vpop.permute.xlu0 %4998 }
 0x897   :  { %v5007_v56 = vsel %vm3715_vm10, %v4999_v60, 0.0 }
 0x898   :  { %5008 = vadd.xlane.f32.xlu0 %v5007_v56 }
 0x8ab   :  { %v5001_v39 = vpop.permute.xlu1 %5000 }
 0x8ac   :  { %v5010_v28 = vsel %vm3715_vm10, %v5001_v39, 0.0 }
 0x8ad   :  { %5011 = vadd.xlane.f32.xlu1 %v5010_v28 }
 0x8bd   :  { %v5003_v19 = vpop.permute.xlu1 %5002 }
 0x8be   :  { %v5013_v4 = vsel %vm3715_vm10, %v5003_v19, 0.0  ;;  %v10622_v19 = vlaneseq }
 0x8bf   :  { %5014 = vadd.xlane.f32.xlu0 %v5013_v4 }
 0x8c0   :  { %v5202_v4 = vand.u32 127, %v10622_v19 }
 0x8c1   :  { %v5034_v9 = vpop.permute.xlu1 %5033 }
 0x8c2   :  { %v5205_v27 = vsub.s32 %v5202_v4, %v10617_v2 }
 0x925   :  { %v5009_v6 = vpop.xlane.xlu0 %5008 }
 0x926   :  { %v5016_v48 = vmul.f32 0.03125, %v5009_v6 }
 0x928   :  { %v5019_v36 = vadd.f32 1e-05, %v5016_v48 }
 0x92a   :  { %6050 = vrsqrt.f32 %v5019_v36 }
 0x934   :  { %v6051_v22 = vpop.eup %6050 }
 0x935   :  { %v5025_v26 = vmul.f32 %v6051_v22, %v4989_v18 }
 0x937   :  { %v5036_v41 = vmul.f32 %v5034_v9, %v5025_v26 }
 0x939   :  { %v5039_v54 = vadd.f32 %v5036_v41, %v5031_v14 }
 0x93a   :  { %v5012_v10 = vpop.xlane.xlu1 %5011 }
 0x93b   :  { %v5017_v0 = vmul.f32 0.03125, %v5012_v10  ;;  %5046 = vrot.lane.b32.xlu0 %v5039_v54, %s6083_s1 }
 0x93d   :  { %v5020_v59 = vadd.f32 1e-05, %v5017_v0 }
 0x93f   :  { %6052 = vrsqrt.f32 %v5020_v59 }
 0x949   :  { %v6053_v17 = vpop.eup %6052 }
 0x94a   :  { %v5026_v52 = vmul.f32 %v6053_v17, %v4990_v40 }
 0x94c   :  { %v5015_v61 = vpop.xlane.xlu0 %5014  ;;  %v5037_v62 = vmul.f32 %v5034_v9, %v5026_v52 }
 0x94d   :  { %v5018_v46 = vmul.f32 0.03125, %v5015_v61 }
 0x94e   :  { %v5040_v20 = vadd.f32 %v5037_v62, %v5031_v14 }
 0x94f   :  { %v5021_v58 = vadd.f32 1e-05, %v5018_v46 }
 0x950   :  { %5048 = vrot.lane.b32.xlu1 %v5040_v20, %s6083_s1 }
 0x951   :  { %6054 = vrsqrt.f32 %v5021_v58 }
 0x95b   :  { %v6055_v29 = vpop.eup %6054 }
 0x95c   :  { %v5027_v31 = vmul.f32 %v6055_v29, %v4991_v43 }
 0x95e   :  { %v5038_v11 = vmul.f32 %v5034_v9, %v5027_v31 }
 0x960   :  { %v5041_v25 = vadd.f32 %v5038_v11, %v5031_v14 }
 0x962   :  { %5050 = vrot.lane.b32.xlu0 %v5041_v25, %s6083_s1 }
 0x9ad   :  { %v5047_v7 = vpop.permute.xlu0 %5046 }
 0x9ae   :  { %5056 = vst.msk [vmem:[#allocation2] sm:$0xff] %vm3715_vm10, %v5047_v7 }
 0x9b5   :  { %v5063_v3 = vld [vmem:[#allocation2] sm:$0xff] }
 0x9b6   :  { %5671 = vmatmul.mubr.msk.f32.vlgmr.msra.gmra.mrb[36].mxu0 %vm3715_vm10, %v5063_v3 }
 0x9b7   :  { %5673 = vmatprep.mubr.msk.f32.mxu0 %vm6091_vm3, %v6092_v38 }
 0x9c2   :  { %v5049_v1 = vpop.permute.xlu1 %5048 }
 0x9c3   :  { %5057 = vst.msk [vmem:[#allocation2 + $0x8] sm:$0xff] %vm3715_vm10, %v5049_v1 }
 0x9ca   :  { %v5064_v8 = vld [vmem:[#allocation2 + $0x8] sm:$0xff] }
 0x9cb   :  { %5674 = vmatmul.mubr.msk.f32.gmra.mrb[38].mxu0 %vm3715_vm10, %v5064_v8 }
 0x9cc   :  { %5676 = vmatprep.mubr.msk.f32.mxu0 %vm6091_vm3, %v6092_v38  ;;  %v5191_v38 = vrot.slane %v10048_v13, 4  ;;  %vm5213_vm3 = vcmask 58368  }
 0x9d4   :  { %v5051_v23 = vpop.permute.xlu0 %5050 }
 0x9d5   :  { %5058 = vst.msk [vmem:[#allocation2 + $0x10] sm:$0xff] %vm3715_vm10, %v5051_v23 }
 0x9dc   :  { %v5065_v51 = vld [vmem:[#allocation2 + $0x10] sm:$0xff] }
 0x9dd   :  { %5677 = vmatmul.mubr.msk.f32.gmra.mrb[40].mxu0 %vm3715_vm10, %v5065_v51 }
 0xa89   :  { %v5141_v16 = vpop.f32.mrb[36].mxu0 }
 0xa8a   :  { %v5159_v57 = vadd.f32 %v5158_v53, %v5141_v16  ;;  %v5672_v32 = vpop.f32.mrb[37].mxu0 }
 0xa8c   :  { %5169 = vrot.lane.b32.xlu1 %v5159_v57, %s6094_s25 }
 0xa9e   :  { %v5146_v37 = vpop.f32.mrb[38].mxu0 }
 0xa9f   :  { %v5160_v33 = vadd.f32 %v5158_v53, %v5146_v37  ;;  %v5675_v55 = vpop.f32.mrb[39].mxu0 }
 0xaa1   :  { %5163 = vrot.lane.b32.xlu0 %v5160_v33, %s6083_s1 }
 0xaa5   :  { %5192 = vrot.lane.b32.xlu0 %v5191_v38, %s6083_s1 }
 0xab0   :  { %v5151_v24 = vpop.f32.mrb[40].mxu0 }
 0xab1   :  { %v5161_v18 = vadd.f32 %v5158_v53, %v5151_v24  ;;  %v5678_v34 = vpop.f32.mrb[41].mxu0 }
 0xafe   :  { %v5170_v49 = vpop.permute.xlu1 %5169 }
 0xaff   :  { %v5172_v30 = vadd.f32 %v5170_v49, %v5161_v18 }
 0xb01   :  { %v5173_v40 = vmax.f32 %v5172_v30, 0.0 }
 0xb03   :  { %5175 = vrot.lane.b32.xlu1 %v5173_v40, %s6083_s1  ;;  %s6095_s1 = smov [#allocation3]  }
 0xb04   :  { %s5221_s10 = sshll.u32 %s6095_s1, 4  ;;  %s5222_s10 = int_to_ptr.vmem [resolvable:$true] %s5221_s10 }
 0xb05   :  { %s6058_s11 = scalar_lea.vmem %s5222_s10, 32  ;;  %p6063_p1 = scmp.lt.s32.totalorder %s5222_s10, %s5222_s10 }
 0xb06   :  { %p6059_p0 = scmp.ne.s32.totalorder %s5222_s10, %s6058_s11  ;;  %p6064_p2 = scmp.lt.s32.totalorder %s6058_s11, %s6058_s11 }
 0xb08   :  { %p6065_p3 = por %p6064_p2, %p6063_p1 }
 0xb0a   :  { %p6066_p4 = pnand %p6065_p3, %p6059_p0 }
 0xb13   :  { %v5164_v12 = vpop.permute.xlu0 %5163 }
 0xb14   :  { %v5166_v47 = vadd.f32 %v5164_v12, %v5159_v57 }
 0xb16   :  { %v5167_v43 = vmax.f32 %v5166_v47, 0.0 }
 0xb17   :  { %v5193_v50 = vpop.permute.xlu0 %5192 }
 0xb18   :  { %5830 = vpush %v5193_v50  ;;  %v5182_v14 = vmul.f32 %v5181_v63, %v5167_v43 }
 0xb1a   :  { %v5184_v60 = vsel %vm3715_vm10, %v5182_v14, 0.0 }
 0xb27   :  { %5185 = vadd.xlane.f32.xlu1 %v5184_v60 }
 0xb49   :  { %s5831_s3 = spop %5830 }
 0xb4a   :  { %v5195_v21 = vstv %s5831_s3 }
 0xb75   :  { %v5176_v56 = vpop.permute.xlu1 %5175 }
 0xb76   :  { %v5183_v39 = vmul.f32 %v5181_v63, %v5176_v56 }
 0xb78   :  { %v5187_v28 = vsel %vm3715_vm10, %v5183_v39, 0.0 }
 0xb79   :  { %5188 = vadd.xlane.f32.xlu0 %v5187_v28 }
 0xbb4   :  { %v5186_v15 = vpop.xlane.xlu1 %5185 }
 0xbb5   :  { %v5197_v6 = vadd.f32 %v5195_v21, %v5186_v15 }
 0xbb7   :  { %v5206_v13 = vrot.slane %v5197_v6, %v5205_v27 }
 0xc06   :  { %v5189_v48 = vpop.xlane.xlu0 %5188 }
 0xc07   :  { %v5198_v36 = vadd.f32 %v5195_v21, %v5189_v48 }
 0xc09   :  { %v5210_v44 = vrot.slane %v5198_v36, %v5205_v27 }
 0xc0b   :  { %v5211_v45 = vsel %vm4813_vm12, %v5210_v44, %v5206_v13 }
 0xc0c   :  { %5214 = vst.msk [vmem:[#allocation3] sm:$0x3] %vm5213_vm3, %v5211_v45 }
 0xc0d   :  { %6069 = shalt.err (!%p6066_p4)
}
 0xc0e   :  { %s6070_s14 = scalar_lea.hbm %s10113_s5, 32 }
 0xc0f   :  { %p6071_p5 = scmp.ne.s32.totalorder %s10113_s5, %s6070_s14  ;;  %p6074_p6 = scmp.lt.u32.totalorder %s6070_s14, %s10113_s5 }
 0xc11   :  { %p6076_p7 = pnand %p6074_p6, %p6071_p5 }
 0xc13   :  { %6079 = shalt.err (!%p6076_p7)
}
 0xc14   :  { %5224 = dma.vmem_to_hbm [thread:$0]  %s5222_s10, 32, %s10113_s5, [#allocation4]  }
 0xc15   :  { %6080 = dma.done.wait [#allocation4], 32  }
 0xc16   :  { %6081 = vsyncadd [#allocation4], 4294967264 }
 0xc17   :  { %5228 = vsyncpa [#allocation4], 1 }

</bundles_post_ra>
